<compile_context>
chip_gen: v7x
topology: tpu7x:2x2x1
jax: 0.10.0
libtpu: 0.0.40
codegen_flags: <defaults>
</compile_context>

<pallas_src>
import numpy as np
import jax
import jax.numpy as jnp
from jax import lax
from jax.experimental import pallas as pl
from jax.experimental.pallas import tpu as pltpu  # noqa: F401  (TPU backend; whole-array VMEM blocks)

# ---------------------------------------------------------------------------
# Config (scaled-down "Tiny" Swin)
# ---------------------------------------------------------------------------
IMG = 16          # input image size
IN_CHANS = 3
PATCH = 2         # patch-embed patch size
EMBED = 16        # embed dim
DEPTHS = (2, 2)   # blocks per stage
HEADS = (2, 4)    # attention heads per stage
WINDOW = 4        # window size
N_CLASSES = 5
BATCH = 2
LN_EPS = 1e-5


# ---------------------------------------------------------------------------
# In-kernel math helpers (pure jnp, traced inside Pallas kernels)
# ---------------------------------------------------------------------------
def _ln_rows(x, g, b, eps=LN_EPS):
    """LayerNorm over the last dim of a [rows, C] slab; g/b are [1, C]."""
    mean = jnp.mean(x, axis=-1, keepdims=True)
    xc = x - mean
    var = jnp.mean(xc * xc, axis=-1, keepdims=True)
    return xc * lax.rsqrt(var + eps) * g + b


def _softmax_last(s):
    """Numerically-stable softmax over the last axis (explicit, Pallas-safe)."""
    m = jnp.max(s, axis=-1, keepdims=True)
    e = jnp.exp(s - m)
    return e / jnp.sum(e, axis=-1, keepdims=True)


def _gelu_erf(x):
    """Exact (erf) GELU. erf via Abramowitz-Stegun 7.1.26 (max abs err ~1.5e-7),
    built only from exp/mul/add/select so it lowers to VPU+EUP on every TPU gen."""
    z = x * 0.7071067811865476
    az = jnp.abs(z)
    t = 1.0 / (1.0 + 0.3275911 * az)
    poly = t * (0.254829592 + t * (-0.284496736 + t * (1.421413741
                + t * (-1.453152027 + t * 1.061405429))))
    erf_abs = 1.0 - poly * jnp.exp(-az * az)
    erf = jnp.where(z < 0.0, -erf_abs, erf_abs)
    return 0.5 * x * (1.0 + erf)


# ---------------------------------------------------------------------------
# Pallas kernels (each pallas_call = single invocation, whole arrays in VMEM)
# ---------------------------------------------------------------------------
def _make_swin_block_kernel(num_heads, nWB, L, C, has_mask):
    """Whole Swin block fused: LN1 -> window attention -> +res -> LN2 -> MLP -> +res."""
    T = nWB * L
    hd = C // num_heads
    scale = float(hd) ** -0.5

    def kernel(x_ref, n1g_ref, n1b_ref, qkvw_ref, qkvb_ref, projw_ref,
               projb_ref, bias_ref, *rest):
        if has_mask:
            mask_ref = rest[0]
            rest = rest[1:]
        (n2g_ref, n2b_ref, w1_ref, b1_ref, w2_ref, b2_ref, o_ref) = rest

        x = x_ref[...]                                    # (T, C) window-major tokens
        # ---- LN1 + QKV for all windows at once (M = T: sublane-dense matmul) ----
        y = _ln_rows(x, n1g_ref[...], n1b_ref[...])
        qkv = jnp.dot(y, qkvw_ref[...], preferred_element_type=jnp.float32)
        qkv = (qkv + qkvb_ref[...]).reshape(nWB, L, 3 * C)
        bias = bias_ref[...]                              # (nh, L, L)
        mask = mask_ref[...] if has_mask else None        # (nWB, L, L)
        heads = []
        for h in range(num_heads):                        # tiny static head loop
            q = qkv[:, :, h * hd:(h + 1) * hd] * scale
            k = qkv[:, :, C + h * hd:C + (h + 1) * hd]
            v = qkv[:, :, 2 * C + h * hd:2 * C + (h + 1) * hd]
            s = jnp.einsum("bqd,bkd->bqk", q, k,
                           preferred_element_type=jnp.float32)
            s = s + bias[h][None, :, :]
            if has_mask:
                s = s + mask
            p = _softmax_last(s)
            heads.append(jnp.einsum("bqk,bkd->bqd", p, v,
                                    preferred_element_type=jnp.float32))
        # concat heads -> one dense (T, C) @ (C, C) output projection
        attn = jnp.concatenate(heads, axis=-1).reshape(T, C)
        attn = jnp.dot(attn, projw_ref[...],
                       preferred_element_type=jnp.float32) + projb_ref[...]
        x = x + attn                                      # residual 1 (stoch. depth = id)
        # ---- LN2 + MLP with fused exact GELU ----
        y = _ln_rows(x, n2g_ref[...], n2b_ref[...])
        hmid = jnp.dot(y, w1_ref[...], preferred_element_type=jnp.float32) + b1_ref[...]
        hmid = _gelu_erf(hmid)
        out = jnp.dot(hmid, w2_ref[...], preferred_element_type=jnp.float32) + b2_ref[...]
        o_ref[...] = x + out                              # residual 2

    return kernel


def _linear_ln_kernel(x_ref, w_ref, b_ref, g_ref, beta_ref, o_ref):
    """Patch embed: (patches @ W + b) -> LayerNorm."""
    y = jnp.dot(x_ref[...], w_ref[...], preferred_element_type=jnp.float32) + b_ref[...]
    o_ref[...] = _ln_rows(y, g_ref[...], beta_ref[...])


def _ln_linear_kernel(x_ref, g_ref, b_ref, w_ref, o_ref):
    """Patch merging: LayerNorm(4C) -> Linear(4C, 2C, bias=False)."""
    y = _ln_rows(x_ref[...], g_ref[...], b_ref[...])
    o_ref[...] = jnp.dot(y, w_ref[...], preferred_element_type=jnp.float32)


def _norm_pool_head_kernel(x_ref, g_ref, b_ref, pool_ref, w1_ref, b1_ref,
                           s_ref, t_ref, w2_ref, b2_ref, o_ref):
    """Final LN -> global average pool (as matmul) -> Linear -> BN(eval) -> GELU -> Linear."""
    y = _ln_rows(x_ref[...], g_ref[...], b_ref[...])          # (T, C)
    pooled = jnp.dot(pool_ref[...], y,
                     preferred_element_type=jnp.float32)      # (B, C)
    h = jnp.dot(pooled, w1_ref[...],
                preferred_element_type=jnp.float32) + b1_ref[...]
    h = _gelu_erf(h * s_ref[...] + t_ref[...])                # BN folded; Dropout = id
    o_ref[...] = jnp.dot(h, w2_ref[...],
                         preferred_element_type=jnp.float32) + b2_ref[...]


def _stn_fc_kernel(x_ref, w1_ref, b1_ref, w2_ref, b2_ref, o_ref):
    """STN localization head: Linear -> ReLU -> Linear (theta)."""
    h = jnp.dot(x_ref[...], w1_ref[...], preferred_element_type=jnp.float32) + b1_ref[...]
    h = jnp.maximum(h, 0.0)
    o_ref[...] = jnp.dot(h, w2_ref[...], preferred_element_type=jnp.float32) + b2_ref[...]


# ---------------------------------------------------------------------------
# JAX glue: window partitioning / rolls / masks (cheap XLA), Pallas for the math
# ---------------------------------------------------------------------------
def make_rel_bias(table, ws, num_heads):
    """torchvision Swin relative position bias: [nh, L, L]."""
    coords = np.stack(np.meshgrid(np.arange(ws), np.arange(ws), indexing="ij"))
    flat = coords.reshape(2, -1)
    rel = (flat[:, :, None] - flat[:, None, :]).transpose(1, 2, 0).astype(np.int64)
    rel[:, :, 0] += ws - 1
    rel[:, :, 1] += ws - 1
    rel[:, :, 0] *= 2 * ws - 1
    idx = rel.sum(-1).reshape(-1)
    L = ws * ws
    bias = table[idx].reshape(L, L, num_heads)
    return jnp.transpose(bias, (2, 0, 1)).astype(jnp.float32)


def _make_attn_mask(Hp, Wp, ws, sh):
    """Shifted-window attention mask, numpy constant of shape (nH*nW, L, L)."""
    img_mask = np.zeros((Hp, Wp), np.float32)
    cnt = 0
    h_sl = ((0, Hp - ws), (Hp - ws, Hp - sh[0]), (Hp - sh[0], Hp))
    w_sl = ((0, Wp - ws), (Wp - ws, Wp - sh[1]), (Wp - sh[1], Wp))
    for h0, h1 in h_sl:
        for w0, w1 in w_sl:
            img_mask[h0:h1, w0:w1] = cnt
            cnt += 1
    mw = img_mask.reshape(Hp // ws, ws, Wp // ws, ws).transpose(0, 2, 1, 3)
    mw = mw.reshape(-1, ws * ws)
    diff = mw[:, None, :] - mw[:, :, None]
    return np.where(diff != 0, -100.0, 0.0).astype(np.float32)


def swin_block(x, p, num_heads, ws, shift):
    """One fused-kernel Swin block operating on window-partitioned tokens."""
    B, H, W, C = x.shape
    # Config guarantees H, W are multiples of the window (8/4, 4/4) -> no padding path.
    assert H % ws == 0 and W % ws == 0
    sh_h = 0 if ws >= H else shift
    sh_w = 0 if ws >= W else shift
    shifted = (sh_h > 0) or (sh_w > 0)
    xs = jnp.roll(x, shift=(-sh_h, -sh_w), axis=(1, 2)) if shifted else x
    nH, nW = H // ws, W // ws
    L = ws * ws
    nWB = B * nH * nW
    xw = xs.reshape(B, nH, ws, nW, ws, C).transpose(0, 1, 3, 2, 4, 5)
    xw = xw.reshape(nWB * L, C)

    args = [xw,
            p["norm1_g"].reshape(1, C), p["norm1_b"].reshape(1, C),
            p["qkv_w"], p["qkv_b"].reshape(1, 3 * C),
            p["proj_w"], p["proj_b"].reshape(1, C),
            p["rel_bias"]]
    if shifted:  # only shifted blocks carry a mask (no zero-mask DMA otherwise)
        mask = jnp.asarray(np.tile(_make_attn_mask(H, W, ws, (sh_h, sh_w)),
                                   (B, 1, 1)))
        args.append(mask)
    args += [p["norm2_g"].reshape(1, C), p["norm2_b"].reshape(1, C),
             p["mlp_w1"], p["mlp_b1"].reshape(1, 4 * C),
             p["mlp_w2"], p["mlp_b2"].reshape(1, C)]

    kernel = _make_swin_block_kernel(num_heads, nWB, L, C, shifted)
    out = pl.pallas_call(
        kernel,
        out_shape=jax.ShapeDtypeStruct((nWB * L, C), jnp.float32),
    )(*args)

    y = out.reshape(B, nH, nW, ws, ws, C).transpose(0, 1, 3, 2, 4, 5)
    y = y.reshape(B, H, W, C)
    if shifted:
        y = jnp.roll(y, shift=(sh_h, sh_w), axis=(1, 2))
    return y


def patch_embed(x_nchw, P):
    B, Cin, H, W = x_nchw.shape
    E = P["patch_w"].shape[0]
    p = PATCH
    x = jnp.transpose(x_nchw, (0, 2, 3, 1))                       # NHWC
    x = x.reshape(B, H // p, p, W // p, p, Cin).transpose(0, 1, 3, 2, 4, 5)
    x = x.reshape(B * (H // p) * (W // p), p * p * Cin)           # (kh, kw, c) order
    w = jnp.transpose(P["patch_w"], (2, 3, 1, 0)).reshape(p * p * Cin, E)
    out = pl.pallas_call(
        _linear_ln_kernel,
        out_shape=jax.ShapeDtypeStruct((x.shape[0], E), jnp.float32),
    )(x, w, P["patch_b"].reshape(1, E),
      P["patch_norm_g"].reshape(1, E), P["patch_norm_b"].reshape(1, E))
    return out.reshape(B, H // p, W // p, E)


def patch_merging(x, m):
    B, H, W, C = x.shape
    x0 = x[:, 0::2, 0::2, :]
    x1 = x[:, 1::2, 0::2, :]
    x2 = x[:, 0::2, 1::2, :]
    x3 = x[:, 1::2, 1::2, :]
    y = jnp.concatenate([x0, x1, x2, x3], axis=-1)                # [B, H/2, W/2, 4C]
    H2, W2, C4 = H // 2, W // 2, 4 * C
    y = y.reshape(B * H2 * W2, C4)
    out = pl.pallas_call(
        _ln_linear_kernel,
        out_shape=jax.ShapeDtypeStruct((y.shape[0], 2 * C), jnp.float32),
    )(y, m["norm_g"].reshape(1, C4), m["norm_b"].reshape(1, C4), m["red_w"])
    return out.reshape(B, H2, W2, 2 * C)


def norm_pool_head(x, P):
    B, H, W, C = x.shape
    hw = H * W
    T = B * hw
    pool = np.zeros((B, T), np.float32)
    for b in range(B):
        pool[b, b * hw:(b + 1) * hw] = 1.0 / hw                   # mean pool as matmul
    hp = P["head"]
    scale = hp["bn_g"] / jnp.sqrt(hp["bn_rv"] + 1e-5)             # BN eval fold
    shift = hp["bn_b"] - hp["bn_rm"] * scale
    n1 = hp["h1_w"].shape[1]
    return pl.pallas_call(
        _norm_pool_head_kernel,
        out_shape=jax.ShapeDtypeStruct((B, N_CLASSES), jnp.float32),
    )(x.reshape(T, C), P["norm_g"].reshape(1, C), P["norm_b"].reshape(1, C),
      jnp.asarray(pool), hp["h1_w"], hp["h1_b"].reshape(1, n1),
      scale.reshape(1, n1), shift.reshape(1, n1),
      hp["h2_w"], hp["h2_b"].reshape(1, N_CLASSES))


# ---------------------------------------------------------------------------
# STN (standard localization-net + affine grid sample; arch assumption)
# ---------------------------------------------------------------------------
def maxpool2x2(x):
    B, C, H, W = x.shape
    return x.reshape(B, C, H // 2, 2, W // 2, 2).max(axis=(3, 5))


def affine_grid(theta, size):
    B, _, H, W = size
    xs = (2.0 * jnp.arange(W, dtype=jnp.float32) + 1.0) / W - 1.0
    ys = (2.0 * jnp.arange(H, dtype=jnp.float32) + 1.0) / H - 1.0
    xg, yg = jnp.meshgrid(xs, ys)                                 # [H, W]
    base = jnp.stack([xg, yg, jnp.ones_like(xg)], axis=-1)        # [H, W, 3]
    return jnp.einsum("hwk,bik->bhwi", base, theta)               # [B, H, W, 2] (x, y)


def grid_sample_bilinear(img, grid):
    # TODO(synk): data-dependent bilinear gather (F.grid_sample) has no clean Pallas
    # equivalent; kept in plain JAX.
    B, C, H, W = img.shape
    x, y = grid[..., 0], grid[..., 1]
    ix = ((x + 1.0) * W - 1.0) / 2.0
    iy = ((y + 1.0) * H - 1.0) / 2.0
    ix0, iy0 = jnp.floor(ix), jnp.floor(iy)
    ix1, iy1 = ix0 + 1.0, iy0 + 1.0
    wx1, wy1 = ix - ix0, iy - iy0
    wx0, wy0 = 1.0 - wx1, 1.0 - wy1

    def gather(iy_, ix_):
        valid = ((ix_ >= 0) & (ix_ <= W - 1) & (iy_ >= 0) & (iy_ <= H - 1))
        ixc = jnp.clip(ix_, 0, W - 1).astype(jnp.int32)
        iyc = jnp.clip(iy_, 0, H - 1).astype(jnp.int32)

        def per_b(imb, iyb, ixb, vb):
            return imb[:, iyb, ixb] * vb[None]
        return jax.vmap(per_b)(img, iyc, ixc, valid.astype(img.dtype))

    out = (gather(iy0, ix0) * (wy0 * wx0)[:, None] +
           gather(iy0, ix1) * (wy0 * wx1)[:, None] +
           gather(iy1, ix0) * (wy1 * wx0)[:, None] +
           gather(iy1, ix1) * (wy1 * wx1)[:, None])
    return out


def stn_forward(x, p):
    # Tiny localization convs: one fused XLA conv each (replaces ~200-op im2col);
    # the matmul-heavy FC head stays in a fused Pallas kernel.
    y = lax.conv_general_dilated(x, p["c1_w"], (1, 1), ((3, 3), (3, 3)),
                                 dimension_numbers=("NCHW", "OIHW", "NCHW"))
    y = y + p["c1_b"][None, :, None, None]
    y = jnp.maximum(maxpool2x2(y), 0.0)                           # MaxPool2d(2) -> ReLU
    y = lax.conv_general_dilated(y, p["c2_w"], (1, 1), ((2, 2), (2, 2)),
                                 dimension_numbers=("NCHW", "OIHW", "NCHW"))
    y = y + p["c2_b"][None, :, None, None]
    y = jnp.maximum(maxpool2x2(y), 0.0)
    B = x.shape[0]
    feat = y.reshape(B, -1)
    theta = pl.pallas_call(
        _stn_fc_kernel,
        out_shape=jax.ShapeDtypeStruct((B, 6), jnp.float32),
    )(feat, p["fc1_w"], p["fc1_b"].reshape(1, -1),
      p["fc2_w"], p["fc2_b"].reshape(1, 6))
    grid = affine_grid(theta.reshape(B, 2, 3), x.shape)
    return grid_sample_bilinear(x, grid)


# ---------------------------------------------------------------------------
# Full forward
# ---------------------------------------------------------------------------
def vanilla_swin_forward(x_nchw, P):
    x = stn_forward(x_nchw, P["stn"])
    x = patch_embed(x, P)
    for stage in P["stages"]:
        nh = stage["num_heads"]
        for bi, blk in enumerate(stage["blocks"]):
            shift = 0 if bi % 2 == 0 else WINDOW // 2
            x = swin_block(x, blk, nh, WINDOW, shift)
        if stage["merge"] is not None:
            x = patch_merging(x, stage["merge"])
    return norm_pool_head(x, P)


# ---------------------------------------------------------------------------
# Deterministic parameter init
# ---------------------------------------------------------------------------
class KeyGen:
    def __init__(self, key):
        self.key = key

    def next(self):
        self.key, sub = jax.random.split(self.key)
        return sub


def _normal(kg, shape, std):
    return std * jax.random.normal(kg.next(), shape, jnp.float32)


def init_params(kg):
    P = {}
    P["patch_w"] = _normal(kg, (EMBED, IN_CHANS, PATCH, PATCH), 0.05)
    P["patch_b"] = _normal(kg, (EMBED,), 0.02)
    P["patch_norm_g"] = jnp.ones((EMBED,), jnp.float32)
    P["patch_norm_b"] = jnp.zeros((EMBED,), jnp.float32)
    stages = []
    dim = EMBED
    for s, (depth, nh) in enumerate(zip(DEPTHS, HEADS)):
        blocks = []
        for _ in range(depth):
            table = _normal(kg, ((2 * WINDOW - 1) ** 2, nh), 0.02)
            blocks.append(dict(
                norm1_g=jnp.ones((dim,), jnp.float32),
                norm1_b=jnp.zeros((dim,), jnp.float32),
                qkv_w=_normal(kg, (dim, 3 * dim), 0.02),
                qkv_b=jnp.zeros((3 * dim,), jnp.float32),
                proj_w=_normal(kg, (dim, dim), 0.02),
                proj_b=jnp.zeros((dim,), jnp.float32),
                rel_bias=make_rel_bias(table, WINDOW, nh),
                norm2_g=jnp.ones((dim,), jnp.float32),
                norm2_b=jnp.zeros((dim,), jnp.float32),
                mlp_w1=_normal(kg, (dim, 4 * dim), 0.02),
                mlp_b1=jnp.zeros((4 * dim,), jnp.float32),
                mlp_w2=_normal(kg, (4 * dim, dim), 0.02),
                mlp_b2=jnp.zeros((dim,), jnp.float32),
            ))
        merge = None
        if s < len(DEPTHS) - 1:
            merge = dict(norm_g=jnp.ones((4 * dim,), jnp.float32),
                         norm_b=jnp.zeros((4 * dim,), jnp.float32),
                         red_w=_normal(kg, (4 * dim, 2 * dim), 0.02))
        stages.append(dict(blocks=blocks, merge=merge, num_heads=nh))
        if merge is not None:
            dim *= 2
    P["stages"] = stages
    P["norm_g"] = jnp.ones((dim,), jnp.float32)
    P["norm_b"] = jnp.zeros((dim,), jnp.float32)
    P["head"] = dict(
        h1_w=_normal(kg, (dim, 256), 0.05), h1_b=jnp.zeros((256,), jnp.float32),
        bn_g=jnp.ones((256,), jnp.float32), bn_b=jnp.zeros((256,), jnp.float32),
        bn_rm=jnp.zeros((256,), jnp.float32), bn_rv=jnp.ones((256,), jnp.float32),
        h2_w=_normal(kg, (256, N_CLASSES), 0.05),
        h2_b=jnp.zeros((N_CLASSES,), jnp.float32),
    )
    s4 = IMG // 4
    P["stn"] = dict(
        c1_w=_normal(kg, (8, IN_CHANS, 7, 7), 0.05), c1_b=jnp.zeros((8,), jnp.float32),
        c2_w=_normal(kg, (10, 8, 5, 5), 0.05), c2_b=jnp.zeros((10,), jnp.float32),
        fc1_w=_normal(kg, (10 * s4 * s4, 32), 0.05), fc1_b=jnp.zeros((32,), jnp.float32),
        fc2_w=_normal(kg, (32, 6), 0.01),
        fc2_b=jnp.array([1.0, 0.0, 0.0, 0.0, 1.0, 0.0], jnp.float32),  # identity theta bias
    )
    return P


if __name__ == "__main__":
    k_param, k_x = jax.random.split(jax.random.PRNGKey(0))
    params = init_params(KeyGen(k_param))
    x = jax.random.normal(k_x, (BATCH, IN_CHANS, IMG, IMG), jnp.float32)

    fwd = jax.jit(lambda inp: vanilla_swin_forward(inp, params))
    out = jax.block_until_ready(fwd(x))

    assert out.shape == (BATCH, N_CLASSES), out.shape
    assert bool(jnp.all(jnp.isfinite(out)))
    print("KERNEL_OK")
</pallas_src>

<mosaic_0001>
module attributes {stable_mosaic.version = 11 : i64} {
  func.func @_stn_fc_kernel(%arg0: memref<2x160xf32, #tpu.memory_space<vmem>>, %arg1: memref<160x32xf32, #tpu.memory_space<vmem>>, %arg2: memref<1x32xf32, #tpu.memory_space<vmem>>, %arg3: memref<32x6xf32, #tpu.memory_space<vmem>>, %arg4: memref<1x6xf32, #tpu.memory_space<vmem>>, %arg5: memref<2x6xf32, #tpu.memory_space<vmem>>) attributes {dimension_semantics = [], scalar_prefetch = 0 : i64, scratch_operands = 0 : i64, tpu.core_type = #tpu.core_type<tc>} {
    %c0 = arith.constant 0 : index
    %c0_0 = arith.constant 0 : index
    %0 = vector.load %arg0[%c0, %c0_0] : memref<2x160xf32, #tpu.memory_space<vmem>>, vector<2x160xf32>
    %c0_1 = arith.constant 0 : index
    %c0_2 = arith.constant 0 : index
    %1 = vector.load %arg1[%c0_1, %c0_2] : memref<160x32xf32, #tpu.memory_space<vmem>>, vector<160x32xf32>
    %cst = arith.constant dense<0.000000e+00> : vector<2x32xf32>
    %2 = tpu.matmul %0, %1, %cst {dimension_numbers = #tpu.dot_dimension_numbers<[1], [0], [0], [1], [0, 0, 1, 1], [], []>} : vector<2x160xf32>, vector<160x32xf32>, vector<2x32xf32> -> vector<2x32xf32>
    %c0_3 = arith.constant 0 : index
    %c0_4 = arith.constant 0 : index
    %3 = vector.load %arg2[%c0_3, %c0_4] : memref<1x32xf32, #tpu.memory_space<vmem>>, vector<1x32xf32>
    %4 = vector.broadcast %3 : vector<1x32xf32> to vector<2x32xf32>
    %5 = arith.addf %2, %4 : vector<2x32xf32>
    %cst_5 = arith.constant 0.000000e+00 : f32
    %6 = vector.broadcast %cst_5 : f32 to vector<2x32xf32>
    %7 = arith.maximumf %5, %6 : vector<2x32xf32>
    %c0_6 = arith.constant 0 : index
    %c0_7 = arith.constant 0 : index
    %8 = vector.load %arg3[%c0_6, %c0_7] : memref<32x6xf32, #tpu.memory_space<vmem>>, vector<32x6xf32>
    %cst_8 = arith.constant dense<0.000000e+00> : vector<2x6xf32>
    %9 = tpu.matmul %7, %8, %cst_8 {dimension_numbers = #tpu.dot_dimension_numbers<[1], [0], [0], [1], [0, 0, 1, 1], [], []>} : vector<2x32xf32>, vector<32x6xf32>, vector<2x6xf32> -> vector<2x6xf32>
    %c0_9 = arith.constant 0 : index
    %c0_10 = arith.constant 0 : index
    %10 = vector.load %arg4[%c0_9, %c0_10] : memref<1x6xf32, #tpu.memory_space<vmem>>, vector<1x6xf32>
    %11 = vector.broadcast %10 : vector<1x6xf32> to vector<2x6xf32>
    %12 = arith.addf %9, %11 : vector<2x6xf32>
    %c0_11 = arith.constant 0 : index
    %c0_12 = arith.constant 0 : index
    %13 = vector.load %arg5[%c0_11, %c0_12] : memref<2x6xf32, #tpu.memory_space<vmem>>, vector<2x6xf32>
    tpu.vector_store %arg5[%c0_11, %c0_12], %12 {strides = array<i32>} : memref<2x6xf32, #tpu.memory_space<vmem>>, vector<2x6xf32>,
    return
  }
}

module attributes {stable_mosaic.version = 11 : i64} {
  func.func @_linear_ln_kernel(%arg0: memref<128x12xf32, #tpu.memory_space<vmem>>, %arg1: memref<12x16xf32, #tpu.memory_space<vmem>>, %arg2: memref<1x16xf32, #tpu.memory_space<vmem>>, %arg3: memref<1x16xf32, #tpu.memory_space<vmem>>, %arg4: memref<1x16xf32, #tpu.memory_space<vmem>>, %arg5: memref<128x16xf32, #tpu.memory_space<vmem>>) attributes {dimension_semantics = [], scalar_prefetch = 0 : i64, scratch_operands = 0 : i64, tpu.core_type = #tpu.core_type<tc>} {
    %c0 = arith.constant 0 : index
    %c0_0 = arith.constant 0 : index
    %0 = vector.load %arg0[%c0, %c0_0] : memref<128x12xf32, #tpu.memory_space<vmem>>, vector<128x12xf32>
    %c0_1 = arith.constant 0 : index
    %c0_2 = arith.constant 0 : index
    %1 = vector.load %arg1[%c0_1, %c0_2] : memref<12x16xf32, #tpu.memory_space<vmem>>, vector<12x16xf32>
    %cst = arith.constant dense<0.000000e+00> : vector<128x16xf32>
    %2 = tpu.matmul %0, %1, %cst {dimension_numbers = #tpu.dot_dimension_numbers<[1], [0], [0], [1], [0, 0, 1, 1], [], []>} : vector<128x12xf32>, vector<12x16xf32>, vector<128x16xf32> -> vector<128x16xf32>
    %c0_3 = arith.constant 0 : index
    %c0_4 = arith.constant 0 : index
    %3 = vector.load %arg2[%c0_3, %c0_4] : memref<1x16xf32, #tpu.memory_space<vmem>>, vector<1x16xf32>
    %4 = vector.broadcast %3 : vector<1x16xf32> to vector<128x16xf32>
    %5 = arith.addf %2, %4 : vector<128x16xf32>
    %c0_5 = arith.constant 0 : index
    %c0_6 = arith.constant 0 : index
    %6 = vector.load %arg3[%c0_5, %c0_6] : memref<1x16xf32, #tpu.memory_space<vmem>>, vector<1x16xf32>
    %c0_7 = arith.constant 0 : index
    %c0_8 = arith.constant 0 : index
    %7 = vector.load %arg4[%c0_7, %c0_8] : memref<1x16xf32, #tpu.memory_space<vmem>>, vector<1x16xf32>
    %cst_9 = arith.constant dense<0.000000e+00> : vector<128xf32>
    %8 = vector.multi_reduction <add>, %5, %cst_9 [1] : vector<128x16xf32> to vector<128xf32>
    %9 = vector.shape_cast %8 : vector<128xf32> to vector<128x1xf32>
    %cst_10 = arith.constant 1.600000e+01 : f32
    %10 = vector.broadcast %cst_10 : f32 to vector<128x1xf32>
    %11 = arith.divf %9, %10 : vector<128x1xf32>
    %12 = vector.broadcast %11 : vector<128x1xf32> to vector<128x16xf32>
    %13 = arith.subf %5, %12 : vector<128x16xf32>
    %14 = arith.mulf %13, %13 : vector<128x16xf32>
    %cst_11 = arith.constant dense<0.000000e+00> : vector<128xf32>
    %15 = vector.multi_reduction <add>, %14, %cst_11 [1] : vector<128x16xf32> to vector<128xf32>
    %16 = vector.shape_cast %15 : vector<128xf32> to vector<128x1xf32>
    %cst_12 = arith.constant 1.600000e+01 : f32
    %17 = vector.broadcast %cst_12 : f32 to vector<128x1xf32>
    %18 = arith.divf %16, %17 : vector<128x1xf32>
    %cst_13 = arith.constant 9.99999974E-6 : f32
    %19 = vector.broadcast %cst_13 : f32 to vector<128x1xf32>
    %20 = arith.addf %18, %19 : vector<128x1xf32>
    %21 = math.rsqrt %20 : vector<128x1xf32>
    %22 = vector.broadcast %21 : vector<128x1xf32> to vector<128x16xf32>
    %23 = arith.mulf %13, %22 : vector<128x16xf32>
    %24 = vector.broadcast %6 : vector<1x16xf32> to vector<128x16xf32>
    %25 = arith.mulf %23, %24 : vector<128x16xf32>
    %26 = vector.broadcast %7 : vector<1x16xf32> to vector<128x16xf32>
    %27 = arith.addf %25, %26 : vector<128x16xf32>
    %c0_14 = arith.constant 0 : index
    %c0_15 = arith.constant 0 : index
    %28 = vector.load %arg5[%c0_14, %c0_15] : memref<128x16xf32, #tpu.memory_space<vmem>>, vector<128x16xf32>
    tpu.vector_store %arg5[%c0_14, %c0_15], %27 {strides = array<i32>} : memref<128x16xf32, #tpu.memory_space<vmem>>, vector<128x16xf32>,
    return
  }
}

module attributes {stable_mosaic.version = 11 : i64} {
  func.func @kernel(%arg0: memref<128x16xf32, #tpu.memory_space<vmem>>, %arg1: memref<1x16xf32, #tpu.memory_space<vmem>>, %arg2: memref<1x16xf32, #tpu.memory_space<vmem>>, %arg3: memref<16x48xf32, #tpu.memory_space<vmem>>, %arg4: memref<1x48xf32, #tpu.memory_space<vmem>>, %arg5: memref<16x16xf32, #tpu.memory_space<vmem>>, %arg6: memref<1x16xf32, #tpu.memory_space<vmem>>, %arg7: memref<2x16x16xf32, #tpu.memory_space<vmem>>, %arg8: memref<1x16xf32, #tpu.memory_space<vmem>>, %arg9: memref<1x16xf32, #tpu.memory_space<vmem>>, %arg10: memref<16x64xf32, #tpu.memory_space<vmem>>, %arg11: memref<1x64xf32, #tpu.memory_space<vmem>>, %arg12: memref<64x16xf32, #tpu.memory_space<vmem>>, %arg13: memref<1x16xf32, #tpu.memory_space<vmem>>, %arg14: memref<128x16xf32, #tpu.memory_space<vmem>>) attributes {dimension_semantics = [], scalar_prefetch = 0 : i64, scratch_operands = 0 : i64, tpu.core_type = #tpu.core_type<tc>} {
    %c0 = arith.constant 0 : index
    %c0_0 = arith.constant 0 : index
    %0 = vector.load %arg0[%c0, %c0_0] : memref<128x16xf32, #tpu.memory_space<vmem>>, vector<128x16xf32>
    %c0_1 = arith.constant 0 : index
    %c0_2 = arith.constant 0 : index
    %1 = vector.load %arg1[%c0_1, %c0_2] : memref<1x16xf32, #tpu.memory_space<vmem>>, vector<1x16xf32>
    %c0_3 = arith.constant 0 : index
    %c0_4 = arith.constant 0 : index
    %2 = vector.load %arg2[%c0_3, %c0_4] : memref<1x16xf32, #tpu.memory_space<vmem>>, vector<1x16xf32>
    %cst = arith.constant dense<0.000000e+00> : vector<128xf32>
    %3 = vector.multi_reduction <add>, %0, %cst [1] : vector<128x16xf32> to vector<128xf32>
    %4 = vector.shape_cast %3 : vector<128xf32> to vector<128x1xf32>
    %cst_5 = arith.constant 1.600000e+01 : f32
    %5 = vector.broadcast %cst_5 : f32 to vector<128x1xf32>
    %6 = arith.divf %4, %5 : vector<128x1xf32>
    %7 = vector.broadcast %6 : vector<128x1xf32> to vector<128x16xf32>
    %8 = arith.subf %0, %7 : vector<128x16xf32>
    %9 = arith.mulf %8, %8 : vector<128x16xf32>
    %cst_6 = arith.constant dense<0.000000e+00> : vector<128xf32>
    %10 = vector.multi_reduction <add>, %9, %cst_6 [1] : vector<128x16xf32> to vector<128xf32>
    %11 = vector.shape_cast %10 : vector<128xf32> to vector<128x1xf32>
    %cst_7 = arith.constant 1.600000e+01 : f32
    %12 = vector.broadcast %cst_7 : f32 to vector<128x1xf32>
    %13 = arith.divf %11, %12 : vector<128x1xf32>
    %cst_8 = arith.constant 9.99999974E-6 : f32
    %14 = vector.broadcast %cst_8 : f32 to vector<128x1xf32>
    %15 = arith.addf %13, %14 : vector<128x1xf32>
    %16 = math.rsqrt %15 : vector<128x1xf32>
    %17 = vector.broadcast %16 : vector<128x1xf32> to vector<128x16xf32>
    %18 = arith.mulf %8, %17 : vector<128x16xf32>
    %19 = vector.broadcast %1 : vector<1x16xf32> to vector<128x16xf32>
    %20 = arith.mulf %18, %19 : vector<128x16xf32>
    %21 = vector.broadcast %2 : vector<1x16xf32> to vector<128x16xf32>
    %22 = arith.addf %20, %21 : vector<128x16xf32>
    %c0_9 = arith.constant 0 : index
    %c0_10 = arith.constant 0 : index
    %23 = vector.load %arg3[%c0_9, %c0_10] : memref<16x48xf32, #tpu.memory_space<vmem>>, vector<16x48xf32>
    %cst_11 = arith.constant dense<0.000000e+00> : vector<128x48xf32>
    %24 = tpu.matmul %22, %23, %cst_11 {dimension_numbers = #tpu.dot_dimension_numbers<[1], [0], [0], [1], [0, 0, 1, 1], [], []>} : vector<128x16xf32>, vector<16x48xf32>, vector<128x48xf32> -> vector<128x48xf32>
    %c0_12 = arith.constant 0 : index
    %c0_13 = arith.constant 0 : index
    %25 = vector.load %arg4[%c0_12, %c0_13] : memref<1x48xf32, #tpu.memory_space<vmem>>, vector<1x48xf32>
    %26 = vector.broadcast %25 : vector<1x48xf32> to vector<128x48xf32>
    %27 = arith.addf %24, %26 : vector<128x48xf32>
    %28 = vector.shape_cast %27 : vector<128x48xf32> to vector<8x16x48xf32>
    %c0_14 = arith.constant 0 : index
    %c0_15 = arith.constant 0 : index
    %c0_16 = arith.constant 0 : index
    %29 = vector.load %arg7[%c0_14, %c0_15, %c0_16] : memref<2x16x16xf32, #tpu.memory_space<vmem>>, vector<2x16x16xf32>
    %30 = vector.extract_strided_slice %28 {offsets = [0, 0, 0], sizes = [8, 16, 8], strides = [1, 1, 1]} : vector<8x16x48xf32> to vector<8x16x8xf32>
    %cst_17 = arith.constant 0.353553385 : f32
    %31 = vector.broadcast %cst_17 : f32 to vector<8x16x8xf32>
    %32 = arith.mulf %30, %31 : vector<8x16x8xf32>
    %33 = vector.extract_strided_slice %28 {offsets = [0, 0, 16], sizes = [8, 16, 8], strides = [1, 1, 1]} : vector<8x16x48xf32> to vector<8x16x8xf32>
    %34 = vector.extract_strided_slice %28 {offsets = [0, 0, 32], sizes = [8, 16, 8], strides = [1, 1, 1]} : vector<8x16x48xf32> to vector<8x16x8xf32>
    "tpu.trace_start"() <{level = 10 : i32, message = "bqd,bkd->bqk"}> : () -> ()
    %cst_18 = arith.constant dense<0.000000e+00> : vector<8x16x16xf32>
    %35 = tpu.matmul %32, %33, %cst_18 {dimension_numbers = #tpu.dot_dimension_numbers<[2], [2], [1], [1], [0, 0, 0, 1, 1, 1], [0], [0]>} : vector<8x16x8xf32>, vector<8x16x8xf32>, vector<8x16x16xf32> -> vector<8x16x16xf32>
    "tpu.trace_stop"() : () -> ()
    %36 = vector.extract_strided_slice %29 {offsets = [0, 0, 0], sizes = [1, 16, 16], strides = [1, 1, 1]} : vector<2x16x16xf32> to vector<1x16x16xf32>
    %37 = vector.shape_cast %36 : vector<1x16x16xf32> to vector<16x16xf32>
    %38 = vector.shape_cast %37 : vector<16x16xf32> to vector<1x16x16xf32>
    %39 = vector.broadcast %38 : vector<1x16x16xf32> to vector<8x16x16xf32>
    %40 = arith.addf %35, %39 : vector<8x16x16xf32>
    %cst_19 = arith.constant dense<0xFF800000> : vector<8x16xf32>
    %41 = vector.multi_reduction <maximumf>, %40, %cst_19 [2] : vector<8x16x16xf32> to vector<8x16xf32>
    %42 = vector.shape_cast %41 : vector<8x16xf32> to vector<8x16x1xf32>
    %43 = vector.broadcast %42 : vector<8x16x1xf32> to vector<8x16x16xf32>
    %44 = arith.subf %40, %43 : vector<8x16x16xf32>
    %45 = math.exp %44 : vector<8x16x16xf32>
    %cst_20 = arith.constant dense<0.000000e+00> : vector<8x16xf32>
    %46 = vector.multi_reduction <add>, %45, %cst_20 [2] : vector<8x16x16xf32> to vector<8x16xf32>
    %47 = vector.shape_cast %46 : vector<8x16xf32> to vector<8x16x1xf32>
    %48 = vector.broadcast %47 : vector<8x16x1xf32> to vector<8x16x16xf32>
    %49 = arith.divf %45, %48 : vector<8x16x16xf32>
    "tpu.trace_start"() <{level = 10 : i32, message = "bqk,bkd->bqd"}> : () -> ()
    %cst_21 = arith.constant dense<0.000000e+00> : vector<8x16x8xf32>
    %50 = tpu.matmul %49, %34, %cst_21 {dimension_numbers = #tpu.dot_dimension_numbers<[2], [1], [1], [2], [0, 0, 0, 1, 1, 2], [0], [0]>} : vector<8x16x16xf32>, vector<8x16x8xf32>, vector<8x16x8xf32> -> vector<8x16x8xf32>
    "tpu.trace_stop"() : () -> ()
    %51 = vector.extract_strided_slice %28 {offsets = [0, 0, 8], sizes = [8, 16, 8], strides = [1, 1, 1]} : vector<8x16x48xf32> to vector<8x16x8xf32>
    %cst_22 = arith.constant 0.353553385 : f32
    %52 = vector.broadcast %cst_22 : f32 to vector<8x16x8xf32>
    %53 = arith.mulf %51, %52 : vector<8x16x8xf32>
    %54 = vector.extract_strided_slice %28 {offsets = [0, 0, 24], sizes = [8, 16, 8], strides = [1, 1, 1]} : vector<8x16x48xf32> to vector<8x16x8xf32>
    %55 = vector.extract_strided_slice %28 {offsets = [0, 0, 40], sizes = [8, 16, 8], strides = [1, 1, 1]} : vector<8x16x48xf32> to vector<8x16x8xf32>
    "tpu.trace_start"() <{level = 10 : i32, message = "bqd,bkd->bqk"}> : () -> ()
    %cst_23 = arith.constant dense<0.000000e+00> : vector<8x16x16xf32>
    %56 = tpu.matmul %53, %54, %cst_23 {dimension_numbers = #tpu.dot_dimension_numbers<[2], [2], [1], [1], [0, 0, 0, 1, 1, 1], [0], [0]>} : vector<8x16x8xf32>, vector<8x16x8xf32>, vector<8x16x16xf32> -> vector<8x16x16xf32>
    "tpu.trace_stop"() : () -> ()
    %57 = vector.extract_strided_slice %29 {offsets = [1, 0, 0], sizes = [1, 16, 16], strides = [1, 1, 1]} : vector<2x16x16xf32> to vector<1x16x16xf32>
    %58 = vector.shape_cast %57 : vector<1x16x16xf32> to vector<16x16xf32>
    %59 = vector.shape_cast %58 : vector<16x16xf32> to vector<1x16x16xf32>
    %60 = vector.broadcast %59 : vector<1x16x16xf32> to vector<8x16x16xf32>
    %61 = arith.addf %56, %60 : vector<8x16x16xf32>
    %cst_24 = arith.constant dense<0xFF800000> : vector<8x16xf32>
    %62 = vector.multi_reduction <maximumf>, %61, %cst_24 [2] : vector<8x16x16xf32> to vector<8x16xf32>
    %63 = vector.shape_cast %62 : vector<8x16xf32> to vector<8x16x1xf32>
    %64 = vector.broadcast %63 : vector<8x16x1xf32> to vector<8x16x16xf32>
    %65 = arith.subf %61, %64 : vector<8x16x16xf32>
    %66 = math.exp %65 : vector<8x16x16xf32>
    %cst_25 = arith.constant dense<0.000000e+00> : vector<8x16xf32>
    %67 = vector.multi_reduction <add>, %66, %cst_25 [2] : vector<8x16x16xf32> to vector<8x16xf32>
    %68 = vector.shape_cast %67 : vector<8x16xf32> to vector<8x16x1xf32>
    %69 = vector.broadcast %68 : vector<8x16x1xf32> to vector<8x16x16xf32>
    %70 = arith.divf %66, %69 : vector<8x16x16xf32>
    "tpu.trace_start"() <{level = 10 : i32, message = "bqk,bkd->bqd"}> : () -> ()
    %cst_26 = arith.constant dense<0.000000e+00> : vector<8x16x8xf32>
    %71 = tpu.matmul %70, %55, %cst_26 {dimension_numbers = #tpu.dot_dimension_numbers<[2], [1], [1], [2], [0, 0, 0, 1, 1, 2], [0], [0]>} : vector<8x16x16xf32>, vector<8x16x8xf32>, vector<8x16x8xf32> -> vector<8x16x8xf32>
    "tpu.trace_stop"() : () -> ()
    %72 = tpu.concatenate %50, %71 in 2 : vector<8x16x8xf32>, vector<8x16x8xf32> -> vector<8x16x16xf32>
    %73 = vector.shape_cast %72 : vector<8x16x16xf32> to vector<128x16xf32>
    %c0_27 = arith.constant 0 : index
    %c0_28 = arith.constant 0 : index
    %74 = vector.load %arg5[%c0_27, %c0_28] : memref<16x16xf32, #tpu.memory_space<vmem>>, vector<16x16xf32>
    %cst_29 = arith.constant dense<0.000000e+00> : vector<128x16xf32>
    %75 = tpu.matmul %73, %74, %cst_29 {dimension_numbers = #tpu.dot_dimension_numbers<[1], [0], [0], [1], [0, 0, 1, 1], [], []>} : vector<128x16xf32>, vector<16x16xf32>, vector<128x16xf32> -> vector<128x16xf32>
    %c0_30 = arith.constant 0 : index
    %c0_31 = arith.constant 0 : index
    %76 = vector.load %arg6[%c0_30, %c0_31] : memref<1x16xf32, #tpu.memory_space<vmem>>, vector<1x16xf32>
    %77 = vector.broadcast %76 : vector<1x16xf32> to vector<128x16xf32>
    %78 = arith.addf %75, %77 : vector<128x16xf32>
    %79 = arith.addf %0, %78 : vector<128x16xf32>
    %c0_32 = arith.constant 0 : index
    %c0_33 = arith.constant 0 : index
    %80 = vector.load %arg8[%c0_32, %c0_33] : memref<1x16xf32, #tpu.memory_space<vmem>>, vector<1x16xf32>
    %c0_34 = arith.constant 0 : index
    %c0_35 = arith.constant 0 : index
    %81 = vector.load %arg9[%c0_34, %c0_35] : memref<1x16xf32, #tpu.memory_space<vmem>>, vector<1x16xf32>
    %cst_36 = arith.constant dense<0.000000e+00> : vector<128xf32>
    %82 = vector.multi_reduction <add>, %79, %cst_36 [1] : vector<128x16xf32> to vector<128xf32>
    %83 = vector.shape_cast %82 : vector<128xf32> to vector<128x1xf32>
    %cst_37 = arith.constant 1.600000e+01 : f32
    %84 = vector.broadcast %cst_37 : f32 to vector<128x1xf32>
    %85 = arith.divf %83, %84 : vector<128x1xf32>
    %86 = vector.broadcast %85 : vector<128x1xf32> to vector<128x16xf32>
    %87 = arith.subf %79, %86 : vector<128x16xf32>
    %88 = arith.mulf %87, %87 : vector<128x16xf32>
    %cst_38 = arith.constant dense<0.000000e+00> : vector<128xf32>
    %89 = vector.multi_reduction <add>, %88, %cst_38 [1] : vector<128x16xf32> to vector<128xf32>
    %90 = vector.shape_cast %89 : vector<128xf32> to vector<128x1xf32>
    %cst_39 = arith.constant 1.600000e+01 : f32
    %91 = vector.broadcast %cst_39 : f32 to vector<128x1xf32>
    %92 = arith.divf %90, %91 : vector<128x1xf32>
    %cst_40 = arith.constant 9.99999974E-6 : f32
    %93 = vector.broadcast %cst_40 : f32 to vector<128x1xf32>
    %94 = arith.addf %92, %93 : vector<128x1xf32>
    %95 = math.rsqrt %94 : vector<128x1xf32>
    %96 = vector.broadcast %95 : vector<128x1xf32> to vector<128x16xf32>
    %97 = arith.mulf %87, %96 : vector<128x16xf32>
    %98 = vector.broadcast %80 : vector<1x16xf32> to vector<128x16xf32>
    %99 = arith.mulf %97, %98 : vector<128x16xf32>
    %100 = vector.broadcast %81 : vector<1x16xf32> to vector<128x16xf32>
    %101 = arith.addf %99, %100 : vector<128x16xf32>
    %c0_41 = arith.constant 0 : index
    %c0_42 = arith.constant 0 : index
    %102 = vector.load %arg10[%c0_41, %c0_42] : memref<16x64xf32, #tpu.memory_space<vmem>>, vector<16x64xf32>
    %cst_43 = arith.constant dense<0.000000e+00> : vector<128x64xf32>
    %103 = tpu.matmul %101, %102, %cst_43 {dimension_numbers = #tpu.dot_dimension_numbers<[1], [0], [0], [1], [0, 0, 1, 1], [], []>} : vector<128x16xf32>, vector<16x64xf32>, vector<128x64xf32> -> vector<128x64xf32>
    %c0_44 = arith.constant 0 : index
    %c0_45 = arith.constant 0 : index
    %104 = vector.load %arg11[%c0_44, %c0_45] : memref<1x64xf32, #tpu.memory_space<vmem>>, vector<1x64xf32>
    %105 = vector.broadcast %104 : vector<1x64xf32> to vector<128x64xf32>
    %106 = arith.addf %103, %105 : vector<128x64xf32>
    %cst_46 = arith.constant 0.707106769 : f32
    %107 = vector.broadcast %cst_46 : f32 to vector<128x64xf32>
    %108 = arith.mulf %106, %107 : vector<128x64xf32>
    %109 = math.absf %108 : vector<128x64xf32>
    %cst_47 = arith.constant 0.327591091 : f32
    %110 = vector.broadcast %cst_47 : f32 to vector<128x64xf32>
    %111 = arith.mulf %110, %109 : vector<128x64xf32>
    %cst_48 = arith.constant 1.000000e+00 : f32
    %112 = vector.broadcast %cst_48 : f32 to vector<128x64xf32>
    %113 = arith.addf %112, %111 : vector<128x64xf32>
    %cst_49 = arith.constant 1.000000e+00 : f32
    %114 = vector.broadcast %cst_49 : f32 to vector<128x64xf32>
    %115 = arith.divf %114, %113 : vector<128x64xf32>
    %cst_50 = arith.constant 1.06140542 : f32
    %116 = vector.broadcast %cst_50 : f32 to vector<128x64xf32>
    %117 = arith.mulf %115, %116 : vector<128x64xf32>
    %cst_51 = arith.constant -1.45315206 : f32
    %118 = vector.broadcast %cst_51 : f32 to vector<128x64xf32>
    %119 = arith.addf %118, %117 : vector<128x64xf32>
    %120 = arith.mulf %115, %119 : vector<128x64xf32>
    %cst_52 = arith.constant 1.42141378 : f32
    %121 = vector.broadcast %cst_52 : f32 to vector<128x64xf32>
    %122 = arith.addf %121, %120 : vector<128x64xf32>
    %123 = arith.mulf %115, %122 : vector<128x64xf32>
    %cst_53 = arith.constant -0.284496725 : f32
    %124 = vector.broadcast %cst_53 : f32 to vector<128x64xf32>
    %125 = arith.addf %124, %123 : vector<128x64xf32>
    %126 = arith.mulf %115, %125 : vector<128x64xf32>
    %cst_54 = arith.constant 0.254829586 : f32
    %127 = vector.broadcast %cst_54 : f32 to vector<128x64xf32>
    %128 = arith.addf %127, %126 : vector<128x64xf32>
    %129 = arith.mulf %115, %128 : vector<128x64xf32>
    %cst_55 = arith.constant 0.000000e+00 : f32
    %130 = vector.broadcast %cst_55 : f32 to vector<128x64xf32>
    %131 = arith.subf %130, %109 : vector<128x64xf32>
    %132 = arith.mulf %131, %109 : vector<128x64xf32>
    %133 = math.exp %132 : vector<128x64xf32>
    %134 = arith.mulf %129, %133 : vector<128x64xf32>
    %cst_56 = arith.constant 1.000000e+00 : f32
    %135 = vector.broadcast %cst_56 : f32 to vector<128x64xf32>
    %136 = arith.subf %135, %134 : vector<128x64xf32>
    %cst_57 = arith.constant 0.000000e+00 : f32
    %137 = vector.broadcast %cst_57 : f32 to vector<128x64xf32>
    %138 = arith.cmpf olt, %108, %137 : vector<128x64xf32>
    %cst_58 = arith.constant 0.000000e+00 : f32
    %139 = vector.broadcast %cst_58 : f32 to vector<128x64xf32>
    %140 = arith.subf %139, %136 : vector<128x64xf32>
    %141 = arith.select %138, %140, %136 : vector<128x64xi1>, vector<128x64xf32>
    %cst_59 = arith.constant 5.000000e-01 : f32
    %142 = vector.broadcast %cst_59 : f32 to vector<128x64xf32>
    %143 = arith.mulf %142, %106 : vector<128x64xf32>
    %cst_60 = arith.constant 1.000000e+00 : f32
    %144 = vector.broadcast %cst_60 : f32 to vector<128x64xf32>
    %145 = arith.addf %144, %141 : vector<128x64xf32>
    %146 = arith.mulf %143, %145 : vector<128x64xf32>
    %c0_61 = arith.constant 0 : index
    %c0_62 = arith.constant 0 : index
    %147 = vector.load %arg12[%c0_61, %c0_62] : memref<64x16xf32, #tpu.memory_space<vmem>>, vector<64x16xf32>
    %cst_63 = arith.constant dense<0.000000e+00> : vector<128x16xf32>
    %148 = tpu.matmul %146, %147, %cst_63 {dimension_numbers = #tpu.dot_dimension_numbers<[1], [0], [0], [1], [0, 0, 1, 1], [], []>} : vector<128x64xf32>, vector<64x16xf32>, vector<128x16xf32> -> vector<128x16xf32>
    %c0_64 = arith.constant 0 : index
    %c0_65 = arith.constant 0 : index
    %149 = vector.load %arg13[%c0_64, %c0_65] : memref<1x16xf32, #tpu.memory_space<vmem>>, vector<1x16xf32>
    %150 = vector.broadcast %149 : vector<1x16xf32> to vector<128x16xf32>
    %151 = arith.addf %148, %150 : vector<128x16xf32>
    %152 = arith.addf %79, %151 : vector<128x16xf32>
    %c0_66 = arith.constant 0 : index
    %c0_67 = arith.constant 0 : index
    %153 = vector.load %arg14[%c0_66, %c0_67] : memref<128x16xf32, #tpu.memory_space<vmem>>, vector<128x16xf32>
    tpu.vector_store %arg14[%c0_66, %c0_67], %152 {strides = array<i32>} : memref<128x16xf32, #tpu.memory_space<vmem>>, vector<128x16xf32>,
    return
  }
}

module attributes {stable_mosaic.version = 11 : i64} {
  func.func @kernel(%arg0: memref<128x16xf32, #tpu.memory_space<vmem>>, %arg1: memref<1x16xf32, #tpu.memory_space<vmem>>, %arg2: memref<1x16xf32, #tpu.memory_space<vmem>>, %arg3: memref<16x48xf32, #tpu.memory_space<vmem>>, %arg4: memref<1x48xf32, #tpu.memory_space<vmem>>, %arg5: memref<16x16xf32, #tpu.memory_space<vmem>>, %arg6: memref<1x16xf32, #tpu.memory_space<vmem>>, %arg7: memref<2x16x16xf32, #tpu.memory_space<vmem>>, %arg8: memref<8x16x16xf32, #tpu.memory_space<vmem>>, %arg9: memref<1x16xf32, #tpu.memory_space<vmem>>, %arg10: memref<1x16xf32, #tpu.memory_space<vmem>>, %arg11: memref<16x64xf32, #tpu.memory_space<vmem>>, %arg12: memref<1x64xf32, #tpu.memory_space<vmem>>, %arg13: memref<64x16xf32, #tpu.memory_space<vmem>>, %arg14: memref<1x16xf32, #tpu.memory_space<vmem>>, %arg15: memref<128x16xf32, #tpu.memory_space<vmem>>) attributes {dimension_semantics = [], scalar_prefetch = 0 : i64, scratch_operands = 0 : i64, tpu.core_type = #tpu.core_type<tc>} {
    %c0 = arith.constant 0 : index
    %c0_0 = arith.constant 0 : index
    %0 = vector.load %arg0[%c0, %c0_0] : memref<128x16xf32, #tpu.memory_space<vmem>>, vector<128x16xf32>
    %c0_1 = arith.constant 0 : index
    %c0_2 = arith.constant 0 : index
    %1 = vector.load %arg1[%c0_1, %c0_2] : memref<1x16xf32, #tpu.memory_space<vmem>>, vector<1x16xf32>
    %c0_3 = arith.constant 0 : index
    %c0_4 = arith.constant 0 : index
    %2 = vector.load %arg2[%c0_3, %c0_4] : memref<1x16xf32, #tpu.memory_space<vmem>>, vector<1x16xf32>
    %cst = arith.constant dense<0.000000e+00> : vector<128xf32>
    %3 = vector.multi_reduction <add>, %0, %cst [1] : vector<128x16xf32> to vector<128xf32>
    %4 = vector.shape_cast %3 : vector<128xf32> to vector<128x1xf32>
    %cst_5 = arith.constant 1.600000e+01 : f32
    %5 = vector.broadcast %cst_5 : f32 to vector<128x1xf32>
    %6 = arith.divf %4, %5 : vector<128x1xf32>
    %7 = vector.broadcast %6 : vector<128x1xf32> to vector<128x16xf32>
    %8 = arith.subf %0, %7 : vector<128x16xf32>
    %9 = arith.mulf %8, %8 : vector<128x16xf32>
    %cst_6 = arith.constant dense<0.000000e+00> : vector<128xf32>
    %10 = vector.multi_reduction <add>, %9, %cst_6 [1] : vector<128x16xf32> to vector<128xf32>
    %11 = vector.shape_cast %10 : vector<128xf32> to vector<128x1xf32>
    %cst_7 = arith.constant 1.600000e+01 : f32
    %12 = vector.broadcast %cst_7 : f32 to vector<128x1xf32>
    %13 = arith.divf %11, %12 : vector<128x1xf32>
    %cst_8 = arith.constant 9.99999974E-6 : f32
    %14 = vector.broadcast %cst_8 : f32 to vector<128x1xf32>
    %15 = arith.addf %13, %14 : vector<128x1xf32>
    %16 = math.rsqrt %15 : vector<128x1xf32>
    %17 = vector.broadcast %16 : vector<128x1xf32> to vector<128x16xf32>
    %18 = arith.mulf %8, %17 : vector<128x16xf32>
    %19 = vector.broadcast %1 : vector<1x16xf32> to vector<128x16xf32>
    %20 = arith.mulf %18, %19 : vector<128x16xf32>
    %21 = vector.broadcast %2 : vector<1x16xf32> to vector<128x16xf32>
    %22 = arith.addf %20, %21 : vector<128x16xf32>
    %c0_9 = arith.constant 0 : index
    %c0_10 = arith.constant 0 : index
    %23 = vector.load %arg3[%c0_9, %c0_10] : memref<16x48xf32, #tpu.memory_space<vmem>>, vector<16x48xf32>
    %cst_11 = arith.constant dense<0.000000e+00> : vector<128x48xf32>
    %24 = tpu.matmul %22, %23, %cst_11 {dimension_numbers = #tpu.dot_dimension_numbers<[1], [0], [0], [1], [0, 0, 1, 1], [], []>} : vector<128x16xf32>, vector<16x48xf32>, vector<128x48xf32> -> vector<128x48xf32>
    %c0_12 = arith.constant 0 : index
    %c0_13 = arith.constant 0 : index
    %25 = vector.load %arg4[%c0_12, %c0_13] : memref<1x48xf32, #tpu.memory_space<vmem>>, vector<1x48xf32>
    %26 = vector.broadcast %25 : vector<1x48xf32> to vector<128x48xf32>
    %27 = arith.addf %24, %26 : vector<128x48xf32>
    %28 = vector.shape_cast %27 : vector<128x48xf32> to vector<8x16x48xf32>
    %c0_14 = arith.constant 0 : index
    %c0_15 = arith.constant 0 : index
    %c0_16 = arith.constant 0 : index
    %29 = vector.load %arg7[%c0_14, %c0_15, %c0_16] : memref<2x16x16xf32, #tpu.memory_space<vmem>>, vector<2x16x16xf32>
    %c0_17 = arith.constant 0 : index
    %c0_18 = arith.constant 0 : index
    %c0_19 = arith.constant 0 : index
    %30 = vector.load %arg8[%c0_17, %c0_18, %c0_19] : memref<8x16x16xf32, #tpu.memory_space<vmem>>, vector<8x16x16xf32>
    %31 = vector.extract_strided_slice %28 {offsets = [0, 0, 0], sizes = [8, 16, 8], strides = [1, 1, 1]} : vector<8x16x48xf32> to vector<8x16x8xf32>
    %cst_20 = arith.constant 0.353553385 : f32
    %32 = vector.broadcast %cst_20 : f32 to vector<8x16x8xf32>
    %33 = arith.mulf %31, %32 : vector<8x16x8xf32>
    %34 = vector.extract_strided_slice %28 {offsets = [0, 0, 16], sizes = [8, 16, 8], strides = [1, 1, 1]} : vector<8x16x48xf32> to vector<8x16x8xf32>
    %35 = vector.extract_strided_slice %28 {offsets = [0, 0, 32], sizes = [8, 16, 8], strides = [1, 1, 1]} : vector<8x16x48xf32> to vector<8x16x8xf32>
    "tpu.trace_start"() <{level = 10 : i32, message = "bqd,bkd->bqk"}> : () -> ()
    %cst_21 = arith.constant dense<0.000000e+00> : vector<8x16x16xf32>
    %36 = tpu.matmul %33, %34, %cst_21 {dimension_numbers = #tpu.dot_dimension_numbers<[2], [2], [1], [1], [0, 0, 0, 1, 1, 1], [0], [0]>} : vector<8x16x8xf32>, vector<8x16x8xf32>, vector<8x16x16xf32> -> vector<8x16x16xf32>
    "tpu.trace_stop"() : () -> ()
    %37 = vector.extract_strided_slice %29 {offsets = [0, 0, 0], sizes = [1, 16, 16], strides = [1, 1, 1]} : vector<2x16x16xf32> to vector<1x16x16xf32>
    %38 = vector.shape_cast %37 : vector<1x16x16xf32> to vector<16x16xf32>
    %39 = vector.shape_cast %38 : vector<16x16xf32> to vector<1x16x16xf32>
    %40 = vector.broadcast %39 : vector<1x16x16xf32> to vector<8x16x16xf32>
    %41 = arith.addf %36, %40 : vector<8x16x16xf32>
    %42 = arith.addf %41, %30 : vector<8x16x16xf32>
    %cst_22 = arith.constant dense<0xFF800000> : vector<8x16xf32>
    %43 = vector.multi_reduction <maximumf>, %42, %cst_22 [2] : vector<8x16x16xf32> to vector<8x16xf32>
    %44 = vector.shape_cast %43 : vector<8x16xf32> to vector<8x16x1xf32>
    %45 = vector.broadcast %44 : vector<8x16x1xf32> to vector<8x16x16xf32>
    %46 = arith.subf %42, %45 : vector<8x16x16xf32>
    %47 = math.exp %46 : vector<8x16x16xf32>
    %cst_23 = arith.constant dense<0.000000e+00> : vector<8x16xf32>
    %48 = vector.multi_reduction <add>, %47, %cst_23 [2] : vector<8x16x16xf32> to vector<8x16xf32>
    %49 = vector.shape_cast %48 : vector<8x16xf32> to vector<8x16x1xf32>
    %50 = vector.broadcast %49 : vector<8x16x1xf32> to vector<8x16x16xf32>
    %51 = arith.divf %47, %50 : vector<8x16x16xf32>
    "tpu.trace_start"() <{level = 10 : i32, message = "bqk,bkd->bqd"}> : () -> ()
    %cst_24 = arith.constant dense<0.000000e+00> : vector<8x16x8xf32>
    %52 = tpu.matmul %51, %35, %cst_24 {dimension_numbers = #tpu.dot_dimension_numbers<[2], [1], [1], [2], [0, 0, 0, 1, 1, 2], [0], [0]>} : vector<8x16x16xf32>, vector<8x16x8xf32>, vector<8x16x8xf32> -> vector<8x16x8xf32>
    "tpu.trace_stop"() : () -> ()
    %53 = vector.extract_strided_slice %28 {offsets = [0, 0, 8], sizes = [8, 16, 8], strides = [1, 1, 1]} : vector<8x16x48xf32> to vector<8x16x8xf32>
    %cst_25 = arith.constant 0.353553385 : f32
    %54 = vector.broadcast %cst_25 : f32 to vector<8x16x8xf32>
    %55 = arith.mulf %53, %54 : vector<8x16x8xf32>
    %56 = vector.extract_strided_slice %28 {offsets = [0, 0, 24], sizes = [8, 16, 8], strides = [1, 1, 1]} : vector<8x16x48xf32> to vector<8x16x8xf32>
    %57 = vector.extract_strided_slice %28 {offsets = [0, 0, 40], sizes = [8, 16, 8], strides = [1, 1, 1]} : vector<8x16x48xf32> to vector<8x16x8xf32>
    "tpu.trace_start"() <{level = 10 : i32, message = "bqd,bkd->bqk"}> : () -> ()
    %cst_26 = arith.constant dense<0.000000e+00> : vector<8x16x16xf32>
    %58 = tpu.matmul %55, %56, %cst_26 {dimension_numbers = #tpu.dot_dimension_numbers<[2], [2], [1], [1], [0, 0, 0, 1, 1, 1], [0], [0]>} : vector<8x16x8xf32>, vector<8x16x8xf32>, vector<8x16x16xf32> -> vector<8x16x16xf32>
    "tpu.trace_stop"() : () -> ()
    %59 = vector.extract_strided_slice %29 {offsets = [1, 0, 0], sizes = [1, 16, 16], strides = [1, 1, 1]} : vector<2x16x16xf32> to vector<1x16x16xf32>
    %60 = vector.shape_cast %59 : vector<1x16x16xf32> to vector<16x16xf32>
    %61 = vector.shape_cast %60 : vector<16x16xf32> to vector<1x16x16xf32>
    %62 = vector.broadcast %61 : vector<1x16x16xf32> to vector<8x16x16xf32>
    %63 = arith.addf %58, %62 : vector<8x16x16xf32>
    %64 = arith.addf %63, %30 : vector<8x16x16xf32>
    %cst_27 = arith.constant dense<0xFF800000> : vector<8x16xf32>
    %65 = vector.multi_reduction <maximumf>, %64, %cst_27 [2] : vector<8x16x16xf32> to vector<8x16xf32>
    %66 = vector.shape_cast %65 : vector<8x16xf32> to vector<8x16x1xf32>
    %67 = vector.broadcast %66 : vector<8x16x1xf32> to vector<8x16x16xf32>
    %68 = arith.subf %64, %67 : vector<8x16x16xf32>
    %69 = math.exp %68 : vector<8x16x16xf32>
    %cst_28 = arith.constant dense<0.000000e+00> : vector<8x16xf32>
    %70 = vector.multi_reduction <add>, %69, %cst_28 [2] : vector<8x16x16xf32> to vector<8x16xf32>
    %71 = vector.shape_cast %70 : vector<8x16xf32> to vector<8x16x1xf32>
    %72 = vector.broadcast %71 : vector<8x16x1xf32> to vector<8x16x16xf32>
    %73 = arith.divf %69, %72 : vector<8x16x16xf32>
    "tpu.trace_start"() <{level = 10 : i32, message = "bqk,bkd->bqd"}> : () -> ()
    %cst_29 = arith.constant dense<0.000000e+00> : vector<8x16x8xf32>
    %74 = tpu.matmul %73, %57, %cst_29 {dimension_numbers = #tpu.dot_dimension_numbers<[2], [1], [1], [2], [0, 0, 0, 1, 1, 2], [0], [0]>} : vector<8x16x16xf32>, vector<8x16x8xf32>, vector<8x16x8xf32> -> vector<8x16x8xf32>
    "tpu.trace_stop"() : () -> ()
    %75 = tpu.concatenate %52, %74 in 2 : vector<8x16x8xf32>, vector<8x16x8xf32> -> vector<8x16x16xf32>
    %76 = vector.shape_cast %75 : vector<8x16x16xf32> to vector<128x16xf32>
    %c0_30 = arith.constant 0 : index
    %c0_31 = arith.constant 0 : index
    %77 = vector.load %arg5[%c0_30, %c0_31] : memref<16x16xf32, #tpu.memory_space<vmem>>, vector<16x16xf32>
    %cst_32 = arith.constant dense<0.000000e+00> : vector<128x16xf32>
    %78 = tpu.matmul %76, %77, %cst_32 {dimension_numbers = #tpu.dot_dimension_numbers<[1], [0], [0], [1], [0, 0, 1, 1], [], []>} : vector<128x16xf32>, vector<16x16xf32>, vector<128x16xf32> -> vector<128x16xf32>
    %c0_33 = arith.constant 0 : index
    %c0_34 = arith.constant 0 : index
    %79 = vector.load %arg6[%c0_33, %c0_34] : memref<1x16xf32, #tpu.memory_space<vmem>>, vector<1x16xf32>
    %80 = vector.broadcast %79 : vector<1x16xf32> to vector<128x16xf32>
    %81 = arith.addf %78, %80 : vector<128x16xf32>
    %82 = arith.addf %0, %81 : vector<128x16xf32>
    %c0_35 = arith.constant 0 : index
    %c0_36 = arith.constant 0 : index
    %83 = vector.load %arg9[%c0_35, %c0_36] : memref<1x16xf32, #tpu.memory_space<vmem>>, vector<1x16xf32>
    %c0_37 = arith.constant 0 : index
    %c0_38 = arith.constant 0 : index
    %84 = vector.load %arg10[%c0_37, %c0_38] : memref<1x16xf32, #tpu.memory_space<vmem>>, vector<1x16xf32>
    %cst_39 = arith.constant dense<0.000000e+00> : vector<128xf32>
    %85 = vector.multi_reduction <add>, %82, %cst_39 [1] : vector<128x16xf32> to vector<128xf32>
    %86 = vector.shape_cast %85 : vector<128xf32> to vector<128x1xf32>
    %cst_40 = arith.constant 1.600000e+01 : f32
    %87 = vector.broadcast %cst_40 : f32 to vector<128x1xf32>
    %88 = arith.divf %86, %87 : vector<128x1xf32>
    %89 = vector.broadcast %88 : vector<128x1xf32> to vector<128x16xf32>
    %90 = arith.subf %82, %89 : vector<128x16xf32>
    %91 = arith.mulf %90, %90 : vector<128x16xf32>
    %cst_41 = arith.constant dense<0.000000e+00> : vector<128xf32>
    %92 = vector.multi_reduction <add>, %91, %cst_41 [1] : vector<128x16xf32> to vector<128xf32>
    %93 = vector.shape_cast %92 : vector<128xf32> to vector<128x1xf32>
    %cst_42 = arith.constant 1.600000e+01 : f32
    %94 = vector.broadcast %cst_42 : f32 to vector<128x1xf32>
    %95 = arith.divf %93, %94 : vector<128x1xf32>
    %cst_43 = arith.constant 9.99999974E-6 : f32
    %96 = vector.broadcast %cst_43 : f32 to vector<128x1xf32>
    %97 = arith.addf %95, %96 : vector<128x1xf32>
    %98 = math.rsqrt %97 : vector<128x1xf32>
    %99 = vector.broadcast %98 : vector<128x1xf32> to vector<128x16xf32>
    %100 = arith.mulf %90, %99 : vector<128x16xf32>
    %101 = vector.broadcast %83 : vector<1x16xf32> to vector<128x16xf32>
    %102 = arith.mulf %100, %101 : vector<128x16xf32>
    %103 = vector.broadcast %84 : vector<1x16xf32> to vector<128x16xf32>
    %104 = arith.addf %102, %103 : vector<128x16xf32>
    %c0_44 = arith.constant 0 : index
    %c0_45 = arith.constant 0 : index
    %105 = vector.load %arg11[%c0_44, %c0_45] : memref<16x64xf32, #tpu.memory_space<vmem>>, vector<16x64xf32>
    %cst_46 = arith.constant dense<0.000000e+00> : vector<128x64xf32>
    %106 = tpu.matmul %104, %105, %cst_46 {dimension_numbers = #tpu.dot_dimension_numbers<[1], [0], [0], [1], [0, 0, 1, 1], [], []>} : vector<128x16xf32>, vector<16x64xf32>, vector<128x64xf32> -> vector<128x64xf32>
    %c0_47 = arith.constant 0 : index
    %c0_48 = arith.constant 0 : index
    %107 = vector.load %arg12[%c0_47, %c0_48] : memref<1x64xf32, #tpu.memory_space<vmem>>, vector<1x64xf32>
    %108 = vector.broadcast %107 : vector<1x64xf32> to vector<128x64xf32>
    %109 = arith.addf %106, %108 : vector<128x64xf32>
    %cst_49 = arith.constant 0.707106769 : f32
    %110 = vector.broadcast %cst_49 : f32 to vector<128x64xf32>
    %111 = arith.mulf %109, %110 : vector<128x64xf32>
    %112 = math.absf %111 : vector<128x64xf32>
    %cst_50 = arith.constant 0.327591091 : f32
    %113 = vector.broadcast %cst_50 : f32 to vector<128x64xf32>
    %114 = arith.mulf %113, %112 : vector<128x64xf32>
    %cst_51 = arith.constant 1.000000e+00 : f32
    %115 = vector.broadcast %cst_51 : f32 to vector<128x64xf32>
    %116 = arith.addf %115, %114 : vector<128x64xf32>
    %cst_52 = arith.constant 1.000000e+00 : f32
    %117 = vector.broadcast %cst_52 : f32 to vector<128x64xf32>
    %118 = arith.divf %117, %116 : vector<128x64xf32>
    %cst_53 = arith.constant 1.06140542 : f32
    %119 = vector.broadcast %cst_53 : f32 to vector<128x64xf32>
    %120 = arith.mulf %118, %119 : vector<128x64xf32>
    %cst_54 = arith.constant -1.45315206 : f32
    %121 = vector.broadcast %cst_54 : f32 to vector<128x64xf32>
    %122 = arith.addf %121, %120 : vector<128x64xf32>
    %123 = arith.mulf %118, %122 : vector<128x64xf32>
    %cst_55 = arith.constant 1.42141378 : f32
    %124 = vector.broadcast %cst_55 : f32 to vector<128x64xf32>
    %125 = arith.addf %124, %123 : vector<128x64xf32>
    %126 = arith.mulf %118, %125 : vector<128x64xf32>
    %cst_56 = arith.constant -0.284496725 : f32
    %127 = vector.broadcast %cst_56 : f32 to vector<128x64xf32>
    %128 = arith.addf %127, %126 : vector<128x64xf32>
    %129 = arith.mulf %118, %128 : vector<128x64xf32>
    %cst_57 = arith.constant 0.254829586 : f32
    %130 = vector.broadcast %cst_57 : f32 to vector<128x64xf32>
    %131 = arith.addf %130, %129 : vector<128x64xf32>
    %132 = arith.mulf %118, %131 : vector<128x64xf32>
    %cst_58 = arith.constant 0.000000e+00 : f32
    %133 = vector.broadcast %cst_58 : f32 to vector<128x64xf32>
    %134 = arith.subf %133, %112 : vector<128x64xf32>
    %135 = arith.mulf %134, %112 : vector<128x64xf32>
    %136 = math.exp %135 : vector<128x64xf32>
    %137 = arith.mulf %132, %136 : vector<128x64xf32>
    %cst_59 = arith.constant 1.000000e+00 : f32
    %138 = vector.broadcast %cst_59 : f32 to vector<128x64xf32>
    %139 = arith.subf %138, %137 : vector<128x64xf32>
    %cst_60 = arith.constant 0.000000e+00 : f32
    %140 = vector.broadcast %cst_60 : f32 to vector<128x64xf32>
    %141 = arith.cmpf olt, %111, %140 : vector<128x64xf32>
    %cst_61 = arith.constant 0.000000e+00 : f32
    %142 = vector.broadcast %cst_61 : f32 to vector<128x64xf32>
    %143 = arith.subf %142, %139 : vector<128x64xf32>
    %144 = arith.select %141, %143, %139 : vector<128x64xi1>, vector<128x64xf32>
    %cst_62 = arith.constant 5.000000e-01 : f32
    %145 = vector.broadcast %cst_62 : f32 to vector<128x64xf32>
    %146 = arith.mulf %145, %109 : vector<128x64xf32>
    %cst_63 = arith.constant 1.000000e+00 : f32
    %147 = vector.broadcast %cst_63 : f32 to vector<128x64xf32>
    %148 = arith.addf %147, %144 : vector<128x64xf32>
    %149 = arith.mulf %146, %148 : vector<128x64xf32>
    %c0_64 = arith.constant 0 : index
    %c0_65 = arith.constant 0 : index
    %150 = vector.load %arg13[%c0_64, %c0_65] : memref<64x16xf32, #tpu.memory_space<vmem>>, vector<64x16xf32>
    %cst_66 = arith.constant dense<0.000000e+00> : vector<128x16xf32>
    %151 = tpu.matmul %149, %150, %cst_66 {dimension_numbers = #tpu.dot_dimension_numbers<[1], [0], [0], [1], [0, 0, 1, 1], [], []>} : vector<128x64xf32>, vector<64x16xf32>, vector<128x16xf32> -> vector<128x16xf32>
    %c0_67 = arith.constant 0 : index
    %c0_68 = arith.constant 0 : index
    %152 = vector.load %arg14[%c0_67, %c0_68] : memref<1x16xf32, #tpu.memory_space<vmem>>, vector<1x16xf32>
    %153 = vector.broadcast %152 : vector<1x16xf32> to vector<128x16xf32>
    %154 = arith.addf %151, %153 : vector<128x16xf32>
    %155 = arith.addf %82, %154 : vector<128x16xf32>
    %c0_69 = arith.constant 0 : index
    %c0_70 = arith.constant 0 : index
    %156 = vector.load %arg15[%c0_69, %c0_70] : memref<128x16xf32, #tpu.memory_space<vmem>>, vector<128x16xf32>
    tpu.vector_store %arg15[%c0_69, %c0_70], %155 {strides = array<i32>} : memref<128x16xf32, #tpu.memory_space<vmem>>, vector<128x16xf32>,
    return
  }
}

module attributes {stable_mosaic.version = 11 : i64} {
  func.func @_ln_linear_kernel(%arg0: memref<32x64xf32, #tpu.memory_space<vmem>>, %arg1: memref<1x64xf32, #tpu.memory_space<vmem>>, %arg2: memref<1x64xf32, #tpu.memory_space<vmem>>, %arg3: memref<64x32xf32, #tpu.memory_space<vmem>>, %arg4: memref<32x32xf32, #tpu.memory_space<vmem>>) attributes {dimension_semantics = [], scalar_prefetch = 0 : i64, scratch_operands = 0 : i64, tpu.core_type = #tpu.core_type<tc>} {
    %c0 = arith.constant 0 : index
    %c0_0 = arith.constant 0 : index
    %0 = vector.load %arg0[%c0, %c0_0] : memref<32x64xf32, #tpu.memory_space<vmem>>, vector<32x64xf32>
    %c0_1 = arith.constant 0 : index
    %c0_2 = arith.constant 0 : index
    %1 = vector.load %arg1[%c0_1, %c0_2] : memref<1x64xf32, #tpu.memory_space<vmem>>, vector<1x64xf32>
    %c0_3 = arith.constant 0 : index
    %c0_4 = arith.constant 0 : index
    %2 = vector.load %arg2[%c0_3, %c0_4] : memref<1x64xf32, #tpu.memory_space<vmem>>, vector<1x64xf32>
    %cst = arith.constant dense<0.000000e+00> : vector<32xf32>
    %3 = vector.multi_reduction <add>, %0, %cst [1] : vector<32x64xf32> to vector<32xf32>
    %4 = vector.shape_cast %3 : vector<32xf32> to vector<32x1xf32>
    %cst_5 = arith.constant 6.400000e+01 : f32
    %5 = vector.broadcast %cst_5 : f32 to vector<32x1xf32>
    %6 = arith.divf %4, %5 : vector<32x1xf32>
    %7 = vector.broadcast %6 : vector<32x1xf32> to vector<32x64xf32>
    %8 = arith.subf %0, %7 : vector<32x64xf32>
    %9 = arith.mulf %8, %8 : vector<32x64xf32>
    %cst_6 = arith.constant dense<0.000000e+00> : vector<32xf32>
    %10 = vector.multi_reduction <add>, %9, %cst_6 [1] : vector<32x64xf32> to vector<32xf32>
    %11 = vector.shape_cast %10 : vector<32xf32> to vector<32x1xf32>
    %cst_7 = arith.constant 6.400000e+01 : f32
    %12 = vector.broadcast %cst_7 : f32 to vector<32x1xf32>
    %13 = arith.divf %11, %12 : vector<32x1xf32>
    %cst_8 = arith.constant 9.99999974E-6 : f32
    %14 = vector.broadcast %cst_8 : f32 to vector<32x1xf32>
    %15 = arith.addf %13, %14 : vector<32x1xf32>
    %16 = math.rsqrt %15 : vector<32x1xf32>
    %17 = vector.broadcast %16 : vector<32x1xf32> to vector<32x64xf32>
    %18 = arith.mulf %8, %17 : vector<32x64xf32>
    %19 = vector.broadcast %1 : vector<1x64xf32> to vector<32x64xf32>
    %20 = arith.mulf %18, %19 : vector<32x64xf32>
    %21 = vector.broadcast %2 : vector<1x64xf32> to vector<32x64xf32>
    %22 = arith.addf %20, %21 : vector<32x64xf32>
    %c0_9 = arith.constant 0 : index
    %c0_10 = arith.constant 0 : index
    %23 = vector.load %arg3[%c0_9, %c0_10] : memref<64x32xf32, #tpu.memory_space<vmem>>, vector<64x32xf32>
    %cst_11 = arith.constant dense<0.000000e+00> : vector<32x32xf32>
    %24 = tpu.matmul %22, %23, %cst_11 {dimension_numbers = #tpu.dot_dimension_numbers<[1], [0], [0], [1], [0, 0, 1, 1], [], []>} : vector<32x64xf32>, vector<64x32xf32>, vector<32x32xf32> -> vector<32x32xf32>
    %c0_12 = arith.constant 0 : index
    %c0_13 = arith.constant 0 : index
    %25 = vector.load %arg4[%c0_12, %c0_13] : memref<32x32xf32, #tpu.memory_space<vmem>>, vector<32x32xf32>
    tpu.vector_store %arg4[%c0_12, %c0_13], %24 {strides = array<i32>} : memref<32x32xf32, #tpu.memory_space<vmem>>, vector<32x32xf32>,
    return
  }
}

module attributes {stable_mosaic.version = 11 : i64} {
  func.func @kernel(%arg0: memref<32x32xf32, #tpu.memory_space<vmem>>, %arg1: memref<1x32xf32, #tpu.memory_space<vmem>>, %arg2: memref<1x32xf32, #tpu.memory_space<vmem>>, %arg3: memref<32x96xf32, #tpu.memory_space<vmem>>, %arg4: memref<1x96xf32, #tpu.memory_space<vmem>>, %arg5: memref<32x32xf32, #tpu.memory_space<vmem>>, %arg6: memref<1x32xf32, #tpu.memory_space<vmem>>, %arg7: memref<4x16x16xf32, #tpu.memory_space<vmem>>, %arg8: memref<1x32xf32, #tpu.memory_space<vmem>>, %arg9: memref<1x32xf32, #tpu.memory_space<vmem>>, %arg10: memref<32x128xf32, #tpu.memory_space<vmem>>, %arg11: memref<1x128xf32, #tpu.memory_space<vmem>>, %arg12: memref<128x32xf32, #tpu.memory_space<vmem>>, %arg13: memref<1x32xf32, #tpu.memory_space<vmem>>, %arg14: memref<32x32xf32, #tpu.memory_space<vmem>>) attributes {dimension_semantics = [], scalar_prefetch = 0 : i64, scratch_operands = 0 : i64, tpu.core_type = #tpu.core_type<tc>} {
    %c0 = arith.constant 0 : index
    %c0_0 = arith.constant 0 : index
    %0 = vector.load %arg0[%c0, %c0_0] : memref<32x32xf32, #tpu.memory_space<vmem>>, vector<32x32xf32>
    %c0_1 = arith.constant 0 : index
    %c0_2 = arith.constant 0 : index
    %1 = vector.load %arg1[%c0_1, %c0_2] : memref<1x32xf32, #tpu.memory_space<vmem>>, vector<1x32xf32>
    %c0_3 = arith.constant 0 : index
    %c0_4 = arith.constant 0 : index
    %2 = vector.load %arg2[%c0_3, %c0_4] : memref<1x32xf32, #tpu.memory_space<vmem>>, vector<1x32xf32>
    %cst = arith.constant dense<0.000000e+00> : vector<32xf32>
    %3 = vector.multi_reduction <add>, %0, %cst [1] : vector<32x32xf32> to vector<32xf32>
    %4 = vector.shape_cast %3 : vector<32xf32> to vector<32x1xf32>
    %cst_5 = arith.constant 3.200000e+01 : f32
    %5 = vector.broadcast %cst_5 : f32 to vector<32x1xf32>
    %6 = arith.divf %4, %5 : vector<32x1xf32>
    %7 = vector.broadcast %6 : vector<32x1xf32> to vector<32x32xf32>
    %8 = arith.subf %0, %7 : vector<32x32xf32>
    %9 = arith.mulf %8, %8 : vector<32x32xf32>
    %cst_6 = arith.constant dense<0.000000e+00> : vector<32xf32>
    %10 = vector.multi_reduction <add>, %9, %cst_6 [1] : vector<32x32xf32> to vector<32xf32>
    %11 = vector.shape_cast %10 : vector<32xf32> to vector<32x1xf32>
    %cst_7 = arith.constant 3.200000e+01 : f32
    %12 = vector.broadcast %cst_7 : f32 to vector<32x1xf32>
    %13 = arith.divf %11, %12 : vector<32x1xf32>
    %cst_8 = arith.constant 9.99999974E-6 : f32
    %14 = vector.broadcast %cst_8 : f32 to vector<32x1xf32>
    %15 = arith.addf %13, %14 : vector<32x1xf32>
    %16 = math.rsqrt %15 : vector<32x1xf32>
    %17 = vector.broadcast %16 : vector<32x1xf32> to vector<32x32xf32>
    %18 = arith.mulf %8, %17 : vector<32x32xf32>
    %19 = vector.broadcast %1 : vector<1x32xf32> to vector<32x32xf32>
    %20 = arith.mulf %18, %19 : vector<32x32xf32>
    %21 = vector.broadcast %2 : vector<1x32xf32> to vector<32x32xf32>
    %22 = arith.addf %20, %21 : vector<32x32xf32>
    %c0_9 = arith.constant 0 : index
    %c0_10 = arith.constant 0 : index
    %23 = vector.load %arg3[%c0_9, %c0_10] : memref<32x96xf32, #tpu.memory_space<vmem>>, vector<32x96xf32>
    %cst_11 = arith.constant dense<0.000000e+00> : vector<32x96xf32>
    %24 = tpu.matmul %22, %23, %cst_11 {dimension_numbers = #tpu.dot_dimension_numbers<[1], [0], [0], [1], [0, 0, 1, 1], [], []>} : vector<32x32xf32>, vector<32x96xf32>, vector<32x96xf32> -> vector<32x96xf32>
    %c0_12 = arith.constant 0 : index
    %c0_13 = arith.constant 0 : index
    %25 = vector.load %arg4[%c0_12, %c0_13] : memref<1x96xf32, #tpu.memory_space<vmem>>, vector<1x96xf32>
    %26 = vector.broadcast %25 : vector<1x96xf32> to vector<32x96xf32>
    %27 = arith.addf %24, %26 : vector<32x96xf32>
    %28 = vector.shape_cast %27 : vector<32x96xf32> to vector<2x16x96xf32>
    %c0_14 = arith.constant 0 : index
    %c0_15 = arith.constant 0 : index
    %c0_16 = arith.constant 0 : index
    %29 = vector.load %arg7[%c0_14, %c0_15, %c0_16] : memref<4x16x16xf32, #tpu.memory_space<vmem>>, vector<4x16x16xf32>
    %30 = vector.extract_strided_slice %28 {offsets = [0, 0, 0], sizes = [2, 16, 8], strides = [1, 1, 1]} : vector<2x16x96xf32> to vector<2x16x8xf32>
    %cst_17 = arith.constant 0.353553385 : f32
    %31 = vector.broadcast %cst_17 : f32 to vector<2x16x8xf32>
    %32 = arith.mulf %30, %31 : vector<2x16x8xf32>
    %33 = vector.extract_strided_slice %28 {offsets = [0, 0, 32], sizes = [2, 16, 8], strides = [1, 1, 1]} : vector<2x16x96xf32> to vector<2x16x8xf32>
    %34 = vector.extract_strided_slice %28 {offsets = [0, 0, 64], sizes = [2, 16, 8], strides = [1, 1, 1]} : vector<2x16x96xf32> to vector<2x16x8xf32>
    "tpu.trace_start"() <{level = 10 : i32, message = "bqd,bkd->bqk"}> : () -> ()
    %cst_18 = arith.constant dense<0.000000e+00> : vector<2x16x16xf32>
    %35 = tpu.matmul %32, %33, %cst_18 {dimension_numbers = #tpu.dot_dimension_numbers<[2], [2], [1], [1], [0, 0, 0, 1, 1, 1], [0], [0]>} : vector<2x16x8xf32>, vector<2x16x8xf32>, vector<2x16x16xf32> -> vector<2x16x16xf32>
    "tpu.trace_stop"() : () -> ()
    %36 = vector.extract_strided_slice %29 {offsets = [0, 0, 0], sizes = [1, 16, 16], strides = [1, 1, 1]} : vector<4x16x16xf32> to vector<1x16x16xf32>
    %37 = vector.shape_cast %36 : vector<1x16x16xf32> to vector<16x16xf32>
    %38 = vector.shape_cast %37 : vector<16x16xf32> to vector<1x16x16xf32>
    %39 = vector.broadcast %38 : vector<1x16x16xf32> to vector<2x16x16xf32>
    %40 = arith.addf %35, %39 : vector<2x16x16xf32>
    %cst_19 = arith.constant dense<0xFF800000> : vector<2x16xf32>
    %41 = vector.multi_reduction <maximumf>, %40, %cst_19 [2] : vector<2x16x16xf32> to vector<2x16xf32>
    %42 = vector.shape_cast %41 : vector<2x16xf32> to vector<2x16x1xf32>
    %43 = vector.broadcast %42 : vector<2x16x1xf32> to vector<2x16x16xf32>
    %44 = arith.subf %40, %43 : vector<2x16x16xf32>
    %45 = math.exp %44 : vector<2x16x16xf32>
    %cst_20 = arith.constant dense<0.000000e+00> : vector<2x16xf32>
    %46 = vector.multi_reduction <add>, %45, %cst_20 [2] : vector<2x16x16xf32> to vector<2x16xf32>
    %47 = vector.shape_cast %46 : vector<2x16xf32> to vector<2x16x1xf32>
    %48 = vector.broadcast %47 : vector<2x16x1xf32> to vector<2x16x16xf32>
    %49 = arith.divf %45, %48 : vector<2x16x16xf32>
    "tpu.trace_start"() <{level = 10 : i32, message = "bqk,bkd->bqd"}> : () -> ()
    %cst_21 = arith.constant dense<0.000000e+00> : vector<2x16x8xf32>
    %50 = tpu.matmul %49, %34, %cst_21 {dimension_numbers = #tpu.dot_dimension_numbers<[2], [1], [1], [2], [0, 0, 0, 1, 1, 2], [0], [0]>} : vector<2x16x16xf32>, vector<2x16x8xf32>, vector<2x16x8xf32> -> vector<2x16x8xf32>
    "tpu.trace_stop"() : () -> ()
    %51 = vector.extract_strided_slice %28 {offsets = [0, 0, 8], sizes = [2, 16, 8], strides = [1, 1, 1]} : vector<2x16x96xf32> to vector<2x16x8xf32>
    %cst_22 = arith.constant 0.353553385 : f32
    %52 = vector.broadcast %cst_22 : f32 to vector<2x16x8xf32>
    %53 = arith.mulf %51, %52 : vector<2x16x8xf32>
    %54 = vector.extract_strided_slice %28 {offsets = [0, 0, 40], sizes = [2, 16, 8], strides = [1, 1, 1]} : vector<2x16x96xf32> to vector<2x16x8xf32>
    %55 = vector.extract_strided_slice %28 {offsets = [0, 0, 72], sizes = [2, 16, 8], strides = [1, 1, 1]} : vector<2x16x96xf32> to vector<2x16x8xf32>
    "tpu.trace_start"() <{level = 10 : i32, message = "bqd,bkd->bqk"}> : () -> ()
    %cst_23 = arith.constant dense<0.000000e+00> : vector<2x16x16xf32>
    %56 = tpu.matmul %53, %54, %cst_23 {dimension_numbers = #tpu.dot_dimension_numbers<[2], [2], [1], [1], [0, 0, 0, 1, 1, 1], [0], [0]>} : vector<2x16x8xf32>, vector<2x16x8xf32>, vector<2x16x16xf32> -> vector<2x16x16xf32>
    "tpu.trace_stop"() : () -> ()
    %57 = vector.extract_strided_slice %29 {offsets = [1, 0, 0], sizes = [1, 16, 16], strides = [1, 1, 1]} : vector<4x16x16xf32> to vector<1x16x16xf32>
    %58 = vector.shape_cast %57 : vector<1x16x16xf32> to vector<16x16xf32>
    %59 = vector.shape_cast %58 : vector<16x16xf32> to vector<1x16x16xf32>
    %60 = vector.broadcast %59 : vector<1x16x16xf32> to vector<2x16x16xf32>
    %61 = arith.addf %56, %60 : vector<2x16x16xf32>
    %cst_24 = arith.constant dense<0xFF800000> : vector<2x16xf32>
    %62 = vector.multi_reduction <maximumf>, %61, %cst_24 [2] : vector<2x16x16xf32> to vector<2x16xf32>
    %63 = vector.shape_cast %62 : vector<2x16xf32> to vector<2x16x1xf32>
    %64 = vector.broadcast %63 : vector<2x16x1xf32> to vector<2x16x16xf32>
    %65 = arith.subf %61, %64 : vector<2x16x16xf32>
    %66 = math.exp %65 : vector<2x16x16xf32>
    %cst_25 = arith.constant dense<0.000000e+00> : vector<2x16xf32>
    %67 = vector.multi_reduction <add>, %66, %cst_25 [2] : vector<2x16x16xf32> to vector<2x16xf32>
    %68 = vector.shape_cast %67 : vector<2x16xf32> to vector<2x16x1xf32>
    %69 = vector.broadcast %68 : vector<2x16x1xf32> to vector<2x16x16xf32>
    %70 = arith.divf %66, %69 : vector<2x16x16xf32>
    "tpu.trace_start"() <{level = 10 : i32, message = "bqk,bkd->bqd"}> : () -> ()
    %cst_26 = arith.constant dense<0.000000e+00> : vector<2x16x8xf32>
    %71 = tpu.matmul %70, %55, %cst_26 {dimension_numbers = #tpu.dot_dimension_numbers<[2], [1], [1], [2], [0, 0, 0, 1, 1, 2], [0], [0]>} : vector<2x16x16xf32>, vector<2x16x8xf32>, vector<2x16x8xf32> -> vector<2x16x8xf32>
    "tpu.trace_stop"() : () -> ()
    %72 = vector.extract_strided_slice %28 {offsets = [0, 0, 16], sizes = [2, 16, 8], strides = [1, 1, 1]} : vector<2x16x96xf32> to vector<2x16x8xf32>
    %cst_27 = arith.constant 0.353553385 : f32
    %73 = vector.broadcast %cst_27 : f32 to vector<2x16x8xf32>
    %74 = arith.mulf %72, %73 : vector<2x16x8xf32>
    %75 = vector.extract_strided_slice %28 {offsets = [0, 0, 48], sizes = [2, 16, 8], strides = [1, 1, 1]} : vector<2x16x96xf32> to vector<2x16x8xf32>
    %76 = vector.extract_strided_slice %28 {offsets = [0, 0, 80], sizes = [2, 16, 8], strides = [1, 1, 1]} : vector<2x16x96xf32> to vector<2x16x8xf32>
    "tpu.trace_start"() <{level = 10 : i32, message = "bqd,bkd->bqk"}> : () -> ()
    %cst_28 = arith.constant dense<0.000000e+00> : vector<2x16x16xf32>
    %77 = tpu.matmul %74, %75, %cst_28 {dimension_numbers = #tpu.dot_dimension_numbers<[2], [2], [1], [1], [0, 0, 0, 1, 1, 1], [0], [0]>} : vector<2x16x8xf32>, vector<2x16x8xf32>, vector<2x16x16xf32> -> vector<2x16x16xf32>
    "tpu.trace_stop"() : () -> ()
    %78 = vector.extract_strided_slice %29 {offsets = [2, 0, 0], sizes = [1, 16, 16], strides = [1, 1, 1]} : vector<4x16x16xf32> to vector<1x16x16xf32>
    %79 = vector.shape_cast %78 : vector<1x16x16xf32> to vector<16x16xf32>
    %80 = vector.shape_cast %79 : vector<16x16xf32> to vector<1x16x16xf32>
    %81 = vector.broadcast %80 : vector<1x16x16xf32> to vector<2x16x16xf32>
    %82 = arith.addf %77, %81 : vector<2x16x16xf32>
    %cst_29 = arith.constant dense<0xFF800000> : vector<2x16xf32>
    %83 = vector.multi_reduction <maximumf>, %82, %cst_29 [2] : vector<2x16x16xf32> to vector<2x16xf32>
    %84 = vector.shape_cast %83 : vector<2x16xf32> to vector<2x16x1xf32>
    %85 = vector.broadcast %84 : vector<2x16x1xf32> to vector<2x16x16xf32>
    %86 = arith.subf %82, %85 : vector<2x16x16xf32>
    %87 = math.exp %86 : vector<2x16x16xf32>
    %cst_30 = arith.constant dense<0.000000e+00> : vector<2x16xf32>
    %88 = vector.multi_reduction <add>, %87, %cst_30 [2] : vector<2x16x16xf32> to vector<2x16xf32>
    %89 = vector.shape_cast %88 : vector<2x16xf32> to vector<2x16x1xf32>
    %90 = vector.broadcast %89 : vector<2x16x1xf32> to vector<2x16x16xf32>
    %91 = arith.divf %87, %90 : vector<2x16x16xf32>
    "tpu.trace_start"() <{level = 10 : i32, message = "bqk,bkd->bqd"}> : () -> ()
    %cst_31 = arith.constant dense<0.000000e+00> : vector<2x16x8xf32>
    %92 = tpu.matmul %91, %76, %cst_31 {dimension_numbers = #tpu.dot_dimension_numbers<[2], [1], [1], [2], [0, 0, 0, 1, 1, 2], [0], [0]>} : vector<2x16x16xf32>, vector<2x16x8xf32>, vector<2x16x8xf32> -> vector<2x16x8xf32>
    "tpu.trace_stop"() : () -> ()
    %93 = vector.extract_strided_slice %28 {offsets = [0, 0, 24], sizes = [2, 16, 8], strides = [1, 1, 1]} : vector<2x16x96xf32> to vector<2x16x8xf32>
    %cst_32 = arith.constant 0.353553385 : f32
    %94 = vector.broadcast %cst_32 : f32 to vector<2x16x8xf32>
    %95 = arith.mulf %93, %94 : vector<2x16x8xf32>
    %96 = vector.extract_strided_slice %28 {offsets = [0, 0, 56], sizes = [2, 16, 8], strides = [1, 1, 1]} : vector<2x16x96xf32> to vector<2x16x8xf32>
    %97 = vector.extract_strided_slice %28 {offsets = [0, 0, 88], sizes = [2, 16, 8], strides = [1, 1, 1]} : vector<2x16x96xf32> to vector<2x16x8xf32>
    "tpu.trace_start"() <{level = 10 : i32, message = "bqd,bkd->bqk"}> : () -> ()
    %cst_33 = arith.constant dense<0.000000e+00> : vector<2x16x16xf32>
    %98 = tpu.matmul %95, %96, %cst_33 {dimension_numbers = #tpu.dot_dimension_numbers<[2], [2], [1], [1], [0, 0, 0, 1, 1, 1], [0], [0]>} : vector<2x16x8xf32>, vector<2x16x8xf32>, vector<2x16x16xf32> -> vector<2x16x16xf32>
    "tpu.trace_stop"() : () -> ()
    %99 = vector.extract_strided_slice %29 {offsets = [3, 0, 0], sizes = [1, 16, 16], strides = [1, 1, 1]} : vector<4x16x16xf32> to vector<1x16x16xf32>
    %100 = vector.shape_cast %99 : vector<1x16x16xf32> to vector<16x16xf32>
    %101 = vector.shape_cast %100 : vector<16x16xf32> to vector<1x16x16xf32>
    %102 = vector.broadcast %101 : vector<1x16x16xf32> to vector<2x16x16xf32>
    %103 = arith.addf %98, %102 : vector<2x16x16xf32>
    %cst_34 = arith.constant dense<0xFF800000> : vector<2x16xf32>
    %104 = vector.multi_reduction <maximumf>, %103, %cst_34 [2] : vector<2x16x16xf32> to vector<2x16xf32>
    %105 = vector.shape_cast %104 : vector<2x16xf32> to vector<2x16x1xf32>
    %106 = vector.broadcast %105 : vector<2x16x1xf32> to vector<2x16x16xf32>
    %107 = arith.subf %103, %106 : vector<2x16x16xf32>
    %108 = math.exp %107 : vector<2x16x16xf32>
    %cst_35 = arith.constant dense<0.000000e+00> : vector<2x16xf32>
    %109 = vector.multi_reduction <add>, %108, %cst_35 [2] : vector<2x16x16xf32> to vector<2x16xf32>
    %110 = vector.shape_cast %109 : vector<2x16xf32> to vector<2x16x1xf32>
    %111 = vector.broadcast %110 : vector<2x16x1xf32> to vector<2x16x16xf32>
    %112 = arith.divf %108, %111 : vector<2x16x16xf32>
    "tpu.trace_start"() <{level = 10 : i32, message = "bqk,bkd->bqd"}> : () -> ()
    %cst_36 = arith.constant dense<0.000000e+00> : vector<2x16x8xf32>
    %113 = tpu.matmul %112, %97, %cst_36 {dimension_numbers = #tpu.dot_dimension_numbers<[2], [1], [1], [2], [0, 0, 0, 1, 1, 2], [0], [0]>} : vector<2x16x16xf32>, vector<2x16x8xf32>, vector<2x16x8xf32> -> vector<2x16x8xf32>
    "tpu.trace_stop"() : () -> ()
    %114 = tpu.concatenate %50, %71, %92, %113 in 2 : vector<2x16x8xf32>, vector<2x16x8xf32>, vector<2x16x8xf32>, vector<2x16x8xf32> -> vector<2x16x32xf32>
    %115 = vector.shape_cast %114 : vector<2x16x32xf32> to vector<32x32xf32>
    %c0_37 = arith.constant 0 : index
    %c0_38 = arith.constant 0 : index
    %116 = vector.load %arg5[%c0_37, %c0_38] : memref<32x32xf32, #tpu.memory_space<vmem>>, vector<32x32xf32>
    %cst_39 = arith.constant dense<0.000000e+00> : vector<32x32xf32>
    %117 = tpu.matmul %115, %116, %cst_39 {dimension_numbers = #tpu.dot_dimension_numbers<[1], [0], [0], [1], [0, 0, 1, 1], [], []>} : vector<32x32xf32>, vector<32x32xf32>, vector<32x32xf32> -> vector<32x32xf32>
    %c0_40 = arith.constant 0 : index
    %c0_41 = arith.constant 0 : index
    %118 = vector.load %arg6[%c0_40, %c0_41] : memref<1x32xf32, #tpu.memory_space<vmem>>, vector<1x32xf32>
    %119 = vector.broadcast %118 : vector<1x32xf32> to vector<32x32xf32>
    %120 = arith.addf %117, %119 : vector<32x32xf32>
    %121 = arith.addf %0, %120 : vector<32x32xf32>
    %c0_42 = arith.constant 0 : index
    %c0_43 = arith.constant 0 : index
    %122 = vector.load %arg8[%c0_42, %c0_43] : memref<1x32xf32, #tpu.memory_space<vmem>>, vector<1x32xf32>
    %c0_44 = arith.constant 0 : index
    %c0_45 = arith.constant 0 : index
    %123 = vector.load %arg9[%c0_44, %c0_45] : memref<1x32xf32, #tpu.memory_space<vmem>>, vector<1x32xf32>
    %cst_46 = arith.constant dense<0.000000e+00> : vector<32xf32>
    %124 = vector.multi_reduction <add>, %121, %cst_46 [1] : vector<32x32xf32> to vector<32xf32>
    %125 = vector.shape_cast %124 : vector<32xf32> to vector<32x1xf32>
    %cst_47 = arith.constant 3.200000e+01 : f32
    %126 = vector.broadcast %cst_47 : f32 to vector<32x1xf32>
    %127 = arith.divf %125, %126 : vector<32x1xf32>
    %128 = vector.broadcast %127 : vector<32x1xf32> to vector<32x32xf32>
    %129 = arith.subf %121, %128 : vector<32x32xf32>
    %130 = arith.mulf %129, %129 : vector<32x32xf32>
    %cst_48 = arith.constant dense<0.000000e+00> : vector<32xf32>
    %131 = vector.multi_reduction <add>, %130, %cst_48 [1] : vector<32x32xf32> to vector<32xf32>
    %132 = vector.shape_cast %131 : vector<32xf32> to vector<32x1xf32>
    %cst_49 = arith.constant 3.200000e+01 : f32
    %133 = vector.broadcast %cst_49 : f32 to vector<32x1xf32>
    %134 = arith.divf %132, %133 : vector<32x1xf32>
    %cst_50 = arith.constant 9.99999974E-6 : f32
    %135 = vector.broadcast %cst_50 : f32 to vector<32x1xf32>
    %136 = arith.addf %134, %135 : vector<32x1xf32>
    %137 = math.rsqrt %136 : vector<32x1xf32>
    %138 = vector.broadcast %137 : vector<32x1xf32> to vector<32x32xf32>
    %139 = arith.mulf %129, %138 : vector<32x32xf32>
    %140 = vector.broadcast %122 : vector<1x32xf32> to vector<32x32xf32>
    %141 = arith.mulf %139, %140 : vector<32x32xf32>
    %142 = vector.broadcast %123 : vector<1x32xf32> to vector<32x32xf32>
    %143 = arith.addf %141, %142 : vector<32x32xf32>
    %c0_51 = arith.constant 0 : index
    %c0_52 = arith.constant 0 : index
    %144 = vector.load %arg10[%c0_51, %c0_52] : memref<32x128xf32, #tpu.memory_space<vmem>>, vector<32x128xf32>
    %cst_53 = arith.constant dense<0.000000e+00> : vector<32x128xf32>
    %145 = tpu.matmul %143, %144, %cst_53 {dimension_numbers = #tpu.dot_dimension_numbers<[1], [0], [0], [1], [0, 0, 1, 1], [], []>} : vector<32x32xf32>, vector<32x128xf32>, vector<32x128xf32> -> vector<32x128xf32>
    %c0_54 = arith.constant 0 : index
    %c0_55 = arith.constant 0 : index
    %146 = vector.load %arg11[%c0_54, %c0_55] : memref<1x128xf32, #tpu.memory_space<vmem>>, vector<1x128xf32>
    %147 = vector.broadcast %146 : vector<1x128xf32> to vector<32x128xf32>
    %148 = arith.addf %145, %147 : vector<32x128xf32>
    %cst_56 = arith.constant 0.707106769 : f32
    %149 = vector.broadcast %cst_56 : f32 to vector<32x128xf32>
    %150 = arith.mulf %148, %149 : vector<32x128xf32>
    %151 = math.absf %150 : vector<32x128xf32>
    %cst_57 = arith.constant 0.327591091 : f32
    %152 = vector.broadcast %cst_57 : f32 to vector<32x128xf32>
    %153 = arith.mulf %152, %151 : vector<32x128xf32>
    %cst_58 = arith.constant 1.000000e+00 : f32
    %154 = vector.broadcast %cst_58 : f32 to vector<32x128xf32>
    %155 = arith.addf %154, %153 : vector<32x128xf32>
    %cst_59 = arith.constant 1.000000e+00 : f32
    %156 = vector.broadcast %cst_59 : f32 to vector<32x128xf32>
    %157 = arith.divf %156, %155 : vector<32x128xf32>
    %cst_60 = arith.constant 1.06140542 : f32
    %158 = vector.broadcast %cst_60 : f32 to vector<32x128xf32>
    %159 = arith.mulf %157, %158 : vector<32x128xf32>
    %cst_61 = arith.constant -1.45315206 : f32
    %160 = vector.broadcast %cst_61 : f32 to vector<32x128xf32>
    %161 = arith.addf %160, %159 : vector<32x128xf32>
    %162 = arith.mulf %157, %161 : vector<32x128xf32>
    %cst_62 = arith.constant 1.42141378 : f32
    %163 = vector.broadcast %cst_62 : f32 to vector<32x128xf32>
    %164 = arith.addf %163, %162 : vector<32x128xf32>
    %165 = arith.mulf %157, %164 : vector<32x128xf32>
    %cst_63 = arith.constant -0.284496725 : f32
    %166 = vector.broadcast %cst_63 : f32 to vector<32x128xf32>
    %167 = arith.addf %166, %165 : vector<32x128xf32>
    %168 = arith.mulf %157, %167 : vector<32x128xf32>
    %cst_64 = arith.constant 0.254829586 : f32
    %169 = vector.broadcast %cst_64 : f32 to vector<32x128xf32>
    %170 = arith.addf %169, %168 : vector<32x128xf32>
    %171 = arith.mulf %157, %170 : vector<32x128xf32>
    %cst_65 = arith.constant 0.000000e+00 : f32
    %172 = vector.broadcast %cst_65 : f32 to vector<32x128xf32>
    %173 = arith.subf %172, %151 : vector<32x128xf32>
    %174 = arith.mulf %173, %151 : vector<32x128xf32>
    %175 = math.exp %174 : vector<32x128xf32>
    %176 = arith.mulf %171, %175 : vector<32x128xf32>
    %cst_66 = arith.constant 1.000000e+00 : f32
    %177 = vector.broadcast %cst_66 : f32 to vector<32x128xf32>
    %178 = arith.subf %177, %176 : vector<32x128xf32>
    %cst_67 = arith.constant 0.000000e+00 : f32
    %179 = vector.broadcast %cst_67 : f32 to vector<32x128xf32>
    %180 = arith.cmpf olt, %150, %179 : vector<32x128xf32>
    %cst_68 = arith.constant 0.000000e+00 : f32
    %181 = vector.broadcast %cst_68 : f32 to vector<32x128xf32>
    %182 = arith.subf %181, %178 : vector<32x128xf32>
    %183 = arith.select %180, %182, %178 : vector<32x128xi1>, vector<32x128xf32>
    %cst_69 = arith.constant 5.000000e-01 : f32
    %184 = vector.broadcast %cst_69 : f32 to vector<32x128xf32>
    %185 = arith.mulf %184, %148 : vector<32x128xf32>
    %cst_70 = arith.constant 1.000000e+00 : f32
    %186 = vector.broadcast %cst_70 : f32 to vector<32x128xf32>
    %187 = arith.addf %186, %183 : vector<32x128xf32>
    %188 = arith.mulf %185, %187 : vector<32x128xf32>
    %c0_71 = arith.constant 0 : index
    %c0_72 = arith.constant 0 : index
    %189 = vector.load %arg12[%c0_71, %c0_72] : memref<128x32xf32, #tpu.memory_space<vmem>>, vector<128x32xf32>
    %cst_73 = arith.constant dense<0.000000e+00> : vector<32x32xf32>
    %190 = tpu.matmul %188, %189, %cst_73 {dimension_numbers = #tpu.dot_dimension_numbers<[1], [0], [0], [1], [0, 0, 1, 1], [], []>} : vector<32x128xf32>, vector<128x32xf32>, vector<32x32xf32> -> vector<32x32xf32>
    %c0_74 = arith.constant 0 : index
    %c0_75 = arith.constant 0 : index
    %191 = vector.load %arg13[%c0_74, %c0_75] : memref<1x32xf32, #tpu.memory_space<vmem>>, vector<1x32xf32>
    %192 = vector.broadcast %191 : vector<1x32xf32> to vector<32x32xf32>
    %193 = arith.addf %190, %192 : vector<32x32xf32>
    %194 = arith.addf %121, %193 : vector<32x32xf32>
    %c0_76 = arith.constant 0 : index
    %c0_77 = arith.constant 0 : index
    %195 = vector.load %arg14[%c0_76, %c0_77] : memref<32x32xf32, #tpu.memory_space<vmem>>, vector<32x32xf32>
    tpu.vector_store %arg14[%c0_76, %c0_77], %194 {strides = array<i32>} : memref<32x32xf32, #tpu.memory_space<vmem>>, vector<32x32xf32>,
    return
  }
}

module attributes {stable_mosaic.version = 11 : i64} {
  func.func @_norm_pool_head_kernel(%arg0: memref<32x32xf32, #tpu.memory_space<vmem>>, %arg1: memref<1x32xf32, #tpu.memory_space<vmem>>, %arg2: memref<1x32xf32, #tpu.memory_space<vmem>>, %arg3: memref<2x32xf32, #tpu.memory_space<vmem>>, %arg4: memref<32x256xf32, #tpu.memory_space<vmem>>, %arg5: memref<1x256xf32, #tpu.memory_space<vmem>>, %arg6: memref<1x256xf32, #tpu.memory_space<vmem>>, %arg7: memref<1x256xf32, #tpu.memory_space<vmem>>, %arg8: memref<256x5xf32, #tpu.memory_space<vmem>>, %arg9: memref<1x5xf32, #tpu.memory_space<vmem>>, %arg10: memref<2x5xf32, #tpu.memory_space<vmem>>) attributes {dimension_semantics = [], scalar_prefetch = 0 : i64, scratch_operands = 0 : i64, tpu.core_type = #tpu.core_type<tc>} {
    %c0 = arith.constant 0 : index
    %c0_0 = arith.constant 0 : index
    %0 = vector.load %arg0[%c0, %c0_0] : memref<32x32xf32, #tpu.memory_space<vmem>>, vector<32x32xf32>
    %c0_1 = arith.constant 0 : index
    %c0_2 = arith.constant 0 : index
    %1 = vector.load %arg1[%c0_1, %c0_2] : memref<1x32xf32, #tpu.memory_space<vmem>>, vector<1x32xf32>
    %c0_3 = arith.constant 0 : index
    %c0_4 = arith.constant 0 : index
    %2 = vector.load %arg2[%c0_3, %c0_4] : memref<1x32xf32, #tpu.memory_space<vmem>>, vector<1x32xf32>
    %cst = arith.constant dense<0.000000e+00> : vector<32xf32>
    %3 = vector.multi_reduction <add>, %0, %cst [1] : vector<32x32xf32> to vector<32xf32>
    %4 = vector.shape_cast %3 : vector<32xf32> to vector<32x1xf32>
    %cst_5 = arith.constant 3.200000e+01 : f32
    %5 = vector.broadcast %cst_5 : f32 to vector<32x1xf32>
    %6 = arith.divf %4, %5 : vector<32x1xf32>
    %7 = vector.broadcast %6 : vector<32x1xf32> to vector<32x32xf32>
    %8 = arith.subf %0, %7 : vector<32x32xf32>
    %9 = arith.mulf %8, %8 : vector<32x32xf32>
    %cst_6 = arith.constant dense<0.000000e+00> : vector<32xf32>
    %10 = vector.multi_reduction <add>, %9, %cst_6 [1] : vector<32x32xf32> to vector<32xf32>
    %11 = vector.shape_cast %10 : vector<32xf32> to vector<32x1xf32>
    %cst_7 = arith.constant 3.200000e+01 : f32
    %12 = vector.broadcast %cst_7 : f32 to vector<32x1xf32>
    %13 = arith.divf %11, %12 : vector<32x1xf32>
    %cst_8 = arith.constant 9.99999974E-6 : f32
    %14 = vector.broadcast %cst_8 : f32 to vector<32x1xf32>
    %15 = arith.addf %13, %14 : vector<32x1xf32>
    %16 = math.rsqrt %15 : vector<32x1xf32>
    %17 = vector.broadcast %16 : vector<32x1xf32> to vector<32x32xf32>
    %18 = arith.mulf %8, %17 : vector<32x32xf32>
    %19 = vector.broadcast %1 : vector<1x32xf32> to vector<32x32xf32>
    %20 = arith.mulf %18, %19 : vector<32x32xf32>
    %21 = vector.broadcast %2 : vector<1x32xf32> to vector<32x32xf32>
    %22 = arith.addf %20, %21 : vector<32x32xf32>
    %c0_9 = arith.constant 0 : index
    %c0_10 = arith.constant 0 : index
    %23 = vector.load %arg3[%c0_9, %c0_10] : memref<2x32xf32, #tpu.memory_space<vmem>>, vector<2x32xf32>
    %cst_11 = arith.constant dense<0.000000e+00> : vector<2x32xf32>
    %24 = tpu.matmul %23, %22, %cst_11 {dimension_numbers = #tpu.dot_dimension_numbers<[1], [0], [0], [1], [0, 0, 1, 1], [], []>} : vector<2x32xf32>, vector<32x32xf32>, vector<2x32xf32> -> vector<2x32xf32>
    %c0_12 = arith.constant 0 : index
    %c0_13 = arith.constant 0 : index
    %25 = vector.load %arg4[%c0_12, %c0_13] : memref<32x256xf32, #tpu.memory_space<vmem>>, vector<32x256xf32>
    %cst_14 = arith.constant dense<0.000000e+00> : vector<2x256xf32>
    %26 = tpu.matmul %24, %25, %cst_14 {dimension_numbers = #tpu.dot_dimension_numbers<[1], [0], [0], [1], [0, 0, 1, 1], [], []>} : vector<2x32xf32>, vector<32x256xf32>, vector<2x256xf32> -> vector<2x256xf32>
    %c0_15 = arith.constant 0 : index
    %c0_16 = arith.constant 0 : index
    %27 = vector.load %arg5[%c0_15, %c0_16] : memref<1x256xf32, #tpu.memory_space<vmem>>, vector<1x256xf32>
    %28 = vector.broadcast %27 : vector<1x256xf32> to vector<2x256xf32>
    %29 = arith.addf %26, %28 : vector<2x256xf32>
    %c0_17 = arith.constant 0 : index
    %c0_18 = arith.constant 0 : index
    %30 = vector.load %arg6[%c0_17, %c0_18] : memref<1x256xf32, #tpu.memory_space<vmem>>, vector<1x256xf32>
    %31 = vector.broadcast %30 : vector<1x256xf32> to vector<2x256xf32>
    %32 = arith.mulf %29, %31 : vector<2x256xf32>
    %c0_19 = arith.constant 0 : index
    %c0_20 = arith.constant 0 : index
    %33 = vector.load %arg7[%c0_19, %c0_20] : memref<1x256xf32, #tpu.memory_space<vmem>>, vector<1x256xf32>
    %34 = vector.broadcast %33 : vector<1x256xf32> to vector<2x256xf32>
    %35 = arith.addf %32, %34 : vector<2x256xf32>
    %cst_21 = arith.constant 0.707106769 : f32
    %36 = vector.broadcast %cst_21 : f32 to vector<2x256xf32>
    %37 = arith.mulf %35, %36 : vector<2x256xf32>
    %38 = math.absf %37 : vector<2x256xf32>
    %cst_22 = arith.constant 0.327591091 : f32
    %39 = vector.broadcast %cst_22 : f32 to vector<2x256xf32>
    %40 = arith.mulf %39, %38 : vector<2x256xf32>
    %cst_23 = arith.constant 1.000000e+00 : f32
    %41 = vector.broadcast %cst_23 : f32 to vector<2x256xf32>
    %42 = arith.addf %41, %40 : vector<2x256xf32>
    %cst_24 = arith.constant 1.000000e+00 : f32
    %43 = vector.broadcast %cst_24 : f32 to vector<2x256xf32>
    %44 = arith.divf %43, %42 : vector<2x256xf32>
    %cst_25 = arith.constant 1.06140542 : f32
    %45 = vector.broadcast %cst_25 : f32 to vector<2x256xf32>
    %46 = arith.mulf %44, %45 : vector<2x256xf32>
    %cst_26 = arith.constant -1.45315206 : f32
    %47 = vector.broadcast %cst_26 : f32 to vector<2x256xf32>
    %48 = arith.addf %47, %46 : vector<2x256xf32>
    %49 = arith.mulf %44, %48 : vector<2x256xf32>
    %cst_27 = arith.constant 1.42141378 : f32
    %50 = vector.broadcast %cst_27 : f32 to vector<2x256xf32>
    %51 = arith.addf %50, %49 : vector<2x256xf32>
    %52 = arith.mulf %44, %51 : vector<2x256xf32>
    %cst_28 = arith.constant -0.284496725 : f32
    %53 = vector.broadcast %cst_28 : f32 to vector<2x256xf32>
    %54 = arith.addf %53, %52 : vector<2x256xf32>
    %55 = arith.mulf %44, %54 : vector<2x256xf32>
    %cst_29 = arith.constant 0.254829586 : f32
    %56 = vector.broadcast %cst_29 : f32 to vector<2x256xf32>
    %57 = arith.addf %56, %55 : vector<2x256xf32>
    %58 = arith.mulf %44, %57 : vector<2x256xf32>
    %cst_30 = arith.constant 0.000000e+00 : f32
    %59 = vector.broadcast %cst_30 : f32 to vector<2x256xf32>
    %60 = arith.subf %59, %38 : vector<2x256xf32>
    %61 = arith.mulf %60, %38 : vector<2x256xf32>
    %62 = math.exp %61 : vector<2x256xf32>
    %63 = arith.mulf %58, %62 : vector<2x256xf32>
    %cst_31 = arith.constant 1.000000e+00 : f32
    %64 = vector.broadcast %cst_31 : f32 to vector<2x256xf32>
    %65 = arith.subf %64, %63 : vector<2x256xf32>
    %cst_32 = arith.constant 0.000000e+00 : f32
    %66 = vector.broadcast %cst_32 : f32 to vector<2x256xf32>
    %67 = arith.cmpf olt, %37, %66 : vector<2x256xf32>
    %cst_33 = arith.constant 0.000000e+00 : f32
    %68 = vector.broadcast %cst_33 : f32 to vector<2x256xf32>
    %69 = arith.subf %68, %65 : vector<2x256xf32>
    %70 = arith.select %67, %69, %65 : vector<2x256xi1>, vector<2x256xf32>
    %cst_34 = arith.constant 5.000000e-01 : f32
    %71 = vector.broadcast %cst_34 : f32 to vector<2x256xf32>
    %72 = arith.mulf %71, %35 : vector<2x256xf32>
    %cst_35 = arith.constant 1.000000e+00 : f32
    %73 = vector.broadcast %cst_35 : f32 to vector<2x256xf32>
    %74 = arith.addf %73, %70 : vector<2x256xf32>
    %75 = arith.mulf %72, %74 : vector<2x256xf32>
    %c0_36 = arith.constant 0 : index
    %c0_37 = arith.constant 0 : index
    %76 = vector.load %arg8[%c0_36, %c0_37] : memref<256x5xf32, #tpu.memory_space<vmem>>, vector<256x5xf32>
    %cst_38 = arith.constant dense<0.000000e+00> : vector<2x5xf32>
    %77 = tpu.matmul %75, %76, %cst_38 {dimension_numbers = #tpu.dot_dimension_numbers<[1], [0], [0], [1], [0, 0, 1, 1], [], []>} : vector<2x256xf32>, vector<256x5xf32>, vector<2x5xf32> -> vector<2x5xf32>
    %c0_39 = arith.constant 0 : index
    %c0_40 = arith.constant 0 : index
    %78 = vector.load %arg9[%c0_39, %c0_40] : memref<1x5xf32, #tpu.memory_space<vmem>>, vector<1x5xf32>
    %79 = vector.broadcast %78 : vector<1x5xf32> to vector<2x5xf32>
    %80 = arith.addf %77, %79 : vector<2x5xf32>
    %c0_41 = arith.constant 0 : index
    %c0_42 = arith.constant 0 : index
    %81 = vector.load %arg10[%c0_41, %c0_42] : memref<2x5xf32, #tpu.memory_space<vmem>>, vector<2x5xf32>
    tpu.vector_store %arg10[%c0_41, %c0_42], %80 {strides = array<i32>} : memref<2x5xf32, #tpu.memory_space<vmem>>, vector<2x5xf32>,
    return
  }
}

</mosaic_0001>

<bundles_post_ra>
// kernel: _lambda_.8
= control target key start
LH: loop header
LB: loop body
LE: loop exit
PB: predicated region body
PF: predicated region fallthrough
CT: control target
= control target key end

     0   :  { %v282_v0 = vmov 0.0|0.0   ;;  %vm58_vm0 = vcmask 261120   ;;  %vm283_vm1 = vmmov 0   ;;  %v284_v39 = vmov 0.0   ;;  %s401_s1 = inlined_call_operand.vmem [shape: f32[160,32], index: 1, kind: input, shape index: {}]   ;;  %s402_s0 = inlined_call_operand.vmem [shape: f32[2,160], index: 0, kind: input, shape index: {}]   ;;  %s403_s3 = inlined_call_operand.vmem [shape: f32[32,6], index: 3, kind: input, shape index: {}]   ;;  %s404_s2 = inlined_call_operand.vmem [shape: f32[1,32], index: 2, kind: input, shape index: {}]   ;;  %s405_s4 = inlined_call_operand.vmem [shape: f32[1,6], index: 4, kind: input, shape index: {}]   ;;  %s406_s5 = inlined_call_operand.vmem [shape: f32[2,6], index: 5, kind: output, shape index: {}]  }
   0x1   :  { %243 = vmatprep.subr.bf16.mxu0 %v282_v0  ;;  %v21_v1 = vld [vmem:[%s401_s1] sm:$0xff]  ;;  %v22_v2 = vld [vmem:[%s401_s1 + $0x8] sm:$0xff]  ;;  %v23_v3 = vld [vmem:[%s401_s1 + $0x10] sm:$0xff]  ;;  %273 = vmatprep.subr.bf16.mxu1 %v282_v0  ;;  %vm216_vm2 = vcmask 41984  }
   0x2   :  { %v244_v4 = vpack.c.bf16 %v22_v2, %v21_v1  ;;  %v24_v5 = vld [vmem:[%s401_s1 + $0x18] sm:$0xff]  ;;  %v25_v7 = vld [vmem:[%s401_s1 + $0x20] sm:$0xff]  ;;  %v26_v8 = vld [vmem:[%s401_s1 + $0x28] sm:$0xff]  ;;  %240 = vmatprep.mubr.msk.f32.mxu1 %vm283_vm1, %v284_v39 }
   0x3   :  { %v247_v6 = vpack.c.bf16 %v24_v5, %v23_v3  ;;  %v223_v9 = vld.sshfl [vmem:[%s402_s0] sm:$0x33 pattern:$0x76325410]  ;;  %v250_v10 = vpack.c.bf16 %v26_v8, %v25_v7  ;;  %v133_v13 = vld [vmem:[%s403_s3 + $0x8] sm:$0xff]  ;;  %v27_v14 = vld [vmem:[%s401_s1 + $0x30] sm:$0xff] }
   0x4   :  { %245 = vmatpush1.bf16.msra.mxu0 %v244_v4  ;;  %v56_v11 = vcombine.high %v223_v9, %v223_v9  ;;  %v132_v12 = vld [vmem:[%s403_s3] sm:$0xff]  ;;  %v28_v15 = vld [vmem:[%s401_s1 + $0x38] sm:$0xff]  ;;  %v30_v19 = vld [vmem:[%s401_s1 + $0x48] sm:$0xff] }
   0x5   :  { %246 = vmatprep.subr.bf16.mxu0 %v282_v0  ;;  %v274_v16 = vpack.c.bf16 %v133_v13, %v132_v12  ;;  %v253_v17 = vpack.c.bf16 %v28_v15, %v27_v14  ;;  %v29_v18 = vld [vmem:[%s401_s1 + $0x40] sm:$0xff]  ;;  %v31_v21 = vld [vmem:[%s401_s1 + $0x50] sm:$0xff]  ;;  %v32_v22 = vld [vmem:[%s401_s1 + $0x58] sm:$0xff] }
   0x6   :  { %224 = vmatprep.mubr.msk.f32.mxu0 %vm58_vm0, %v56_v11  ;;  %v256_v20 = vpack.c.bf16 %v30_v19, %v29_v18  ;;  %v259_v23 = vpack.c.bf16 %v32_v22, %v31_v21  ;;  %v33_v24 = vld [vmem:[%s401_s1 + $0x60] sm:$0xff]  ;;  %v34_v25 = vld [vmem:[%s401_s1 + $0x68] sm:$0xff]  ;;  %v35_v27 = vld [vmem:[%s401_s1 + $0x70] sm:$0xff] }
   0x7   :  { %275 = vmatpush3.bf16.msra.mxu1 %v274_v16  ;;  %v262_v26 = vpack.c.bf16 %v34_v25, %v33_v24  ;;  %v36_v28 = vld [vmem:[%s401_s1 + $0x78] sm:$0xff]  ;;  %v37_v30 = vld [vmem:[%s401_s1 + $0x80] sm:$0xff]  ;;  %v38_v31 = vld [vmem:[%s401_s1 + $0x88] sm:$0xff] }
   0x8   :  { %248 = vmatpush1.bf16.msra.mxu0 %v247_v6  ;;  %276 = vmatprep.subr.bf16.mxu1 %v282_v0  ;;  %v265_v29 = vpack.c.bf16 %v36_v28, %v35_v27  ;;  %v268_v32 = vpack.c.bf16 %v38_v31, %v37_v30  ;;  %v39_v33 = vld [vmem:[%s401_s1 + $0x90] sm:$0xff]  ;;  %v40_v34 = vld [vmem:[%s401_s1 + $0x98] sm:$0xff]  ;;  %v222_v40 = vld [vmem:[%s404_s2] ss:$0 sm:$0xff] }
   0x9   :  { %249 = vmatprep.subr.bf16.mxu0 %v282_v0  ;;  %v271_v35 = vpack.c.bf16 %v40_v34, %v39_v33  ;;  %v134_v36 = vld [vmem:[%s403_s3 + $0x10] sm:$0xff]  ;;  %v135_v37 = vld [vmem:[%s403_s3 + $0x18] sm:$0xff]  ;;  %v225_v45 = vld [vmem:[%s405_s4] ss:$0 sm:$0xff] }
   0xa   :  { %v277_v38 = vpack.c.bf16 %v135_v37, %v134_v36 }
   0xc   :  { %251 = vmatpush1.bf16.msra.mxu0 %v250_v10  ;;  %278 = vmatpush3.bf16.msra.mxu1 %v277_v38 }
   0xd   :  { %252 = vmatprep.subr.bf16.mxu0 %v282_v0 }
  0x10   :  { %254 = vmatpush1.bf16.msra.mxu0 %v253_v17 }
  0x11   :  { %255 = vmatprep.subr.bf16.mxu0 %v282_v0 }
  0x14   :  { %257 = vmatpush1.bf16.msra.mxu0 %v256_v20 }
  0x15   :  { %258 = vmatprep.subr.bf16.mxu0 %v282_v0 }
  0x18   :  { %260 = vmatpush1.bf16.msra.mxu0 %v259_v23 }
  0x19   :  { %261 = vmatprep.subr.bf16.mxu0 %v282_v0 }
  0x1c   :  { %263 = vmatpush1.bf16.msra.mxu0 %v262_v26 }
  0x1d   :  { %264 = vmatprep.subr.bf16.mxu0 %v282_v0 }
  0x20   :  { %266 = vmatpush1.bf16.msra.mxu0 %v265_v29 }
  0x21   :  { %267 = vmatprep.subr.bf16.mxu0 %v282_v0 }
  0x24   :  { %269 = vmatpush1.bf16.msra.mxu0 %v268_v32 }
  0x25   :  { %270 = vmatprep.subr.bf16.mxu0 %v282_v0 }
  0x28   :  { %272 = vmatpush1.bf16.msra.mxu0 %v271_v35 }
  0x2b   :  { %126 = vmatmul.mubr.f32.vlgmr.msra.gmra.mrb[0].mxu0 %v223_v9 }
  0xfe   :  { %v127_v41 = vpop.f32.mrb[0].mxu0 }
  0xff   :  { %v128_v42 = vadd.f32 %v222_v40, %v127_v41  ;;  %v129_v43 = vpop.f32.mrb[1].mxu0 }
 0x101   :  { %v131_v44 = vmax.f32 %v128_v42, 0.0 }
 0x103   :  { %241 = vmatmul.mubr.msk.f32.vlgmr.msra.gmra.mrb[0].mxu1 %vm58_vm0, %v131_v44 }
 0x1d6   :  { %v212_v46 = vpop.f32.mrb[0].mxu1 }
 0x1d7   :  { %v213_v47 = vadd.f32 %v225_v45, %v212_v46  ;;  %v242_v48 = vpop.f32.mrb[1].mxu1 }
 0x1d9   :  { %217 = vst.msk [vmem:[%s406_s5] sm:$0x3] %vm216_vm2, %v213_v47 }

// kernel: _lambda_.9
= control target key start
LH: loop header
LB: loop body
LE: loop exit
PB: predicated region body
PF: predicated region fallthrough
CT: control target
= control target key end

     0   :  { %vm94_vm0 = vcmask 1043456   ;;  %vm45_vm1 = vcmask 97280   ;;  %vm626_vm2 = vmmov 1   ;;  %vm245_vm4 = vcmask 130048   ;;  %s1008_s1 = inlined_call_operand.vmem [shape: f32[12,16], index: 1, kind: input, shape index: {}]   ;;  %s1009_s0 = inlined_call_operand.vmem [shape: f32[128,12], index: 0, kind: input, shape index: {}]   ;;  %s1010_s2 = inlined_call_operand.vmem [shape: f32[1,16], index: 2, kind: input, shape index: {}]   ;;  %s1011_s3 = inlined_call_operand.vmem [shape: f32[1,16], index: 3, kind: input, shape index: {}]   ;;  %s1012_s4 = inlined_call_operand.vmem [shape: f32[1,16], index: 4, kind: input, shape index: {}]   ;;  %s1013_s5 = inlined_call_operand.vmem [shape: f32[128,16], index: 5, kind: output, shape index: {}]  }
   0x1   :  { %v36_v0 = vld [vmem:[%s1008_s1] sm:$0xff]  ;;  %v37_v1 = vld [vmem:[%s1008_s1 + $0x8] sm:$0xf]  ;;  %vm586_vm3 = vmpackc.low %vm94_vm0, %vm626_vm2 }
   0x2   :  { %v585_v2 = vpack.c.bf16 %v37_v1, %v36_v0  ;;  %v20_v3 = vld [vmem:[%s1009_s0] sm:$0xff]  ;;  %v21_v5 = vld [vmem:[%s1009_s0 + $0x8] sm:$0xff]  ;;  %v22_v7 = vld [vmem:[%s1009_s0 + $0x10] sm:$0xff] }
   0x3   :  { %v28_v4 = vld [vmem:[%s1009_s0 + $0x40] sm:$0xff]  ;;  %561 = vmatprep.mubr.msk.f32.mxu0 %vm45_vm1, %v20_v3  ;;  %v29_v6 = vld [vmem:[%s1009_s0 + $0x48] sm:$0xff]  ;;  %v30_v8 = vld [vmem:[%s1009_s0 + $0x50] sm:$0xff] }
   0x4   :  { %573 = vmatprep.mubr.msk.f32.mxu1 %vm45_vm1, %v28_v4  ;;  %587 = vmatprep.subr.msk.bf16.mxu0 %vm586_vm3, %v585_v2  ;;  %v23_v9 = vld [vmem:[%s1009_s0 + $0x18] sm:$0xff]  ;;  %v24_v11 = vld [vmem:[%s1009_s0 + $0x20] sm:$0xff]  ;;  %v25_v13 = vld [vmem:[%s1009_s0 + $0x28] sm:$0xff] }
   0x5   :  { %591 = vmatprep.subr.msk.bf16.mxu1 %vm586_vm3, %v585_v2  ;;  %590 = vmatpush3.bf16.msk.msra.mxu0 %vm586_vm3, %v585_v2  ;;  %v31_v10 = vld [vmem:[%s1009_s0 + $0x58] sm:$0xff]  ;;  %v32_v12 = vld [vmem:[%s1009_s0 + $0x60] sm:$0xff]  ;;  %v33_v14 = vld [vmem:[%s1009_s0 + $0x68] sm:$0xff] }
   0x6   :  { %592 = vmatpush3.bf16.msk.msra.mxu1 %vm586_vm3, %v585_v2  ;;  %v26_v15 = vld [vmem:[%s1009_s0 + $0x30] sm:$0xff]  ;;  %v27_v17 = vld [vmem:[%s1009_s0 + $0x38] sm:$0xff]  ;;  %v519_v19 = vld [vmem:[%s1010_s2] ss:$0 sm:$0xff] }
   0x7   :  { %v34_v16 = vld [vmem:[%s1009_s0 + $0x70] sm:$0xff]  ;;  %v35_v18 = vld [vmem:[%s1009_s0 + $0x78] sm:$0xff] }
   0x8   :  { %562 = vmatmul.mubr.msk.f32.vlgmr.msra.gmra.mrb[0].mxu0 %vm45_vm1, %v21_v5 }
   0x9   :  { %574 = vmatmul.mubr.msk.f32.vlgmr.msra.gmra.mrb[0].mxu1 %vm45_vm1, %v29_v6  ;;  %564 = vmatprep.mubr.msk.f32.mxu0 %vm45_vm1, %v22_v7 }
   0xa   :  { %576 = vmatprep.mubr.msk.f32.mxu1 %vm45_vm1, %v30_v8 }
   0xc   :  { %565 = vmatmul.mubr.msk.f32.gmra.mrb[2].mxu0 %vm45_vm1, %v23_v9 }
   0xd   :  { %577 = vmatmul.mubr.msk.f32.gmra.mrb[2].mxu1 %vm45_vm1, %v31_v10  ;;  %567 = vmatprep.mubr.msk.f32.mxu0 %vm45_vm1, %v24_v11 }
   0xe   :  { %579 = vmatprep.mubr.msk.f32.mxu1 %vm45_vm1, %v32_v12 }
  0x10   :  { %568 = vmatmul.mubr.msk.f32.gmra.mrb[4].mxu0 %vm45_vm1, %v25_v13 }
  0x11   :  { %580 = vmatmul.mubr.msk.f32.gmra.mrb[4].mxu1 %vm45_vm1, %v33_v14  ;;  %570 = vmatprep.mubr.msk.f32.mxu0 %vm45_vm1, %v26_v15 }
  0x12   :  { %582 = vmatprep.mubr.msk.f32.mxu1 %vm45_vm1, %v34_v16 }
  0x14   :  { %571 = vmatmul.mubr.msk.f32.gmra.mrb[6].mxu0 %vm45_vm1, %v27_v17 }
  0x15   :  { %583 = vmatmul.mubr.msk.f32.gmra.mrb[6].mxu1 %vm45_vm1, %v35_v18 }
  0xdb   :  { %v563_v20 = vpop.f32.mrb[0].mxu0 }
  0xdc   :  { %v575_v21 = vpop.f32.mrb[0].mxu1  ;;  %v730_v22 = vadd.f32 %v563_v20, %v519_v19  ;;  %v164_v24 = vpop.f32.mrb[1].mxu0 }
  0xdd   :  { %v732_v23 = vadd.f32 %v575_v21, %v519_v19  ;;  %v204_v25 = vpop.f32.mrb[1].mxu1  ;;  %v734_v26 = vadd.f32 %v519_v19, %v164_v24 }
  0xde   :  { %v249_v28 = vsel %vm245_vm4, %v730_v22, 0.0  ;;  %v742_v35 = vadd.f32 %v519_v19, %v204_v25 }
  0xdf   :  { %v273_v27 = vsel %vm245_vm4, %v732_v23, 0.0  ;;  %250 = vadd.xlane.f32.xlu0 %v249_v28  ;;  %v566_v29 = vpop.f32.mrb[2].mxu0  ;;  %v246_v37 = vsel %vm245_vm4, %v734_v26, 0.0 }
  0xe0   :  { %274 = vadd.xlane.f32.xlu1 %v273_v27  ;;  %v578_v30 = vpop.f32.mrb[2].mxu1  ;;  %v180_v31 = vadd.f32 %v566_v29, %v519_v19  ;;  %v174_v32 = vpop.f32.mrb[3].mxu0  ;;  %v270_v45 = vsel %vm245_vm4, %v742_v35, 0.0 }
  0xe1   :  { %v740_v33 = vadd.f32 %v578_v30, %v519_v19  ;;  %v214_v34 = vpop.f32.mrb[3].mxu1  ;;  %v749_v43 = vadd.f32 %v519_v19, %v174_v32 }
  0xe2   :  { %v255_v36 = vsel %vm245_vm4, %v180_v31, 0.0  ;;  %v751_v44 = vadd.f32 %v519_v19, %v214_v34 }
  0xe3   :  { %247 = vadd.xlane.f32.xlu0 %v246_v37  ;;  %v569_v38 = vpop.f32.mrb[4].mxu0  ;;  %v279_v40 = vsel %vm245_vm4, %v740_v33, 0.0  ;;  %v252_v52 = vsel %vm245_vm4, %v749_v43, 0.0 }
  0xe4   :  { %256 = vadd.xlane.f32.xlu1 %v255_v36  ;;  %v581_v39 = vpop.f32.mrb[4].mxu1  ;;  %v184_v41 = vpop.f32.mrb[5].mxu0  ;;  %v755_v48 = vadd.f32 %v569_v38, %v519_v19  ;;  %v276_v53 = vsel %vm245_vm4, %v751_v44, 0.0 }
  0xe5   :  { %v224_v42 = vpop.f32.mrb[5].mxu1  ;;  %v757_v49 = vadd.f32 %v519_v19, %v184_v41  ;;  %v763_v54 = vadd.f32 %v581_v39, %v519_v19 }
  0xe6   :  { %v765_v55 = vadd.f32 %v519_v19, %v224_v42  ;;  %v261_v56 = vsel %vm245_vm4, %v755_v48, 0.0 }
  0xe7   :  { %271 = vadd.xlane.f32.xlu0 %v270_v45  ;;  %v572_v46 = vpop.f32.mrb[6].mxu0  ;;  %v258_v57 = vsel %vm245_vm4, %v757_v49, 0.0  ;;  %v285_v60 = vsel %vm245_vm4, %v763_v54, 0.0 }
  0xe8   :  { %280 = vadd.xlane.f32.xlu1 %v279_v40  ;;  %v584_v47 = vpop.f32.mrb[6].mxu1  ;;  %v194_v50 = vpop.f32.mrb[7].mxu0  ;;  %v771_v58 = vadd.f32 %v572_v46, %v519_v19  ;;  %v282_v61 = vsel %vm245_vm4, %v765_v55, 0.0 }
  0xe9   :  { %v234_v51 = vpop.f32.mrb[7].mxu1  ;;  %v773_v59 = vadd.f32 %v519_v19, %v194_v50  ;;  %v779_v62 = vadd.f32 %v584_v47, %v519_v19 }
  0xea   :  { %v781_v63 = vadd.f32 %v519_v19, %v234_v51  ;;  %v267_v0 = vsel %vm245_vm4, %v771_v58, 0.0 }
  0xeb   :  { %277 = vadd.xlane.f32.xlu0 %v276_v53  ;;  %v264_v1 = vsel %vm245_vm4, %v773_v59, 0.0  ;;  %v291_v2 = vsel %vm245_vm4, %v779_v62, 0.0 }
  0xec   :  { %253 = vadd.xlane.f32.xlu1 %v252_v52  ;;  %v288_v3 = vsel %vm245_vm4, %v781_v63, 0.0 }
  0xef   :  { %259 = vadd.xlane.f32.xlu0 %v258_v57 }
  0xf0   :  { %262 = vadd.xlane.f32.xlu1 %v261_v56 }
  0xf3   :  { %283 = vadd.xlane.f32.xlu0 %v282_v61 }
  0xf4   :  { %286 = vadd.xlane.f32.xlu1 %v285_v60 }
  0xf7   :  { %265 = vadd.xlane.f32.xlu0 %v264_v1 }
  0xf8   :  { %268 = vadd.xlane.f32.xlu1 %v267_v0 }
  0xfb   :  { %289 = vadd.xlane.f32.xlu0 %v288_v3 }
  0xfc   :  { %292 = vadd.xlane.f32.xlu1 %v291_v2 }
 0x16c   :  { %v251_v5 = vpop.xlane.xlu0 %250 }
 0x16d   :  { %v275_v4 = vpop.xlane.xlu1 %274  ;;  %v296_v7 = vmul.f32 0.0625, %v251_v5 }
 0x16e   :  { %v304_v6 = vmul.f32 0.0625, %v275_v4 }
 0x16f   :  { %v795_v9 = vsub.f32 %v730_v22, %v296_v7 }
 0x170   :  { %v792_v8 = vsub.f32 %v732_v23, %v304_v6  ;;  %v248_v11 = vpop.xlane.xlu0 %247 }
 0x171   :  { %v257_v10 = vpop.xlane.xlu1 %256  ;;  %v295_v13 = vmul.f32 0.0625, %v248_v11  ;;  %v328_v14 = vmul.f32 %v795_v9, %v795_v9 }
 0x172   :  { %v298_v12 = vmul.f32 0.0625, %v257_v10  ;;  %v336_v18 = vmul.f32 %v792_v8, %v792_v8 }
 0x173   :  { %v802_v16 = vsub.f32 %v734_v26, %v295_v13  ;;  %v346_v17 = vsel %vm245_vm4, %v328_v14, 0.0 }
 0x174   :  { %v799_v15 = vsub.f32 %v180_v31, %v298_v12  ;;  %347 = vadd.xlane.f32.xlu1 %v346_v17  ;;  %v272_v20 = vpop.xlane.xlu0 %271  ;;  %v370_v27 = vsel %vm245_vm4, %v336_v18, 0.0 }
 0x175   :  { %v281_v19 = vpop.xlane.xlu1 %280  ;;  %v303_v22 = vmul.f32 0.0625, %v272_v20  ;;  %v327_v23 = vmul.f32 %v802_v16, %v802_v16 }
 0x176   :  { %v306_v21 = vmul.f32 0.0625, %v281_v19  ;;  %v330_v24 = vmul.f32 %v799_v15, %v799_v15 }
 0x177   :  { %v815_v26 = vsub.f32 %v742_v35, %v303_v22  ;;  %v343_v28 = vsel %vm245_vm4, %v327_v23, 0.0 }
 0x178   :  { %v812_v25 = vsub.f32 %v740_v33, %v306_v21  ;;  %371 = vadd.xlane.f32.xlu1 %v370_v27  ;;  %344 = vadd.xlane.f32.xlu0 %v343_v28  ;;  %v278_v30 = vpop.xlane.xlu0 %277  ;;  %v352_v36 = vsel %vm245_vm4, %v330_v24, 0.0 }
 0x179   :  { %v254_v29 = vpop.xlane.xlu1 %253  ;;  %v305_v32 = vmul.f32 0.0625, %v278_v30  ;;  %v335_v34 = vmul.f32 %v815_v26, %v815_v26 }
 0x17a   :  { %v297_v31 = vmul.f32 0.0625, %v254_v29  ;;  %v338_v38 = vmul.f32 %v812_v25, %v812_v25 }
 0x17b   :  { %v826_v35 = vsub.f32 %v751_v44, %v305_v32  ;;  %v367_v37 = vsel %vm245_vm4, %v335_v34, 0.0 }
 0x17c   :  { %v823_v33 = vsub.f32 %v749_v43, %v297_v31  ;;  %353 = vadd.xlane.f32.xlu1 %v352_v36  ;;  %368 = vadd.xlane.f32.xlu0 %v367_v37  ;;  %v260_v40 = vpop.xlane.xlu0 %259  ;;  %v376_v47 = vsel %vm245_vm4, %v338_v38, 0.0 }
 0x17d   :  { %v263_v39 = vpop.xlane.xlu1 %262  ;;  %v299_v42 = vmul.f32 0.0625, %v260_v40  ;;  %v337_v43 = vmul.f32 %v826_v35, %v826_v35 }
 0x17e   :  { %v300_v41 = vmul.f32 0.0625, %v263_v39  ;;  %v329_v45 = vmul.f32 %v823_v33, %v823_v33 }
 0x17f   :  { %v839_v46 = vsub.f32 %v757_v49, %v299_v42  ;;  %v373_v60 = vsel %vm245_vm4, %v337_v43, 0.0 }
 0x180   :  { %v836_v44 = vsub.f32 %v755_v48, %v300_v41  ;;  %v349_v50 = vsel %vm245_vm4, %v329_v45, 0.0  ;;  %377 = vadd.xlane.f32.xlu1 %v376_v47  ;;  %v284_v52 = vpop.xlane.xlu0 %283 }
 0x181   :  { %v287_v51 = vpop.xlane.xlu1 %286  ;;  %350 = vadd.xlane.f32.xlu0 %v349_v50  ;;  %v307_v56 = vmul.f32 0.0625, %v284_v52  ;;  %v331_v0 = vmul.f32 %v839_v46, %v839_v46  ;;  %v889_v52 = vld [vmem:[%s1011_s3] ss:$0 sm:$0xff] }
 0x182   :  { %v308_v53 = vmul.f32 0.0625, %v287_v51  ;;  %v332_v57 = vmul.f32 %v836_v44, %v836_v44 }
 0x183   :  { %v850_v49 = vsub.f32 %v765_v55, %v307_v56  ;;  %v355_v10 = vsel %vm245_vm4, %v331_v0, 0.0  ;;  %v895_v0 = vld [vmem:[%s1012_s4] ss:$0 sm:$0xff] }
 0x184   :  { %v847_v48 = vsub.f32 %v763_v54, %v308_v53  ;;  %v358_v61 = vsel %vm245_vm4, %v332_v57, 0.0  ;;  %v266_v2 = vpop.xlane.xlu0 %265 }
 0x185   :  { %359 = vadd.xlane.f32.xlu1 %v358_v61  ;;  %v269_v1 = vpop.xlane.xlu1 %268  ;;  %374 = vadd.xlane.f32.xlu0 %v373_v60  ;;  %v301_v4 = vmul.f32 0.0625, %v266_v2  ;;  %v339_v54 = vmul.f32 %v850_v49, %v850_v49 }
 0x186   :  { %v302_v3 = vmul.f32 0.0625, %v269_v1  ;;  %v340_v5 = vmul.f32 %v847_v48, %v847_v48 }
 0x187   :  { %v863_v6 = vsub.f32 %v773_v59, %v301_v4  ;;  %v379_v18 = vsel %vm245_vm4, %v339_v54, 0.0 }
 0x188   :  { %v860_v55 = vsub.f32 %v771_v58, %v302_v3  ;;  %v382_v7 = vsel %vm245_vm4, %v340_v5, 0.0  ;;  %v290_v12 = vpop.xlane.xlu0 %289 }
 0x189   :  { %383 = vadd.xlane.f32.xlu1 %v382_v7  ;;  %v293_v11 = vpop.xlane.xlu1 %292  ;;  %356 = vadd.xlane.f32.xlu0 %v355_v10  ;;  %v309_v14 = vmul.f32 0.0625, %v290_v12  ;;  %v333_v20 = vmul.f32 %v863_v6, %v863_v6 }
 0x18a   :  { %v310_v13 = vmul.f32 0.0625, %v293_v11  ;;  %v334_v17 = vmul.f32 %v860_v55, %v860_v55 }
 0x18b   :  { %v874_v59 = vsub.f32 %v781_v63, %v309_v14  ;;  %v361_v23 = vsel %vm245_vm4, %v333_v20, 0.0 }
 0x18c   :  { %v871_v58 = vsub.f32 %v779_v62, %v310_v13  ;;  %v364_v19 = vsel %vm245_vm4, %v334_v17, 0.0 }
 0x18d   :  { %365 = vadd.xlane.f32.xlu1 %v364_v19  ;;  %380 = vadd.xlane.f32.xlu0 %v379_v18  ;;  %v341_v62 = vmul.f32 %v874_v59, %v874_v59 }
 0x18e   :  { %v342_v21 = vmul.f32 %v871_v58, %v871_v58 }
 0x18f   :  { %v385_v63 = vsel %vm245_vm4, %v341_v62, 0.0 }
 0x190   :  { %v388_v22 = vsel %vm245_vm4, %v342_v21, 0.0 }
 0x191   :  { %389 = vadd.xlane.f32.xlu1 %v388_v22  ;;  %362 = vadd.xlane.f32.xlu0 %v361_v23 }
 0x195   :  { %386 = vadd.xlane.f32.xlu0 %v385_v63 }
 0x201   :  { %v348_v24 = vpop.xlane.xlu1 %347 }
 0x202   :  { %v392_v27 = vmul.f32 0.0625, %v348_v24 }
 0x204   :  { %v408_v28 = vadd.f32 1e-05, %v392_v27 }
 0x205   :  { %v372_v29 = vpop.xlane.xlu1 %371  ;;  %v345_v30 = vpop.xlane.xlu0 %344 }
 0x206   :  { %594 = vrsqrt.f32 %v408_v28  ;;  %v400_v31 = vmul.f32 0.0625, %v372_v29  ;;  %v391_v32 = vmul.f32 0.0625, %v345_v30 }
 0x208   :  { %v416_v34 = vadd.f32 1e-05, %v400_v31  ;;  %v407_v36 = vadd.f32 1e-05, %v391_v32 }
 0x209   :  { %v354_v37 = vpop.xlane.xlu1 %353  ;;  %v369_v38 = vpop.xlane.xlu0 %368 }
 0x20a   :  { %596 = vrsqrt.f32 %v416_v34  ;;  %v394_v39 = vmul.f32 0.0625, %v354_v37  ;;  %v399_v40 = vmul.f32 0.0625, %v369_v38 }
 0x20b   :  { %598 = vrsqrt.f32 %v407_v36 }
 0x20c   :  { %v410_v41 = vadd.f32 1e-05, %v394_v39  ;;  %v415_v42 = vadd.f32 1e-05, %v399_v40 }
 0x20d   :  { %v378_v45 = vpop.xlane.xlu1 %377 }
 0x20e   :  { %v351_v43 = vpop.xlane.xlu0 %350  ;;  %600 = vrsqrt.f32 %v410_v41  ;;  %v402_v47 = vmul.f32 0.0625, %v378_v45 }
 0x20f   :  { %v393_v50 = vmul.f32 0.0625, %v351_v43  ;;  %602 = vrsqrt.f32 %v415_v42 }
 0x210   :  { %v595_v51 = vpop.eup %594  ;;  %v418_v53 = vadd.f32 1e-05, %v402_v47 }
 0x211   :  { %v409_v56 = vadd.f32 1e-05, %v393_v50  ;;  %v440_v57 = vmul.f32 %v595_v51, %v795_v9 }
 0x212   :  { %v360_v60 = vpop.xlane.xlu1 %359  ;;  %v375_v61 = vpop.xlane.xlu0 %374  ;;  %604 = vrsqrt.f32 %v418_v53 }
 0x213   :  { %v396_v1 = vmul.f32 0.0625, %v360_v60  ;;  %v401_v2 = vmul.f32 0.0625, %v375_v61  ;;  %v462_v3 = vmul.f32 %v889_v52, %v440_v57  ;;  %606 = vrsqrt.f32 %v409_v56 }
 0x214   :  { %v597_v4 = vpop.eup %596 }
 0x215   :  { %v412_v5 = vadd.f32 1e-05, %v396_v1  ;;  %v417_v54 = vadd.f32 1e-05, %v401_v2  ;;  %v599_v7 = vpop.eup %598  ;;  %v484_v10 = vadd.f32 %v895_v0, %v462_v3  ;;  %v448_v9 = vmul.f32 %v597_v4, %v792_v8 }
 0x216   :  { %v384_v11 = vpop.xlane.xlu1 %383  ;;  %v357_v12 = vpop.xlane.xlu0 %356  ;;  %v439_v13 = vmul.f32 %v599_v7, %v802_v16 }
 0x217   :  { %608 = vrsqrt.f32 %v412_v5  ;;  %v404_v14 = vmul.f32 0.0625, %v384_v11  ;;  %v395_v17 = vmul.f32 0.0625, %v357_v12  ;;  %500 = vst.msk [vmem:[%s1013_s5 + $0x8] sm:$0xff] %vm245_vm4, %v484_v10  ;;  %v470_v18 = vmul.f32 %v889_v52, %v448_v9 }
 0x218   :  { %610 = vrsqrt.f32 %v417_v54  ;;  %v601_v19 = vpop.eup %600  ;;  %v461_v20 = vmul.f32 %v889_v52, %v439_v13 }
 0x219   :  { %v420_v21 = vadd.f32 1e-05, %v404_v14  ;;  %v411_v8 = vadd.f32 1e-05, %v395_v17  ;;  %v603_v22 = vpop.eup %602  ;;  %v492_v23 = vadd.f32 %v895_v0, %v470_v18  ;;  %v442_v16 = vmul.f32 %v601_v19, %v799_v15 }
 0x21a   :  { %v366_v62 = vpop.xlane.xlu1 %365  ;;  %v381_v63 = vpop.xlane.xlu0 %380  ;;  %v483_v24 = vadd.f32 %v895_v0, %v461_v20  ;;  %v447_v27 = vmul.f32 %v603_v22, %v815_v26 }
 0x21b   :  { %612 = vrsqrt.f32 %v420_v21  ;;  %v398_v28 = vmul.f32 0.0625, %v366_v62  ;;  %508 = vst.msk [vmem:[%s1013_s5 + $0x48] sm:$0xff] %vm245_vm4, %v492_v23  ;;  %v464_v29 = vmul.f32 %v889_v52, %v442_v16  ;;  %v403_v30 = vmul.f32 0.0625, %v381_v63 }
 0x21c   :  { %614 = vrsqrt.f32 %v411_v8  ;;  %v605_v31 = vpop.eup %604  ;;  %499 = vst.msk [vmem:[%s1013_s5] sm:$0xff] %vm245_vm4, %v483_v24  ;;  %v469_v15 = vmul.f32 %v889_v52, %v447_v27 }
 0x21d   :  { %v414_v26 = vadd.f32 1e-05, %v398_v28  ;;  %v607_v32 = vpop.eup %606  ;;  %v486_v34 = vadd.f32 %v895_v0, %v464_v29  ;;  %v450_v36 = vmul.f32 %v605_v31, %v812_v25  ;;  %v419_v37 = vadd.f32 1e-05, %v403_v30 }
 0x21e   :  { %v390_v38 = vpop.xlane.xlu1 %389  ;;  %v363_v39 = vpop.xlane.xlu0 %362  ;;  %v491_v40 = vadd.f32 %v895_v0, %v469_v15  ;;  %v441_v41 = vmul.f32 %v607_v32, %v823_v33 }
 0x21f   :  { %616 = vrsqrt.f32 %v414_v26  ;;  %v406_v42 = vmul.f32 0.0625, %v390_v38  ;;  %502 = vst.msk [vmem:[%s1013_s5 + $0x18] sm:$0xff] %vm245_vm4, %v486_v34  ;;  %v472_v45 = vmul.f32 %v889_v52, %v450_v36  ;;  %v397_v43 = vmul.f32 0.0625, %v363_v39 }
 0x220   :  { %618 = vrsqrt.f32 %v419_v37  ;;  %507 = vst.msk [vmem:[%s1013_s5 + $0x40] sm:$0xff] %vm245_vm4, %v491_v40  ;;  %v463_v25 = vmul.f32 %v889_v52, %v441_v41 }
 0x221   :  { %v609_v47 = vpop.eup %608  ;;  %v422_v33 = vadd.f32 1e-05, %v406_v42  ;;  %v494_v51 = vadd.f32 %v895_v0, %v472_v45  ;;  %v413_v56 = vadd.f32 1e-05, %v397_v43 }
 0x222   :  { %v611_v50 = vpop.eup %610  ;;  %v444_v53 = vmul.f32 %v609_v47, %v836_v44  ;;  %v387_v57 = vpop.xlane.xlu0 %386  ;;  %v485_v60 = vadd.f32 %v895_v0, %v463_v25 }
 0x223   :  { %v449_v61 = vmul.f32 %v611_v50, %v826_v35  ;;  %620 = vrsqrt.f32 %v422_v33  ;;  %v405_v1 = vmul.f32 0.0625, %v387_v57  ;;  %510 = vst.msk [vmem:[%s1013_s5 + $0x58] sm:$0xff] %vm245_vm4, %v494_v51 }
 0x224   :  { %v466_v2 = vmul.f32 %v889_v52, %v444_v53  ;;  %622 = vrsqrt.f32 %v413_v56  ;;  %501 = vst.msk [vmem:[%s1013_s5 + $0x10] sm:$0xff] %vm245_vm4, %v485_v60 }
 0x225   :  { %v613_v3 = vpop.eup %612  ;;  %v471_v44 = vmul.f32 %v889_v52, %v449_v61  ;;  %v421_v4 = vadd.f32 1e-05, %v405_v1 }
 0x226   :  { %v615_v35 = vpop.eup %614  ;;  %v488_v5 = vadd.f32 %v895_v0, %v466_v2  ;;  %v452_v54 = vmul.f32 %v613_v3, %v847_v48 }
 0x227   :  { %v493_v7 = vadd.f32 %v895_v0, %v471_v44  ;;  %v443_v10 = vmul.f32 %v615_v35, %v839_v46  ;;  %624 = vrsqrt.f32 %v421_v4 }
 0x228   :  { %504 = vst.msk [vmem:[%s1013_s5 + $0x28] sm:$0xff] %vm245_vm4, %v488_v5  ;;  %v474_v9 = vmul.f32 %v889_v52, %v452_v54 }
 0x229   :  { %v617_v11 = vpop.eup %616  ;;  %509 = vst.msk [vmem:[%s1013_s5 + $0x50] sm:$0xff] %vm245_vm4, %v493_v7  ;;  %v465_v48 = vmul.f32 %v889_v52, %v443_v10 }
 0x22a   :  { %v619_v12 = vpop.eup %618  ;;  %v496_v13 = vadd.f32 %v895_v0, %v474_v9  ;;  %v446_v46 = vmul.f32 %v617_v11, %v860_v55 }
 0x22b   :  { %v487_v14 = vadd.f32 %v895_v0, %v465_v48  ;;  %v451_v17 = vmul.f32 %v619_v12, %v850_v49 }
 0x22c   :  { %512 = vst.msk [vmem:[%s1013_s5 + $0x68] sm:$0xff] %vm245_vm4, %v496_v13  ;;  %v468_v18 = vmul.f32 %v889_v52, %v446_v46 }
 0x22d   :  { %v621_v19 = vpop.eup %620  ;;  %503 = vst.msk [vmem:[%s1013_s5 + $0x20] sm:$0xff] %vm245_vm4, %v487_v14  ;;  %v473_v20 = vmul.f32 %v889_v52, %v451_v17 }
 0x22e   :  { %v623_v55 = vpop.eup %622  ;;  %v490_v21 = vadd.f32 %v895_v0, %v468_v18  ;;  %v454_v49 = vmul.f32 %v621_v19, %v871_v58 }
 0x22f   :  { %v495_v8 = vadd.f32 %v895_v0, %v473_v20  ;;  %v445_v22 = vmul.f32 %v623_v55, %v863_v6 }
 0x230   :  { %506 = vst.msk [vmem:[%s1013_s5 + $0x38] sm:$0xff] %vm245_vm4, %v490_v21  ;;  %v476_v23 = vmul.f32 %v889_v52, %v454_v49 }
 0x231   :  { %v625_v16 = vpop.eup %624  ;;  %511 = vst.msk [vmem:[%s1013_s5 + $0x60] sm:$0xff] %vm245_vm4, %v495_v8  ;;  %v467_v62 = vmul.f32 %v889_v52, %v445_v22 }
 0x232   :  { %v498_v58 = vadd.f32 %v895_v0, %v476_v23  ;;  %v453_v63 = vmul.f32 %v625_v16, %v874_v59 }
 0x233   :  { %v489_v6 = vadd.f32 %v895_v0, %v467_v62 }
 0x234   :  { %514 = vst.msk [vmem:[%s1013_s5 + $0x78] sm:$0xff] %vm245_vm4, %v498_v58  ;;  %v475_v24 = vmul.f32 %v889_v52, %v453_v63 }
 0x235   :  { %505 = vst.msk [vmem:[%s1013_s5 + $0x30] sm:$0xff] %vm245_vm4, %v489_v6 }
 0x236   :  { %v497_v27 = vadd.f32 %v895_v0, %v475_v24 }
 0x238   :  { %513 = vst.msk [vmem:[%s1013_s5 + $0x70] sm:$0xff] %vm245_vm4, %v497_v27 }

// kernel: _lambda_.10
= control target key start
LH: loop header
LB: loop body
LE: loop exit
PB: predicated region body
PF: predicated region fallthrough
CT: control target
= control target key end

     0   :  { %vm65_vm0 = vcmask 130048   ;;  %vm547_vm1 = vcmask 64512   ;;  %s6523_s20 = smov 112   ;;  %s6525_s21 = smov 104   ;;  %vm4943_vm5 = vcmask 523264   ;;  %s8386_s0 = inlined_call_operand.vmem [shape: f32[128,16], index: 0, kind: input, shape index: {}]   ;;  %s8387_s3 = inlined_call_operand.vmem [shape: f32[16,48], index: 3, kind: input, shape index: {}]   ;;  %s8388_s1 = inlined_call_operand.vmem [shape: f32[1,16], index: 1, kind: input, shape index: {}, may-alias: {1,8}]   ;;  %s8389_s2 = inlined_call_operand.vmem [shape: f32[1,16], index: 2, kind: input, shape index: {}, may-alias: {2,6,9,13}]   ;;  %s8390_s4 = inlined_call_operand.vmem [shape: f32[1,48], index: 4, kind: input, shape index: {}]   ;;  %s8391_s7 = inlined_call_operand.vmem [shape: f32[2,16,16], index: 7, kind: input, shape index: {}]   ;;  %s8392_s5 = inlined_call_operand.vmem [shape: f32[16,16], index: 5, kind: input, shape index: {}]   ;;  %s8393_s6 = inlined_call_operand.vmem [shape: f32[1,16], index: 6, kind: input, shape index: {}, may-alias: {2,6,9,13}]   ;;  %s8394_s10 = inlined_call_operand.vmem [shape: f32[16,64], index: 10, kind: input, shape index: {}]   ;;  %s8395_s8 = inlined_call_operand.vmem [shape: f32[1,16], index: 8, kind: input, shape index: {}, may-alias: {1,8}]   ;;  %s8396_s9 = inlined_call_operand.vmem [shape: f32[1,16], index: 9, kind: input, shape index: {}, may-alias: {2,6,9,13}]   ;;  %s8397_s12 = inlined_call_operand.vmem [shape: f32[64,16], index: 12, kind: input, shape index: {}]   ;;  %s8398_s11 = inlined_call_operand.vmem [shape: f32[1,64], index: 11, kind: input, shape index: {}]   ;;  %s8399_s13 = inlined_call_operand.vmem [shape: f32[1,16], index: 13, kind: input, shape index: {}, may-alias: {2,6,9,13}]   ;;  %s8400_s14 = inlined_call_operand.vmem [shape: f32[128,16], index: 14, kind: output, shape index: {}]  }
   0x1   :  { %v47_v0 = vld [vmem:[%s8386_s0] sm:$0xff]  ;;  %v49_v1 = vld [vmem:[%s8386_s0 + $0x10] sm:$0xff]  ;;  %v48_v2 = vld [vmem:[%s8386_s0 + $0x8] sm:$0xff]  ;;  %s6526_s26 = smov 120   ;;  %s6527_s27 = smov 88  }
   0x2   :  { %v66_v3 = vsel %vm65_vm0, %v47_v0, 0.0  ;;  %v72_v4 = vsel %vm65_vm0, %v49_v1, 0.0  ;;  %v50_v5 = vld [vmem:[%s8386_s0 + $0x18] sm:$0xff]  ;;  %v69_v6 = vsel %vm65_vm0, %v48_v2, 0.0  ;;  %v51_v8 = vld [vmem:[%s8386_s0 + $0x20] sm:$0xff]  ;;  %v52_v9 = vld [vmem:[%s8386_s0 + $0x28] sm:$0xff] }
   0x3   :  { %67 = vadd.xlane.f32.xlu0 %v66_v3  ;;  %73 = vadd.xlane.f32.xlu1 %v72_v4  ;;  %v75_v7 = vsel %vm65_vm0, %v50_v5, 0.0  ;;  %v78_v10 = vsel %vm65_vm0, %v51_v8, 0.0  ;;  %v81_v11 = vsel %vm65_vm0, %v52_v9, 0.0  ;;  %v6631_v12 = vld [vmem:[%s8386_s0 + $0x30] sm:$0xff]  ;;  %v6636_v13 = vld [vmem:[%s8386_s0 + $0x38] sm:$0xff]  ;;  %v6645_v16 = vld [vmem:[%s8386_s0 + $0x40] sm:$0xff] }
   0x4   :  { %v84_v14 = vsel %vm65_vm0, %v6631_v12, 0.0  ;;  %v87_v15 = vsel %vm65_vm0, %v6636_v13, 0.0  ;;  %v6650_v17 = vld [vmem:[%s8386_s0 + $0x48] sm:$0xff]  ;;  %v90_v18 = vsel %vm65_vm0, %v6645_v16, 0.0  ;;  %v6659_v20 = vld [vmem:[%s8386_s0 + $0x50] sm:$0xff]  ;;  %v6664_v21 = vld [vmem:[%s8386_s0 + $0x58] sm:$0xff] }
   0x5   :  { %v93_v19 = vsel %vm65_vm0, %v6650_v17, 0.0  ;;  %v96_v22 = vsel %vm65_vm0, %v6659_v20, 0.0  ;;  %v99_v23 = vsel %vm65_vm0, %v6664_v21, 0.0  ;;  %v6673_v24 = vld [vmem:[%s8386_s0 + $0x60] sm:$0xff]  ;;  %v6678_v25 = vld [vmem:[%s8386_s0 + $0x68] sm:$0xff]  ;;  %v6687_v28 = vld [vmem:[%s8386_s0 + $0x70] sm:$0xff] }
   0x6   :  { %v102_v26 = vsel %vm65_vm0, %v6673_v24, 0.0  ;;  %v105_v27 = vsel %vm65_vm0, %v6678_v25, 0.0  ;;  %v6692_v29 = vld [vmem:[%s8386_s0 + $0x78] sm:$0xff]  ;;  %v108_v30 = vsel %vm65_vm0, %v6687_v28, 0.0  ;;  %vm6965_vm2 = vmpackc.low %vm547_vm1, %vm547_vm1  ;;  %s6528_s18 = smov 8  }
   0x7   :  { %70 = vadd.xlane.f32.xlu0 %v69_v6  ;;  %76 = vadd.xlane.f32.xlu1 %v75_v7  ;;  %v111_v31 = vsel %vm65_vm0, %v6692_v29, 0.0 }
   0xb   :  { %79 = vadd.xlane.f32.xlu0 %v78_v10  ;;  %82 = vadd.xlane.f32.xlu1 %v81_v11 }
   0xf   :  { %85 = vadd.xlane.f32.xlu0 %v84_v14  ;;  %88 = vadd.xlane.f32.xlu1 %v87_v15 }
  0x13   :  { %91 = vadd.xlane.f32.xlu0 %v90_v18  ;;  %94 = vadd.xlane.f32.xlu1 %v93_v19 }
  0x17   :  { %97 = vadd.xlane.f32.xlu0 %v96_v22  ;;  %100 = vadd.xlane.f32.xlu1 %v99_v23 }
  0x1b   :  { %103 = vadd.xlane.f32.xlu0 %v102_v26  ;;  %106 = vadd.xlane.f32.xlu1 %v105_v27 }
  0x1f   :  { %109 = vadd.xlane.f32.xlu0 %v108_v30  ;;  %112 = vadd.xlane.f32.xlu1 %v111_v31 }
  0x90   :  { %v68_v32 = vpop.xlane.xlu0 %67  ;;  %v74_v33 = vpop.xlane.xlu1 %73 }
  0x91   :  { %v115_v34 = vmul.f32 0.0625, %v68_v32  ;;  %v117_v35 = vmul.f32 0.0625, %v74_v33 }
  0x93   :  { %v6698_v36 = vsub.f32 %v47_v0, %v115_v34  ;;  %v6700_v37 = vsub.f32 %v49_v1, %v117_v35 }
  0x94   :  { %v71_v38 = vpop.xlane.xlu0 %70  ;;  %v77_v39 = vpop.xlane.xlu1 %76 }
  0x95   :  { %v116_v40 = vmul.f32 0.0625, %v71_v38  ;;  %v118_v41 = vmul.f32 0.0625, %v77_v39  ;;  %v147_v42 = vmul.f32 %v6698_v36, %v6698_v36  ;;  %v149_v43 = vmul.f32 %v6700_v37, %v6700_v37 }
  0x97   :  { %v6706_v44 = vsub.f32 %v48_v2, %v116_v40  ;;  %v6708_v45 = vsub.f32 %v50_v5, %v118_v41  ;;  %v163_v46 = vsel %vm65_vm0, %v147_v42, 0.0  ;;  %v169_v49 = vsel %vm65_vm0, %v149_v43, 0.0 }
  0x98   :  { %164 = vadd.xlane.f32.xlu0 %v163_v46  ;;  %v80_v47 = vpop.xlane.xlu0 %79  ;;  %v83_v48 = vpop.xlane.xlu1 %82 }
  0x99   :  { %v119_v50 = vmul.f32 0.0625, %v80_v47  ;;  %v120_v51 = vmul.f32 0.0625, %v83_v48  ;;  %v148_v52 = vmul.f32 %v6706_v44, %v6706_v44  ;;  %v150_v53 = vmul.f32 %v6708_v45, %v6708_v45 }
  0x9b   :  { %v6716_v54 = vsub.f32 %v51_v8, %v119_v50  ;;  %v6718_v55 = vsub.f32 %v52_v9, %v120_v51  ;;  %v166_v56 = vsel %vm65_vm0, %v148_v52, 0.0  ;;  %v172_v59 = vsel %vm65_vm0, %v150_v53, 0.0  ;;  %v320_v53 = vld [vmem:[%s8387_s3 + $0x8] sm:$0xff] }
  0x9c   :  { %170 = vadd.xlane.f32.xlu0 %v169_v49  ;;  %167 = vadd.xlane.f32.xlu1 %v166_v56  ;;  %v86_v57 = vpop.xlane.xlu0 %85  ;;  %v89_v58 = vpop.xlane.xlu1 %88 }
  0x9d   :  { %v121_v60 = vmul.f32 0.0625, %v86_v57  ;;  %v122_v61 = vmul.f32 0.0625, %v89_v58  ;;  %v151_v62 = vmul.f32 %v6716_v54, %v6716_v54  ;;  %v152_v63 = vmul.f32 %v6718_v55, %v6718_v55 }
  0x9f   :  { %v6727_v0 = vsub.f32 %v6631_v12, %v121_v60  ;;  %v6730_v1 = vsub.f32 %v6636_v13, %v122_v61  ;;  %v175_v2 = vsel %vm65_vm0, %v151_v62, 0.0  ;;  %v178_v5 = vsel %vm65_vm0, %v152_v63, 0.0 }
  0xa0   :  { %173 = vadd.xlane.f32.xlu1 %v172_v59  ;;  %176 = vadd.xlane.f32.xlu0 %v175_v2  ;;  %v92_v3 = vpop.xlane.xlu0 %91  ;;  %v95_v4 = vpop.xlane.xlu1 %94 }
  0xa1   :  { %v123_v6 = vmul.f32 0.0625, %v92_v3  ;;  %v124_v7 = vmul.f32 0.0625, %v95_v4  ;;  %v153_v8 = vmul.f32 %v6727_v0, %v6727_v0  ;;  %v154_v9 = vmul.f32 %v6730_v1, %v6730_v1 }
  0xa3   :  { %v6739_v10 = vsub.f32 %v6645_v16, %v123_v6  ;;  %v6742_v11 = vsub.f32 %v6650_v17, %v124_v7  ;;  %v181_v12 = vsel %vm65_vm0, %v153_v8, 0.0  ;;  %v184_v15 = vsel %vm65_vm0, %v154_v9, 0.0 }
  0xa4   :  { %179 = vadd.xlane.f32.xlu1 %v178_v5  ;;  %182 = vadd.xlane.f32.xlu0 %v181_v12  ;;  %v98_v13 = vpop.xlane.xlu0 %97  ;;  %v101_v14 = vpop.xlane.xlu1 %100 }
  0xa5   :  { %v125_v18 = vmul.f32 0.0625, %v98_v13  ;;  %v126_v19 = vmul.f32 0.0625, %v101_v14  ;;  %v155_v22 = vmul.f32 %v6739_v10, %v6739_v10  ;;  %v156_v16 = vmul.f32 %v6742_v11, %v6742_v11 }
  0xa7   :  { %v6751_v23 = vsub.f32 %v6659_v20, %v125_v18  ;;  %v6754_v17 = vsub.f32 %v6664_v21, %v126_v19  ;;  %v187_v26 = vsel %vm65_vm0, %v155_v22, 0.0  ;;  %v190_v31 = vsel %vm65_vm0, %v156_v16, 0.0  ;;  %v6797_v16 = vld [vmem:[%s8388_s1] ss:$0 sm:$0xff] }
  0xa8   :  { %185 = vadd.xlane.f32.xlu1 %v184_v15  ;;  %188 = vadd.xlane.f32.xlu0 %v187_v26  ;;  %v104_v27 = vpop.xlane.xlu0 %103  ;;  %v107_v30 = vpop.xlane.xlu1 %106 }
  0xa9   :  { %v127_v32 = vmul.f32 0.0625, %v104_v27  ;;  %v128_v33 = vmul.f32 0.0625, %v107_v30  ;;  %v157_v34 = vmul.f32 %v6751_v23, %v6751_v23  ;;  %v158_v20 = vmul.f32 %v6754_v17, %v6754_v17 }
  0xab   :  { %v6763_v35 = vsub.f32 %v6673_v24, %v127_v32  ;;  %v6766_v21 = vsub.f32 %v6678_v25, %v128_v33  ;;  %v193_v38 = vsel %vm65_vm0, %v157_v34, 0.0  ;;  %v196_v41 = vsel %vm65_vm0, %v158_v20, 0.0  ;;  %v6803_v33 = vld [vmem:[%s8389_s2] ss:$0 sm:$0xff] }
  0xac   :  { %191 = vadd.xlane.f32.xlu1 %v190_v31  ;;  %194 = vadd.xlane.f32.xlu0 %v193_v38  ;;  %v110_v39 = vpop.xlane.xlu0 %109  ;;  %v113_v40 = vpop.xlane.xlu1 %112 }
  0xad   :  { %v129_v42 = vmul.f32 0.0625, %v110_v39  ;;  %v130_v43 = vmul.f32 0.0625, %v113_v40  ;;  %v159_v46 = vmul.f32 %v6763_v35, %v6763_v35  ;;  %v160_v24 = vmul.f32 %v6766_v21, %v6766_v21 }
  0xaf   :  { %v6775_v47 = vsub.f32 %v6687_v28, %v129_v42  ;;  %v6778_v25 = vsub.f32 %v6692_v29, %v130_v43  ;;  %v199_v48 = vsel %vm65_vm0, %v159_v46, 0.0  ;;  %v202_v49 = vsel %vm65_vm0, %v160_v24, 0.0  ;;  %v319_v29 = vld [vmem:[%s8387_s3] sm:$0xff] }
  0xb0   :  { %197 = vadd.xlane.f32.xlu1 %v196_v41  ;;  %200 = vadd.xlane.f32.xlu0 %v199_v48  ;;  %v5895_v56 = vpack.c.bf16 %v320_v53, %v319_v29 }
  0xb1   :  { %v161_v50 = vmul.f32 %v6775_v47, %v6775_v47  ;;  %v162_v51 = vmul.f32 %v6778_v25, %v6778_v25 }
  0xb2   :  { %5896 = vmatprep.subr.bf16.mxu0 %v5895_v56 }
  0xb3   :  { %v205_v52 = vsel %vm65_vm0, %v161_v50, 0.0  ;;  %v208_v28 = vsel %vm65_vm0, %v162_v51, 0.0  ;;  %5898 = vmatpush3.bf16.msra.mxu0 %v5895_v56 }
  0xb4   :  { %203 = vadd.xlane.f32.xlu1 %v202_v49  ;;  %206 = vadd.xlane.f32.xlu0 %v205_v52 }
  0xb8   :  { %209 = vadd.xlane.f32.xlu1 %v208_v28 }
 0x125   :  { %v165_v57 = vpop.xlane.xlu0 %164 }
 0x126   :  { %v211_v58 = vmul.f32 0.0625, %v165_v57 }
 0x128   :  { %v227_v59 = vadd.f32 1e-05, %v211_v58 }
 0x129   :  { %v168_v60 = vpop.xlane.xlu1 %167  ;;  %v171_v61 = vpop.xlane.xlu0 %170 }
 0x12a   :  { %6251 = vrsqrt.f32 %v227_v59  ;;  %v212_v62 = vmul.f32 0.0625, %v168_v60  ;;  %v213_v63 = vmul.f32 0.0625, %v171_v61 }
 0x12c   :  { %v228_v2 = vadd.f32 1e-05, %v212_v62  ;;  %v229_v3 = vadd.f32 1e-05, %v213_v63 }
 0x12d   :  { %v174_v4 = vpop.xlane.xlu1 %173  ;;  %v177_v5 = vpop.xlane.xlu0 %176 }
 0x12e   :  { %6253 = vrsqrt.f32 %v228_v2  ;;  %v214_v6 = vmul.f32 0.0625, %v174_v4  ;;  %v215_v7 = vmul.f32 0.0625, %v177_v5 }
 0x12f   :  { %6255 = vrsqrt.f32 %v229_v3 }
 0x130   :  { %v230_v8 = vadd.f32 1e-05, %v214_v6  ;;  %v231_v9 = vadd.f32 1e-05, %v215_v7 }
 0x131   :  { %v180_v12 = vpop.xlane.xlu1 %179  ;;  %v183_v13 = vpop.xlane.xlu0 %182 }
 0x132   :  { %6257 = vrsqrt.f32 %v230_v8  ;;  %v216_v14 = vmul.f32 0.0625, %v180_v12  ;;  %v217_v15 = vmul.f32 0.0625, %v183_v13 }
 0x133   :  { %6259 = vrsqrt.f32 %v231_v9 }
 0x134   :  { %v6252_v18 = vpop.eup %6251  ;;  %v232_v19 = vadd.f32 1e-05, %v216_v14  ;;  %v233_v22 = vadd.f32 1e-05, %v217_v15 }
 0x135   :  { %v186_v26 = vpop.xlane.xlu1 %185  ;;  %v189_v27 = vpop.xlane.xlu0 %188  ;;  %v259_v30 = vmul.f32 %v6252_v18, %v6698_v36 }
 0x136   :  { %6261 = vrsqrt.f32 %v232_v19  ;;  %v218_v31 = vmul.f32 0.0625, %v186_v26  ;;  %v219_v32 = vmul.f32 0.0625, %v189_v27 }
 0x137   :  { %6263 = vrsqrt.f32 %v233_v22  ;;  %v281_v34 = vmul.f32 %v6797_v16, %v259_v30 }
 0x138   :  { %v6254_v20 = vpop.eup %6253  ;;  %v234_v38 = vadd.f32 1e-05, %v218_v31  ;;  %v235_v39 = vadd.f32 1e-05, %v219_v32 }
 0x139   :  { %v6256_v40 = vpop.eup %6255  ;;  %v192_v41 = vpop.xlane.xlu1 %191  ;;  %v303_v43 = vadd.f32 %v6803_v33, %v281_v34  ;;  %v260_v36 = vmul.f32 %v6254_v20, %v6706_v44 }
 0x13a   :  { %v195_v42 = vpop.xlane.xlu0 %194  ;;  %6265 = vrsqrt.f32 %v234_v38  ;;  %v220_v46 = vmul.f32 0.0625, %v192_v41  ;;  %v261_v48 = vmul.f32 %v6256_v40, %v6700_v37 }
 0x13b   :  { %v221_v24 = vmul.f32 0.0625, %v195_v42  ;;  %6267 = vrsqrt.f32 %v235_v39  ;;  %5551 = vmatprep.mubr.msk.f32.mxu0 %vm65_vm0, %v303_v43  ;;  %v282_v49 = vmul.f32 %v6797_v16, %v260_v36 }
 0x13c   :  { %v6258_v50 = vpop.eup %6257  ;;  %v236_v51 = vadd.f32 1e-05, %v220_v46  ;;  %v283_v28 = vmul.f32 %v6797_v16, %v261_v48 }
 0x13d   :  { %v237_v52 = vadd.f32 1e-05, %v221_v24  ;;  %v6260_v29 = vpop.eup %6259  ;;  %v198_v53 = vpop.xlane.xlu1 %197  ;;  %v304_v44 = vadd.f32 %v6803_v33, %v282_v49  ;;  %v262_v57 = vmul.f32 %v6258_v50, %v6708_v45 }
 0x13e   :  { %v201_v56 = vpop.xlane.xlu0 %200  ;;  %6269 = vrsqrt.f32 %v236_v51  ;;  %v222_v58 = vmul.f32 0.0625, %v198_v53  ;;  %v305_v59 = vadd.f32 %v6803_v33, %v283_v28  ;;  %v263_v61 = vmul.f32 %v6260_v29, %v6716_v54 }
 0x13f   :  { %v223_v37 = vmul.f32 0.0625, %v201_v56  ;;  %6271 = vrsqrt.f32 %v237_v52  ;;  %5552 = vmatmul.mubr.msk.f32.vlgmr.msra.gmra.mrb[0].mxu0 %vm65_vm0, %v304_v44  ;;  %v284_v60 = vmul.f32 %v6797_v16, %v262_v57 }
 0x140   :  { %v6262_v62 = vpop.eup %6261  ;;  %v238_v63 = vadd.f32 1e-05, %v222_v58  ;;  %5554 = vmatprep.mubr.msk.f32.mxu0 %vm65_vm0, %v305_v59  ;;  %v285_v6 = vmul.f32 %v6797_v16, %v263_v61  ;;  %v5175_v59 = vld [vmem:[%s8390_s4] ss:$0 sm:$0xff]  ;;  %s6524_s4 = smov 96  }
 0x141   :  { %v239_v2 = vadd.f32 1e-05, %v223_v37  ;;  %v6264_v3 = vpop.eup %6263  ;;  %v204_v4 = vpop.xlane.xlu1 %203  ;;  %v306_v5 = vadd.f32 %v6803_v33, %v284_v60  ;;  %v264_v7 = vmul.f32 %v6262_v62, %v6718_v55 }
 0x142   :  { %v207_v45 = vpop.xlane.xlu0 %206  ;;  %6273 = vrsqrt.f32 %v238_v63  ;;  %v224_v8 = vmul.f32 0.0625, %v204_v4  ;;  %v265_v12 = vmul.f32 %v6264_v3, %v6727_v0  ;;  %v307_v54 = vadd.f32 %v6803_v33, %v285_v6 }
 0x143   :  { %v225_v9 = vmul.f32 0.0625, %v207_v45  ;;  %6275 = vrsqrt.f32 %v239_v2  ;;  %5555 = vmatmul.mubr.msk.f32.gmra.mrb[2].mxu0 %vm65_vm0, %v306_v5  ;;  %v286_v13 = vmul.f32 %v6797_v16, %v264_v7 }
 0x144   :  { %v6266_v14 = vpop.eup %6265  ;;  %v240_v15 = vadd.f32 1e-05, %v224_v8  ;;  %v287_v19 = vmul.f32 %v6797_v16, %v265_v12  ;;  %5557 = vmatprep.mubr.msk.f32.mxu0 %vm65_vm0, %v307_v54 }
 0x145   :  { %v241_v18 = vadd.f32 1e-05, %v225_v9  ;;  %v6268_v22 = vpop.eup %6267  ;;  %v210_v55 = vpop.xlane.xlu1 %209  ;;  %v308_v26 = vadd.f32 %v6803_v33, %v286_v13  ;;  %v266_v0 = vmul.f32 %v6266_v14, %v6730_v1 }
 0x146   :  { %6277 = vrsqrt.f32 %v240_v15  ;;  %v226_v27 = vmul.f32 0.0625, %v210_v55  ;;  %v309_v30 = vadd.f32 %v6803_v33, %v287_v19  ;;  %v267_v31 = vmul.f32 %v6268_v22, %v6739_v10 }
 0x147   :  { %6279 = vrsqrt.f32 %v241_v18  ;;  %5558 = vmatmul.mubr.msk.f32.gmra.mrb[4].mxu0 %vm65_vm0, %v308_v26  ;;  %v288_v32 = vmul.f32 %v6797_v16, %v266_v0 }
 0x148   :  { %v6270_v34 = vpop.eup %6269  ;;  %v242_v20 = vadd.f32 1e-05, %v226_v27  ;;  %5560 = vmatprep.mubr.msk.f32.mxu0 %vm65_vm0, %v309_v30  ;;  %v289_v38 = vmul.f32 %v6797_v16, %v267_v31 }
 0x149   :  { %v6272_v39 = vpop.eup %6271  ;;  %v310_v1 = vadd.f32 %v6803_v33, %v288_v32  ;;  %v268_v40 = vmul.f32 %v6270_v34, %v6742_v11 }
 0x14a   :  { %6281 = vrsqrt.f32 %v242_v20  ;;  %v311_v41 = vadd.f32 %v6803_v33, %v289_v38  ;;  %v269_v10 = vmul.f32 %v6272_v39, %v6751_v23 }
 0x14b   :  { %5561 = vmatmul.mubr.msk.f32.gmra.mrb[6].mxu0 %vm65_vm0, %v310_v1  ;;  %v290_v42 = vmul.f32 %v6797_v16, %v268_v40 }
 0x14c   :  { %v6274_v43 = vpop.eup %6273  ;;  %5563 = vmatprep.mubr.msk.f32.mxu0 %vm65_vm0, %v311_v41  ;;  %v291_v36 = vmul.f32 %v6797_v16, %v269_v10 }
 0x14d   :  { %v6276_v46 = vpop.eup %6275  ;;  %v312_v24 = vadd.f32 %v6803_v33, %v290_v42  ;;  %v270_v48 = vmul.f32 %v6274_v43, %v6754_v17 }
 0x14e   :  { %v313_v11 = vadd.f32 %v6803_v33, %v291_v36  ;;  %v271_v49 = vmul.f32 %v6276_v46, %v6763_v35 }
 0x14f   :  { %5564 = vmatmul.mubr.msk.f32.gmra.mrb[8].mxu0 %vm65_vm0, %v312_v24  ;;  %v292_v23 = vmul.f32 %v6797_v16, %v270_v48 }
 0x150   :  { %v6278_v50 = vpop.eup %6277  ;;  %5566 = vmatprep.mubr.msk.f32.mxu0 %vm65_vm0, %v313_v11  ;;  %v293_v51 = vmul.f32 %v6797_v16, %v271_v49 }
 0x151   :  { %v6280_v52 = vpop.eup %6279  ;;  %v314_v28 = vadd.f32 %v6803_v33, %v292_v23  ;;  %v272_v29 = vmul.f32 %v6278_v50, %v6766_v21 }
 0x152   :  { %v315_v17 = vadd.f32 %v6803_v33, %v293_v51  ;;  %v273_v53 = vmul.f32 %v6280_v52, %v6775_v47 }
 0x153   :  { %5567 = vmatmul.mubr.msk.f32.gmra.mrb[10].mxu0 %vm65_vm0, %v314_v28  ;;  %v294_v35 = vmul.f32 %v6797_v16, %v272_v29 }
 0x154   :  { %v6282_v56 = vpop.eup %6281  ;;  %5569 = vmatprep.mubr.msk.f32.mxu0 %vm65_vm0, %v315_v17  ;;  %v295_v44 = vmul.f32 %v6797_v16, %v273_v53 }
 0x155   :  { %v316_v57 = vadd.f32 %v6803_v33, %v294_v35  ;;  %v274_v58 = vmul.f32 %v6282_v56, %v6778_v25 }
 0x156   :  { %v317_v37 = vadd.f32 %v6803_v33, %v295_v44 }
 0x157   :  { %5570 = vmatmul.mubr.msk.f32.gmra.mrb[12].mxu0 %vm65_vm0, %v316_v57  ;;  %v296_v21 = vmul.f32 %v6797_v16, %v274_v58 }
 0x158   :  { %5572 = vmatprep.mubr.msk.f32.mxu0 %vm65_vm0, %v317_v37 }
 0x159   :  { %v318_v47 = vadd.f32 %v6803_v33, %v296_v21 }
 0x15b   :  { %5573 = vmatmul.mubr.msk.f32.gmra.mrb[14].mxu0 %vm65_vm0, %v318_v47 }
 0x212   :  { %v5553_v60 = vpop.f32.mrb[0].mxu0 }
 0x213   :  { %v6871_v61 = vadd.f32 %v5553_v60, %v5175_v59  ;;  %v442_v25 = vpop.f32.mrb[1].mxu0 }
 0x214   :  { %v443_v62 = vadd.f32 %v5175_v59, %v442_v25 }
 0x215   :  { %v6976_v53 = vmul.f32 0.35355338, %v6871_v61 }
 0x216   :  { %v5556_v63 = vpop.f32.mrb[2].mxu0  ;;  %v6874_v2 = vpack.i.bf16 %v6871_v61, %v443_v62  ;;  %v6876_v16 = vmul.f32 0.35355338, %v443_v62 }
 0x217   :  { %v6878_v3 = vadd.f32 %v5556_v63, %v5175_v59  ;;  %v452_v33 = vpop.f32.mrb[3].mxu0 }
 0x218   :  { %v6880_v4 = vadd.f32 %v5175_v59, %v452_v33  ;;  %6092 = vrot.lane.b32.xlu0 %v6874_v2, %s6523_s20  ;;  %5579 = vmatprep.mubr.msk.f32.mxu1 %vm547_vm1, %v6876_v16 }
 0x219   :  { %v6990_v60 = vmul.f32 0.35355338, %v6878_v3 }
 0x21a   :  { %v5559_v45 = vpop.f32.mrb[4].mxu0  ;;  %v6888_v5 = vpack.i.bf16 %v6878_v3, %v6880_v4  ;;  %v6979_v35 = vmul.f32 0.35355338, %v6880_v4 }
 0x21b   :  { %v6890_v6 = vadd.f32 %v5559_v45, %v5175_v59  ;;  %v462_v7 = vpop.f32.mrb[5].mxu0 }
 0x21c   :  { %v6892_v8 = vadd.f32 %v5175_v59, %v462_v7  ;;  %6097 = vrot.lane.b32.xlu1 %v6888_v5, %s6523_s20 }
 0x21e   :  { %v5562_v9 = vpop.f32.mrb[6].mxu0  ;;  %v6898_v12 = vpack.i.bf16 %v6890_v6, %v6892_v8  ;;  %v6993_v61 = vmul.f32 0.35355338, %v6892_v8  ;;  %v7008_v8 = vmul.f32 0.35355338, %v6890_v6 }
 0x21f   :  { %v6900_v54 = vadd.f32 %v5562_v9, %v5175_v59  ;;  %v472_v13 = vpop.f32.mrb[7].mxu0 }
 0x220   :  { %v6902_v14 = vadd.f32 %v5175_v59, %v472_v13  ;;  %6102 = vrot.lane.b32.xlu1 %v6898_v12, %s6523_s20 }
 0x222   :  { %v5565_v15 = vpop.f32.mrb[8].mxu0  ;;  %v6908_v18 = vpack.i.bf16 %v6900_v54, %v6902_v14 }
 0x223   :  { %v6910_v19 = vadd.f32 %v5565_v15, %v5175_v59  ;;  %v482_v22 = vpop.f32.mrb[9].mxu0  ;;  %v7018_v15 = vmul.f32 0.35355338, %v6902_v14 }
 0x224   :  { %v483_v55 = vadd.f32 %v5175_v59, %v482_v22  ;;  %6107 = vrot.lane.b32.xlu1 %v6908_v18, %s6523_s20 }
 0x225   :  { %v7011_v9 = vmul.f32 0.35355338, %v6910_v19 }
 0x226   :  { %v5568_v26 = vpop.f32.mrb[10].mxu0  ;;  %v6915_v0 = vpack.i.bf16 %v6910_v19, %v483_v55  ;;  %v6917_v27 = vmul.f32 0.35355338, %v483_v55 }
 0x227   :  { %v6919_v30 = vadd.f32 %v5568_v26, %v5175_v59  ;;  %v492_v31 = vpop.f32.mrb[11].mxu0 }
 0x228   :  { %v6921_v32 = vadd.f32 %v5175_v59, %v492_v31  ;;  %6112 = vrot.lane.b32.xlu0 %v6915_v0, %s6523_s20  ;;  %5607 = vmatprep.mubr.msk.f32.mxu0 %vm547_vm1, %v6917_v27 }
 0x22a   :  { %v5571_v34 = vpop.f32.mrb[12].mxu0  ;;  %v6929_v20 = vpack.i.bf16 %v6919_v30, %v6921_v32 }
 0x22b   :  { %v6931_v38 = vadd.f32 %v5571_v34, %v5175_v59  ;;  %v502_v39 = vpop.f32.mrb[13].mxu0 }
 0x22c   :  { %v6933_v1 = vadd.f32 %v5175_v59, %v502_v39  ;;  %6117 = vrot.lane.b32.xlu1 %v6929_v20, %s6523_s20 }
 0x22e   :  { %v5574_v40 = vpop.f32.mrb[14].mxu0  ;;  %v6939_v41 = vpack.i.bf16 %v6931_v38, %v6933_v1  ;;  %v7025_v6 = vmul.f32 0.35355338, %v6933_v1 }
 0x22f   :  { %v6941_v10 = vadd.f32 %v5574_v40, %v5175_v59  ;;  %v512_v42 = vpop.f32.mrb[15].mxu0  ;;  %v7036_v40 = vmul.f32 0.35355338, %v6900_v54 }
 0x230   :  { %v6943_v43 = vadd.f32 %v5175_v59, %v512_v42  ;;  %6122 = vrot.lane.b32.xlu0 %v6939_v41, %s6523_s20 }
 0x232   :  { %v6949_v36 = vpack.i.bf16 %v6941_v10, %v6943_v43 }
 0x234   :  { %6137 = vrot.lane.b32.xlu0 %v6888_v5, %s6524_s4  ;;  %6127 = vrot.lane.b32.xlu1 %v6949_v36, %s6523_s20 }
 0x238   :  { %6162 = vrot.lane.b32.xlu0 %v6939_v41, %s6524_s4  ;;  %6132 = vrot.lane.b32.xlu1 %v6874_v2, %s6524_s4 }
 0x23c   :  { %6167 = vrot.lane.b32.xlu0 %v6874_v2, %s6525_s21  ;;  %6142 = vrot.lane.b32.xlu1 %v6898_v12, %s6524_s4 }
 0x240   :  { %6147 = vrot.lane.b32.xlu1 %v6908_v18, %s6524_s4 }
 0x244   :  { %6152 = vrot.lane.b32.xlu1 %v6915_v0, %s6524_s4 }
 0x248   :  { %6157 = vrot.lane.b32.xlu1 %v6929_v20, %s6524_s4 }
 0x24c   :  { %6172 = vrot.lane.b32.xlu1 %v6949_v36, %s6524_s4 }
 0x28a   :  { %v6093_v46 = vpop.permute.xlu0 %6092 }
 0x28b   :  { %v6095_v24 = vunpack.i.h.bf16 %v6093_v46  ;;  %v6094_v48 = vunpack.i.l.bf16 %v6093_v46 }
 0x28d   :  { %v5899_v49 = vpack.c.bf16 %v6095_v24, %v6094_v48  ;;  %v7039_v24 = vmul.f32 0.35355338, %v6931_v38  ;;  %v7044_v48 = vmul.f32 0.35355338, %v6921_v32 }
 0x28e   :  { %v6098_v23 = vpop.permute.xlu1 %6097 }
 0x28f   :  { %v6100_v50 = vunpack.i.h.bf16 %v6098_v23  ;;  %v6099_v51 = vunpack.i.l.bf16 %v6098_v23  ;;  %5901 = vmatprep.subr.msk.bf16.mxu1 %vm6965_vm2, %v5899_v49 }
 0x290   :  { %5904 = vmatpush3.bf16.xpose.msk.msra.mxu1 %vm6965_vm2, %v5899_v49 }
 0x291   :  { %v5905_v52 = vpack.c.bf16 %v6100_v50, %v6099_v51  ;;  %v7060_v50 = vmul.f32 0.35355338, %v6919_v30  ;;  %v7063_v51 = vmul.f32 0.35355338, %v6943_v43  ;;  %v7072_v30 = vmul.f32 0.35355338, %v6941_v10 }
 0x292   :  { %v6103_v28 = vpop.permute.xlu1 %6102 }
 0x293   :  { %v6105_v29 = vunpack.i.h.bf16 %v6103_v28  ;;  %v6104_v17 = vunpack.i.l.bf16 %v6103_v28  ;;  %5907 = vmatprep.subr.msk.bf16.mxu1 %vm6965_vm2, %v5905_v52 }
 0x295   :  { %v5911_v56 = vpack.c.bf16 %v6105_v29, %v6104_v17 }
 0x296   :  { %v6108_v44 = vpop.permute.xlu1 %6107 }
 0x297   :  { %5580 = vmatmul.mubr.msk.f32.vlgmr.msra.gmra.mrb[0].mxu1 %vm547_vm1, %v6976_v53  ;;  %v6110_v58 = vunpack.i.h.bf16 %v6108_v44  ;;  %v6109_v37 = vunpack.i.l.bf16 %v6108_v44  ;;  %v521_v44 = vld [vmem:[%s8391_s7] sm:$0xff] }
 0x298   :  { %5910 = vmatpush3.bf16.xpose.msk.msra.mxu1 %vm6965_vm2, %v5905_v52  ;;  %5586 = vmatprep.mubr.msk.f32.mxu1 %vm547_vm1, %v6979_v35 }
 0x299   :  { %5913 = vmatprep.subr.msk.bf16.mxu1 %vm6965_vm2, %v5911_v56  ;;  %v5917_v25 = vpack.c.bf16 %v6110_v58, %v6109_v37 }
 0x29a   :  { %v6113_v57 = vpop.permute.xlu0 %6112 }
 0x29b   :  { %v6115_v21 = vunpack.i.h.bf16 %v6113_v57  ;;  %v6114_v47 = vunpack.i.l.bf16 %v6113_v57 }
 0x29d   :  { %v5923_v59 = vpack.c.bf16 %v6115_v21, %v6114_v47 }
 0x29e   :  { %v6118_v62 = vpop.permute.xlu1 %6117 }
 0x29f   :  { %5587 = vmatmul.mubr.msk.f32.vlgmr.msra.gmra.mrb[2].mxu1 %vm547_vm1, %v6990_v60  ;;  %5925 = vmatprep.subr.msk.bf16.mxu0 %vm6965_vm2, %v5923_v59  ;;  %v6120_v4 = vunpack.i.h.bf16 %v6118_v62  ;;  %v6119_v45 = vunpack.i.l.bf16 %v6118_v62 }
 0x2a0   :  { %5916 = vmatpush3.bf16.xpose.msk.msra.mxu1 %vm6965_vm2, %v5911_v56  ;;  %5593 = vmatprep.mubr.msk.f32.mxu1 %vm547_vm1, %v6993_v61  ;;  %v522_v56 = vld [vmem:[%s8391_s7 + $0x8] sm:$0xff] }
 0x2a1   :  { %5928 = vmatpush3.bf16.xpose.msk.msra.mxu0 %vm6965_vm2, %v5923_v59  ;;  %5919 = vmatprep.subr.msk.bf16.mxu1 %vm6965_vm2, %v5917_v25  ;;  %v5929_v22 = vpack.c.bf16 %v6120_v4, %v6119_v45 }
 0x2a2   :  { %v6123_v63 = vpop.permute.xlu0 %6122 }
 0x2a3   :  { %v6125_v3 = vunpack.i.h.bf16 %v6123_v63  ;;  %v6124_v33 = vunpack.i.l.bf16 %v6123_v63 }
 0x2a5   :  { %v5935_v7 = vpack.c.bf16 %v6125_v3, %v6124_v33 }
 0x2a6   :  { %v6128_v13 = vpop.permute.xlu1 %6127  ;;  %v6138_v19 = vpop.permute.xlu0 %6137 }
 0x2a7   :  { %5594 = vmatmul.mubr.msk.f32.vlgmr.msra.gmra.mrb[4].mxu1 %vm547_vm1, %v7008_v8  ;;  %5937 = vmatprep.subr.msk.bf16.mxu0 %vm6965_vm2, %v5935_v7  ;;  %v6130_v31 = vunpack.i.h.bf16 %v6128_v13  ;;  %v6129_v34 = vunpack.i.l.bf16 %v6128_v13  ;;  %v6140_v39 = vunpack.i.h.bf16 %v6138_v19  ;;  %v6139_v1 = vunpack.i.l.bf16 %v6138_v19 }
 0x2a8   :  { %5608 = vmatmul.mubr.msk.f32.vlgmr.msra.gmra.mrb[16].mxu0 %vm547_vm1, %v7011_v9  ;;  %5922 = vmatpush3.bf16.xpose.msk.msra.mxu1 %vm6965_vm2, %v5917_v25 }
 0x2a9   :  { %5600 = vmatprep.mubr.msk.f32.mxu1 %vm547_vm1, %v7018_v15  ;;  %5940 = vmatpush3.bf16.xpose.msk.msra.mxu0 %vm6965_vm2, %v5935_v7  ;;  %v5941_v49 = vpack.c.bf16 %v6130_v31, %v6129_v34  ;;  %v7050_v54 = vpack.c.bf16 %v6140_v39, %v6139_v1 }
 0x2aa   :  { %5621 = vmatprep.mubr.msk.f32.mxu0 %vm547_vm1, %v7025_v6  ;;  %5931 = vmatprep.subr.msk.bf16.mxu1 %vm6965_vm2, %v5929_v22  ;;  %v6133_v14 = vpop.permute.xlu1 %6132 }
 0x2ab   :  { %v6135_v55 = vunpack.i.h.bf16 %v6133_v14  ;;  %v6134_v26 = vunpack.i.l.bf16 %v6133_v14 }
 0x2ad   :  { %v5947_v42 = vpack.c.bf16 %v6135_v55, %v6134_v26 }
 0x2ae   :  { %v6143_v46 = vpop.permute.xlu1 %6142 }
 0x2af   :  { %5601 = vmatmul.mubr.msk.f32.vlgmr.msra.gmra.mrb[6].mxu1 %vm547_vm1, %v7036_v40  ;;  %5948 = vmatprep.subr.bf16.mxu0 %v5947_v42  ;;  %v6145_v38 = vunpack.i.h.bf16 %v6143_v46  ;;  %v6144_v23 = vunpack.i.l.bf16 %v6143_v46 }
 0x2b0   :  { %5622 = vmatmul.mubr.msk.f32.vlgmr.msra.gmra.mrb[18].mxu0 %vm547_vm1, %v7039_v24  ;;  %5934 = vmatpush3.bf16.xpose.msk.msra.mxu1 %vm6965_vm2, %v5929_v22 }
 0x2b1   :  { %5614 = vmatprep.mubr.msk.f32.mxu1 %vm547_vm1, %v7044_v48  ;;  %5950 = vmatpush3.bf16.msra.mxu0 %v5947_v42  ;;  %v5955_v52 = vpack.c.bf16 %v6145_v38, %v6144_v23 }
 0x2b2   :  { %5943 = vmatprep.subr.msk.bf16.mxu1 %vm6965_vm2, %v5941_v49  ;;  %5952 = vmatprep.subr.bf16.mxu0 %v7050_v54  ;;  %v7057_v32 = vpop.permute.xlu1 %6147 }
 0x2b6   :  { %v6153_v28 = vpop.permute.xlu1 %6152 }
 0x2b7   :  { %5615 = vmatmul.mubr.msk.f32.vlgmr.msra.gmra.mrb[8].mxu1 %vm547_vm1, %v7060_v50  ;;  %v6155_v29 = vunpack.i.h.bf16 %v6153_v28  ;;  %v6154_v17 = vunpack.i.l.bf16 %v6153_v28 }
 0x2b8   :  { %5946 = vmatpush3.bf16.xpose.msk.msra.mxu1 %vm6965_vm2, %v5941_v49  ;;  %5628 = vmatprep.mubr.msk.f32.mxu1 %vm547_vm1, %v7063_v51 }
 0x2b9   :  { %5956 = vmatprep.subr.bf16.mxu1 %v5955_v52  ;;  %v7076_v43 = vpack.c.bf16 %v6155_v29, %v6154_v17 }
 0x2bf   :  { %5629 = vmatmul.mubr.msk.f32.vlgmr.msra.gmra.mrb[10].mxu1 %vm547_vm1, %v7072_v30 }
 0x2c0   :  { %5958 = vmatpush3.bf16.msra.mxu1 %v5955_v52 }
 0x2c1   :  { %5964 = vmatprep.subr.bf16.mxu1 %v7076_v43 }
 0x36a   :  { %v5581_v57 = vpop.f32.mrb[0].mxu1 }
 0x36b   :  { %v7085_v58 = vadd.f32 %v5581_v57, %v522_v56  ;;  %v624_v10 = vpop.f32.mrb[1].mxu1 }
 0x36c   :  { %v7087_v37 = vadd.f32 %v624_v10, %v521_v44 }
 0x36d   :  { %v1273_v21 = vsel %vm65_vm0, %v7085_v58, -inf }
 0x36e   :  { %1274 = vmax.xlane.f32.xlu1 %v1273_v21  ;;  %v1270_v47 = vsel %vm65_vm0, %v7087_v37, -inf }
 0x36f   :  { %1271 = vmax.xlane.f32.xlu0 %v1270_v47 }
 0x372   :  { %v5588_v59 = vpop.f32.mrb[2].mxu1 }
 0x373   :  { %v7093_v25 = vadd.f32 %v5588_v59, %v522_v56  ;;  %v715_v62 = vpop.f32.mrb[3].mxu1 }
 0x374   :  { %v7095_v63 = vadd.f32 %v715_v62, %v521_v44 }
 0x375   :  { %v1279_v3 = vsel %vm65_vm0, %v7093_v25, -inf }
 0x376   :  { %1280 = vmax.xlane.f32.xlu0 %v1279_v3  ;;  %v1276_v33 = vsel %vm65_vm0, %v7095_v63, -inf }
 0x37a   :  { %v5595_v4 = vpop.f32.mrb[4].mxu1  ;;  %1277 = vmax.xlane.f32.xlu0 %v1276_v33 }
 0x37b   :  { %v7101_v45 = vadd.f32 %v5595_v4, %v522_v56  ;;  %v5609_v7 = vpop.f32.mrb[16].mxu0  ;;  %v806_v13 = vpop.f32.mrb[5].mxu1 }
 0x37c   :  { %v7103_v22 = vadd.f32 %v806_v13, %v521_v44  ;;  %v988_v19 = vpop.f32.mrb[17].mxu0  ;;  %v7105_v14 = vadd.f32 %v5609_v7, %v522_v56 }
 0x37d   :  { %v1285_v55 = vsel %vm65_vm0, %v7101_v45, -inf  ;;  %v7111_v31 = vadd.f32 %v988_v19, %v521_v44 }
 0x37e   :  { %1286 = vmax.xlane.f32.xlu1 %v1285_v55  ;;  %v1282_v26 = vsel %vm65_vm0, %v7103_v22, -inf  ;;  %v1297_v34 = vsel %vm65_vm0, %v7105_v14, -inf }
 0x37f   :  { %1283 = vmax.xlane.f32.xlu0 %v1282_v26  ;;  %v1294_v52 = vsel %vm65_vm0, %v7111_v31, -inf }
 0x382   :  { %1298 = vmax.xlane.f32.xlu1 %v1297_v34  ;;  %v5602_v39 = vpop.f32.mrb[6].mxu1 }
 0x383   :  { %v5623_v1 = vpop.f32.mrb[18].mxu0  ;;  %v7115_v42 = vadd.f32 %v5602_v39, %v522_v56  ;;  %v897_v46 = vpop.f32.mrb[7].mxu1 }
 0x384   :  { %v1170_v49 = vpop.f32.mrb[19].mxu0  ;;  %v7117_v38 = vadd.f32 %v5623_v1, %v522_v56  ;;  %v7119_v23 = vadd.f32 %v897_v46, %v521_v44 }
 0x385   :  { %v1291_v28 = vsel %vm65_vm0, %v7115_v42, -inf  ;;  %v7125_v29 = vadd.f32 %v1170_v49, %v521_v44 }
 0x386   :  { %1295 = vmax.xlane.f32.xlu1 %v1294_v52  ;;  %1292 = vmax.xlane.f32.xlu0 %v1291_v28  ;;  %v1309_v17 = vsel %vm65_vm0, %v7117_v38, -inf  ;;  %v1288_v57 = vsel %vm65_vm0, %v7119_v23, -inf }
 0x387   :  { %v1306_v3 = vsel %vm65_vm0, %v7125_v29, -inf }
 0x38a   :  { %1310 = vmax.xlane.f32.xlu1 %v1309_v17  ;;  %v5616_v10 = vpop.f32.mrb[8].mxu1  ;;  %1289 = vmax.xlane.f32.xlu0 %v1288_v57 }
 0x38b   :  { %v7131_v21 = vadd.f32 %v5616_v10, %v522_v56  ;;  %v1079_v47 = vpop.f32.mrb[9].mxu1 }
 0x38c   :  { %v7133_v59 = vadd.f32 %v1079_v47, %v521_v44 }
 0x38d   :  { %v1303_v62 = vsel %vm65_vm0, %v7131_v21, -inf }
 0x38e   :  { %1304 = vmax.xlane.f32.xlu1 %v1303_v62  ;;  %1307 = vmax.xlane.f32.xlu0 %v1306_v3  ;;  %v1300_v33 = vsel %vm65_vm0, %v7133_v59, -inf }
 0x392   :  { %v5630_v4 = vpop.f32.mrb[10].mxu1  ;;  %1301 = vmax.xlane.f32.xlu0 %v1300_v33 }
 0x393   :  { %v7141_v7 = vadd.f32 %v5630_v4, %v522_v56  ;;  %v1261_v13 = vpop.f32.mrb[11].mxu1  ;;  %v7161_v56 = vpop.permute.xlu1 %6157 }
 0x394   :  { %v7143_v19 = vadd.f32 %v1261_v13, %v521_v44  ;;  %v7163_v44 = vpop.permute.xlu0 %6162 }
 0x395   :  { %v1315_v55 = vsel %vm65_vm0, %v7141_v7, -inf }
 0x396   :  { %v1312_v26 = vsel %vm65_vm0, %v7143_v19, -inf }
 0x397   :  { %v7165_v34 = vpop.permute.xlu1 %6172 }
 0x398   :  { %v7167_v39 = vpop.permute.xlu0 %6167 }
 0x39f   :  { %6177 = vrot.lane.b32.xlu1 %v6888_v5, %s6525_s21 }
 0x3a8   :  { %6182 = vrot.lane.b32.xlu0 %v6898_v12, %s6525_s21 }
 0x3c3   :  { %1316 = vmax.xlane.f32.xlu1 %v1315_v55 }
 0x3c7   :  { %1313 = vmax.xlane.f32.xlu0 %v1312_v26 }
 0x3d4   :  { %2142 = vrot.lane.b32.xlu1 %v6876_v16, %s6526_s26 }
 0x3d8   :  { %6187 = vrot.lane.b32.xlu1 %v6908_v18, %s6525_s21 }
 0x3dd   :  { %2144 = vrot.lane.b32.xlu0 %v6976_v53, %s6526_s26 }
 0x3e1   :  { %2233 = vrot.lane.b32.xlu0 %v6979_v35, %s6526_s26 }
 0x3fb   :  { %v1275_v1 = vpop.xlane.xlu1 %1274 }
 0x3fc   :  { %v1319_v16 = vsub.f32 %v7085_v58, %v1275_v1  ;;  %v1272_v46 = vpop.xlane.xlu0 %1271 }
 0x3fd   :  { %v1318_v49 = vsub.f32 %v7087_v37, %v1272_v46 }
 0x3fe   :  { %v1336_v52 = vmul.f32 1.442695, %v1319_v16 }
 0x3ff   :  { %v1334_v28 = vmul.f32 1.442695, %v1318_v49 }
 0x400   :  { %6283 = vpow2.f32 %v1336_v52 }
 0x401   :  { %6285 = vpow2.f32 %v1334_v28 }
 0x403   :  { %v1281_v53 = vpop.xlane.xlu0 %1280 }
 0x404   :  { %v1321_v35 = vsub.f32 %v7093_v25, %v1281_v53 }
 0x406   :  { %v1340_v17 = vmul.f32 1.442695, %v1321_v35 }
 0x407   :  { %v1278_v57 = vpop.xlane.xlu0 %1277 }
 0x408   :  { %6287 = vpow2.f32 %v1340_v17  ;;  %v1320_v10 = vsub.f32 %v7095_v63, %v1278_v57 }
 0x40a   :  { %v7173_v47 = vpop.eup %6283  ;;  %v1338_v62 = vmul.f32 1.442695, %v1320_v10 }
 0x40b   :  { %v7175_v3 = vpop.eup %6285  ;;  %v1287_v58 = vpop.xlane.xlu1 %1286  ;;  %v1369_v37 = vsel %vm65_vm0, %v7173_v47, 0.0 }
 0x40c   :  { %6289 = vpow2.f32 %v1338_v62  ;;  %v1323_v33 = vsub.f32 %v7101_v45, %v1287_v58  ;;  %1370 = vadd.xlane.f32.xlu1 %v1369_v37  ;;  %v1284_v4 = vpop.xlane.xlu0 %1283  ;;  %v1366_v25 = vsel %vm65_vm0, %v7175_v3, 0.0 }
 0x40d   :  { %1367 = vadd.xlane.f32.xlu0 %v1366_v25  ;;  %v1322_v63 = vsub.f32 %v7103_v22, %v1284_v4 }
 0x40e   :  { %v1344_v13 = vmul.f32 1.442695, %v1323_v33 }
 0x40f   :  { %v1299_v55 = vpop.xlane.xlu1 %1298  ;;  %v1342_v16 = vmul.f32 1.442695, %v1322_v63 }
 0x410   :  { %6291 = vpow2.f32 %v1344_v13  ;;  %v1327_v26 = vsub.f32 %v7105_v14, %v1299_v55 }
 0x412   :  { %v7184_v1 = vpop.eup %6287  ;;  %v1352_v46 = vmul.f32 1.442695, %v1327_v26 }
 0x413   :  { %v1296_v49 = vpop.xlane.xlu1 %1295  ;;  %v1293_v52 = vpop.xlane.xlu0 %1292  ;;  %v1375_v45 = vsel %vm65_vm0, %v7184_v1, 0.0 }
 0x414   :  { %6293 = vpow2.f32 %v1352_v46  ;;  %v1326_v28 = vsub.f32 %v7111_v31, %v1296_v49  ;;  %v1325_v53 = vsub.f32 %v7115_v42, %v1293_v52  ;;  %1376 = vadd.xlane.f32.xlu0 %v1375_v45 }
 0x415   :  { %6295 = vpow2.f32 %v1342_v16 }
 0x416   :  { %v7190_v22 = vpop.eup %6289  ;;  %v1350_v35 = vmul.f32 1.442695, %v1326_v28  ;;  %v1348_v14 = vmul.f32 1.442695, %v1325_v53 }
 0x417   :  { %v1311_v17 = vpop.xlane.xlu1 %1310  ;;  %v1290_v57 = vpop.xlane.xlu0 %1289  ;;  %v1372_v10 = vsel %vm65_vm0, %v7190_v22, 0.0 }
 0x418   :  { %v1331_v62 = vsub.f32 %v7117_v38, %v1311_v17  ;;  %v1324_v58 = vsub.f32 %v7119_v23, %v1290_v57  ;;  %1373 = vadd.xlane.f32.xlu0 %v1372_v10  ;;  %6297 = vpow2.f32 %v1348_v14 }
 0x419   :  { %6299 = vpow2.f32 %v1350_v35 }
 0x41a   :  { %v7196_v31 = vpop.eup %6291  ;;  %v1360_v42 = vmul.f32 1.442695, %v1331_v62  ;;  %v1346_v37 = vmul.f32 1.442695, %v1324_v58 }
 0x41b   :  { %v1305_v33 = vpop.xlane.xlu1 %1304  ;;  %v1308_v4 = vpop.xlane.xlu0 %1307  ;;  %v1381_v25 = vsel %vm65_vm0, %v7196_v31, 0.0 }
 0x41c   :  { %v1329_v13 = vsub.f32 %v7131_v21, %v1305_v33  ;;  %v1330_v63 = vsub.f32 %v7125_v29, %v1308_v4  ;;  %1382 = vadd.xlane.f32.xlu1 %v1381_v25  ;;  %6301 = vpow2.f32 %v1346_v37 }
 0x41d   :  { %6303 = vpow2.f32 %v1360_v42 }
 0x41e   :  { %v7202_v38 = vpop.eup %6293  ;;  %v1356_v23 = vmul.f32 1.442695, %v1329_v13  ;;  %v1358_v55 = vmul.f32 1.442695, %v1330_v63 }
 0x41f   :  { %v1302_v26 = vpop.xlane.xlu0 %1301  ;;  %v1393_v16 = vsel %vm65_vm0, %v7202_v38, 0.0  ;;  %v7206_v46 = vpop.eup %6295 }
 0x420   :  { %v1328_v49 = vsub.f32 %v7133_v59, %v1302_v26  ;;  %1394 = vadd.xlane.f32.xlu1 %v1393_v16  ;;  %6305 = vpow2.f32 %v1358_v55  ;;  %v1378_v52 = vsel %vm65_vm0, %v7206_v46, 0.0  ;;  %v7245_v33 = vpop.permute.xlu1 %6177  ;;  %v6150_v26 = vunpack.i.h.bf16 %v7057_v32 }
 0x421   :  { %6307 = vpow2.f32 %v1356_v23 }
 0x422   :  { %v1354_v21 = vmul.f32 1.442695, %v1328_v49  ;;  %v7209_v29 = vpop.eup %6297 }
 0x423   :  { %v7213_v45 = vpop.eup %6299  ;;  %v1387_v28 = vsel %vm65_vm0, %v7209_v29, 0.0  ;;  %v7249_v4 = vpop.permute.xlu0 %6182 }
 0x424   :  { %6309 = vpow2.f32 %v1354_v21  ;;  %1379 = vadd.xlane.f32.xlu1 %v1378_v52  ;;  %1388 = vadd.xlane.f32.xlu0 %v1387_v28  ;;  %v1390_v59 = vsel %vm65_vm0, %v7213_v45, 0.0 }
 0x426   :  { %v7217_v53 = vpop.eup %6301 }
 0x427   :  { %v7221_v35 = vpop.eup %6303  ;;  %v1384_v14 = vsel %vm65_vm0, %v7217_v53, 0.0 }
 0x428   :  { %1391 = vadd.xlane.f32.xlu1 %v1390_v59  ;;  %1385 = vadd.xlane.f32.xlu0 %v1384_v14  ;;  %v1405_v57 = vsel %vm65_vm0, %v7221_v35, 0.0  ;;  %v6159_v14 = vunpack.i.l.bf16 %v7161_v56 }
 0x42a   :  { %v7225_v17 = vpop.eup %6305 }
 0x42b   :  { %v7229_v10 = vpop.eup %6307  ;;  %v1402_v62 = vsel %vm65_vm0, %v7225_v17, 0.0 }
 0x42c   :  { %1406 = vadd.xlane.f32.xlu1 %v1405_v57  ;;  %1403 = vadd.xlane.f32.xlu0 %v1402_v62  ;;  %v1399_v42 = vsel %vm65_vm0, %v7229_v10, 0.0 }
 0x42e   :  { %v7233_v58 = vpop.eup %6309 }
 0x42f   :  { %v1396_v37 = vsel %vm65_vm0, %v7233_v58, 0.0 }
 0x430   :  { %1400 = vadd.xlane.f32.xlu1 %v1399_v42  ;;  %1397 = vadd.xlane.f32.xlu0 %v1396_v37 }
 0x441   :  { %2235 = vrot.lane.b32.xlu1 %v6990_v60, %s6526_s26 }
 0x445   :  { %2324 = vrot.lane.b32.xlu1 %v6993_v61, %s6526_s26 }
 0x449   :  { %6197 = vrot.lane.b32.xlu1 %v6929_v20, %s6525_s21 }
 0x44d   :  { %2417 = vrot.lane.b32.xlu1 %v7036_v40, %s6526_s26 }
 0x450   :  { %v1317_v25 = vpop.xlane.xlu1 %1316 }
 0x451   :  { %v1333_v13 = vsub.f32 %v7141_v7, %v1317_v25  ;;  %2506 = vrot.lane.b32.xlu1 %v6917_v27, %s6526_s26 }
 0x453   :  { %v1364_v60 = vmul.f32 1.442695, %v1333_v13 }
 0x454   :  { %v1314_v63 = vpop.xlane.xlu0 %1313 }
 0x455   :  { %6311 = vpow2.f32 %v1364_v60  ;;  %v1332_v61 = vsub.f32 %v7143_v19, %v1314_v63  ;;  %6207 = vrot.lane.b32.xlu1 %v6949_v36, %s6525_s21  ;;  %v6164_v60 = vunpack.i.l.bf16 %v7163_v44 }
 0x457   :  { %v1362_v23 = vmul.f32 1.442695, %v1332_v61 }
 0x459   :  { %6313 = vpow2.f32 %v1362_v23  ;;  %2599 = vrot.lane.b32.xlu1 %v7060_v50, %s6526_s26 }
 0x45d   :  { %2690 = vrot.lane.b32.xlu1 %v7039_v24, %s6526_s26  ;;  %v7283_v24 = vpop.permute.xlu1 %2142 }
 0x45f   :  { %v7261_v40 = vpop.eup %6311 }
 0x460   :  { %v1411_v27 = vsel %vm65_vm0, %v7261_v40, 0.0 }
 0x461   :  { %2781 = vrot.lane.b32.xlu1 %v7072_v30, %s6526_s26  ;;  %1412 = vadd.xlane.f32.xlu0 %v1411_v27 }
 0x463   :  { %v7267_v7 = vpop.eup %6313 }
 0x464   :  { %v1408_v19 = vsel %vm65_vm0, %v7267_v7, 0.0 }
 0x465   :  { %6217 = vrot.lane.b32.xlu1 %v6888_v5, %s6527_s27  ;;  %1409 = vadd.xlane.f32.xlu0 %v1408_v19  ;;  %v7287_v5 = vpop.permute.xlu0 %2144 }
 0x469   :  { %v7293_v50 = vpop.permute.xlu0 %2233 }
 0x47b   :  { %6192 = vrot.lane.b32.xlu0 %v6915_v0, %s6525_s21 }
 0x47f   :  { %2326 = vrot.lane.b32.xlu0 %v7008_v8, %s6526_s26  ;;  %v7291_v8 = vpop.permute.xlu1 %6187 }
 0x483   :  { %2415 = vrot.lane.b32.xlu0 %v7018_v15, %s6526_s26 }
 0x487   :  { %6202 = vrot.lane.b32.xlu0 %v6939_v41, %s6525_s21 }
 0x48b   :  { %2508 = vrot.lane.b32.xlu0 %v7011_v9, %s6526_s26 }
 0x48f   :  { %2597 = vrot.lane.b32.xlu0 %v7044_v48, %s6526_s26 }
 0x493   :  { %2688 = vrot.lane.b32.xlu0 %v7025_v6, %s6526_s26  ;;  %v6149_v6 = vunpack.i.l.bf16 %v7057_v32  ;;  %v6160_v32 = vunpack.i.h.bf16 %v7161_v56 }
 0x497   :  { %2779 = vrot.lane.b32.xlu0 %v7063_v51, %s6526_s26 }
 0x499   :  { %v1371_v15 = vpop.xlane.xlu1 %1370 }
 0x49a   :  { %6315 = vrcp.f32 %v1371_v15  ;;  %v1368_v9 = vpop.xlane.xlu0 %1367 }
 0x49b   :  { %6317 = vrcp.f32 %v1368_v9  ;;  %6212 = vrot.lane.b32.xlu0 %v6874_v2, %s6527_s27  ;;  %v5959_v2 = vpack.c.bf16 %v6150_v26, %v6149_v6  ;;  %v6174_v26 = vunpack.i.l.bf16 %v7165_v34 }
 0x4a1   :  { %v1377_v48 = vpop.xlane.xlu0 %1376 }
 0x4a2   :  { %6319 = vrcp.f32 %v1377_v48  ;;  %v6170_v48 = vunpack.i.h.bf16 %v7167_v39 }
 0x4a4   :  { %v6316_v30 = vpop.eup %6315 }
 0x4a5   :  { %v6318_v55 = vpop.eup %6317  ;;  %v1374_v16 = vpop.xlane.xlu0 %1373  ;;  %v1417_v51 = vmul.f32 %v6316_v30, %v7173_v47  ;;  %v6169_v30 = vunpack.i.l.bf16 %v7167_v39 }
 0x4a6   :  { %6321 = vrcp.f32 %v1374_v16  ;;  %v1415_v49 = vmul.f32 %v6318_v55, %v7175_v3 }
 0x4a8   :  { %5635 = vmatprep.mubr.msk.f32.mxu0 %vm65_vm0, %v1415_v49 }
 0x4a9   :  { %v1383_v21 = vpop.xlane.xlu1 %1382  ;;  %5636 = vmatmul.mubr.msk.f32.vlgmr.msra.gmra.mrb[20].mxu0 %vm65_vm0, %v1417_v51  ;;  %v5979_v51 = vpack.c.bf16 %v6170_v48, %v6169_v30 }
 0x4aa   :  { %5954 = vmatpush3.bf16.msra.mxu0 %v7050_v54  ;;  %6323 = vrcp.f32 %v1383_v21  ;;  %v5967_v54 = vpack.c.bf16 %v6160_v32, %v6159_v14 }
 0x4ab   :  { %5960 = vmatprep.subr.bf16.mxu0 %v5959_v2 }
 0x4ac   :  { %v6320_v28 = vpop.eup %6319 }
 0x4ad   :  { %v1395_v52 = vpop.xlane.xlu1 %1394  ;;  %v1421_v62 = vmul.f32 %v6320_v28, %v7184_v1  ;;  %v6165_v1 = vunpack.i.h.bf16 %v7163_v44  ;;  %v6184_v28 = vunpack.i.l.bf16 %v7249_v4 }
 0x4af   :  { %v5971_v44 = vpack.c.bf16 %v6165_v1, %v6164_v60 }
 0x4b0   :  { %v6322_v59 = vpop.eup %6321 }
 0x4b1   :  { %v1380_v3 = vpop.xlane.xlu1 %1379  ;;  %v1419_v47 = vmul.f32 %v6322_v59, %v7190_v22  ;;  %v1389_v57 = vpop.xlane.xlu0 %1388 }
 0x4b2   :  { %6325 = vrcp.f32 %v1380_v3 }
 0x4b3   :  { %5642 = vmatprep.mubr.msk.f32.mxu0 %vm65_vm0, %v1419_v47  ;;  %6327 = vrcp.f32 %v1395_v52  ;;  %v6185_v52 = vunpack.i.h.bf16 %v7249_v4 }
 0x4b4   :  { %5643 = vmatmul.mubr.msk.f32.vlgmr.msra.gmra.mrb[22].mxu0 %vm65_vm0, %v1421_v62  ;;  %6329 = vrcp.f32 %v1389_v57  ;;  %v6324_v25 = vpop.eup %6323 }
 0x4b5   :  { %5962 = vmatpush3.bf16.msra.mxu0 %v5959_v2  ;;  %v1392_v42 = vpop.xlane.xlu1 %1391  ;;  %v1386_v56 = vpop.xlane.xlu0 %1385  ;;  %v1425_v19 = vmul.f32 %v6324_v25, %v7196_v31  ;;  %v6179_v2 = vunpack.i.l.bf16 %v7245_v33  ;;  %v5991_v32 = vpack.c.bf16 %v6185_v52, %v6184_v28  ;;  %v6189_v25 = vunpack.i.l.bf16 %v7291_v8 }
 0x4b6   :  { %6331 = vrcp.f32 %v1392_v42  ;;  %5968 = vmatprep.subr.bf16.mxu0 %v5967_v54 }
 0x4b7   :  { %6333 = vrcp.f32 %v1386_v56 }
 0x4b9   :  { %v1407_v37 = vpop.xlane.xlu1 %1406  ;;  %v1404_v22 = vpop.xlane.xlu0 %1403 }
 0x4ba   :  { %6335 = vrcp.f32 %v1407_v37 }
 0x4bb   :  { %6337 = vrcp.f32 %v1404_v22  ;;  %v6190_v22 = vunpack.i.h.bf16 %v7291_v8 }
 0x4bc   :  { %v6326_v13 = vpop.eup %6325 }
 0x4bd   :  { %v1401_v63 = vpop.xlane.xlu1 %1400  ;;  %v1423_v61 = vmul.f32 %v6326_v13, %v7206_v46  ;;  %v6328_v23 = vpop.eup %6327  ;;  %v6175_v46 = vunpack.i.h.bf16 %v7165_v34 }
 0x4be   :  { %6339 = vrcp.f32 %v1401_v63  ;;  %v1398_v27 = vpop.xlane.xlu0 %1397  ;;  %v6330_v15 = vpop.eup %6329  ;;  %v1433_v16 = vmul.f32 %v6328_v23, %v7202_v38 }
 0x4bf   :  { %6341 = vrcp.f32 %v1398_v27  ;;  %5649 = vmatprep.mubr.msk.f32.mxu1 %vm65_vm0, %v1423_v61  ;;  %v1429_v39 = vmul.f32 %v6330_v15, %v7209_v29  ;;  %v5997_v61 = vpack.c.bf16 %v6190_v22, %v6189_v25 }
 0x4c0   :  { %v6332_v9 = vpop.eup %6331  ;;  %5650 = vmatmul.mubr.msk.f32.vlgmr.msra.gmra.mrb[12].mxu1 %vm65_vm0, %v1425_v19 }
 0x4c1   :  { %v6334_v55 = vpop.eup %6333  ;;  %5966 = vmatpush3.bf16.msra.mxu1 %v7076_v43  ;;  %v1431_v31 = vmul.f32 %v6332_v9, %v7213_v45  ;;  %v5975_v43 = vpack.c.bf16 %v6175_v46, %v6174_v26 }
 0x4c2   :  { %5972 = vmatprep.subr.bf16.mxu1 %v5971_v44  ;;  %v1427_v6 = vmul.f32 %v6334_v55, %v7217_v53  ;;  %v6180_v53 = vunpack.i.h.bf16 %v7245_v33  ;;  %v2236_v33 = vpop.permute.xlu1 %2235 }
 0x4c3   :  { %5663 = vmatprep.mubr.msk.f32.mxu1 %vm65_vm0, %v1431_v31 }
 0x4c4   :  { %v6336_v49 = vpop.eup %6335  ;;  %5656 = vmatprep.mubr.msk.f32.mxu0 %vm65_vm0, %v1427_v6  ;;  %5664 = vmatmul.mubr.msk.f32.vlgmr.msra.gmra.mrb[14].mxu1 %vm65_vm0, %v1433_v16  ;;  %v5985_v59 = vpack.c.bf16 %v6180_v53, %v6179_v2 }
 0x4c5   :  { %v6338_v34 = vpop.eup %6337  ;;  %5657 = vmatmul.mubr.msk.f32.vlgmr.msra.gmra.mrb[24].mxu0 %vm65_vm0, %v1429_v39  ;;  %5974 = vmatpush3.bf16.msra.mxu1 %v5971_v44  ;;  %v1441_v45 = vmul.f32 %v6336_v49, %v7221_v35 }
 0x4c6   :  { %5970 = vmatpush3.bf16.msra.mxu0 %v5967_v54  ;;  %5981 = vmatprep.subr.msk.bf16.mxu1 %vm6965_vm2, %v5979_v51  ;;  %v1439_v38 = vmul.f32 %v6338_v34, %v7225_v17 }
 0x4c7   :  { %5976 = vmatprep.subr.bf16.mxu0 %v5975_v43 }
 0x4c8   :  { %v6340_v29 = vpop.eup %6339  ;;  %5677 = vmatprep.mubr.msk.f32.mxu1 %vm65_vm0, %v1439_v38 }
 0x4c9   :  { %v6342_v21 = vpop.eup %6341  ;;  %5678 = vmatmul.mubr.msk.f32.vlgmr.msra.gmra.mrb[16].mxu1 %vm65_vm0, %v1441_v45  ;;  %v1437_v35 = vmul.f32 %v6340_v29, %v7229_v10  ;;  %v2325_v10 = vpop.permute.xlu1 %2324 }
 0x4ca   :  { %5691 = vmatprep.mubr.msk.f32.mxu1 %vm547_vm1, %v7283_v24  ;;  %v1435_v17 = vmul.f32 %v6342_v21, %v7233_v58 }
 0x4cc   :  { %5670 = vmatprep.mubr.msk.f32.mxu0 %vm65_vm0, %v1435_v17 }
 0x4cd   :  { %5671 = vmatmul.mubr.msk.f32.vlgmr.msra.gmra.mrb[26].mxu0 %vm65_vm0, %v1437_v35  ;;  %v6198_v58 = vpop.permute.xlu1 %6197 }
 0x4ce   :  { %5978 = vmatpush3.bf16.msra.mxu0 %v5975_v43  ;;  %5984 = vmatpush3.bf16.xpose.msk.msra.mxu1 %vm6965_vm2, %v5979_v51  ;;  %v6200_v27 = vunpack.i.h.bf16 %v6198_v58 }
 0x4cf   :  { %5987 = vmatprep.subr.msk.bf16.mxu0 %vm6965_vm2, %v5985_v59  ;;  %5993 = vmatprep.subr.msk.bf16.mxu1 %vm6965_vm2, %v5991_v32 }
 0x4d1   :  { %v2418_v4 = vpop.permute.xlu1 %2417 }
 0x4d5   :  { %5692 = vmatmul.mubr.msk.f32.vlgmr.msra.gmra.mrb[18].mxu1 %vm547_vm1, %v7287_v5  ;;  %v2507_v3 = vpop.permute.xlu1 %2506 }
 0x4d6   :  { %5996 = vmatpush3.bf16.xpose.msk.msra.mxu1 %vm6965_vm2, %v5991_v32  ;;  %5705 = vmatprep.mubr.msk.f32.mxu1 %vm547_vm1, %v2325_v10 }
 0x4d9   :  { %v6208_v42 = vpop.permute.xlu1 %6207 }
 0x4da   :  { %v6210_v44 = vunpack.i.h.bf16 %v6208_v42  ;;  %v6209_v55 = vunpack.i.l.bf16 %v6208_v42 }
 0x4dc   :  { %v6021_v26 = vpack.c.bf16 %v6210_v44, %v6209_v55 }
 0x4dd   :  { %v2600_v63 = vpop.permute.xlu1 %2599 }
 0x4e1   :  { %v2691_v15 = vpop.permute.xlu1 %2690 }
 0x4e5   :  { %v2782_v30 = vpop.permute.xlu1 %2781 }
 0x4e9   :  { %v6218_v31 = vpop.permute.xlu1 %6217 }
 0x4ea   :  { %v6220_v16 = vunpack.i.h.bf16 %v6218_v31  ;;  %v6219_v39 = vunpack.i.l.bf16 %v6218_v31 }
 0x4ec   :  { %v6031_v43 = vpack.c.bf16 %v6220_v16, %v6219_v39 }
 0x4ee   :  { %v1413_v24 = vpop.xlane.xlu0 %1412 }
 0x4ef   :  { %6343 = vrcp.f32 %v1413_v24 }
 0x4f2   :  { %v1410_v14 = vpop.xlane.xlu0 %1409 }
 0x4f3   :  { %6345 = vrcp.f32 %v1410_v14 }
 0x4f6   :  { %v6193_v47 = vpop.permute.xlu0 %6192 }
 0x4f7   :  { %v6195_v57 = vunpack.i.h.bf16 %v6193_v47  ;;  %v6194_v62 = vunpack.i.l.bf16 %v6193_v47 }
 0x4f9   :  { %v6003_v54 = vpack.c.bf16 %v6195_v57, %v6194_v62  ;;  %v6344_v5 = vpop.eup %6343 }
 0x4fa   :  { %v2327_v56 = vpop.permute.xlu0 %2326  ;;  %v1445_v60 = vmul.f32 %v6344_v5, %v7261_v40  ;;  %v6199_v40 = vunpack.i.l.bf16 %v6198_v58  ;;  %v7431_v58 = vld [vmem:[%s8391_s7 + $0x18] sm:$0xff] }
 0x4fb   :  { %5706 = vmatmul.mubr.msk.f32.vlgmr.msra.gmra.mrb[20].mxu1 %vm547_vm1, %v2327_v56  ;;  %6005 = vmatprep.subr.msk.bf16.mxu1 %vm6965_vm2, %v6003_v54 }
 0x4fc   :  { %6008 = vmatpush3.bf16.xpose.msk.msra.mxu1 %vm6965_vm2, %v6003_v54  ;;  %5719 = vmatprep.mubr.msk.f32.mxu1 %vm547_vm1, %v2507_v3 }
 0x4fd   :  { %v6346_v37 = vpop.eup %6345 }
 0x4fe   :  { %v2416_v13 = vpop.permute.xlu0 %2415  ;;  %v1443_v1 = vmul.f32 %v6346_v37, %v7267_v7 }
 0x500   :  { %5684 = vmatprep.mubr.msk.f32.mxu0 %vm65_vm0, %v1443_v1 }
 0x501   :  { %5685 = vmatmul.mubr.msk.f32.vlgmr.msra.gmra.mrb[28].mxu0 %vm65_vm0, %v1445_v60 }
 0x502   :  { %5990 = vmatpush3.bf16.xpose.msk.msra.mxu0 %vm6965_vm2, %v5985_v59  ;;  %5698 = vmatprep.mubr.msk.f32.mxu0 %vm547_vm1, %v7293_v50  ;;  %v6203_v23 = vpop.permute.xlu0 %6202  ;;  %v6009_v50 = vpack.c.bf16 %v6200_v27, %v6199_v40 }
 0x503   :  { %5999 = vmatprep.subr.msk.bf16.mxu0 %vm6965_vm2, %v5997_v61  ;;  %v6205_v8 = vunpack.i.h.bf16 %v6203_v23  ;;  %v6204_v7 = vunpack.i.l.bf16 %v6203_v23 }
 0x505   :  { %v6015_v19 = vpack.c.bf16 %v6205_v8, %v6204_v7 }
 0x506   :  { %v2509_v9 = vpop.permute.xlu0 %2508 }
 0x507   :  { %5720 = vmatmul.mubr.msk.f32.vlgmr.msra.gmra.mrb[22].mxu1 %vm547_vm1, %v2509_v9  ;;  %6017 = vmatprep.subr.msk.bf16.mxu1 %vm6965_vm2, %v6015_v19 }
 0x508   :  { %6020 = vmatpush3.bf16.xpose.msk.msra.mxu1 %vm6965_vm2, %v6015_v19 }
 0x509   :  { %5699 = vmatmul.mubr.msk.f32.vlgmr.msra.gmra.mrb[30].mxu0 %vm547_vm1, %v2236_v33 }
 0x50a   :  { %6002 = vmatpush3.bf16.xpose.msk.msra.mxu0 %vm6965_vm2, %v5997_v61  ;;  %5712 = vmatprep.mubr.msk.f32.mxu0 %vm547_vm1, %v2416_v13  ;;  %v2598_v48 = vpop.permute.xlu0 %2597 }
 0x50b   :  { %6011 = vmatprep.subr.msk.bf16.mxu0 %vm6965_vm2, %v6009_v50 }
 0x50e   :  { %v2689_v46 = vpop.permute.xlu0 %2688 }
 0x50f   :  { %5733 = vmatprep.mubr.msk.f32.mxu1 %vm547_vm1, %v2689_v46 }
 0x510   :  { %5734 = vmatmul.mubr.msk.f32.vlgmr.msra.gmra.mrb[24].mxu1 %vm547_vm1, %v2691_v15 }
 0x511   :  { %5713 = vmatmul.mubr.msk.f32.vlgmr.msra.gmra.mrb[32].mxu0 %vm547_vm1, %v2418_v4  ;;  %v7436_v4 = vld [vmem:[%s8391_s7 + $0x10] sm:$0xff] }
 0x512   :  { %6014 = vmatpush3.bf16.xpose.msk.msra.mxu0 %vm6965_vm2, %v6009_v50  ;;  %5726 = vmatprep.mubr.msk.f32.mxu0 %vm547_vm1, %v2598_v48  ;;  %v2780_v6 = vpop.permute.xlu0 %2779 }
 0x513   :  { %6023 = vmatprep.subr.msk.bf16.mxu0 %vm6965_vm2, %v6021_v26 }
 0x516   :  { %v6213_v49 = vpop.permute.xlu0 %6212 }
 0x517   :  { %v6215_v51 = vunpack.i.h.bf16 %v6213_v49  ;;  %v6214_v34 = vunpack.i.l.bf16 %v6213_v49 }
 0x519   :  { %v6027_v45 = vpack.c.bf16 %v6215_v51, %v6214_v34  ;;  %5727 = vmatmul.mubr.msk.f32.vlgmr.msra.gmra.mrb[34].mxu0 %vm547_vm1, %v2600_v63 }
 0x51a   :  { %6026 = vmatpush3.bf16.xpose.msk.msra.mxu0 %vm6965_vm2, %v6021_v26  ;;  %5740 = vmatprep.mubr.msk.f32.mxu0 %vm547_vm1, %v2780_v6 }
 0x51b   :  { %6032 = vmatprep.subr.bf16.mxu0 %v6031_v43  ;;  %6028 = vmatprep.subr.bf16.mxu1 %v6027_v45 }
 0x51c   :  { %6030 = vmatpush3.bf16.msra.mxu1 %v6027_v45 }
 0x521   :  { %5741 = vmatmul.mubr.msk.f32.vlgmr.msra.gmra.mrb[36].mxu0 %vm547_vm1, %v2782_v30 }
 0x522   :  { %6034 = vmatpush3.bf16.msra.mxu0 %v6031_v43 }
 0x57c   :  { %v7400_v38 = vpop.f32.mrb[20].mxu0 }
 0x57d   :  { %v7402_v29 = vpop.f32.mrb[21].mxu0 }
 0x587   :  { %v7404_v53 = vpop.f32.mrb[22].mxu0 }
 0x588   :  { %v7406_v21 = vpop.f32.mrb[23].mxu0 }
 0x593   :  { %v7408_v2 = vpop.f32.mrb[12].mxu1 }
 0x594   :  { %v7410_v11 = vpop.f32.mrb[13].mxu1 }
 0x597   :  { %v7412_v52 = vpop.f32.mrb[14].mxu1 }
 0x598   :  { %v7414_v28 = vpop.f32.mrb[24].mxu0  ;;  %v7416_v35 = vpop.f32.mrb[15].mxu1 }
 0x599   :  { %v7418_v17 = vpop.f32.mrb[25].mxu0 }
 0x59c   :  { %v7420_v59 = vpop.f32.mrb[16].mxu1 }
 0x59d   :  { %v7422_v32 = vpop.f32.mrb[17].mxu1 }
 0x5a0   :  { %v7424_v33 = vpop.f32.mrb[26].mxu0 }
 0x5a1   :  { %v7426_v10 = vpop.f32.mrb[27].mxu0 }
 0x5a8   :  { %v5693_v24 = vpop.f32.mrb[18].mxu1 }
 0x5a9   :  { %v7439_v14 = vadd.f32 %v5693_v24, %v7431_v58  ;;  %v2224_v3 = vpop.f32.mrb[19].mxu1 }
 0x5aa   :  { %v7442_v47 = vadd.f32 %v2224_v3, %v7436_v4 }
 0x5ab   :  { %v2873_v57 = vsel %vm65_vm0, %v7439_v14, -inf }
 0x5ac   :  { %2874 = vmax.xlane.f32.xlu1 %v2873_v57  ;;  %v2870_v62 = vsel %vm65_vm0, %v7442_v47, -inf }
 0x5ad   :  { %2871 = vmax.xlane.f32.xlu0 %v2870_v62 }
 0x5ce   :  { %v5707_v54 = vpop.f32.mrb[20].mxu1 }
 0x5cf   :  { %v7449_v42 = vadd.f32 %v5707_v54, %v7431_v58  ;;  %v2406_v56 = vpop.f32.mrb[21].mxu1 }
 0x5d0   :  { %v7452_v5 = vadd.f32 %v2406_v56, %v7436_v4 }
 0x5d1   :  { %v2885_v37 = vsel %vm65_vm0, %v7449_v42, -inf }
 0x5d2   :  { %2886 = vmax.xlane.f32.xlu1 %v2885_v37  ;;  %v2882_v22 = vsel %vm65_vm0, %v7452_v5, -inf }
 0x5d3   :  { %2883 = vmax.xlane.f32.xlu0 %v2882_v22 }
 0x5d4   :  { %v7458_v25 = vpop.f32.mrb[28].mxu0 }
 0x5d5   :  { %v7460_v13 = vpop.f32.mrb[29].mxu0 }
 0x5da   :  { %v5721_v1 = vpop.f32.mrb[22].mxu1 }
 0x5db   :  { %v7463_v60 = vadd.f32 %v5721_v1, %v7431_v58  ;;  %v2588_v63 = vpop.f32.mrb[23].mxu1 }
 0x5dc   :  { %v5700_v61 = vpop.f32.mrb[30].mxu0  ;;  %v7476_v19 = vadd.f32 %v2588_v63, %v7436_v4 }
 0x5dd   :  { %v7466_v23 = vadd.f32 %v5700_v61, %v7431_v58  ;;  %v2315_v8 = vpop.f32.mrb[31].mxu0  ;;  %v2897_v7 = vsel %vm65_vm0, %v7463_v60, -inf }
 0x5de   :  { %2898 = vmax.xlane.f32.xlu1 %v2897_v7  ;;  %v7471_v27 = vadd.f32 %v2315_v8, %v7436_v4  ;;  %v2894_v31 = vsel %vm65_vm0, %v7476_v19, -inf }
 0x5df   :  { %v2879_v40 = vsel %vm65_vm0, %v7466_v23, -inf }
 0x5e0   :  { %2880 = vmax.xlane.f32.xlu0 %v2879_v40  ;;  %v2876_v9 = vsel %vm65_vm0, %v7471_v27, -inf }
 0x5e3   :  { %v5735_v15 = vpop.f32.mrb[24].mxu1 }
 0x5e4   :  { %v5714_v50 = vpop.f32.mrb[32].mxu0  ;;  %2877 = vmax.xlane.f32.xlu0 %v2876_v9  ;;  %v2770_v48 = vpop.f32.mrb[25].mxu1  ;;  %v7484_v55 = vadd.f32 %v5735_v15, %v7431_v58 }
 0x5e5   :  { %v7481_v30 = vadd.f32 %v5714_v50, %v7431_v58  ;;  %v2497_v44 = vpop.f32.mrb[33].mxu0  ;;  %v7494_v6 = vadd.f32 %v2770_v48, %v7436_v4 }
 0x5e6   :  { %v7487_v46 = vadd.f32 %v2497_v44, %v7436_v4  ;;  %v2909_v16 = vsel %vm65_vm0, %v7484_v55, -inf }
 0x5e7   :  { %v2891_v26 = vsel %vm65_vm0, %v7481_v30, -inf  ;;  %v2906_v24 = vsel %vm65_vm0, %v7494_v6, -inf }
 0x5e8   :  { %2892 = vmax.xlane.f32.xlu1 %v2891_v26  ;;  %2895 = vmax.xlane.f32.xlu0 %v2894_v31  ;;  %v2888_v39 = vsel %vm65_vm0, %v7487_v46, -inf }
 0x5ec   :  { %v5728_v49 = vpop.f32.mrb[34].mxu0  ;;  %2910 = vmax.xlane.f32.xlu1 %v2909_v16  ;;  %2889 = vmax.xlane.f32.xlu0 %v2888_v39 }
 0x5ed   :  { %v7501_v51 = vadd.f32 %v5728_v49, %v7431_v58  ;;  %v2679_v34 = vpop.f32.mrb[35].mxu0 }
 0x5ee   :  { %v7504_v43 = vadd.f32 %v2679_v34, %v7436_v4 }
 0x5ef   :  { %v2903_v45 = vsel %vm65_vm0, %v7501_v51, -inf }
 0x5f0   :  { %2904 = vmax.xlane.f32.xlu1 %v2903_v45  ;;  %2907 = vmax.xlane.f32.xlu0 %v2906_v24  ;;  %v2900_v3 = vsel %vm65_vm0, %v7504_v43, -inf }
 0x5f4   :  { %v5742_v57 = vpop.f32.mrb[36].mxu0  ;;  %2901 = vmax.xlane.f32.xlu0 %v2900_v3 }
 0x5f5   :  { %v2861_v62 = vpop.f32.mrb[37].mxu0  ;;  %v7517_v54 = vadd.f32 %v5742_v57, %v7431_v58 }
 0x5f6   :  { %v7520_v56 = vadd.f32 %v2861_v62, %v7436_v4 }
 0x5f7   :  { %v2915_v37 = vsel %vm65_vm0, %v7517_v54, -inf }
 0x5f8   :  { %v2912_v22 = vsel %vm65_vm0, %v7520_v56, -inf }
 0x601   :  { %6227 = vrot.lane.b32.xlu1 %v6908_v18, %s6527_s27 }
 0x60a   :  { %6222 = vrot.lane.b32.xlu0 %v6898_v12, %s6527_s27 }
 0x625   :  { %2916 = vmax.xlane.f32.xlu1 %v2915_v37 }
 0x629   :  { %2913 = vmax.xlane.f32.xlu0 %v2912_v22 }
 0x636   :  { %6237 = vrot.lane.b32.xlu1 %v6929_v20, %s6527_s27 }
 0x639   :  { %v2875_v12 = vpop.xlane.xlu1 %2874 }
 0x63a   :  { %v2919_v18 = vsub.f32 %v7439_v14, %v2875_v12  ;;  %v2872_v58 = vpop.xlane.xlu0 %2871 }
 0x63b   :  { %v2918_v1 = vsub.f32 %v7442_v47, %v2872_v58 }
 0x63c   :  { %v2936_v4 = vmul.f32 1.442695, %v2919_v18 }
 0x63d   :  { %v2934_v63 = vmul.f32 1.442695, %v2918_v1 }
 0x63e   :  { %6347 = vpow2.f32 %v2936_v4 }
 0x63f   :  { %6232 = vrot.lane.b32.xlu0 %v6915_v0, %s6527_s27  ;;  %6349 = vpow2.f32 %v2934_v63 }
 0x648   :  { %v7532_v61 = vpop.eup %6347 }
 0x649   :  { %v2969_v8 = vsel %vm65_vm0, %v7532_v61, 0.0  ;;  %v7536_v7 = vpop.eup %6349 }
 0x64a   :  { %v2966_v0 = vsel %vm65_vm0, %v7536_v7, 0.0 }
 0x65a   :  { %2970 = vadd.xlane.f32.xlu1 %v2969_v8 }
 0x65e   :  { %2967 = vadd.xlane.f32.xlu0 %v2966_v0 }
 0x65f   :  { %v2887_v20 = vpop.xlane.xlu1 %2886 }
 0x660   :  { %v2923_v14 = vsub.f32 %v7449_v42, %v2887_v20  ;;  %v2884_v40 = vpop.xlane.xlu0 %2883 }
 0x661   :  { %v2922_v47 = vsub.f32 %v7452_v5, %v2884_v40 }
 0x662   :  { %v2944_v15 = vmul.f32 1.442695, %v2923_v14 }
 0x663   :  { %v2942_v9 = vmul.f32 1.442695, %v2922_v47 }
 0x664   :  { %6351 = vpow2.f32 %v2944_v15 }
 0x665   :  { %6353 = vpow2.f32 %v2942_v9 }
 0x66b   :  { %v2899_v50 = vpop.xlane.xlu1 %2898 }
 0x66c   :  { %v2927_v48 = vsub.f32 %v7463_v60, %v2899_v50 }
 0x66d   :  { %v2881_v44 = vpop.xlane.xlu0 %2880 }
 0x66e   :  { %v7543_v26 = vpop.eup %6351  ;;  %v2921_v31 = vsub.f32 %v7466_v23, %v2881_v44  ;;  %v2952_v39 = vmul.f32 1.442695, %v2927_v48 }
 0x66f   :  { %v7546_v16 = vpop.eup %6353  ;;  %v2981_v42 = vsel %vm65_vm0, %v7543_v26, 0.0 }
 0x670   :  { %v2940_v49 = vmul.f32 1.442695, %v2921_v31  ;;  %2982 = vadd.xlane.f32.xlu1 %v2981_v42  ;;  %v2978_v5 = vsel %vm65_vm0, %v7546_v16, 0.0 }
 0x671   :  { %v2878_v34 = vpop.xlane.xlu0 %2877  ;;  %2979 = vadd.xlane.f32.xlu0 %v2978_v5 }
 0x672   :  { %6355 = vpow2.f32 %v2940_v49  ;;  %v2920_v60 = vsub.f32 %v7471_v27, %v2878_v34 }
 0x673   :  { %6357 = vpow2.f32 %v2952_v39 }
 0x674   :  { %v2938_v45 = vmul.f32 1.442695, %v2920_v60 }
 0x675   :  { %v2893_v24 = vpop.xlane.xlu1 %2892  ;;  %v2896_v23 = vpop.xlane.xlu0 %2895 }
 0x676   :  { %6359 = vpow2.f32 %v2938_v45  ;;  %v2925_v3 = vsub.f32 %v7481_v30, %v2893_v24  ;;  %v2926_v57 = vsub.f32 %v7476_v19, %v2896_v23 }
 0x678   :  { %v2948_v62 = vmul.f32 1.442695, %v2925_v3  ;;  %v2950_v37 = vmul.f32 1.442695, %v2926_v57 }
 0x679   :  { %v2911_v22 = vpop.xlane.xlu1 %2910  ;;  %v2890_v12 = vpop.xlane.xlu0 %2889 }
 0x67a   :  { %6361 = vpow2.f32 %v2948_v62  ;;  %v2931_v18 = vsub.f32 %v7484_v55, %v2911_v22  ;;  %v2924_v58 = vsub.f32 %v7487_v46, %v2890_v12 }
 0x67b   :  { %6363 = vpow2.f32 %v2950_v37 }
 0x67c   :  { %v7557_v27 = vpop.eup %6355  ;;  %v2960_v4 = vmul.f32 1.442695, %v2931_v18  ;;  %v2946_v1 = vmul.f32 1.442695, %v2924_v58 }
 0x67d   :  { %v2905_v63 = vpop.xlane.xlu1 %2904  ;;  %v2908_v8 = vpop.xlane.xlu0 %2907  ;;  %v2975_v30 = vsel %vm65_vm0, %v7557_v27, 0.0 }
 0x67e   :  { %v7561_v19 = vpop.eup %6357  ;;  %6365 = vpow2.f32 %v2960_v4  ;;  %v2929_v0 = vsub.f32 %v7501_v51, %v2905_v63  ;;  %v2930_v20 = vsub.f32 %v7494_v6, %v2908_v8  ;;  %2976 = vadd.xlane.f32.xlu1 %v2975_v30 }
 0x67f   :  { %6367 = vpow2.f32 %v2946_v1  ;;  %v2993_v15 = vsel %vm65_vm0, %v7561_v19, 0.0 }
 0x680   :  { %v7565_v55 = vpop.eup %6359  ;;  %v2958_v46 = vmul.f32 1.442695, %v2930_v20  ;;  %v2956_v14 = vmul.f32 1.442695, %v2929_v0 }
 0x681   :  { %v6228_v40 = vpop.permute.xlu1 %6227  ;;  %v2902_v47 = vpop.xlane.xlu0 %2901  ;;  %v2972_v9 = vsel %vm65_vm0, %v7565_v55, 0.0 }
 0x682   :  { %v6230_v50 = vunpack.i.h.bf16 %v6228_v40  ;;  %v6229_v48 = vunpack.i.l.bf16 %v6228_v40  ;;  %v2928_v51 = vsub.f32 %v7504_v43, %v2902_v47  ;;  %2994 = vadd.xlane.f32.xlu1 %v2993_v15  ;;  %2973 = vadd.xlane.f32.xlu0 %v2972_v9  ;;  %6369 = vpow2.f32 %v2958_v46 }
 0x683   :  { %6371 = vpow2.f32 %v2956_v14 }
 0x684   :  { %v7572_v6 = vpop.eup %6361  ;;  %v7574_v44 = vpack.c.bf16 %v6230_v50, %v6229_v48  ;;  %v2954_v31 = vmul.f32 1.442695, %v2928_v51 }
 0x685   :  { %v7576_v42 = vpop.eup %6363  ;;  %v6223_v39 = vpop.permute.xlu0 %6222  ;;  %v2987_v49 = vsel %vm65_vm0, %v7572_v6, 0.0 }
 0x686   :  { %6373 = vpow2.f32 %v2954_v31  ;;  %v6225_v5 = vunpack.i.h.bf16 %v6223_v39  ;;  %v6224_v34 = vunpack.i.l.bf16 %v6223_v39  ;;  %6040 = vmatprep.subr.bf16.mxu0 %v7574_v44  ;;  %2988 = vadd.xlane.f32.xlu1 %v2987_v49  ;;  %v2990_v43 = vsel %vm65_vm0, %v7576_v42, 0.0 }
 0x687   :  { %2991 = vadd.xlane.f32.xlu0 %v2990_v43 }
 0x688   :  { %v7583_v60 = vpop.eup %6365  ;;  %v6035_v45 = vpack.c.bf16 %v6225_v5, %v6224_v34 }
 0x689   :  { %v7585_v24 = vpop.eup %6367  ;;  %v3005_v23 = vsel %vm65_vm0, %v7583_v60, 0.0 }
 0x68a   :  { %3006 = vadd.xlane.f32.xlu1 %v3005_v23  ;;  %v2984_v3 = vsel %vm65_vm0, %v7585_v24, 0.0  ;;  %6036 = vmatprep.subr.bf16.mxu1 %v6035_v45 }
 0x68b   :  { %2985 = vadd.xlane.f32.xlu0 %v2984_v3 }
 0x68c   :  { %v7591_v57 = vpop.eup %6369 }
 0x68d   :  { %v3002_v62 = vsel %vm65_vm0, %v7591_v57, 0.0  ;;  %v7595_v37 = vpop.eup %6371 }
 0x68e   :  { %3003 = vadd.xlane.f32.xlu1 %v3002_v62  ;;  %v2999_v18 = vsel %vm65_vm0, %v7595_v37, 0.0 }
 0x690   :  { %v7597_v22 = vpop.eup %6373 }
 0x691   :  { %v2996_v12 = vsel %vm65_vm0, %v7597_v22, 0.0 }
 0x692   :  { %2997 = vadd.xlane.f32.xlu0 %v2996_v12  ;;  %3000 = vadd.xlane.f32.xlu1 %v2999_v18 }
 0x6b2   :  { %v2917_v58 = vpop.xlane.xlu1 %2916 }
 0x6b3   :  { %v2933_v4 = vsub.f32 %v7517_v54, %v2917_v58 }
 0x6b5   :  { %v2964_v1 = vmul.f32 1.442695, %v2933_v4 }
 0x6b6   :  { %v2914_v63 = vpop.xlane.xlu0 %2913  ;;  %v6238_v54 = vpop.permute.xlu1 %6237 }
 0x6b7   :  { %6375 = vpow2.f32 %v2964_v1  ;;  %v2932_v8 = vsub.f32 %v7520_v56, %v2914_v63  ;;  %v6240_v18 = vunpack.i.h.bf16 %v6238_v54  ;;  %v6239_v58 = vunpack.i.l.bf16 %v6238_v54 }
 0x6b9   :  { %v2962_v30 = vmul.f32 1.442695, %v2932_v8 }
 0x6ba   :  { %v6233_v56 = vpop.permute.xlu0 %6232 }
 0x6bb   :  { %6377 = vpow2.f32 %v2962_v30  ;;  %v6235_v50 = vunpack.i.h.bf16 %v6233_v56  ;;  %v6234_v48 = vunpack.i.l.bf16 %v6233_v56 }
 0x6c1   :  { %v7605_v0 = vpop.eup %6375 }
 0x6c2   :  { %v3011_v20 = vsel %vm65_vm0, %v7605_v0, 0.0 }
 0x6c3   :  { %3012 = vadd.xlane.f32.xlu1 %v3011_v20  ;;  %v6047_v20 = vpack.c.bf16 %v6240_v18, %v6239_v58 }
 0x6c5   :  { %v7609_v46 = vpop.eup %6377 }
 0x6c6   :  { %v3008_v14 = vsel %vm65_vm0, %v7609_v46, 0.0 }
 0x6c7   :  { %3009 = vadd.xlane.f32.xlu0 %v3008_v14 }
 0x6d4   :  { %6247 = vrot.lane.b32.xlu1 %v6949_v36, %s6527_s27  ;;  %v6043_v36 = vpack.c.bf16 %v6235_v50, %v6234_v48 }
 0x6dd   :  { %6242 = vrot.lane.b32.xlu0 %v6939_v41, %s6527_s27 }
 0x6e7   :  { %v2971_v40 = vpop.xlane.xlu1 %2970 }
 0x6e8   :  { %6379 = vrcp.f32 %v2971_v40 }
 0x6eb   :  { %v2968_v47 = vpop.xlane.xlu0 %2967 }
 0x6ec   :  { %6381 = vrcp.f32 %v2968_v47 }
 0x6f2   :  { %v6380_v15 = vpop.eup %6379 }
 0x6f3   :  { %v3017_v31 = vmul.f32 %v6380_v15, %v7532_v61 }
 0x6f6   :  { %v6382_v9 = vpop.eup %6381 }
 0x6f7   :  { %v3015_v51 = vmul.f32 %v6382_v9, %v7536_v7 }
 0x6f9   :  { %5747 = vmatprep.mubr.msk.f32.mxu1 %vm65_vm0, %v3015_v51 }
 0x6fa   :  { %5748 = vmatmul.mubr.msk.f32.vlgmr.msra.gmra.mrb[26].mxu1 %vm65_vm0, %v3017_v31 }
 0x6fb   :  { %6038 = vmatpush3.bf16.msra.mxu1 %v6035_v45 }
 0x6fc   :  { %6044 = vmatprep.subr.bf16.mxu1 %v6043_v36 }
 0x6fd   :  { %v2983_v41 = vpop.xlane.xlu1 %2982 }
 0x6fe   :  { %6383 = vrcp.f32 %v2983_v41  ;;  %v2980_v39 = vpop.xlane.xlu0 %2979 }
 0x6ff   :  { %6385 = vrcp.f32 %v2980_v39 }
 0x708   :  { %v6384_v49 = vpop.eup %6383 }
 0x709   :  { %v6386_v5 = vpop.eup %6385  ;;  %v3025_v43 = vmul.f32 %v6384_v49, %v7543_v26 }
 0x70a   :  { %v3023_v34 = vmul.f32 %v6386_v5, %v7546_v16 }
 0x70b   :  { %v2977_v7 = vpop.xlane.xlu1 %2976 }
 0x70c   :  { %5761 = vmatprep.mubr.msk.f32.mxu1 %vm65_vm0, %v3023_v34  ;;  %6387 = vrcp.f32 %v2977_v7 }
 0x70d   :  { %5762 = vmatmul.mubr.msk.f32.vlgmr.msra.gmra.mrb[28].mxu1 %vm65_vm0, %v3025_v43 }
 0x70e   :  { %6046 = vmatpush3.bf16.msra.mxu1 %v6043_v36 }
 0x70f   :  { %v2995_v61 = vpop.xlane.xlu1 %2994  ;;  %v2974_v23 = vpop.xlane.xlu0 %2973 }
 0x710   :  { %6389 = vrcp.f32 %v2974_v23  ;;  %v3822_v23 = vld [vmem:[%s8392_s5] sm:$0xff] }
 0x711   :  { %6391 = vrcp.f32 %v2995_v61 }
 0x713   :  { %v2989_v45 = vpop.xlane.xlu1 %2988 }
 0x714   :  { %v2992_v3 = vpop.xlane.xlu0 %2991 }
 0x715   :  { %6393 = vrcp.f32 %v2992_v3 }
 0x716   :  { %6395 = vrcp.f32 %v2989_v45  ;;  %v6388_v16 = vpop.eup %6387  ;;  %v3823_v45 = vld [vmem:[%s8392_s5 + $0x8] sm:$0xff] }
 0x717   :  { %v3007_v62 = vpop.xlane.xlu1 %3006  ;;  %v3021_v63 = vmul.f32 %v6388_v16, %v7557_v27  ;;  %v6059_v3 = vpack.c.bf16 %v3823_v45, %v3822_v23 }
 0x718   :  { %v2986_v12 = vpop.xlane.xlu0 %2985 }
 0x719   :  { %6397 = vrcp.f32 %v2986_v12 }
 0x71a   :  { %v6390_v26 = vpop.eup %6389 }
 0x71b   :  { %v3004_v4 = vpop.xlane.xlu1 %3003  ;;  %v3019_v1 = vmul.f32 %v6390_v26, %v7565_v55  ;;  %v6392_v8 = vpop.eup %6391 }
 0x71c   :  { %6399 = vrcp.f32 %v3004_v4  ;;  %v3033_v40 = vmul.f32 %v6392_v8, %v7561_v19 }
 0x71d   :  { %5754 = vmatprep.mubr.msk.f32.mxu0 %vm65_vm0, %v3019_v1 }
 0x71e   :  { %5755 = vmatmul.mubr.msk.f32.vlgmr.msra.gmra.mrb[38].mxu0 %vm65_vm0, %v3021_v63 }
 0x71f   :  { %v6394_v30 = vpop.eup %6393  ;;  %v2998_v14 = vpop.xlane.xlu0 %2997  ;;  %6042 = vmatpush3.bf16.msra.mxu0 %v7574_v44 }
 0x720   :  { %v3001_v56 = vpop.xlane.xlu1 %3000  ;;  %6401 = vrcp.f32 %v2998_v14  ;;  %v3031_v54 = vmul.f32 %v6394_v30, %v7576_v42  ;;  %6048 = vmatprep.subr.bf16.mxu0 %v6047_v20  ;;  %v6396_v27 = vpop.eup %6395 }
 0x721   :  { %6403 = vrcp.f32 %v3001_v56  ;;  %v3029_v15 = vmul.f32 %v6396_v27, %v7572_v6 }
 0x722   :  { %5775 = vmatprep.mubr.msk.f32.mxu1 %vm65_vm0, %v3031_v54  ;;  %6405 = vrcp.f32 %v3007_v62 }
 0x723   :  { %v6398_v55 = vpop.eup %6397  ;;  %5776 = vmatmul.mubr.msk.f32.vlgmr.msra.gmra.mrb[30].mxu1 %vm65_vm0, %v3033_v40 }
 0x724   :  { %v3027_v47 = vmul.f32 %v6398_v55, %v7585_v24 }
 0x726   :  { %5768 = vmatprep.mubr.msk.f32.mxu0 %vm65_vm0, %v3027_v47  ;;  %v6400_v44 = vpop.eup %6399 }
 0x727   :  { %5769 = vmatmul.mubr.msk.f32.vlgmr.msra.gmra.mrb[40].mxu0 %vm65_vm0, %v3029_v15  ;;  %v3039_v19 = vmul.f32 %v6400_v44, %v7591_v57 }
 0x728   :  { %6050 = vmatpush3.bf16.msra.mxu0 %v6047_v20 }
 0x729   :  { %5789 = vmatprep.mubr.msk.f32.mxu1 %vm65_vm0, %v3039_v19 }
 0x72a   :  { %v6402_v42 = vpop.eup %6401 }
 0x72b   :  { %v6404_v9 = vpop.eup %6403  ;;  %v3035_v50 = vmul.f32 %v6402_v42, %v7597_v22 }
 0x72c   :  { %v3037_v48 = vmul.f32 %v6404_v9, %v7595_v37  ;;  %v6406_v37 = vpop.eup %6405 }
 0x72d   :  { %5782 = vmatprep.mubr.msk.f32.mxu0 %vm65_vm0, %v3035_v50  ;;  %v3041_v43 = vmul.f32 %v6406_v37, %v7583_v60  ;;  %v6508_v37 = vld [vmem:[%s8386_s0] sm:$0xff] }
 0x72e   :  { %5783 = vmatmul.mubr.msk.f32.vlgmr.msra.gmra.mrb[42].mxu0 %vm65_vm0, %v3037_v48 }
 0x750   :  { %v3013_v6 = vpop.xlane.xlu1 %3012 }
 0x751   :  { %6407 = vrcp.f32 %v3013_v6 }
 0x754   :  { %v6248_v24 = vpop.permute.xlu1 %6247  ;;  %v3010_v51 = vpop.xlane.xlu0 %3009 }
 0x755   :  { %v6250_v31 = vunpack.i.h.bf16 %v6248_v24  ;;  %v6249_v36 = vunpack.i.l.bf16 %v6248_v24  ;;  %6409 = vrcp.f32 %v3010_v51 }
 0x757   :  { %v6055_v57 = vpack.c.bf16 %v6250_v31, %v6249_v36 }
 0x758   :  { %v6243_v41 = vpop.permute.xlu0 %6242 }
 0x759   :  { %v6245_v39 = vunpack.i.h.bf16 %v6243_v41  ;;  %v6244_v49 = vunpack.i.l.bf16 %v6243_v41  ;;  %6056 = vmatprep.subr.bf16.mxu0 %v6055_v57 }
 0x75a   :  { %6058 = vmatpush3.bf16.msra.mxu0 %v6055_v57 }
 0x75b   :  { %v6051_v22 = vpack.c.bf16 %v6245_v39, %v6244_v49  ;;  %v6408_v5 = vpop.eup %6407  ;;  %6060 = vmatprep.subr.bf16.mxu0 %v6059_v3 }
 0x75c   :  { %v3045_v61 = vmul.f32 %v6408_v5, %v7605_v0 }
 0x75d   :  { %6052 = vmatprep.subr.bf16.mxu1 %v6051_v22 }
 0x75e   :  { %6054 = vmatpush3.bf16.msra.mxu1 %v6051_v22 }
 0x75f   :  { %v6410_v34 = vpop.eup %6409  ;;  %6083 = vmatprep.subr.bf16.mxu1 %v6059_v3 }
 0x760   :  { %v3043_v7 = vmul.f32 %v6410_v34, %v7609_v46 }
 0x761   :  { %5790 = vmatmul.mubr.msk.f32.vlgmr.msra.gmra.mrb[32].mxu1 %vm65_vm0, %v3041_v43 }
 0x762   :  { %5796 = vmatprep.mubr.msk.f32.mxu0 %vm65_vm0, %v3043_v7  ;;  %6084 = vmatpush3.bf16.msra.mxu1 %v6059_v3 }
 0x763   :  { %5797 = vmatmul.mubr.msk.f32.vlgmr.msra.gmra.mrb[44].mxu0 %vm65_vm0, %v3045_v61 }
 0x764   :  { %6062 = vmatpush3.bf16.msra.mxu0 %v6059_v3  ;;  %v6509_v3 = vld [vmem:[%s8386_s0 + $0x18] sm:$0xff] }
 0x7cd   :  { %v5749_v60 = vpop.f32.mrb[26].mxu1 }
 0x7ce   :  { %3760 = vrot.lane.b32.xlu1 %v5749_v60, %s6528_s18  ;;  %v3124_v0 = vpop.f32.mrb[27].mxu1 }
 0x7cf   :  { %3758 = vrot.lane.b32.xlu0 %v3124_v0, %s6528_s18 }
 0x7e0   :  { %v5763_v46 = vpop.f32.mrb[28].mxu1 }
 0x7e1   :  { %v3298_v62 = vpop.f32.mrb[29].mxu1 }
 0x7f1   :  { %v5756_v12 = vpop.f32.mrb[38].mxu0 }
 0x7f2   :  { %3764 = vrot.lane.b32.xlu1 %v5756_v12, %s6528_s18  ;;  %v3211_v16 = vpop.f32.mrb[39].mxu0 }
 0x7f3   :  { %3762 = vrot.lane.b32.xlu0 %v3211_v16, %s6528_s18 }
 0x7f6   :  { %v5777_v26 = vpop.f32.mrb[30].mxu1  ;;  %3768 = vrot.lane.b32.xlu1 %v5763_v46, %s6528_s18  ;;  %v6510_v46 = vld [vmem:[%s8386_s0 + $0x10] sm:$0xff] }
 0x7f7   :  { %v3472_v18 = vpop.f32.mrb[31].mxu1  ;;  %3766 = vrot.lane.b32.xlu0 %v3298_v62, %s6528_s18 }
 0x7fa   :  { %v5770_v58 = vpop.f32.mrb[40].mxu0 }
 0x7fb   :  { %v3385_v4 = vpop.f32.mrb[41].mxu0  ;;  %3772 = vrot.lane.b32.xlu1 %v5770_v58, %s6528_s18  ;;  %v6511_v58 = vld [vmem:[%s8386_s0 + $0x28] sm:$0xff] }
 0x7fc   :  { %3770 = vrot.lane.b32.xlu0 %v3385_v4, %s6528_s18 }
 0x7ff   :  { %3776 = vrot.lane.b32.xlu1 %v5777_v26, %s6528_s18 }
 0x800   :  { %3774 = vrot.lane.b32.xlu0 %v3472_v18, %s6528_s18 }
 0x801   :  { %v5784_v1 = vpop.f32.mrb[42].mxu0 }
 0x802   :  { %v3559_v63 = vpop.f32.mrb[43].mxu0 }
 0x803   :  { %3780 = vrot.lane.b32.xlu1 %v5784_v1, %s6528_s18 }
 0x804   :  { %3778 = vrot.lane.b32.xlu0 %v3559_v63, %s6528_s18  ;;  %v6512_v63 = vld [vmem:[%s8386_s0 + $0x20] sm:$0xff] }
 0x834   :  { %v5791_v8 = vpop.f32.mrb[32].mxu1 }
 0x835   :  { %3784 = vrot.lane.b32.xlu1 %v5791_v8, %s6528_s18  ;;  %v3646_v30 = vpop.f32.mrb[33].mxu1 }
 0x836   :  { %v5798_v20 = vpop.f32.mrb[44].mxu0  ;;  %3782 = vrot.lane.b32.xlu0 %v3646_v30, %s6528_s18 }
 0x837   :  { %v3733_v14 = vpop.f32.mrb[45].mxu0 }
 0x839   :  { %3788 = vrot.lane.b32.xlu1 %v5798_v20, %s6528_s18 }
 0x83a   :  { %3786 = vrot.lane.b32.xlu0 %v3733_v14, %s6528_s18 }
 0x840   :  { %v3761_v56 = vpop.permute.xlu1 %3760 }
 0x841   :  { %v3759_v54 = vpop.permute.xlu0 %3758  ;;  %v3807_v27 = vsel %vm547_vm1, %v7400_v38, %v3761_v56 }
 0x842   :  { %v3806_v40 = vsel %vm547_vm1, %v7402_v29, %v3759_v54 }
 0x843   :  { %5803 = vmatprep.mubr.msk.f32.mxu0 %vm65_vm0, %v3806_v40  ;;  %v6513_v40 = vld [vmem:[%s8386_s0 + $0x38] sm:$0xff] }
 0x844   :  { %5804 = vmatmul.mubr.msk.f32.vlgmr.msra.gmra.mrb[46].mxu0 %vm65_vm0, %v3807_v27 }
 0x864   :  { %v3765_v55 = vpop.permute.xlu1 %3764 }
 0x865   :  { %v3763_v47 = vpop.permute.xlu0 %3762  ;;  %v3809_v44 = vsel %vm547_vm1, %v7404_v53, %v3765_v55 }
 0x866   :  { %v3808_v15 = vsel %vm547_vm1, %v7406_v21, %v3763_v47  ;;  %v6514_v47 = vld [vmem:[%s8386_s0 + $0x30] sm:$0xff] }
 0x867   :  { %5806 = vmatprep.mubr.msk.f32.mxu0 %vm65_vm0, %v3808_v15 }
 0x868   :  { %5807 = vmatmul.mubr.msk.f32.gmra.mrb[48].mxu0 %vm65_vm0, %v3809_v44  ;;  %v3769_v29 = vpop.permute.xlu1 %3768 }
 0x869   :  { %v3767_v19 = vpop.permute.xlu0 %3766  ;;  %v3811_v42 = vsel %vm547_vm1, %v7408_v2, %v3769_v29 }
 0x86a   :  { %v3810_v38 = vsel %vm547_vm1, %v7410_v11, %v3767_v19 }
 0x86b   :  { %5809 = vmatprep.mubr.msk.f32.mxu0 %vm65_vm0, %v3810_v38 }
 0x86c   :  { %5810 = vmatmul.mubr.msk.f32.gmra.mrb[50].mxu0 %vm65_vm0, %v3811_v42 }
 0x86d   :  { %v3773_v9 = vpop.permute.xlu1 %3772 }
 0x86e   :  { %v3771_v21 = vpop.permute.xlu0 %3770  ;;  %v3813_v50 = vsel %vm547_vm1, %v7414_v28, %v3773_v9  ;;  %v6515_v9 = vld [vmem:[%s8386_s0 + $0x48] sm:$0xff] }
 0x86f   :  { %v3812_v53 = vsel %vm547_vm1, %v7418_v17, %v3771_v21 }
 0x870   :  { %5812 = vmatprep.mubr.msk.f32.mxu0 %vm65_vm0, %v3812_v53 }
 0x871   :  { %5813 = vmatmul.mubr.msk.f32.gmra.mrb[52].mxu0 %vm65_vm0, %v3813_v50  ;;  %v3777_v11 = vpop.permute.xlu1 %3776  ;;  %v6516_v50 = vld [vmem:[%s8386_s0 + $0x40] sm:$0xff] }
 0x872   :  { %v3775_v48 = vpop.permute.xlu0 %3774  ;;  %v3815_v6 = vsel %vm547_vm1, %v7412_v52, %v3777_v11 }
 0x873   :  { %v3814_v2 = vsel %vm547_vm1, %v7416_v35, %v3775_v48 }
 0x874   :  { %5815 = vmatprep.mubr.msk.f32.mxu1 %vm65_vm0, %v3814_v2 }
 0x875   :  { %v3781_v24 = vpop.permute.xlu1 %3780  ;;  %5816 = vmatmul.mubr.msk.f32.vlgmr.msra.gmra.mrb[34].mxu1 %vm65_vm0, %v3815_v6 }
 0x876   :  { %v3779_v17 = vpop.permute.xlu0 %3778  ;;  %v3817_v51 = vsel %vm547_vm1, %v7424_v33, %v3781_v24 }
 0x877   :  { %v3816_v28 = vsel %vm547_vm1, %v7426_v10, %v3779_v17 }
 0x878   :  { %5818 = vmatprep.mubr.msk.f32.mxu1 %vm65_vm0, %v3816_v28  ;;  %v6517_v28 = vld [vmem:[%s8386_s0 + $0x58] sm:$0xff] }
 0x879   :  { %5819 = vmatmul.mubr.msk.f32.gmra.mrb[36].mxu1 %vm65_vm0, %v3817_v51 }
 0x8a7   :  { %v3785_v35 = vpop.permute.xlu1 %3784 }
 0x8a8   :  { %v3783_v31 = vpop.permute.xlu0 %3782  ;;  %v3819_v36 = vsel %vm547_vm1, %v7420_v59, %v3785_v35  ;;  %v7723_v59 = vld [vmem:[%s8393_s6] ss:$0 sm:$0xff]  ;;  %v6518_v35 = vld [vmem:[%s8386_s0 + $0x50] sm:$0xff] }
 0x8a9   :  { %v3818_v52 = vsel %vm547_vm1, %v7422_v32, %v3783_v31 }
 0x8aa   :  { %5821 = vmatprep.mubr.msk.f32.mxu1 %vm65_vm0, %v3818_v52 }
 0x8ab   :  { %v3789_v57 = vpop.permute.xlu1 %3788  ;;  %5822 = vmatmul.mubr.msk.f32.gmra.mrb[38].mxu1 %vm65_vm0, %v3819_v36 }
 0x8ac   :  { %v3787_v10 = vpop.permute.xlu0 %3786  ;;  %v3821_v41 = vsel %vm547_vm1, %v7458_v25, %v3789_v57 }
 0x8ad   :  { %v3820_v33 = vsel %vm547_vm1, %v7460_v13, %v3787_v10  ;;  %v6507_v13 = vld [vmem:[%s8386_s0 + $0x8] sm:$0xff] }
 0x8ae   :  { %5824 = vmatprep.mubr.msk.f32.mxu1 %vm65_vm0, %v3820_v33 }
 0x8af   :  { %5825 = vmatmul.mubr.msk.f32.gmra.mrb[40].mxu1 %vm65_vm0, %v3821_v41 }
 0x917   :  { %v5805_v32 = vpop.f32.mrb[46].mxu0 }
 0x918   :  { %v3951_v39 = vadd.f32 %v5805_v32, %v7723_v59  ;;  %v3945_v49 = vpop.f32.mrb[47].mxu0 }
 0x919   :  { %v3946_v22 = vadd.f32 %v7723_v59, %v3945_v49 }
 0x91a   :  { %v7730_v25 = vadd.f32 %v6507_v13, %v3951_v39  ;;  %v6519_v39 = vld [vmem:[%s8386_s0 + $0x68] sm:$0xff] }
 0x91b   :  { %v7735_v5 = vadd.f32 %v6508_v37, %v3946_v22  ;;  %v6520_v22 = vld [vmem:[%s8386_s0 + $0x60] sm:$0xff] }
 0x91c   :  { %v4045_v34 = vsel %vm65_vm0, %v7730_v25, 0.0 }
 0x91d   :  { %4046 = vadd.xlane.f32.xlu1 %v4045_v34  ;;  %v4042_v43 = vsel %vm65_vm0, %v7735_v5, 0.0 }
 0x91e   :  { %4043 = vadd.xlane.f32.xlu0 %v4042_v43 }
 0x93b   :  { %v5808_v7 = vpop.f32.mrb[48].mxu0 }
 0x93c   :  { %v3961_v61 = vadd.f32 %v5808_v7, %v7723_v59  ;;  %v3955_v23 = vpop.f32.mrb[49].mxu0 }
 0x93d   :  { %v3956_v45 = vadd.f32 %v7723_v59, %v3955_v23 }
 0x93e   :  { %v7746_v60 = vadd.f32 %v6509_v3, %v3961_v61 }
 0x93f   :  { %v5811_v0 = vpop.f32.mrb[50].mxu0  ;;  %v7751_v62 = vadd.f32 %v6510_v46, %v3956_v45  ;;  %v6521_v45 = vld [vmem:[%s8386_s0 + $0x78] sm:$0xff] }
 0x940   :  { %v3971_v12 = vadd.f32 %v5811_v0, %v7723_v59  ;;  %v3965_v16 = vpop.f32.mrb[51].mxu0  ;;  %v4051_v26 = vsel %vm65_vm0, %v7746_v60, 0.0  ;;  %v6522_v0 = vld [vmem:[%s8386_s0 + $0x70] sm:$0xff] }
 0x941   :  { %v3966_v18 = vadd.f32 %v7723_v59, %v3965_v16  ;;  %4052 = vadd.xlane.f32.xlu0 %v4051_v26  ;;  %v4048_v56 = vsel %vm65_vm0, %v7751_v62, 0.0 }
 0x942   :  { %v7760_v4 = vadd.f32 %v6511_v58, %v3971_v12 }
 0x943   :  { %v7765_v8 = vadd.f32 %v6512_v63, %v3966_v18 }
 0x944   :  { %v5814_v1 = vpop.f32.mrb[52].mxu0  ;;  %v4057_v14 = vsel %vm65_vm0, %v7760_v4, 0.0 }
 0x945   :  { %v3981_v30 = vadd.f32 %v5814_v1, %v7723_v59  ;;  %v3975_v20 = vpop.f32.mrb[53].mxu0  ;;  %4058 = vadd.xlane.f32.xlu1 %v4057_v14  ;;  %4049 = vadd.xlane.f32.xlu0 %v4048_v56  ;;  %v4054_v38 = vsel %vm65_vm0, %v7765_v8, 0.0 }
 0x946   :  { %v3976_v54 = vadd.f32 %v7723_v59, %v3975_v20 }
 0x947   :  { %v7776_v27 = vadd.f32 %v6513_v40, %v3981_v30 }
 0x948   :  { %v5817_v55 = vpop.f32.mrb[34].mxu1  ;;  %v7781_v15 = vadd.f32 %v6514_v47, %v3976_v54  ;;  %v4294_v47 = vld [vmem:[%s8394_s10] sm:$0xff] }
 0x949   :  { %v3991_v44 = vadd.f32 %v5817_v55, %v7723_v59  ;;  %v3985_v29 = vpop.f32.mrb[35].mxu1  ;;  %v4063_v19 = vsel %vm65_vm0, %v7776_v27, 0.0  ;;  %4055 = vadd.xlane.f32.xlu0 %v4054_v38 }
 0x94a   :  { %v3986_v42 = vadd.f32 %v7723_v59, %v3985_v29  ;;  %4064 = vadd.xlane.f32.xlu1 %v4063_v19  ;;  %v4060_v6 = vsel %vm65_vm0, %v7781_v15, 0.0 }
 0x94b   :  { %v7792_v21 = vadd.f32 %v6515_v9, %v3991_v44  ;;  %v4295_v44 = vld [vmem:[%s8394_s10 + $0x8] sm:$0xff] }
 0x94c   :  { %v5820_v53 = vpop.f32.mrb[36].mxu1  ;;  %v7797_v11 = vadd.f32 %v6516_v50, %v3986_v42  ;;  %v6063_v38 = vpack.c.bf16 %v4295_v44, %v4294_v47 }
 0x94d   :  { %v4001_v48 = vadd.f32 %v5820_v53, %v7723_v59  ;;  %v3995_v2 = vpop.f32.mrb[37].mxu1  ;;  %v4069_v24 = vsel %vm65_vm0, %v7792_v21, 0.0  ;;  %4061 = vadd.xlane.f32.xlu0 %v4060_v6 }
 0x94e   :  { %8410 = vst [vmem:[#allocation2_spill] sm:$0xff] %v7797_v11  ;;  %v3996_v17 = vadd.f32 %v7723_v59, %v3995_v2  ;;  %4070 = vadd.xlane.f32.xlu1 %v4069_v24  ;;  %v4066_v36 = vsel %vm65_vm0, %v7797_v11, 0.0  ;;  %6064 = vmatprep.subr.bf16.mxu0 %v6063_v38 }
 0x94f   :  { %v7808_v51 = vadd.f32 %v6517_v28, %v4001_v48  ;;  %6066 = vmatpush3.bf16.msra.mxu0 %v6063_v38 }
 0x950   :  { %v7813_v31 = vadd.f32 %v6518_v35, %v3996_v17 }
 0x951   :  { %8411 = vst [vmem:[#allocation3_spill] sm:$0xff] %v7808_v51  ;;  %v4075_v52 = vsel %vm65_vm0, %v7808_v51, 0.0  ;;  %4067 = vadd.xlane.f32.xlu0 %v4066_v36 }
 0x952   :  { %8412 = vst [vmem:[#allocation4_spill] sm:$0xff] %v7813_v31  ;;  %4076 = vadd.xlane.f32.xlu1 %v4075_v52  ;;  %v4072_v57 = vsel %vm65_vm0, %v7813_v31, 0.0 }
 0x955   :  { %4073 = vadd.xlane.f32.xlu0 %v4072_v57 }
 0x97e   :  { %v5823_v10 = vpop.f32.mrb[38].mxu1 }
 0x97f   :  { %v4011_v33 = vadd.f32 %v5823_v10, %v7723_v59  ;;  %v4005_v41 = vpop.f32.mrb[39].mxu1 }
 0x980   :  { %v4006_v32 = vadd.f32 %v7723_v59, %v4005_v41 }
 0x981   :  { %v7826_v49 = vadd.f32 %v6519_v39, %v4011_v33 }
 0x982   :  { %v7831_v13 = vadd.f32 %v6520_v22, %v4006_v32  ;;  %v5826_v37 = vpop.f32.mrb[40].mxu1 }
 0x983   :  { %8413 = vst [vmem:[#allocation5_spill] sm:$0xff] %v7826_v49  ;;  %v4021_v34 = vadd.f32 %v5826_v37, %v7723_v59  ;;  %v4015_v43 = vpop.f32.mrb[41].mxu1  ;;  %v4081_v7 = vsel %vm65_vm0, %v7826_v49, 0.0 }
 0x984   :  { %8414 = vst [vmem:[#allocation6_spill] sm:$0xff] %v7831_v13  ;;  %v4016_v61 = vadd.f32 %v7723_v59, %v4015_v43  ;;  %4082 = vadd.xlane.f32.xlu1 %v4081_v7  ;;  %v4078_v23 = vsel %vm65_vm0, %v7831_v13, 0.0 }
 0x985   :  { %v7842_v3 = vadd.f32 %v6521_v45, %v4021_v34  ;;  %4079 = vadd.xlane.f32.xlu0 %v4078_v23 }
 0x986   :  { %v7847_v46 = vadd.f32 %v6522_v0, %v4016_v61 }
 0x987   :  { %8415 = vst [vmem:[#allocation7_spill] sm:$0xff] %v7842_v3  ;;  %v4087_v59 = vsel %vm65_vm0, %v7842_v3, 0.0 }
 0x988   :  { %8416 = vst [vmem:[#allocation8_spill] sm:$0xff] %v7847_v46  ;;  %4088 = vadd.xlane.f32.xlu1 %v4087_v59  ;;  %v4084_v12 = vsel %vm65_vm0, %v7847_v46, 0.0 }
 0x989   :  { %4085 = vadd.xlane.f32.xlu0 %v4084_v12 }
 0x9aa   :  { %v4047_v16 = vpop.xlane.xlu1 %4046 }
 0x9ab   :  { %v4091_v26 = vmul.f32 0.0625, %v4047_v16  ;;  %v4044_v18 = vpop.xlane.xlu0 %4043 }
 0x9ac   :  { %v4090_v58 = vmul.f32 0.0625, %v4044_v18 }
 0x9ad   :  { %v7854_v1 = vsub.f32 %v7730_v25, %v4091_v26 }
 0x9ae   :  { %v7857_v63 = vsub.f32 %v7735_v5, %v4090_v58 }
 0x9af   :  { %v4123_v30 = vmul.f32 %v7854_v1, %v7854_v1 }
 0x9b0   :  { %v4122_v20 = vmul.f32 %v7857_v63, %v7857_v63 }
 0x9b1   :  { %v4141_v14 = vsel %vm65_vm0, %v4123_v30, 0.0 }
 0x9b2   :  { %4142 = vadd.xlane.f32.xlu1 %v4141_v14  ;;  %v4138_v56 = vsel %vm65_vm0, %v4122_v20, 0.0 }
 0x9b3   :  { %4139 = vadd.xlane.f32.xlu0 %v4138_v56 }
 0x9ce   :  { %v4053_v54 = vpop.xlane.xlu0 %4052 }
 0x9cf   :  { %v4093_v40 = vmul.f32 0.0625, %v4053_v54 }
 0x9d1   :  { %v7866_v55 = vsub.f32 %v7746_v60, %v4093_v40 }
 0x9d2   :  { %v4059_v29 = vpop.xlane.xlu1 %4058  ;;  %v4050_v19 = vpop.xlane.xlu0 %4049 }
 0x9d3   :  { %v4095_v42 = vmul.f32 0.0625, %v4059_v29  ;;  %v4092_v9 = vmul.f32 0.0625, %v4050_v19  ;;  %v4125_v53 = vmul.f32 %v7866_v55, %v7866_v55 }
 0x9d5   :  { %v7877_v50 = vsub.f32 %v7760_v4, %v4095_v42  ;;  %v7880_v48 = vsub.f32 %v7751_v62, %v4092_v9  ;;  %v4147_v2 = vsel %vm65_vm0, %v4125_v53, 0.0 }
 0x9d6   :  { %v4056_v24 = vpop.xlane.xlu0 %4055  ;;  %4148 = vadd.xlane.f32.xlu1 %v4147_v2 }
 0x9d7   :  { %v4065_v6 = vpop.xlane.xlu1 %4064  ;;  %v4094_v28 = vmul.f32 0.0625, %v4056_v24  ;;  %v4127_v35 = vmul.f32 %v7877_v50, %v7877_v50  ;;  %v4124_v52 = vmul.f32 %v7880_v48, %v7880_v48 }
 0x9d8   :  { %v4097_v17 = vmul.f32 0.0625, %v4065_v6 }
 0x9d9   :  { %v7891_v57 = vsub.f32 %v7765_v8, %v4094_v28  ;;  %v4153_v10 = vsel %vm65_vm0, %v4127_v35, 0.0  ;;  %v4144_v33 = vsel %vm65_vm0, %v4124_v52, 0.0 }
 0x9da   :  { %v7888_v36 = vsub.f32 %v7776_v27, %v4097_v17  ;;  %v4062_v41 = vpop.xlane.xlu0 %4061  ;;  %4154 = vadd.xlane.f32.xlu1 %v4153_v10  ;;  %4145 = vadd.xlane.f32.xlu0 %v4144_v33 }
 0x9db   :  { %v4071_v32 = vpop.xlane.xlu1 %4070  ;;  %v4096_v39 = vmul.f32 0.0625, %v4062_v41  ;;  %v4126_v34 = vmul.f32 %v7891_v57, %v7891_v57 }
 0x9dc   :  { %v4099_v22 = vmul.f32 0.0625, %v4071_v32  ;;  %v4129_v37 = vmul.f32 %v7888_v36, %v7888_v36 }
 0x9dd   :  { %v7900_v43 = vsub.f32 %v7781_v15, %v4096_v39  ;;  %v4150_v23 = vsel %vm65_vm0, %v4126_v34, 0.0 }
 0x9de   :  { %v7903_v7 = vsub.f32 %v7792_v21, %v4099_v22  ;;  %v4159_v61 = vsel %vm65_vm0, %v4129_v37, 0.0  ;;  %4151 = vadd.xlane.f32.xlu0 %v4150_v23  ;;  %v4068_v0 = vpop.xlane.xlu0 %4067 }
 0x9df   :  { %v4077_v45 = vpop.xlane.xlu1 %4076  ;;  %4160 = vadd.xlane.f32.xlu1 %v4159_v61  ;;  %v4098_v12 = vmul.f32 0.0625, %v4068_v0  ;;  %v4128_v26 = vmul.f32 %v7900_v43, %v7900_v43 }
 0x9e0   :  { %v4101_v59 = vmul.f32 0.0625, %v4077_v45  ;;  %v4131_v16 = vmul.f32 %v7903_v7, %v7903_v7 }
 0x9e1   :  { %v7915_v58 = vsub.f32 %v7797_v11, %v4098_v12  ;;  %v4156_v20 = vsel %vm65_vm0, %v4128_v26, 0.0 }
 0x9e2   :  { %v7912_v18 = vsub.f32 %v7808_v51, %v4101_v59  ;;  %v4165_v30 = vsel %vm65_vm0, %v4131_v16, 0.0  ;;  %4157 = vadd.xlane.f32.xlu0 %v4156_v20  ;;  %v4074_v14 = vpop.xlane.xlu0 %4073  ;;  %v7958_v20 = vld [vmem:[%s8395_s8] ss:$0 sm:$0xff] }
 0x9e3   :  { %4166 = vadd.xlane.f32.xlu1 %v4165_v30  ;;  %v4100_v56 = vmul.f32 0.0625, %v4074_v14  ;;  %v4130_v40 = vmul.f32 %v7915_v58, %v7915_v58 }
 0x9e4   :  { %v4133_v54 = vmul.f32 %v7912_v18, %v7912_v18 }
 0x9e5   :  { %v7924_v47 = vsub.f32 %v7813_v31, %v4100_v56  ;;  %v4162_v29 = vsel %vm65_vm0, %v4130_v40, 0.0  ;;  %v7965_v40 = vld [vmem:[%s8396_s9] ss:$0 sm:$0xff] }
 0x9e6   :  { %v4171_v44 = vsel %vm65_vm0, %v4133_v54, 0.0  ;;  %4163 = vadd.xlane.f32.xlu0 %v4162_v29 }
 0x9e7   :  { %4172 = vadd.xlane.f32.xlu1 %v4171_v44  ;;  %v4132_v19 = vmul.f32 %v7924_v47, %v7924_v47 }
 0x9e9   :  { %v4168_v38 = vsel %vm65_vm0, %v4132_v19, 0.0 }
 0x9ea   :  { %4169 = vadd.xlane.f32.xlu0 %v4168_v38 }
 0xa11   :  { %v4083_v42 = vpop.xlane.xlu1 %4082 }
 0xa12   :  { %v4103_v9 = vmul.f32 0.0625, %v4083_v42  ;;  %v4080_v53 = vpop.xlane.xlu0 %4079 }
 0xa13   :  { %v4102_v2 = vmul.f32 0.0625, %v4080_v53 }
 0xa14   :  { %v7932_v6 = vsub.f32 %v7826_v49, %v4103_v9 }
 0xa15   :  { %v7935_v24 = vsub.f32 %v7831_v13, %v4102_v2  ;;  %v4089_v17 = vpop.xlane.xlu1 %4088 }
 0xa16   :  { %v4105_v28 = vmul.f32 0.0625, %v4089_v17  ;;  %v4086_v35 = vpop.xlane.xlu0 %4085  ;;  %v4135_v52 = vmul.f32 %v7932_v6, %v7932_v6 }
 0xa17   :  { %v4104_v10 = vmul.f32 0.0625, %v4086_v35  ;;  %v4134_v33 = vmul.f32 %v7935_v24, %v7935_v24 }
 0xa18   :  { %v7942_v41 = vsub.f32 %v7842_v3, %v4105_v28  ;;  %v4177_v32 = vsel %vm65_vm0, %v4135_v52, 0.0 }
 0xa19   :  { %v7946_v39 = vsub.f32 %v7847_v46, %v4104_v10  ;;  %4178 = vadd.xlane.f32.xlu1 %v4177_v32  ;;  %v4174_v22 = vsel %vm65_vm0, %v4134_v33, 0.0 }
 0xa1a   :  { %4175 = vadd.xlane.f32.xlu0 %v4174_v22  ;;  %v4137_v37 = vmul.f32 %v7942_v41, %v7942_v41 }
 0xa1b   :  { %v4136_v34 = vmul.f32 %v7946_v39, %v7946_v39 }
 0xa1c   :  { %v4183_v61 = vsel %vm65_vm0, %v4137_v37, 0.0 }
 0xa1d   :  { %4184 = vadd.xlane.f32.xlu1 %v4183_v61  ;;  %v4180_v23 = vsel %vm65_vm0, %v4136_v34, 0.0 }
 0xa1e   :  { %4181 = vadd.xlane.f32.xlu0 %v4180_v23 }
 0xa3f   :  { %v4143_v45 = vpop.xlane.xlu1 %4142 }
 0xa40   :  { %v4187_v0 = vmul.f32 0.0625, %v4143_v45  ;;  %v4140_v59 = vpop.xlane.xlu0 %4139 }
 0xa41   :  { %v4186_v12 = vmul.f32 0.0625, %v4140_v59 }
 0xa42   :  { %v4203_v16 = vadd.f32 1e-05, %v4187_v0 }
 0xa43   :  { %v4202_v26 = vadd.f32 1e-05, %v4186_v12 }
 0xa44   :  { %6411 = vrsqrt.f32 %v4203_v16 }
 0xa45   :  { %6413 = vrsqrt.f32 %v4202_v26 }
 0xa4e   :  { %v6412_v30 = vpop.eup %6411 }
 0xa4f   :  { %v6414_v14 = vpop.eup %6413  ;;  %v4235_v56 = vmul.f32 %v6412_v30, %v7854_v1 }
 0xa50   :  { %v4234_v54 = vmul.f32 %v6414_v14, %v7857_v63 }
 0xa51   :  { %v4257_v44 = vmul.f32 %v7958_v20, %v4235_v56 }
 0xa52   :  { %v4256_v29 = vmul.f32 %v7958_v20, %v4234_v54 }
 0xa53   :  { %v4279_v38 = vadd.f32 %v7965_v40, %v4257_v44 }
 0xa54   :  { %v4278_v19 = vadd.f32 %v7965_v40, %v4256_v29 }
 0xa56   :  { %5831 = vmatprep.mubr.msk.f32.mxu0 %vm65_vm0, %v4278_v19 }
 0xa57   :  { %5832 = vmatmul.mubr.msk.f32.vlgmr.msra.gmra.mrb[54].mxu0 %vm65_vm0, %v4279_v38 }
 0xa63   :  { %v4149_v1 = vpop.xlane.xlu1 %4148 }
 0xa64   :  { %v4189_v42 = vmul.f32 0.0625, %v4149_v1 }
 0xa66   :  { %v4205_v63 = vadd.f32 1e-05, %v4189_v42 }
 0xa67   :  { %v4155_v9 = vpop.xlane.xlu1 %4154  ;;  %v4146_v53 = vpop.xlane.xlu0 %4145 }
 0xa68   :  { %6415 = vrsqrt.f32 %v4205_v63  ;;  %v4191_v2 = vmul.f32 0.0625, %v4155_v9  ;;  %v4188_v17 = vmul.f32 0.0625, %v4146_v53 }
 0xa6a   :  { %v4207_v28 = vadd.f32 1e-05, %v4191_v2  ;;  %v4204_v35 = vadd.f32 1e-05, %v4188_v17 }
 0xa6b   :  { %v4152_v10 = vpop.xlane.xlu0 %4151 }
 0xa6c   :  { %v4161_v52 = vpop.xlane.xlu1 %4160  ;;  %6417 = vrsqrt.f32 %v4207_v28  ;;  %v4190_v32 = vmul.f32 0.0625, %v4152_v10 }
 0xa6d   :  { %v4193_v33 = vmul.f32 0.0625, %v4161_v52  ;;  %6419 = vrsqrt.f32 %v4204_v35 }
 0xa6e   :  { %v4206_v37 = vadd.f32 1e-05, %v4190_v32 }
 0xa6f   :  { %v4209_v22 = vadd.f32 1e-05, %v4193_v33  ;;  %v4158_v61 = vpop.xlane.xlu0 %4157 }
 0xa70   :  { %v4167_v34 = vpop.xlane.xlu1 %4166  ;;  %v4192_v45 = vmul.f32 0.0625, %v4158_v61 }
 0xa71   :  { %6421 = vrsqrt.f32 %v4209_v22  ;;  %v4195_v23 = vmul.f32 0.0625, %v4167_v34 }
 0xa72   :  { %6423 = vrsqrt.f32 %v4206_v37  ;;  %v6416_v0 = vpop.eup %6415  ;;  %v4208_v12 = vadd.f32 1e-05, %v4192_v45 }
 0xa73   :  { %v4211_v59 = vadd.f32 1e-05, %v4195_v23  ;;  %v4164_v26 = vpop.xlane.xlu0 %4163  ;;  %v4237_v56 = vmul.f32 %v6416_v0, %v7866_v55 }
 0xa74   :  { %v4173_v16 = vpop.xlane.xlu1 %4172  ;;  %v4194_v14 = vmul.f32 0.0625, %v4164_v26 }
 0xa75   :  { %6425 = vrsqrt.f32 %v4211_v59  ;;  %v4197_v30 = vmul.f32 0.0625, %v4173_v16  ;;  %v4259_v63 = vmul.f32 %v7958_v20, %v4237_v56 }
 0xa76   :  { %6427 = vrsqrt.f32 %v4208_v12  ;;  %v6418_v54 = vpop.eup %6417  ;;  %v4210_v29 = vadd.f32 1e-05, %v4194_v14 }
 0xa77   :  { %v4213_v44 = vadd.f32 1e-05, %v4197_v30  ;;  %v6420_v19 = vpop.eup %6419  ;;  %v4170_v38 = vpop.xlane.xlu0 %4169  ;;  %v4239_v9 = vmul.f32 %v6418_v54, %v7877_v50  ;;  %v4281_v52 = vadd.f32 %v7965_v40, %v4259_v63 }
 0xa78   :  { %v4196_v1 = vmul.f32 0.0625, %v4170_v38  ;;  %v4236_v42 = vmul.f32 %v6420_v19, %v7880_v48 }
 0xa79   :  { %6429 = vrsqrt.f32 %v4213_v44  ;;  %v4261_v10 = vmul.f32 %v7958_v20, %v4239_v9 }
 0xa7a   :  { %6431 = vrsqrt.f32 %v4210_v29  ;;  %v4212_v2 = vadd.f32 1e-05, %v4196_v1  ;;  %v4258_v17 = vmul.f32 %v7958_v20, %v4236_v42 }
 0xa7b   :  { %v6422_v53 = vpop.eup %6421 }
 0xa7c   :  { %v6424_v28 = vpop.eup %6423  ;;  %6433 = vrsqrt.f32 %v4212_v2  ;;  %v4280_v55 = vadd.f32 %v7965_v40, %v4258_v17  ;;  %v4241_v48 = vmul.f32 %v6422_v53, %v7888_v36 }
 0xa7d   :  { %v4238_v35 = vmul.f32 %v6424_v28, %v7891_v57  ;;  %v4283_v57 = vadd.f32 %v7965_v40, %v4261_v10 }
 0xa7e   :  { %5834 = vmatprep.mubr.msk.f32.mxu0 %vm65_vm0, %v4280_v55  ;;  %v4263_v34 = vmul.f32 %v7958_v20, %v4241_v48 }
 0xa7f   :  { %v6426_v33 = vpop.eup %6425  ;;  %v4260_v50 = vmul.f32 %v7958_v20, %v4238_v35  ;;  %5835 = vmatmul.mubr.msk.f32.gmra.mrb[56].mxu0 %vm65_vm0, %v4281_v52 }
 0xa80   :  { %v6428_v32 = vpop.eup %6427  ;;  %v4243_v61 = vmul.f32 %v6426_v33, %v7903_v7 }
 0xa81   :  { %v4282_v22 = vadd.f32 %v7965_v40, %v4260_v50  ;;  %v4240_v37 = vmul.f32 %v6428_v32, %v7900_v43  ;;  %v4285_v43 = vadd.f32 %v7965_v40, %v4263_v34 }
 0xa82   :  { %v4265_v12 = vmul.f32 %v7958_v20, %v4243_v61 }
 0xa83   :  { %v6430_v23 = vpop.eup %6429  ;;  %5837 = vmatprep.mubr.msk.f32.mxu0 %vm65_vm0, %v4282_v22  ;;  %v4262_v36 = vmul.f32 %v7958_v20, %v4240_v37 }
 0xa84   :  { %v6432_v45 = vpop.eup %6431  ;;  %5838 = vmatmul.mubr.msk.f32.gmra.mrb[58].mxu0 %vm65_vm0, %v4283_v57  ;;  %v4245_v16 = vmul.f32 %v6430_v23, %v7912_v18  ;;  %v4287_v56 = vadd.f32 %v7965_v40, %v4265_v12  ;;  %v4934_v12 = vld [vmem:[%s8397_s12 + $0x30] sm:$0xff] }
 0xa85   :  { %v4284_v0 = vadd.f32 %v7965_v40, %v4262_v36  ;;  %v4242_v59 = vmul.f32 %v6432_v45, %v7915_v58 }
 0xa86   :  { %v6434_v26 = vpop.eup %6433  ;;  %v4267_v54 = vmul.f32 %v7958_v20, %v4245_v16  ;;  %v4935_v16 = vld [vmem:[%s8397_s12 + $0x38] sm:$0xff] }
 0xa87   :  { %5840 = vmatprep.mubr.msk.f32.mxu0 %vm65_vm0, %v4284_v0  ;;  %v4264_v7 = vmul.f32 %v7958_v20, %v4242_v59  ;;  %v4244_v30 = vmul.f32 %v6434_v26, %v7924_v47  ;;  %v4932_v0 = vld [vmem:[%s8397_s12 + $0x20] sm:$0xff]  ;;  %v4933_v59 = vld [vmem:[%s8397_s12 + $0x28] sm:$0xff]  ;;  %v6079_v26 = vpack.c.bf16 %v4935_v16, %v4934_v12 }
 0xa88   :  { %5841 = vmatmul.mubr.msk.f32.gmra.mrb[60].mxu0 %vm65_vm0, %v4285_v43  ;;  %v4289_v44 = vadd.f32 %v7965_v40, %v4267_v54  ;;  %v6075_v43 = vpack.c.bf16 %v4933_v59, %v4932_v0 }
 0xa89   :  { %v4286_v14 = vadd.f32 %v7965_v40, %v4264_v7  ;;  %v4266_v58 = vmul.f32 %v7958_v20, %v4244_v30  ;;  %v8056_v7 = vld [vmem:[%s8398_s11] ss:$0 sm:$0xff] }
 0xa8b   :  { %5843 = vmatprep.mubr.msk.f32.mxu0 %vm65_vm0, %v4286_v14  ;;  %v4288_v18 = vadd.f32 %v7965_v40, %v4266_v58 }
 0xa8c   :  { %5844 = vmatmul.mubr.msk.f32.gmra.mrb[62].mxu0 %vm65_vm0, %v4287_v56 }
 0xa8d   :  { %5846 = vmatprep.mubr.msk.f32.mxu0 %vm65_vm0, %v4288_v18 }
 0xa90   :  { %5847 = vmatmul.mubr.msk.f32.gmra.mrb[64].mxu0 %vm65_vm0, %v4289_v44 }
 0xaa6   :  { %v4179_v47 = vpop.xlane.xlu1 %4178 }
 0xaa7   :  { %v4199_v29 = vmul.f32 0.0625, %v4179_v47  ;;  %v4176_v19 = vpop.xlane.xlu0 %4175 }
 0xaa8   :  { %v4198_v38 = vmul.f32 0.0625, %v4176_v19 }
 0xaa9   :  { %v4215_v1 = vadd.f32 1e-05, %v4199_v29 }
 0xaaa   :  { %v4214_v42 = vadd.f32 1e-05, %v4198_v38  ;;  %v4185_v63 = vpop.xlane.xlu1 %4184 }
 0xaab   :  { %6435 = vrsqrt.f32 %v4215_v1  ;;  %v4201_v9 = vmul.f32 0.0625, %v4185_v63  ;;  %v4182_v53 = vpop.xlane.xlu0 %4181 }
 0xaac   :  { %6437 = vrsqrt.f32 %v4214_v42  ;;  %v4200_v2 = vmul.f32 0.0625, %v4182_v53 }
 0xaad   :  { %v4217_v17 = vadd.f32 1e-05, %v4201_v9 }
 0xaae   :  { %v4216_v28 = vadd.f32 1e-05, %v4200_v2 }
 0xaaf   :  { %6439 = vrsqrt.f32 %v4217_v17 }
 0xab0   :  { %6441 = vrsqrt.f32 %v4216_v28 }
 0xab5   :  { %v6436_v55 = vpop.eup %6435 }
 0xab6   :  { %v6438_v35 = vpop.eup %6437  ;;  %v4247_v52 = vmul.f32 %v6436_v55, %v7932_v6 }
 0xab7   :  { %v4246_v10 = vmul.f32 %v6438_v35, %v7935_v24 }
 0xab8   :  { %v4269_v48 = vmul.f32 %v7958_v20, %v4247_v52 }
 0xab9   :  { %v6440_v33 = vpop.eup %6439  ;;  %v4268_v50 = vmul.f32 %v7958_v20, %v4246_v10 }
 0xaba   :  { %v6442_v32 = vpop.eup %6441  ;;  %v4249_v22 = vmul.f32 %v6440_v33, %v7942_v41  ;;  %v4291_v34 = vadd.f32 %v7965_v40, %v4269_v48  ;;  %v4928_v41 = vld [vmem:[%s8397_s12] sm:$0xff] }
 0xabb   :  { %v4290_v37 = vadd.f32 %v7965_v40, %v4268_v50  ;;  %v4248_v57 = vmul.f32 %v6442_v32, %v7946_v39  ;;  %v4929_v39 = vld [vmem:[%s8397_s12 + $0x8] sm:$0xff] }
 0xabc   :  { %v4271_v61 = vmul.f32 %v7958_v20, %v4249_v22  ;;  %v6067_v36 = vpack.c.bf16 %v4929_v39, %v4928_v41 }
 0xabd   :  { %5849 = vmatprep.mubr.msk.f32.mxu0 %vm65_vm0, %v4290_v37  ;;  %v4270_v6 = vmul.f32 %v7958_v20, %v4248_v57  ;;  %v4930_v20 = vld [vmem:[%s8397_s12 + $0x10] sm:$0xff] }
 0xabe   :  { %5850 = vmatmul.mubr.msk.f32.gmra.mrb[66].mxu0 %vm65_vm0, %v4291_v34  ;;  %v4293_v23 = vadd.f32 %v7965_v40, %v4271_v61  ;;  %6068 = vmatprep.subr.bf16.mxu1 %v6067_v36 }
 0xabf   :  { %v4292_v24 = vadd.f32 %v7965_v40, %v4270_v6  ;;  %6070 = vmatpush3.bf16.msra.mxu1 %v6067_v36  ;;  %v4931_v40 = vld [vmem:[%s8397_s12 + $0x18] sm:$0xff] }
 0xac0   :  { %v6071_v45 = vpack.c.bf16 %v4931_v40, %v4930_v20 }
 0xac1   :  { %5852 = vmatprep.mubr.msk.f32.mxu0 %vm65_vm0, %v4292_v24 }
 0xac2   :  { %5853 = vmatmul.mubr.msk.f32.gmra.mrb[68].mxu0 %vm65_vm0, %v4293_v23  ;;  %6072 = vmatprep.subr.bf16.mxu1 %v6071_v45 }
 0xac3   :  { %6074 = vmatpush3.bf16.msra.mxu1 %v6071_v45 }
 0xac4   :  { %6076 = vmatprep.subr.bf16.mxu1 %v6075_v43 }
 0xac7   :  { %6078 = vmatpush3.bf16.msra.mxu1 %v6075_v43 }
 0xac8   :  { %6080 = vmatprep.subr.bf16.mxu1 %v6079_v26 }
 0xacb   :  { %6082 = vmatpush3.bf16.msra.mxu1 %v6079_v26 }
 0xb2a   :  { %v5833_v30 = vpop.f32.mrb[54].mxu0 }
 0xb2b   :  { %v8059_v14 = vadd.f32 %v5833_v30, %v8056_v7  ;;  %v4417_v56 = vpop.f32.mrb[55].mxu0 }
 0xb2c   :  { %v8062_v58 = vadd.f32 %v8056_v7, %v4417_v56 }
 0xb2d   :  { %v4497_v54 = vmul.f32 0.70710677, %v8059_v14 }
 0xb2e   :  { %v4496_v18 = vmul.f32 0.70710677, %v8062_v58 }
 0xb2f   :  { %v4513_v44 = vand.u32 2147483647, %v4497_v54  ;;  %vm4833_vm3 = vcmp.lt.f32.partialorder %v4497_v54, 0.0 }
 0xb30   :  { %v4512_v47 = vand.u32 2147483647, %v4496_v18  ;;  %vm4832_vm4 = vcmp.lt.f32.partialorder %v4496_v18, 0.0 }
 0xb31   :  { %v4529_v29 = vmul.f32 0.3275911, %v4513_v44  ;;  %v4737_v42 = vsub.f32 0.0, %v4513_v44 }
 0xb32   :  { %v4528_v19 = vmul.f32 0.3275911, %v4512_v47  ;;  %v4736_v63 = vsub.f32 0.0, %v4512_v47 }
 0xb33   :  { %v4545_v38 = vadd.f32 1.0, %v4529_v29  ;;  %v4753_v53 = vmul.f32 %v4737_v42, %v4513_v44 }
 0xb34   :  { %v4544_v1 = vadd.f32 1.0, %v4528_v19  ;;  %v4752_v28 = vmul.f32 %v4736_v63, %v4512_v47 }
 0xb35   :  { %6443 = vrcp.f32 %v4545_v38  ;;  %v4770_v52 = vmul.f32 1.442695, %v4753_v53 }
 0xb36   :  { %6445 = vrcp.f32 %v4544_v1  ;;  %v4768_v33 = vmul.f32 1.442695, %v4752_v28 }
 0xb37   :  { %6447 = vpow2.f32 %v4770_v52 }
 0xb38   :  { %6449 = vpow2.f32 %v4768_v33 }
 0xb3f   :  { %v6444_v9 = vpop.eup %6443 }
 0xb40   :  { %v6446_v2 = vpop.eup %6445  ;;  %v4593_v17 = vmul.f32 1.0614054, %v6444_v9 }
 0xb41   :  { %v4592_v55 = vmul.f32 1.0614054, %v6446_v2  ;;  %v6448_v36 = vpop.eup %6447 }
 0xb42   :  { %v4609_v35 = vadd.f32 -1.4531521, %v4593_v17  ;;  %v6450_v40 = vpop.eup %6449  ;;  %v4880_v17 = vmul.f32 0.5, %v8062_v58 }
 0xb43   :  { %v4608_v10 = vadd.f32 -1.4531521, %v4592_v55 }
 0xb44   :  { %v4625_v48 = vmul.f32 %v6444_v9, %v4609_v35  ;;  %v4881_v35 = vmul.f32 0.5, %v8059_v14 }
 0xb45   :  { %v4624_v50 = vmul.f32 %v6446_v2, %v4608_v10 }
 0xb46   :  { %v4641_v32 = vadd.f32 1.4214138, %v4625_v48 }
 0xb47   :  { %v4640_v22 = vadd.f32 1.4214138, %v4624_v50 }
 0xb48   :  { %v4657_v37 = vmul.f32 %v6444_v9, %v4641_v32 }
 0xb49   :  { %v4656_v57 = vmul.f32 %v6446_v2, %v4640_v22 }
 0xb4a   :  { %v4673_v34 = vadd.f32 -0.28449672, %v4657_v37 }
 0xb4b   :  { %v4672_v61 = vadd.f32 -0.28449672, %v4656_v57 }
 0xb4c   :  { %v4689_v6 = vmul.f32 %v6444_v9, %v4673_v34 }
 0xb4d   :  { %v4688_v24 = vmul.f32 %v6446_v2, %v4672_v61 }
 0xb4e   :  { %v4705_v23 = vadd.f32 0.2548296, %v4689_v6 }
 0xb4f   :  { %v4704_v41 = vadd.f32 0.2548296, %v4688_v24 }
 0xb50   :  { %v4721_v39 = vmul.f32 %v6444_v9, %v4705_v23 }
 0xb51   :  { %v4720_v20 = vmul.f32 %v6446_v2, %v4704_v41 }
 0xb52   :  { %v4801_v45 = vmul.f32 %v6448_v36, %v4721_v39  ;;  %v5836_v59 = vpop.f32.mrb[56].mxu0 }
 0xb53   :  { %v4800_v0 = vmul.f32 %v6450_v40, %v4720_v20  ;;  %v4433_v12 = vadd.f32 %v5836_v59, %v8056_v7  ;;  %v4427_v16 = vpop.f32.mrb[57].mxu0 }
 0xb54   :  { %v4817_v43 = vsub.f32 1.0, %v4801_v45  ;;  %v4428_v30 = vadd.f32 %v8056_v7, %v4427_v16 }
 0xb55   :  { %v4816_v26 = vsub.f32 1.0, %v4800_v0  ;;  %v8068_v44 = vmul.f32 0.70710677, %v4433_v12 }
 0xb56   :  { %v4849_v56 = vsub.f32 0.0, %v4817_v43  ;;  %v8070_v29 = vmul.f32 0.70710677, %v4428_v30 }
 0xb57   :  { %v4848_v47 = vsub.f32 0.0, %v4816_v26  ;;  %v5839_v19 = vpop.f32.mrb[58].mxu0  ;;  %v4515_v1 = vand.u32 2147483647, %v8068_v44  ;;  %vm4835_vm6 = vcmp.lt.f32.partialorder %v8068_v44, 0.0 }
 0xb58   :  { %v4865_v38 = vsel %vm4833_vm3, %v4849_v56, %v4817_v43  ;;  %v4443_v42 = vadd.f32 %v5839_v19, %v8056_v7  ;;  %v4437_v63 = vpop.f32.mrb[59].mxu0  ;;  %v4514_v2 = vand.u32 2147483647, %v8070_v29  ;;  %vm4834_vm7 = vcmp.lt.f32.partialorder %v8070_v29, 0.0 }
 0xb59   :  { %v4897_v9 = vadd.f32 1.0, %v4865_v38  ;;  %v4864_v53 = vsel %vm4832_vm4, %v4848_v47, %v4816_v26  ;;  %v4531_v55 = vmul.f32 0.3275911, %v4515_v1  ;;  %v4739_v33 = vsub.f32 0.0, %v4515_v1 }
 0xb5a   :  { %v4896_v28 = vadd.f32 1.0, %v4864_v53  ;;  %v8076_v54 = vmul.f32 0.70710677, %v4443_v42  ;;  %v4530_v52 = vmul.f32 0.3275911, %v4514_v2  ;;  %v8081_v57 = vadd.f32 %v8056_v7, %v4437_v63 }
 0xb5b   :  { %v5842_v10 = vpop.f32.mrb[60].mxu0  ;;  %v4547_v48 = vadd.f32 1.0, %v4531_v55  ;;  %v4913_v22 = vmul.f32 %v4897_v9, %v4881_v35  ;;  %v4755_v61 = vmul.f32 %v4739_v33, %v4515_v1  ;;  %v4738_v6 = vsub.f32 0.0, %v4514_v2 }
 0xb5c   :  { %v4912_v18 = vmul.f32 %v4896_v28, %v4880_v17  ;;  %v4517_v50 = vand.u32 2147483647, %v8076_v54  ;;  %v4447_v32 = vpop.f32.mrb[61].mxu0  ;;  %v4546_v37 = vadd.f32 1.0, %v4530_v52  ;;  %v8085_v14 = vmul.f32 0.70710677, %v8081_v57 }
 0xb5d   :  { %6451 = vrcp.f32 %v4547_v48  ;;  %v8089_v23 = vadd.f32 %v5842_v10, %v8056_v7  ;;  %v8093_v36 = vadd.f32 %v8056_v7, %v4447_v32  ;;  %v4774_v59 = vmul.f32 1.442695, %v4755_v61 }
 0xb5e   :  { %v4533_v58 = vmul.f32 0.3275911, %v4517_v50  ;;  %5871 = vmatprep.mubr.msk.f32.mxu1 %vm4943_vm5, %v4912_v18  ;;  %6453 = vrcp.f32 %v4546_v37  ;;  %v4516_v39 = vand.u32 2147483647, %v8085_v14  ;;  %v4741_v40 = vsub.f32 0.0, %v4517_v50 }
 0xb5f   :  { %v5845_v34 = vpop.f32.mrb[62].mxu0  ;;  %5872 = vmatmul.mubr.msk.f32.vlgmr.msra.gmra.mrb[42].mxu1 %vm4943_vm5, %v4913_v22  ;;  %v8096_v20 = vmul.f32 0.70710677, %v8089_v23  ;;  %v8099_v0 = vmul.f32 0.70710677, %v8093_v36  ;;  %v4754_v43 = vmul.f32 %v4738_v6, %v4514_v2  ;;  %v8105_v47 = vmul.f32 0.5, %v4433_v12 }
 0xb60   :  { %v4549_v24 = vadd.f32 1.0, %v4533_v58  ;;  %v4457_v41 = vpop.f32.mrb[63].mxu0  ;;  %v4532_v45 = vmul.f32 0.3275911, %v4516_v39  ;;  %v8103_v26 = vadd.f32 %v5845_v34, %v8056_v7  ;;  %v4740_v38 = vsub.f32 0.0, %v4516_v39 }
 0xb61   :  { %v4519_v16 = vand.u32 2147483647, %v8096_v20  ;;  %v4518_v1 = vand.u32 2147483647, %v8099_v0  ;;  %v8110_v9 = vmul.f32 0.5, %v4428_v30  ;;  %v4757_v28 = vmul.f32 %v4741_v40, %v4517_v50 }
 0xb62   :  { %6455 = vrcp.f32 %v4549_v24  ;;  %v4548_v19 = vadd.f32 1.0, %v4532_v45  ;;  %v8113_v2 = vmul.f32 0.70710677, %v8103_v26  ;;  %v8115_v55 = vmul.f32 0.5, %v4443_v42 }
 0xb63   :  { %v5848_v56 = vpop.f32.mrb[64].mxu0  ;;  %v4535_v53 = vmul.f32 0.3275911, %v4519_v16  ;;  %v4743_v17 = vsub.f32 0.0, %v4519_v16  ;;  %v4534_v35 = vmul.f32 0.3275911, %v4518_v1  ;;  %v4756_v32 = vmul.f32 %v4740_v38, %v4516_v39 }
 0xb64   :  { %v8108_v63 = vpop.f32.mrb[65].mxu0  ;;  %6457 = vrcp.f32 %v4548_v19  ;;  %v4772_v52 = vmul.f32 1.442695, %v4754_v43  ;;  %v4742_v18 = vsub.f32 0.0, %v4518_v1  ;;  %v4521_v48 = vand.u32 2147483647, %v8113_v2 }
 0xb65   :  { %v4551_v10 = vadd.f32 1.0, %v4535_v53  ;;  %6459 = vpow2.f32 %v4774_v59  ;;  %v4550_v22 = vadd.f32 1.0, %v4534_v35  ;;  %v4759_v42 = vmul.f32 %v4743_v17, %v4519_v16 }
 0xb66   :  { %v4537_v37 = vmul.f32 0.3275911, %v4521_v48  ;;  %v4778_v34 = vmul.f32 1.442695, %v4757_v28  ;;  %v4745_v61 = vsub.f32 0.0, %v4521_v48  ;;  %v4758_v40 = vmul.f32 %v4742_v18, %v4518_v1 }
 0xb67   :  { %v8117_v12 = vpop.eup %6451  ;;  %6461 = vrcp.f32 %v4551_v10  ;;  %v8127_v43 = vadd.f32 %v8056_v7, %v4457_v41  ;;  %v4776_v19 = vmul.f32 1.442695, %v4756_v32  ;;  %v4782_v38 = vmul.f32 1.442695, %v4759_v42 }
 0xb68   :  { %v8120_v33 = vpop.eup %6453  ;;  %v4595_v30 = vmul.f32 1.0614054, %v8117_v12  ;;  %6463 = vrcp.f32 %v4550_v22  ;;  %v4553_v45 = vadd.f32 1.0, %v4537_v37  ;;  %v4761_v1 = vmul.f32 %v4745_v61, %v4521_v48 }
 0xb69   :  { %v4594_v50 = vmul.f32 1.0614054, %v8120_v33  ;;  %6465 = vpow2.f32 %v4772_v52  ;;  %v8133_v53 = vmul.f32 0.70710677, %v8127_v43  ;;  %v8136_v35 = vadd.f32 %v5848_v56, %v8056_v7 }
 0xb6a   :  { %v4611_v58 = vadd.f32 -1.4531521, %v4595_v30  ;;  %6467 = vrcp.f32 %v4553_v45  ;;  %v4780_v10 = vmul.f32 1.442695, %v4758_v40  ;;  %v8144_v22 = vmul.f32 0.5, %v8081_v57 }
 0xb6b   :  { %v4610_v24 = vadd.f32 -1.4531521, %v4594_v50  ;;  %6469 = vpow2.f32 %v4778_v34  ;;  %v4520_v52 = vand.u32 2147483647, %v8133_v53  ;;  %v8149_v42 = vmul.f32 0.70710677, %v8136_v35 }
 0xb6c   :  { %v8124_v6 = vpop.eup %6455  ;;  %v4627_v39 = vmul.f32 %v8117_v12, %v4611_v58  ;;  %6471 = vpow2.f32 %v4776_v19  ;;  %v4786_v61 = vmul.f32 1.442695, %v4761_v1  ;;  %vm4837_vm8 = vcmp.lt.f32.partialorder %v8076_v54, 0.0 }
 0xb6d   :  { %v4597_v59 = vmul.f32 1.0614054, %v8124_v6  ;;  %v4626_v16 = vmul.f32 %v8120_v33, %v4610_v24  ;;  %v4536_v50 = vmul.f32 0.3275911, %v4520_v52  ;;  %6473 = vpow2.f32 %v4782_v38 }
 0xb6e   :  { %v4643_v17 = vadd.f32 1.4214138, %v4627_v39  ;;  %v8139_v18 = vpop.eup %6457  ;;  %6475 = vpow2.f32 %v4780_v10  ;;  %vm4836_vm9 = vcmp.lt.f32.partialorder %v8085_v14, 0.0  ;;  %vm4839_vm10 = vcmp.lt.f32.partialorder %v8096_v20, 0.0 }
 0xb6f   :  { %v4613_v28 = vadd.f32 -1.4531521, %v4597_v59  ;;  %v4642_v41 = vadd.f32 1.4214138, %v4626_v16  ;;  %v4596_v56 = vmul.f32 1.0614054, %v8139_v18  ;;  %v6460_v37 = vpop.eup %6459 }
 0xb70   :  { %v4659_v30 = vmul.f32 %v8117_v12, %v4643_v17  ;;  %v4552_v57 = vadd.f32 1.0, %v4536_v50  ;;  %v4744_v17 = vsub.f32 0.0, %v4520_v52  ;;  %vm4838_vm11 = vcmp.lt.f32.partialorder %v8099_v0, 0.0 }
 0xb71   :  { %v4629_v32 = vmul.f32 %v8124_v6, %v4613_v28  ;;  %v4658_v48 = vmul.f32 %v8120_v33, %v4642_v41  ;;  %v8151_v24 = vpop.eup %6461  ;;  %v4612_v45 = vadd.f32 -1.4531521, %v4596_v56  ;;  %v8162_v41 = vand.u32 2147483647, %v8149_v42 }
 0xb72   :  { %v4675_v58 = vadd.f32 -0.28449672, %v4659_v30  ;;  %v8153_v39 = vpop.eup %6463  ;;  %v4599_v16 = vmul.f32 1.0614054, %v8151_v24  ;;  %6477 = vrcp.f32 %v4552_v57  ;;  %v4887_v20 = vmul.f32 0.5, %v8089_v23 }
 0xb73   :  { %v4645_v34 = vadd.f32 1.4214138, %v4629_v32  ;;  %v4674_v40 = vadd.f32 -0.28449672, %v4658_v48  ;;  %v4628_v38 = vmul.f32 %v8139_v18, %v4612_v45  ;;  %v4598_v1 = vmul.f32 1.0614054, %v8153_v39  ;;  %v6466_v10 = vpop.eup %6465 }
 0xb74   :  { %v4691_v59 = vmul.f32 %v8117_v12, %v4675_v58  ;;  %v4615_v48 = vadd.f32 -1.4531521, %v4599_v16  ;;  %v8164_v56 = vpop.eup %6467  ;;  %6479 = vpow2.f32 %v4786_v61  ;;  %vm4841_vm12 = vcmp.lt.f32.partialorder %v8113_v2, 0.0 }
 0xb75   :  { %v4661_v19 = vmul.f32 %v8124_v6, %v4645_v34  ;;  %v4690_v28 = vmul.f32 %v8120_v33, %v4674_v40  ;;  %v4644_v58 = vadd.f32 1.4214138, %v4628_v38  ;;  %v4614_v34 = vadd.f32 -1.4531521, %v4598_v1 }
 0xb76   :  { %v4707_v30 = vadd.f32 0.2548296, %v4691_v59  ;;  %v4631_v46 = vmul.f32 %v8151_v24, %v4615_v48  ;;  %v4601_v59 = vmul.f32 1.0614054, %v8164_v56  ;;  %v4539_v38 = vmul.f32 0.3275911, %v8162_v41 }
 0xb77   :  { %v4677_v32 = vadd.f32 -0.28449672, %v4661_v19  ;;  %v4706_v50 = vadd.f32 0.2548296, %v4690_v28  ;;  %v6470_v19 = vpop.eup %6469  ;;  %v4660_v16 = vmul.f32 %v8139_v18, %v4644_v58  ;;  %v4630_v28 = vmul.f32 %v8153_v39, %v4614_v34 }
 0xb78   :  { %v4723_v40 = vmul.f32 %v8117_v12, %v4707_v30  ;;  %v6472_v61 = vpop.eup %6471  ;;  %v4647_v30 = vadd.f32 1.4214138, %v4631_v46  ;;  %v4617_v3 = vadd.f32 -1.4531521, %v4601_v59  ;;  %v4760_v48 = vmul.f32 %v4744_v17, %v4520_v52 }
 0xb79   :  { %v4693_v45 = vmul.f32 %v8124_v6, %v4677_v32  ;;  %v4722_v57 = vmul.f32 %v8120_v33, %v4706_v50  ;;  %v4676_v32 = vadd.f32 -0.28449672, %v4660_v16  ;;  %v4646_v49 = vadd.f32 1.4214138, %v4630_v28  ;;  %v6474_v31 = vpop.eup %6473 }
 0xb7a   :  { %v4803_v1 = vmul.f32 %v6460_v37, %v4723_v40  ;;  %v4663_v33 = vmul.f32 %v8151_v24, %v4647_v30  ;;  %v4633_v50 = vmul.f32 %v8164_v56, %v4617_v3  ;;  %v6476_v58 = vpop.eup %6475  ;;  %vm4840_vm13 = vcmp.lt.f32.partialorder %v8133_v53, 0.0 }
 0xb7b   :  { %v4709_v12 = vadd.f32 0.2548296, %v4693_v45  ;;  %v4802_v13 = vmul.f32 %v6466_v10, %v4722_v57  ;;  %v4692_v37 = vmul.f32 %v8139_v18, %v4676_v32  ;;  %v4662_v46 = vmul.f32 %v8153_v39, %v4646_v49 }
 0xb7c   :  { %v4819_v51 = vsub.f32 1.0, %v4803_v1  ;;  %v4555_v10 = vadd.f32 1.0, %v4539_v38  ;;  %v4679_v52 = vadd.f32 -0.28449672, %v4663_v33  ;;  %v4649_v17 = vadd.f32 1.4214138, %v4633_v50  ;;  %v8182_v16 = vpop.eup %6477 }
 0xb7d   :  { %v4725_v11 = vmul.f32 %v8124_v6, %v4709_v12  ;;  %v4818_v34 = vsub.f32 1.0, %v4802_v13  ;;  %v4708_v57 = vadd.f32 0.2548296, %v4692_v37  ;;  %v4678_v6 = vadd.f32 -0.28449672, %v4662_v46 }
 0xb7e   :  { %v4851_v40 = vsub.f32 0.0, %v4819_v51  ;;  %6481 = vrcp.f32 %v4555_v10  ;;  %v4695_v13 = vmul.f32 %v8151_v24, %v4679_v52  ;;  %v4665_v1 = vmul.f32 %v8164_v56, %v4649_v17  ;;  %v6480_v49 = vpop.eup %6479 }
 0xb7f   :  { %v4805_v45 = vmul.f32 %v6470_v19, %v4725_v11  ;;  %v4850_v59 = vsub.f32 0.0, %v4818_v34  ;;  %v4724_v19 = vmul.f32 %v8139_v18, %v4708_v57  ;;  %v4694_v12 = vmul.f32 %v8153_v39, %v4678_v6 }
 0xb80   :  { %v4867_v3 = vsel %vm4835_vm6, %v4851_v40, %v4819_v51  ;;  %v4711_v33 = vadd.f32 0.2548296, %v4695_v13  ;;  %v4681_v50 = vadd.f32 -0.28449672, %v4665_v1  ;;  %v4600_v37 = vmul.f32 1.0614054, %v8182_v16 }
 0xb81   :  { %v4821_v28 = vsub.f32 1.0, %v4805_v45  ;;  %v4899_v38 = vadd.f32 1.0, %v4867_v3  ;;  %v4866_v11 = vsel %vm4834_vm7, %v4850_v59, %v4818_v34  ;;  %v4804_v44 = vmul.f32 %v6472_v61, %v4724_v19 }
 0xb82   :  { %v4898_v30 = vadd.f32 1.0, %v4866_v11  ;;  %v4710_v51 = vadd.f32 0.2548296, %v4694_v12  ;;  %v8195_v46 = vadd.f32 %v8056_v7, %v8108_v63  ;;  %v4727_v18 = vmul.f32 %v8151_v24, %v4711_v33 }
 0xb83   :  { %v4853_v32 = vsub.f32 0.0, %v4821_v28  ;;  %v4915_v10 = vmul.f32 %v4899_v38, %v8105_v47  ;;  %v4697_v34 = vmul.f32 %v8164_v56, %v4681_v50  ;;  %v4820_v45 = vsub.f32 1.0, %v4804_v44 }
 0xb84   :  { %v4914_v29 = vmul.f32 %v4898_v30, %v8110_v9  ;;  %v4726_v61 = vmul.f32 %v8153_v39, %v4710_v51  ;;  %v4616_v52 = vadd.f32 -1.4531521, %v4600_v37  ;;  %v4807_v17 = vmul.f32 %v6474_v31, %v4727_v18 }
 0xb85   :  { %v4869_v40 = vsel %vm4837_vm8, %v4853_v32, %v4821_v28  ;;  %v4713_v63 = vadd.f32 0.2548296, %v4697_v34  ;;  %v4784_v59 = vmul.f32 1.442695, %v4760_v48  ;;  %v4852_v47 = vsub.f32 0.0, %v4820_v45 }
 0xb86   :  { %5874 = vmatprep.mubr.msk.f32.mxu1 %vm4943_vm5, %v4914_v29  ;;  %v4806_v9 = vmul.f32 %v6476_v58, %v4726_v61  ;;  %v4632_v24 = vmul.f32 %v8182_v16, %v4616_v52  ;;  %v4901_v54 = vadd.f32 1.0, %v4869_v40  ;;  %v4823_v57 = vsub.f32 1.0, %v4807_v17 }
 0xb87   :  { %5875 = vmatmul.mubr.msk.f32.gmra.mrb[44].mxu1 %vm4943_vm5, %v4915_v10  ;;  %v4729_v39 = vmul.f32 %v8164_v56, %v4713_v63  ;;  %v4868_v31 = vsel %vm4836_vm9, %v4852_v47, %v4820_v45  ;;  %v8214_v3 = vmul.f32 0.70710677, %v8195_v46  ;;  %6483 = vpow2.f32 %v4784_v59 }
 0xb88   :  { %v8211_v14 = vpop.eup %6481  ;;  %v4822_v48 = vsub.f32 1.0, %v4806_v9  ;;  %v4648_v6 = vadd.f32 1.4214138, %v4632_v24  ;;  %v4900_v28 = vadd.f32 1.0, %v4868_v31  ;;  %v4855_v58 = vsub.f32 0.0, %v4823_v57 }
 0xb89   :  { %v4603_v13 = vmul.f32 1.0614054, %v8211_v14  ;;  %v4747_v11 = vsub.f32 0.0, %v8162_v41  ;;  %v8220_v56 = vand.u32 2147483647, %v8214_v3  ;;  %v4809_v30 = vmul.f32 %v6480_v49, %v4729_v39 }
 0xb8a   :  { %v4854_v1 = vsub.f32 0.0, %v4822_v48  ;;  %v4664_v38 = vmul.f32 %v8182_v16, %v4648_v6  ;;  %v4916_v19 = vmul.f32 %v4900_v28, %v8144_v22  ;;  %v4871_v12 = vsel %vm4839_vm10, %v4855_v58, %v4823_v57 }
 0xb8b   :  { %v4619_v32 = vadd.f32 -1.4531521, %v4603_v13  ;;  %v4917_v33 = vmul.f32 %v4901_v54, %v8115_v55  ;;  %v4903_v50 = vadd.f32 1.0, %v4871_v12  ;;  %v4886_v37 = vmul.f32 0.5, %v8093_v36 }
 0xb8c   :  { %v4870_v44 = vsel %vm4838_vm11, %v4854_v1, %v4822_v48  ;;  %v4680_v51 = vadd.f32 -0.28449672, %v4664_v38  ;;  %v4538_v18 = vmul.f32 0.3275911, %v8220_v56  ;;  %5877 = vmatprep.mubr.msk.f32.mxu1 %vm4943_vm5, %v4916_v19  ;;  %v4825_v49 = vsub.f32 1.0, %v4809_v30 }
 0xb8d   :  { %v4902_v10 = vadd.f32 1.0, %v4870_v44  ;;  %v4635_v29 = vmul.f32 %v8211_v14, %v4619_v32  ;;  %5878 = vmatmul.mubr.msk.f32.gmra.mrb[46].mxu1 %vm4943_vm5, %v4917_v33  ;;  %v4919_v45 = vmul.f32 %v4903_v50, %v4887_v20  ;;  %v4763_v61 = vmul.f32 %v4747_v11, %v8162_v41 }
 0xb8e   :  { %v4696_v22 = vmul.f32 %v8182_v16, %v4680_v51  ;;  %v4554_v34 = vadd.f32 1.0, %v4538_v18  ;;  %v4857_v9 = vsub.f32 0.0, %v4825_v49  ;;  %v4746_v1 = vsub.f32 0.0, %v8220_v56 }
 0xb8f   :  { %v4918_v55 = vmul.f32 %v4902_v10, %v4886_v37  ;;  %v4651_v0 = vadd.f32 1.4214138, %v4635_v29  ;;  %v4790_v54 = vmul.f32 1.442695, %v4763_v61  ;;  %v4888_v12 = vmul.f32 0.5, %v8127_v43 }
 0xb90   :  { %v4712_v36 = vadd.f32 0.2548296, %v4696_v22  ;;  %6485 = vrcp.f32 %v4554_v34  ;;  %v4873_v13 = vsel %vm4841_vm12, %v4857_v9, %v4825_v49  ;;  %v4762_v29 = vmul.f32 %v4746_v1, %v8220_v56 }
 0xb91   :  { %v5851_v40 = vpop.f32.mrb[66].mxu0  ;;  %v4667_v17 = vmul.f32 %v8211_v14, %v4651_v0  ;;  %5880 = vmatprep.mubr.msk.f32.mxu1 %vm4943_vm5, %v4918_v55  ;;  %v6484_v47 = vpop.eup %6483  ;;  %6487 = vpow2.f32 %v4790_v54  ;;  %v4905_v50 = vadd.f32 1.0, %v4873_v13  ;;  %v4889_v18 = vmul.f32 0.5, %v8103_v26 }
 0xb92   :  { %v4477_v52 = vpop.f32.mrb[67].mxu0  ;;  %v8239_v23 = vadd.f32 %v5851_v40, %v8056_v7  ;;  %v4728_v59 = vmul.f32 %v8182_v16, %v4712_v36  ;;  %5881 = vmatmul.mubr.msk.f32.gmra.mrb[48].mxu1 %vm4943_vm5, %v4919_v45  ;;  %v4788_v40 = vmul.f32 1.442695, %v4762_v29  ;;  %vm4843_vm14 = vcmp.lt.f32.partialorder %v8149_v42, 0.0 }
 0xb93   :  { %v8242_v63 = vadd.f32 %v8056_v7, %v4477_v52  ;;  %v4683_v31 = vadd.f32 -0.28449672, %v4667_v17  ;;  %v4921_v49 = vmul.f32 %v4905_v50, %v4889_v18  ;;  %vm4842_vm15 = vcmp.lt.f32.partialorder %v8214_v3, 0.0 }
 0xb94   :  { %v8247_v41 = vmul.f32 0.70710677, %v8239_v23  ;;  %v4808_v24 = vmul.f32 %v6484_v47, %v4728_v59 }
 0xb95   :  { %v8250_v57 = vmul.f32 0.70710677, %v8242_v63  ;;  %v5854_v39 = vpop.f32.mrb[68].mxu0  ;;  %v4699_v2 = vmul.f32 %v8211_v14, %v4683_v31 }
 0xb96   :  { %v4525_v48 = vand.u32 2147483647, %v8247_v41  ;;  %v8254_v6 = vadd.f32 %v5854_v39, %v8056_v7  ;;  %v4487_v16 = vpop.f32.mrb[69].mxu0  ;;  %v4824_v28 = vsub.f32 1.0, %v4808_v24  ;;  %vm4845_vm1 = vcmp.lt.f32.partialorder %v8247_v41, 0.0 }
 0xb97   :  { %v4524_v58 = vand.u32 2147483647, %v8250_v57  ;;  %v8260_v11 = vadd.f32 %v8056_v7, %v4487_v16  ;;  %v4715_v55 = vadd.f32 0.2548296, %v4699_v2  ;;  %vm4844_vm2 = vcmp.lt.f32.partialorder %v8250_v57, 0.0 }
 0xb98   :  { %v4541_v38 = vmul.f32 0.3275911, %v4525_v48  ;;  %v4856_v19 = vsub.f32 0.0, %v4824_v28  ;;  %v8264_v32 = vmul.f32 0.70710677, %v8254_v6  ;;  %v4749_v26 = vsub.f32 0.0, %v4525_v48 }
 0xb99   :  { %v4540_v30 = vmul.f32 0.3275911, %v4524_v58  ;;  %v8271_v43 = vmul.f32 0.70710677, %v8260_v11  ;;  %v4731_v36 = vmul.f32 %v8211_v14, %v4715_v55  ;;  %v4748_v17 = vsub.f32 0.0, %v4524_v58 }
 0xb9a   :  { %v4557_v33 = vadd.f32 1.0, %v4541_v38  ;;  %v4872_v44 = vsel %vm4840_vm13, %v4856_v19, %v4824_v28  ;;  %v4527_v37 = vand.u32 2147483647, %v8264_v32  ;;  %v6486_v7 = vpop.eup %6485  ;;  %v4765_v39 = vmul.f32 %v4749_v26, %v4525_v48 }
 0xb9b   :  { %v4556_v51 = vadd.f32 1.0, %v4540_v30  ;;  %v4904_v10 = vadd.f32 1.0, %v4872_v44  ;;  %v4602_v53 = vmul.f32 1.0614054, %v6486_v7  ;;  %v4526_v45 = vand.u32 2147483647, %v8271_v43  ;;  %v6488_v59 = vpop.eup %6487 }
 0xb9c   :  { %6489 = vrcp.f32 %v4557_v33  ;;  %v4543_v20 = vmul.f32 0.3275911, %v4527_v37  ;;  %v4811_v54 = vmul.f32 %v6488_v59, %v4731_v36  ;;  %v4764_v13 = vmul.f32 %v4748_v17, %v4524_v58 }
 0xb9d   :  { %6491 = vrcp.f32 %v4556_v51  ;;  %v4920_v22 = vmul.f32 %v4904_v10, %v4888_v12  ;;  %v4618_v0 = vadd.f32 -1.4531521, %v4602_v53  ;;  %v4542_v61 = vmul.f32 0.3275911, %v4526_v45 }
 0xb9e   :  { %v4559_v34 = vadd.f32 1.0, %v4543_v20  ;;  %v4751_v1 = vsub.f32 0.0, %v4527_v37  ;;  %v4827_v12 = vsub.f32 1.0, %v4811_v54  ;;  %v4794_v30 = vmul.f32 1.442695, %v4765_v39 }
 0xb9f   :  { %5883 = vmatprep.mubr.msk.f32.mxu1 %vm4943_vm5, %v4920_v22  ;;  %v4634_v56 = vmul.f32 %v6486_v7, %v4618_v0  ;;  %v4558_v47 = vadd.f32 1.0, %v4542_v61  ;;  %v4792_v51 = vmul.f32 1.442695, %v4764_v13  ;;  %v4750_v18 = vsub.f32 0.0, %v4526_v45 }
 0xba0   :  { %5884 = vmatmul.mubr.msk.f32.gmra.mrb[50].mxu1 %vm4943_vm5, %v4921_v49  ;;  %6493 = vrcp.f32 %v4559_v34  ;;  %v4767_v10 = vmul.f32 %v4751_v1, %v4527_v37  ;;  %v4859_v22 = vsub.f32 0.0, %v4827_v12  ;;  %vm4847_vm3 = vcmp.lt.f32.partialorder %v8264_v32, 0.0  ;;  %v5324_v32 = vld [vmem:[%s8399_s13] ss:$0 sm:$0xff] }
 0xba1   :  { %v4650_v52 = vadd.f32 1.4214138, %v4634_v56  ;;  %6495 = vpow2.f32 %v4788_v40  ;;  %v4766_v37 = vmul.f32 %v4750_v18, %v4526_v45  ;;  %vm4846_vm4 = vcmp.lt.f32.partialorder %v8271_v43, 0.0 }
 0xba2   :  { %6497 = vrcp.f32 %v4558_v47  ;;  %v4798_v40 = vmul.f32 1.442695, %v4767_v10  ;;  %v4875_v17 = vsel %vm4843_vm14, %v4859_v22, %v4827_v12 }
 0xba3   :  { %v4666_v9 = vmul.f32 %v6486_v7, %v4650_v52  ;;  %6499 = vpow2.f32 %v4794_v30  ;;  %v4796_v13 = vmul.f32 1.442695, %v4766_v37  ;;  %v4907_v1 = vadd.f32 1.0, %v4875_v17 }
 0xba4   :  { %6501 = vpow2.f32 %v4792_v51 }
 0xba5   :  { %v4682_v16 = vadd.f32 -0.28449672, %v4666_v9  ;;  %6503 = vpow2.f32 %v4798_v40 }
 0xba6   :  { %v6490_v24 = vpop.eup %6489  ;;  %6505 = vpow2.f32 %v4796_v13  ;;  %v4894_v13 = vmul.f32 0.5, %v8260_v11 }
 0xba7   :  { %v6492_v31 = vpop.eup %6491  ;;  %v4605_v28 = vmul.f32 1.0614054, %v6490_v24  ;;  %v4698_v19 = vmul.f32 %v6486_v7, %v4682_v16 }
 0xba8   :  { %v4604_v38 = vmul.f32 1.0614054, %v6492_v31 }
 0xba9   :  { %v4621_v14 = vadd.f32 -1.4531521, %v4605_v28  ;;  %v4714_v50 = vadd.f32 0.2548296, %v4698_v19  ;;  %v4890_v19 = vmul.f32 0.5, %v8195_v46 }
 0xbaa   :  { %v4620_v2 = vadd.f32 -1.4531521, %v4604_v38  ;;  %v8278_v33 = vpop.eup %6493 }
 0xbab   :  { %v4637_v44 = vmul.f32 %v6490_v24, %v4621_v14  ;;  %v4607_v48 = vmul.f32 1.0614054, %v8278_v33  ;;  %v4730_v53 = vmul.f32 %v6486_v7, %v4714_v50  ;;  %v6496_v58 = vpop.eup %6495 }
 0xbac   :  { %v4636_v29 = vmul.f32 %v6492_v31, %v4620_v2  ;;  %v6498_v56 = vpop.eup %6497  ;;  %v4891_v2 = vmul.f32 0.5, %v8136_v35 }
 0xbad   :  { %v4653_v20 = vadd.f32 1.4214138, %v4637_v44  ;;  %v4623_v49 = vadd.f32 -1.4531521, %v4607_v48  ;;  %v4810_v0 = vmul.f32 %v6496_v58, %v4730_v53  ;;  %v4606_v7 = vmul.f32 1.0614054, %v6498_v56  ;;  %v6500_v51 = vpop.eup %6499 }
 0xbae   :  { %v4652_v55 = vadd.f32 1.4214138, %v4636_v29  ;;  %v6502_v48 = vpop.eup %6501  ;;  %v4923_v18 = vmul.f32 %v4907_v1, %v4891_v2  ;;  %v4895_v1 = vmul.f32 0.5, %v8254_v6 }
 0xbaf   :  { %v4669_v34 = vmul.f32 %v6490_v24, %v4653_v20  ;;  %v4639_v26 = vmul.f32 %v8278_v33, %v4623_v49  ;;  %v4826_v61 = vsub.f32 1.0, %v4810_v0  ;;  %v4622_v39 = vadd.f32 -1.4531521, %v4606_v7  ;;  %v6504_v49 = vpop.eup %6503 }
 0xbb0   :  { %v4668_v36 = vmul.f32 %v6492_v31, %v4652_v55  ;;  %v4892_v7 = vmul.f32 0.5, %v8242_v63 }
 0xbb1   :  { %v4685_v52 = vadd.f32 -0.28449672, %v4669_v34  ;;  %v4655_v47 = vadd.f32 1.4214138, %v4639_v26  ;;  %v4858_v9 = vsub.f32 0.0, %v4826_v61  ;;  %v4638_v42 = vmul.f32 %v6498_v56, %v4622_v39 }
 0xbb2   :  { %v4684_v59 = vadd.f32 -0.28449672, %v4668_v36 }
 0xbb3   :  { %v4701_v54 = vmul.f32 %v6490_v24, %v4685_v52  ;;  %v4671_v28 = vmul.f32 %v8278_v33, %v4655_v47  ;;  %v4874_v45 = vsel %vm4842_vm15, %v4858_v9, %v4826_v61  ;;  %v4654_v44 = vadd.f32 1.4214138, %v4638_v42  ;;  %v6506_v47 = vpop.eup %6505 }
 0xbb4   :  { %v4700_v16 = vmul.f32 %v6492_v31, %v4684_v59  ;;  %v4906_v14 = vadd.f32 1.0, %v4874_v45 }
 0xbb5   :  { %v4717_v38 = vadd.f32 0.2548296, %v4701_v54  ;;  %v4687_v30 = vadd.f32 -0.28449672, %v4671_v28  ;;  %v4670_v20 = vmul.f32 %v6498_v56, %v4654_v44 }
 0xbb6   :  { %v4716_v12 = vadd.f32 0.2548296, %v4700_v16  ;;  %v4922_v10 = vmul.f32 %v4906_v14, %v4890_v19 }
 0xbb7   :  { %v4733_v50 = vmul.f32 %v6490_v24, %v4717_v38  ;;  %v4703_v29 = vmul.f32 %v8278_v33, %v4687_v30  ;;  %v4686_v55 = vadd.f32 -0.28449672, %v4670_v20 }
 0xbb8   :  { %v4732_v3 = vmul.f32 %v6492_v31, %v4716_v12  ;;  %5886 = vmatprep.mubr.msk.f32.mxu1 %vm4943_vm5, %v4922_v10 }
 0xbb9   :  { %v4813_v53 = vmul.f32 %v6500_v51, %v4733_v50  ;;  %v4719_v22 = vadd.f32 0.2548296, %v4703_v29  ;;  %5887 = vmatmul.mubr.msk.f32.gmra.mrb[52].mxu1 %vm4943_vm5, %v4923_v18  ;;  %v4702_v0 = vmul.f32 %v6498_v56, %v4686_v55 }
 0xbba   :  { %v4812_v58 = vmul.f32 %v6502_v48, %v4732_v3 }
 0xbbb   :  { %v4829_v46 = vsub.f32 1.0, %v4813_v53  ;;  %v4735_v24 = vmul.f32 %v8278_v33, %v4719_v22  ;;  %v4718_v26 = vadd.f32 0.2548296, %v4702_v0  ;;  %v4893_v33 = vmul.f32 0.5, %v8239_v23  ;;  %v8418_v0 = vld [vmem:[#allocation3_spill] sm:$0xff] }
 0xbbc   :  { %v4828_v35 = vsub.f32 1.0, %v4812_v58 }
 0xbbd   :  { %v4861_v31 = vsub.f32 0.0, %v4829_v46  ;;  %v4815_v40 = vmul.f32 %v6504_v49, %v4735_v24  ;;  %v4734_v59 = vmul.f32 %v6498_v56, %v4718_v26 }
 0xbbe   :  { %v4860_v34 = vsub.f32 0.0, %v4828_v35 }
 0xbbf   :  { %v4877_v36 = vsel %vm4845_vm1, %v4861_v31, %v4829_v46  ;;  %v4831_v52 = vsub.f32 1.0, %v4815_v40  ;;  %v4814_v39 = vmul.f32 %v6506_v47, %v4734_v59  ;;  %v8419_v40 = vld [vmem:[#allocation4_spill] sm:$0xff] }
 0xbc0   :  { %v4909_v37 = vadd.f32 1.0, %v4877_v36  ;;  %v4876_v61 = vsel %vm4844_vm2, %v4860_v34, %v4828_v35  ;;  %v8417_v35 = vld [vmem:[#allocation2_spill] sm:$0xff] }
 0xbc1   :  { %v4908_v17 = vadd.f32 1.0, %v4876_v61  ;;  %v4863_v9 = vsub.f32 0.0, %v4831_v52  ;;  %v4830_v16 = vsub.f32 1.0, %v4814_v39  ;;  %v8422_v39 = vld [vmem:[#allocation7_spill] sm:$0xff] }
 0xbc2   :  { %v4925_v41 = vmul.f32 %v4909_v37, %v4893_v33 }
 0xbc3   :  { %v4924_v54 = vmul.f32 %v4908_v17, %v4892_v7  ;;  %v4879_v57 = vsel %vm4847_vm3, %v4863_v9, %v4831_v52  ;;  %v4862_v28 = vsub.f32 0.0, %v4830_v16  ;;  %v8420_v52 = vld [vmem:[#allocation5_spill] sm:$0xff]  ;;  %v8421_v17 = vld [vmem:[#allocation6_spill] sm:$0xff] }
 0xbc4   :  { %v4911_v63 = vadd.f32 1.0, %v4879_v57 }
 0xbc5   :  { %5889 = vmatprep.mubr.msk.f32.mxu1 %vm4943_vm5, %v4924_v54  ;;  %v4878_v56 = vsel %vm4846_vm4, %v4862_v28, %v4830_v16  ;;  %v8423_v16 = vld [vmem:[#allocation8_spill] sm:$0xff] }
 0xbc6   :  { %5890 = vmatmul.mubr.msk.f32.gmra.mrb[54].mxu1 %vm4943_vm5, %v4925_v41  ;;  %v4910_v23 = vadd.f32 1.0, %v4878_v56  ;;  %v4927_v38 = vmul.f32 %v4911_v63, %v4895_v1 }
 0xbc8   :  { %v4926_v45 = vmul.f32 %v4910_v23, %v4894_v13 }
 0xbca   :  { %5892 = vmatprep.mubr.msk.f32.mxu1 %vm4943_vm5, %v4926_v45 }
 0xbcb   :  { %5893 = vmatmul.mubr.msk.f32.gmra.mrb[56].mxu1 %vm4943_vm5, %v4927_v38 }
 0xc32   :  { %v5873_v42 = vpop.f32.mrb[42].mxu1 }
 0xc33   :  { %v5064_v19 = vadd.f32 %v5873_v42, %v5324_v32  ;;  %v5058_v43 = vpop.f32.mrb[43].mxu1 }
 0xc34   :  { %v5059_v14 = vadd.f32 %v5324_v32, %v5058_v43 }
 0xc35   :  { %v5138_v12 = vadd.f32 %v5064_v19, %v7730_v25 }
 0xc36   :  { %v5137_v11 = vadd.f32 %v5059_v14, %v7735_v5 }
 0xc37   :  { %5154 = vst.msk [vmem:[%s8400_s14 + $0x8] sm:$0xff] %vm65_vm0, %v5138_v12 }
 0xc38   :  { %5153 = vst.msk [vmem:[%s8400_s14] sm:$0xff] %vm65_vm0, %v5137_v11 }
 0xc5a   :  { %v5876_v6 = vpop.f32.mrb[44].mxu1 }
 0xc5b   :  { %v5074_v30 = vadd.f32 %v5876_v6, %v5324_v32  ;;  %v5068_v2 = vpop.f32.mrb[45].mxu1 }
 0xc5c   :  { %v5069_v50 = vadd.f32 %v5324_v32, %v5068_v2 }
 0xc5d   :  { %v5140_v44 = vadd.f32 %v5074_v30, %v7746_v60 }
 0xc5e   :  { %v5139_v25 = vadd.f32 %v5069_v50, %v7751_v62 }
 0xc5f   :  { %5156 = vst.msk [vmem:[%s8400_s14 + $0x18] sm:$0xff] %vm65_vm0, %v5140_v44 }
 0xc60   :  { %5155 = vst.msk [vmem:[%s8400_s14 + $0x10] sm:$0xff] %vm65_vm0, %v5139_v25  ;;  %v5879_v5 = vpop.f32.mrb[46].mxu1 }
 0xc61   :  { %v5084_v51 = vadd.f32 %v5879_v5, %v5324_v32  ;;  %v5078_v10 = vpop.f32.mrb[47].mxu1 }
 0xc62   :  { %v5079_v3 = vadd.f32 %v5324_v32, %v5078_v10 }
 0xc63   :  { %v5142_v29 = vadd.f32 %v5084_v51, %v7760_v4 }
 0xc64   :  { %v5141_v60 = vadd.f32 %v5079_v3, %v7765_v8 }
 0xc65   :  { %v5882_v48 = vpop.f32.mrb[48].mxu1  ;;  %5158 = vst.msk [vmem:[%s8400_s14 + $0x28] sm:$0xff] %vm65_vm0, %v5142_v29 }
 0xc66   :  { %v5094_v62 = vadd.f32 %v5882_v48, %v5324_v32  ;;  %v5088_v18 = vpop.f32.mrb[49].mxu1  ;;  %5157 = vst.msk [vmem:[%s8400_s14 + $0x20] sm:$0xff] %vm65_vm0, %v5141_v60 }
 0xc67   :  { %v5089_v53 = vadd.f32 %v5324_v32, %v5088_v18 }
 0xc68   :  { %v5144_v20 = vadd.f32 %v5094_v62, %v7776_v27 }
 0xc69   :  { %v5143_v4 = vadd.f32 %v5089_v53, %v7781_v15 }
 0xc6a   :  { %5160 = vst.msk [vmem:[%s8400_s14 + $0x38] sm:$0xff] %vm65_vm0, %v5144_v20 }
 0xc6b   :  { %5159 = vst.msk [vmem:[%s8400_s14 + $0x30] sm:$0xff] %vm65_vm0, %v5143_v4 }
 0xc73   :  { %v5885_v8 = vpop.f32.mrb[50].mxu1 }
 0xc74   :  { %v5104_v58 = vadd.f32 %v5885_v8, %v5324_v32  ;;  %v5098_v22 = vpop.f32.mrb[51].mxu1 }
 0xc75   :  { %v5099_v46 = vadd.f32 %v5324_v32, %v5098_v22 }
 0xc76   :  { %v5146_v55 = vadd.f32 %v5104_v58, %v7792_v21 }
 0xc77   :  { %v5145_v27 = vadd.f32 %v5099_v46, %v8417_v35 }
 0xc78   :  { %5162 = vst.msk [vmem:[%s8400_s14 + $0x48] sm:$0xff] %vm65_vm0, %v5146_v55 }
 0xc79   :  { %5161 = vst.msk [vmem:[%s8400_s14 + $0x40] sm:$0xff] %vm65_vm0, %v5145_v27 }
 0xc8c   :  { %v5888_v15 = vpop.f32.mrb[52].mxu1 }
 0xc8d   :  { %v5114_v24 = vadd.f32 %v5888_v15, %v5324_v32  ;;  %v5108_v49 = vpop.f32.mrb[53].mxu1 }
 0xc8e   :  { %v5109_v31 = vadd.f32 %v5324_v32, %v5108_v49 }
 0xc8f   :  { %v5148_v34 = vadd.f32 %v5114_v24, %v8418_v0 }
 0xc90   :  { %v5147_v21 = vadd.f32 %v5109_v31, %v8419_v40 }
 0xc91   :  { %5164 = vst.msk [vmem:[%s8400_s14 + $0x58] sm:$0xff] %vm65_vm0, %v5148_v34 }
 0xc92   :  { %5163 = vst.msk [vmem:[%s8400_s14 + $0x50] sm:$0xff] %vm65_vm0, %v5147_v21 }
 0xc99   :  { %v5891_v36 = vpop.f32.mrb[54].mxu1 }
 0xc9a   :  { %v5124_v26 = vadd.f32 %v5891_v36, %v5324_v32  ;;  %v5118_v37 = vpop.f32.mrb[55].mxu1 }
 0xc9b   :  { %v5119_v61 = vadd.f32 %v5324_v32, %v5118_v37 }
 0xc9c   :  { %v5150_v7 = vadd.f32 %v5124_v26, %v8420_v52 }
 0xc9d   :  { %v5149_v59 = vadd.f32 %v5119_v61, %v8421_v17 }
 0xc9e   :  { %5166 = vst.msk [vmem:[%s8400_s14 + $0x68] sm:$0xff] %vm65_vm0, %v5150_v7  ;;  %v5894_v47 = vpop.f32.mrb[56].mxu1 }
 0xc9f   :  { %5165 = vst.msk [vmem:[%s8400_s14 + $0x60] sm:$0xff] %vm65_vm0, %v5149_v59  ;;  %v5134_v33 = vadd.f32 %v5894_v47, %v5324_v32  ;;  %v5128_v9 = vpop.f32.mrb[57].mxu1 }
 0xca0   :  { %v5129_v54 = vadd.f32 %v5324_v32, %v5128_v9 }
 0xca1   :  { %v5152_v41 = vadd.f32 %v5134_v33, %v8422_v39 }
 0xca2   :  { %v5151_v57 = vadd.f32 %v5129_v54, %v8423_v16 }
 0xca3   :  { %5168 = vst.msk [vmem:[%s8400_s14 + $0x78] sm:$0xff] %vm65_vm0, %v5152_v41 }
 0xca4   :  { %5167 = vst.msk [vmem:[%s8400_s14 + $0x70] sm:$0xff] %vm65_vm0, %v5151_v57 }

// kernel: _lambda_.12
= control target key start
LH: loop header
LB: loop body
LE: loop exit
PB: predicated region body
PF: predicated region fallthrough
CT: control target
= control target key end

     0   :  { %vm23_vm0 = vcmask 523264   ;;  %vm202_vm1 = vcmask 261120   ;;  %s394_s0 = inlined_call_operand.vmem [shape: f32[32,64], index: 0, kind: input, shape index: {}]   ;;  %s395_s3 = inlined_call_operand.vmem [shape: f32[64,32], index: 3, kind: input, shape index: {}]   ;;  %s396_s1 = inlined_call_operand.vmem [shape: f32[1,64], index: 1, kind: input, shape index: {}]   ;;  %s397_s2 = inlined_call_operand.vmem [shape: f32[1,64], index: 2, kind: input, shape index: {}]   ;;  %s398_s4 = inlined_call_operand.vmem [shape: f32[32,32], index: 4, kind: output, shape index: {}]  }
   0x1   :  { %v17_v0 = vld [vmem:[%s394_s0] sm:$0xff]  ;;  %v18_v1 = vld [vmem:[%s394_s0 + $0x8] sm:$0xff]  ;;  %v19_v2 = vld [vmem:[%s394_s0 + $0x10] sm:$0xff] }
   0x2   :  { %v24_v3 = vsel %vm23_vm0, %v17_v0, 0.0  ;;  %v27_v4 = vsel %vm23_vm0, %v18_v1, 0.0  ;;  %v20_v5 = vld [vmem:[%s394_s0 + $0x18] sm:$0xff]  ;;  %v30_v6 = vsel %vm23_vm0, %v19_v2, 0.0  ;;  %v97_v28 = vld [vmem:[%s395_s3] sm:$0xff]  ;;  %v98_v29 = vld [vmem:[%s395_s3 + $0x8] sm:$0xff] }
   0x3   :  { %25 = vadd.xlane.f32.xlu0 %v24_v3  ;;  %28 = vadd.xlane.f32.xlu1 %v27_v4  ;;  %v33_v7 = vsel %vm23_vm0, %v20_v5, 0.0  ;;  %v251_v30 = vpack.c.bf16 %v98_v29, %v97_v28  ;;  %v99_v31 = vld [vmem:[%s395_s3 + $0x10] sm:$0xff]  ;;  %v100_v32 = vld [vmem:[%s395_s3 + $0x18] sm:$0xff]  ;;  %v101_v34 = vld [vmem:[%s395_s3 + $0x20] sm:$0xff] }
   0x4   :  { %v255_v33 = vpack.c.bf16 %v100_v32, %v99_v31  ;;  %v102_v35 = vld [vmem:[%s395_s3 + $0x28] sm:$0xff]  ;;  %v103_v37 = vld [vmem:[%s395_s3 + $0x30] sm:$0xff]  ;;  %v104_v38 = vld [vmem:[%s395_s3 + $0x38] sm:$0xff] }
   0x5   :  { %252 = vmatprep.subr.bf16.mxu0 %v251_v30  ;;  %267 = vmatprep.subr.bf16.mxu1 %v251_v30  ;;  %v259_v36 = vpack.c.bf16 %v102_v35, %v101_v34  ;;  %v263_v39 = vpack.c.bf16 %v104_v38, %v103_v37  ;;  %v211_v53 = vld [vmem:[%s396_s1] ss:$0 sm:$0xff] }
   0x6   :  { %254 = vmatpush3.bf16.msra.mxu0 %v251_v30  ;;  %271 = vmatpush3.bf16.msra.mxu1 %v251_v30  ;;  %v212_v55 = vld [vmem:[%s397_s2] ss:$0 sm:$0xff] }
   0x7   :  { %31 = vadd.xlane.f32.xlu0 %v30_v6  ;;  %34 = vadd.xlane.f32.xlu1 %v33_v7 }
   0x8   :  { %256 = vmatprep.subr.bf16.mxu0 %v255_v33  ;;  %268 = vmatprep.subr.bf16.mxu1 %v255_v33 }
   0xa   :  { %258 = vmatpush3.bf16.msra.mxu0 %v255_v33  ;;  %272 = vmatpush3.bf16.msra.mxu1 %v255_v33 }
   0xb   :  { %260 = vmatprep.subr.bf16.mxu0 %v259_v36  ;;  %269 = vmatprep.subr.bf16.mxu1 %v259_v36 }
   0xe   :  { %262 = vmatpush3.bf16.msra.mxu0 %v259_v36  ;;  %273 = vmatpush3.bf16.msra.mxu1 %v259_v36 }
   0xf   :  { %264 = vmatprep.subr.bf16.mxu0 %v263_v39  ;;  %270 = vmatprep.subr.bf16.mxu1 %v263_v39 }
  0x12   :  { %266 = vmatpush3.bf16.msra.mxu0 %v263_v39  ;;  %274 = vmatpush3.bf16.msra.mxu1 %v263_v39 }
  0x90   :  { %v26_v8 = vpop.xlane.xlu0 %25  ;;  %v29_v9 = vpop.xlane.xlu1 %28 }
  0x91   :  { %v37_v10 = vmul.f32 0.015625, %v26_v8  ;;  %v38_v11 = vmul.f32 0.015625, %v29_v9 }
  0x93   :  { %v324_v12 = vsub.f32 %v17_v0, %v37_v10  ;;  %v326_v13 = vsub.f32 %v18_v1, %v38_v11 }
  0x94   :  { %v32_v14 = vpop.xlane.xlu0 %31  ;;  %v35_v15 = vpop.xlane.xlu1 %34 }
  0x95   :  { %v39_v16 = vmul.f32 0.015625, %v32_v14  ;;  %v40_v17 = vmul.f32 0.015625, %v35_v15  ;;  %v45_v18 = vmul.f32 %v324_v12, %v324_v12  ;;  %v46_v19 = vmul.f32 %v326_v13, %v326_v13 }
  0x97   :  { %v332_v20 = vsub.f32 %v19_v2, %v39_v16  ;;  %v334_v21 = vsub.f32 %v20_v5, %v40_v17  ;;  %v49_v22 = vsel %vm23_vm0, %v45_v18, 0.0  ;;  %v52_v23 = vsel %vm23_vm0, %v46_v19, 0.0 }
  0x98   :  { %50 = vadd.xlane.f32.xlu0 %v49_v22 }
  0x99   :  { %v47_v24 = vmul.f32 %v332_v20, %v332_v20  ;;  %v48_v25 = vmul.f32 %v334_v21, %v334_v21 }
  0x9b   :  { %v55_v26 = vsel %vm23_vm0, %v47_v24, 0.0  ;;  %v58_v27 = vsel %vm23_vm0, %v48_v25, 0.0 }
  0x9c   :  { %53 = vadd.xlane.f32.xlu0 %v52_v23  ;;  %56 = vadd.xlane.f32.xlu1 %v55_v26 }
  0xa0   :  { %59 = vadd.xlane.f32.xlu1 %v58_v27 }
 0x125   :  { %v51_v40 = vpop.xlane.xlu0 %50 }
 0x126   :  { %v61_v41 = vmul.f32 0.015625, %v51_v40 }
 0x128   :  { %v65_v42 = vadd.f32 1e-05, %v61_v41 }
 0x129   :  { %v57_v43 = vpop.xlane.xlu1 %56  ;;  %v54_v44 = vpop.xlane.xlu0 %53 }
 0x12a   :  { %275 = vrsqrt.f32 %v65_v42  ;;  %v63_v45 = vmul.f32 0.015625, %v57_v43  ;;  %v62_v46 = vmul.f32 0.015625, %v54_v44 }
 0x12c   :  { %v67_v47 = vadd.f32 1e-05, %v63_v45  ;;  %v66_v48 = vadd.f32 1e-05, %v62_v46 }
 0x12d   :  { %v60_v49 = vpop.xlane.xlu1 %59 }
 0x12e   :  { %277 = vrsqrt.f32 %v67_v47  ;;  %v64_v50 = vmul.f32 0.015625, %v60_v49 }
 0x12f   :  { %279 = vrsqrt.f32 %v66_v48 }
 0x130   :  { %v68_v51 = vadd.f32 1e-05, %v64_v50 }
 0x132   :  { %281 = vrsqrt.f32 %v68_v51 }
 0x134   :  { %v276_v52 = vpop.eup %275 }
 0x135   :  { %v73_v54 = vmul.f32 %v276_v52, %v324_v12 }
 0x137   :  { %v83_v56 = vmul.f32 %v211_v53, %v73_v54 }
 0x138   :  { %v278_v57 = vpop.eup %277 }
 0x139   :  { %v280_v58 = vpop.eup %279  ;;  %v93_v59 = vadd.f32 %v212_v55, %v83_v56  ;;  %v75_v60 = vmul.f32 %v278_v57, %v332_v20 }
 0x13a   :  { %v74_v61 = vmul.f32 %v280_v58, %v326_v13 }
 0x13b   :  { %245 = vmatprep.mubr.msk.f32.mxu0 %vm23_vm0, %v93_v59  ;;  %v85_v62 = vmul.f32 %v211_v53, %v75_v60 }
 0x13c   :  { %v282_v63 = vpop.eup %281  ;;  %v84_v0 = vmul.f32 %v211_v53, %v74_v61 }
 0x13d   :  { %v95_v1 = vadd.f32 %v212_v55, %v85_v62  ;;  %v76_v2 = vmul.f32 %v282_v63, %v334_v21 }
 0x13e   :  { %v94_v3 = vadd.f32 %v212_v55, %v84_v0 }
 0x13f   :  { %248 = vmatprep.mubr.msk.f32.mxu1 %vm23_vm0, %v95_v1  ;;  %v86_v4 = vmul.f32 %v211_v53, %v76_v2 }
 0x140   :  { %246 = vmatmul.mubr.msk.f32.vlgmr.msra.gmra.mrb[0].mxu0 %vm23_vm0, %v94_v3 }
 0x141   :  { %v96_v5 = vadd.f32 %v212_v55, %v86_v4 }
 0x143   :  { %249 = vmatmul.mubr.msk.f32.vlgmr.msra.gmra.mrb[0].mxu1 %vm23_vm0, %v96_v5 }
 0x213   :  { %v247_v6 = vpop.f32.mrb[0].mxu0 }
 0x214   :  { %204 = vst.msk [vmem:[%s398_s4 + $0x8] sm:$0xff] %vm202_vm1, %v247_v6  ;;  %v183_v7 = vpop.f32.mrb[1].mxu0 }
 0x215   :  { %203 = vst.msk [vmem:[%s398_s4] sm:$0xff] %vm202_vm1, %v183_v7 }
 0x216   :  { %v250_v8 = vpop.f32.mrb[0].mxu1 }
 0x217   :  { %206 = vst.msk [vmem:[%s398_s4 + $0x18] sm:$0xff] %vm202_vm1, %v250_v8  ;;  %v193_v9 = vpop.f32.mrb[1].mxu1 }
 0x218   :  { %205 = vst.msk [vmem:[%s398_s4 + $0x10] sm:$0xff] %vm202_vm1, %v193_v9 }

// kernel: _lambda_.11
= control target key start
LH: loop header
LB: loop body
LE: loop exit
PB: predicated region body
PF: predicated region fallthrough
CT: control target
= control target key end

     0   :  { %vm68_vm0 = vcmask 130048   ;;  %vm566_vm1 = vcmask 64512   ;;  %s6574_s27 = smov 112   ;;  %s6576_s28 = smov 104   ;;  %vm4994_vm5 = vcmask 523264   ;;  %s8574_s0 = inlined_call_operand.vmem [shape: f32[128,16], index: 0, kind: input, shape index: {}]   ;;  %s8575_s3 = inlined_call_operand.vmem [shape: f32[16,48], index: 3, kind: input, shape index: {}]   ;;  %s8576_s1 = inlined_call_operand.vmem [shape: f32[1,16], index: 1, kind: input, shape index: {}, may-alias: {1,9}]   ;;  %s8577_s2 = inlined_call_operand.vmem [shape: f32[1,16], index: 2, kind: input, shape index: {}, may-alias: {2,6,10,14}]   ;;  %s8578_s4 = inlined_call_operand.vmem [shape: f32[1,48], index: 4, kind: input, shape index: {}]   ;;  %s8579_s7 = inlined_call_operand.vmem [shape: f32[2,16,16], index: 7, kind: input, shape index: {}]   ;;  %s8580_s8 = inlined_call_operand.vmem [shape: f32[8,16,16], index: 8, kind: input, shape index: {}]   ;;  %s8581_s5 = inlined_call_operand.vmem [shape: f32[16,16], index: 5, kind: input, shape index: {}]   ;;  %s8582_s6 = inlined_call_operand.vmem [shape: f32[1,16], index: 6, kind: input, shape index: {}, may-alias: {2,6,10,14}]   ;;  %s8583_s11 = inlined_call_operand.vmem [shape: f32[16,64], index: 11, kind: input, shape index: {}]   ;;  %s8584_s9 = inlined_call_operand.vmem [shape: f32[1,16], index: 9, kind: input, shape index: {}, may-alias: {1,9}]   ;;  %s8585_s10 = inlined_call_operand.vmem [shape: f32[1,16], index: 10, kind: input, shape index: {}, may-alias: {2,6,10,14}]   ;;  %s8586_s13 = inlined_call_operand.vmem [shape: f32[64,16], index: 13, kind: input, shape index: {}]   ;;  %s8587_s12 = inlined_call_operand.vmem [shape: f32[1,64], index: 12, kind: input, shape index: {}]   ;;  %s8588_s14 = inlined_call_operand.vmem [shape: f32[1,16], index: 14, kind: input, shape index: {}, may-alias: {2,6,10,14}]   ;;  %s8589_s15 = inlined_call_operand.vmem [shape: f32[128,16], index: 15, kind: output, shape index: {}]  }
   0x1   :  { %v50_v0 = vld [vmem:[%s8574_s0] sm:$0xff]  ;;  %v52_v1 = vld [vmem:[%s8574_s0 + $0x10] sm:$0xff]  ;;  %v51_v2 = vld [vmem:[%s8574_s0 + $0x8] sm:$0xff]  ;;  %s6577_s29 = smov 120   ;;  %s6579_s21 = smov 8  }
   0x2   :  { %v69_v3 = vsel %vm68_vm0, %v50_v0, 0.0  ;;  %v75_v4 = vsel %vm68_vm0, %v52_v1, 0.0  ;;  %v53_v5 = vld [vmem:[%s8574_s0 + $0x18] sm:$0xff]  ;;  %v72_v6 = vsel %vm68_vm0, %v51_v2, 0.0  ;;  %v54_v8 = vld [vmem:[%s8574_s0 + $0x20] sm:$0xff]  ;;  %v55_v9 = vld [vmem:[%s8574_s0 + $0x28] sm:$0xff] }
   0x3   :  { %70 = vadd.xlane.f32.xlu0 %v69_v3  ;;  %76 = vadd.xlane.f32.xlu1 %v75_v4  ;;  %v78_v7 = vsel %vm68_vm0, %v53_v5, 0.0  ;;  %v81_v10 = vsel %vm68_vm0, %v54_v8, 0.0  ;;  %v84_v11 = vsel %vm68_vm0, %v55_v9, 0.0  ;;  %v6687_v12 = vld [vmem:[%s8574_s0 + $0x30] sm:$0xff]  ;;  %v6692_v13 = vld [vmem:[%s8574_s0 + $0x38] sm:$0xff]  ;;  %v6701_v16 = vld [vmem:[%s8574_s0 + $0x40] sm:$0xff] }
   0x4   :  { %v87_v14 = vsel %vm68_vm0, %v6687_v12, 0.0  ;;  %v90_v15 = vsel %vm68_vm0, %v6692_v13, 0.0  ;;  %v6706_v17 = vld [vmem:[%s8574_s0 + $0x48] sm:$0xff]  ;;  %v93_v18 = vsel %vm68_vm0, %v6701_v16, 0.0  ;;  %v6715_v20 = vld [vmem:[%s8574_s0 + $0x50] sm:$0xff]  ;;  %v6720_v21 = vld [vmem:[%s8574_s0 + $0x58] sm:$0xff] }
   0x5   :  { %v96_v19 = vsel %vm68_vm0, %v6706_v17, 0.0  ;;  %v99_v22 = vsel %vm68_vm0, %v6715_v20, 0.0  ;;  %v102_v23 = vsel %vm68_vm0, %v6720_v21, 0.0  ;;  %v6729_v24 = vld [vmem:[%s8574_s0 + $0x60] sm:$0xff]  ;;  %v6734_v25 = vld [vmem:[%s8574_s0 + $0x68] sm:$0xff]  ;;  %v6743_v28 = vld [vmem:[%s8574_s0 + $0x70] sm:$0xff] }
   0x6   :  { %v105_v26 = vsel %vm68_vm0, %v6729_v24, 0.0  ;;  %v108_v27 = vsel %vm68_vm0, %v6734_v25, 0.0  ;;  %v6748_v29 = vld [vmem:[%s8574_s0 + $0x78] sm:$0xff]  ;;  %v111_v30 = vsel %vm68_vm0, %v6743_v28, 0.0  ;;  %vm7021_vm2 = vmpackc.low %vm566_vm1, %vm566_vm1 }
   0x7   :  { %73 = vadd.xlane.f32.xlu0 %v72_v6  ;;  %79 = vadd.xlane.f32.xlu1 %v78_v7  ;;  %v114_v31 = vsel %vm68_vm0, %v6748_v29, 0.0 }
   0xb   :  { %82 = vadd.xlane.f32.xlu0 %v81_v10  ;;  %85 = vadd.xlane.f32.xlu1 %v84_v11 }
   0xf   :  { %88 = vadd.xlane.f32.xlu0 %v87_v14  ;;  %91 = vadd.xlane.f32.xlu1 %v90_v15 }
  0x13   :  { %94 = vadd.xlane.f32.xlu0 %v93_v18  ;;  %97 = vadd.xlane.f32.xlu1 %v96_v19 }
  0x17   :  { %100 = vadd.xlane.f32.xlu0 %v99_v22  ;;  %103 = vadd.xlane.f32.xlu1 %v102_v23 }
  0x1b   :  { %106 = vadd.xlane.f32.xlu0 %v105_v26  ;;  %109 = vadd.xlane.f32.xlu1 %v108_v27 }
  0x1f   :  { %112 = vadd.xlane.f32.xlu0 %v111_v30  ;;  %115 = vadd.xlane.f32.xlu1 %v114_v31 }
  0x90   :  { %v71_v32 = vpop.xlane.xlu0 %70  ;;  %v77_v33 = vpop.xlane.xlu1 %76 }
  0x91   :  { %v118_v34 = vmul.f32 0.0625, %v71_v32  ;;  %v120_v35 = vmul.f32 0.0625, %v77_v33 }
  0x93   :  { %v6754_v36 = vsub.f32 %v50_v0, %v118_v34  ;;  %v6756_v37 = vsub.f32 %v52_v1, %v120_v35 }
  0x94   :  { %v74_v38 = vpop.xlane.xlu0 %73  ;;  %v80_v39 = vpop.xlane.xlu1 %79 }
  0x95   :  { %v119_v40 = vmul.f32 0.0625, %v74_v38  ;;  %v121_v41 = vmul.f32 0.0625, %v80_v39  ;;  %v150_v42 = vmul.f32 %v6754_v36, %v6754_v36  ;;  %v152_v43 = vmul.f32 %v6756_v37, %v6756_v37 }
  0x97   :  { %v6762_v44 = vsub.f32 %v51_v2, %v119_v40  ;;  %v6764_v45 = vsub.f32 %v53_v5, %v121_v41  ;;  %v166_v46 = vsel %vm68_vm0, %v150_v42, 0.0  ;;  %v172_v49 = vsel %vm68_vm0, %v152_v43, 0.0 }
  0x98   :  { %167 = vadd.xlane.f32.xlu0 %v166_v46  ;;  %v83_v47 = vpop.xlane.xlu0 %82  ;;  %v86_v48 = vpop.xlane.xlu1 %85 }
  0x99   :  { %v122_v50 = vmul.f32 0.0625, %v83_v47  ;;  %v123_v51 = vmul.f32 0.0625, %v86_v48  ;;  %v151_v52 = vmul.f32 %v6762_v44, %v6762_v44  ;;  %v153_v53 = vmul.f32 %v6764_v45, %v6764_v45 }
  0x9b   :  { %v6772_v54 = vsub.f32 %v54_v8, %v122_v50  ;;  %v6774_v55 = vsub.f32 %v55_v9, %v123_v51  ;;  %v169_v56 = vsel %vm68_vm0, %v151_v52, 0.0  ;;  %v175_v59 = vsel %vm68_vm0, %v153_v53, 0.0  ;;  %v323_v53 = vld [vmem:[%s8575_s3 + $0x8] sm:$0xff] }
  0x9c   :  { %173 = vadd.xlane.f32.xlu0 %v172_v49  ;;  %170 = vadd.xlane.f32.xlu1 %v169_v56  ;;  %v89_v57 = vpop.xlane.xlu0 %88  ;;  %v92_v58 = vpop.xlane.xlu1 %91 }
  0x9d   :  { %v124_v60 = vmul.f32 0.0625, %v89_v57  ;;  %v125_v61 = vmul.f32 0.0625, %v92_v58  ;;  %v154_v62 = vmul.f32 %v6772_v54, %v6772_v54  ;;  %v155_v63 = vmul.f32 %v6774_v55, %v6774_v55 }
  0x9f   :  { %v6783_v0 = vsub.f32 %v6687_v12, %v124_v60  ;;  %v6786_v1 = vsub.f32 %v6692_v13, %v125_v61  ;;  %v178_v2 = vsel %vm68_vm0, %v154_v62, 0.0  ;;  %v181_v5 = vsel %vm68_vm0, %v155_v63, 0.0 }
  0xa0   :  { %176 = vadd.xlane.f32.xlu1 %v175_v59  ;;  %179 = vadd.xlane.f32.xlu0 %v178_v2  ;;  %v95_v3 = vpop.xlane.xlu0 %94  ;;  %v98_v4 = vpop.xlane.xlu1 %97 }
  0xa1   :  { %v126_v6 = vmul.f32 0.0625, %v95_v3  ;;  %v127_v7 = vmul.f32 0.0625, %v98_v4  ;;  %v156_v8 = vmul.f32 %v6783_v0, %v6783_v0  ;;  %v157_v9 = vmul.f32 %v6786_v1, %v6786_v1 }
  0xa3   :  { %v6795_v10 = vsub.f32 %v6701_v16, %v126_v6  ;;  %v6798_v11 = vsub.f32 %v6706_v17, %v127_v7  ;;  %v184_v12 = vsel %vm68_vm0, %v156_v8, 0.0  ;;  %v187_v15 = vsel %vm68_vm0, %v157_v9, 0.0 }
  0xa4   :  { %182 = vadd.xlane.f32.xlu1 %v181_v5  ;;  %185 = vadd.xlane.f32.xlu0 %v184_v12  ;;  %v101_v13 = vpop.xlane.xlu0 %100  ;;  %v104_v14 = vpop.xlane.xlu1 %103 }
  0xa5   :  { %v128_v18 = vmul.f32 0.0625, %v101_v13  ;;  %v129_v19 = vmul.f32 0.0625, %v104_v14  ;;  %v158_v22 = vmul.f32 %v6795_v10, %v6795_v10  ;;  %v159_v16 = vmul.f32 %v6798_v11, %v6798_v11 }
  0xa7   :  { %v6807_v23 = vsub.f32 %v6715_v20, %v128_v18  ;;  %v6810_v17 = vsub.f32 %v6720_v21, %v129_v19  ;;  %v190_v26 = vsel %vm68_vm0, %v158_v22, 0.0  ;;  %v193_v31 = vsel %vm68_vm0, %v159_v16, 0.0  ;;  %v6853_v16 = vld [vmem:[%s8576_s1] ss:$0 sm:$0xff] }
  0xa8   :  { %188 = vadd.xlane.f32.xlu1 %v187_v15  ;;  %191 = vadd.xlane.f32.xlu0 %v190_v26  ;;  %v107_v27 = vpop.xlane.xlu0 %106  ;;  %v110_v30 = vpop.xlane.xlu1 %109 }
  0xa9   :  { %v130_v32 = vmul.f32 0.0625, %v107_v27  ;;  %v131_v33 = vmul.f32 0.0625, %v110_v30  ;;  %v160_v34 = vmul.f32 %v6807_v23, %v6807_v23  ;;  %v161_v20 = vmul.f32 %v6810_v17, %v6810_v17 }
  0xab   :  { %v6819_v35 = vsub.f32 %v6729_v24, %v130_v32  ;;  %v6822_v21 = vsub.f32 %v6734_v25, %v131_v33  ;;  %v196_v38 = vsel %vm68_vm0, %v160_v34, 0.0  ;;  %v199_v41 = vsel %vm68_vm0, %v161_v20, 0.0  ;;  %v6859_v33 = vld [vmem:[%s8577_s2] ss:$0 sm:$0xff] }
  0xac   :  { %194 = vadd.xlane.f32.xlu1 %v193_v31  ;;  %197 = vadd.xlane.f32.xlu0 %v196_v38  ;;  %v113_v39 = vpop.xlane.xlu0 %112  ;;  %v116_v40 = vpop.xlane.xlu1 %115 }
  0xad   :  { %v132_v42 = vmul.f32 0.0625, %v113_v39  ;;  %v133_v43 = vmul.f32 0.0625, %v116_v40  ;;  %v162_v46 = vmul.f32 %v6819_v35, %v6819_v35  ;;  %v163_v24 = vmul.f32 %v6822_v21, %v6822_v21 }
  0xaf   :  { %v6831_v47 = vsub.f32 %v6743_v28, %v132_v42  ;;  %v6834_v25 = vsub.f32 %v6748_v29, %v133_v43  ;;  %v202_v48 = vsel %vm68_vm0, %v162_v46, 0.0  ;;  %v205_v49 = vsel %vm68_vm0, %v163_v24, 0.0  ;;  %v322_v29 = vld [vmem:[%s8575_s3] sm:$0xff] }
  0xb0   :  { %200 = vadd.xlane.f32.xlu1 %v199_v41  ;;  %203 = vadd.xlane.f32.xlu0 %v202_v48  ;;  %v5946_v56 = vpack.c.bf16 %v323_v53, %v322_v29 }
  0xb1   :  { %v164_v50 = vmul.f32 %v6831_v47, %v6831_v47  ;;  %v165_v51 = vmul.f32 %v6834_v25, %v6834_v25 }
  0xb2   :  { %5947 = vmatprep.subr.bf16.mxu0 %v5946_v56 }
  0xb3   :  { %v208_v52 = vsel %vm68_vm0, %v164_v50, 0.0  ;;  %v211_v28 = vsel %vm68_vm0, %v165_v51, 0.0  ;;  %5949 = vmatpush3.bf16.msra.mxu0 %v5946_v56 }
  0xb4   :  { %206 = vadd.xlane.f32.xlu1 %v205_v49  ;;  %209 = vadd.xlane.f32.xlu0 %v208_v52 }
  0xb8   :  { %212 = vadd.xlane.f32.xlu1 %v211_v28 }
 0x125   :  { %v168_v57 = vpop.xlane.xlu0 %167 }
 0x126   :  { %v214_v58 = vmul.f32 0.0625, %v168_v57 }
 0x128   :  { %v230_v59 = vadd.f32 1e-05, %v214_v58 }
 0x129   :  { %v171_v60 = vpop.xlane.xlu1 %170  ;;  %v174_v61 = vpop.xlane.xlu0 %173 }
 0x12a   :  { %6302 = vrsqrt.f32 %v230_v59  ;;  %v215_v62 = vmul.f32 0.0625, %v171_v60  ;;  %v216_v63 = vmul.f32 0.0625, %v174_v61 }
 0x12c   :  { %v231_v2 = vadd.f32 1e-05, %v215_v62  ;;  %v232_v3 = vadd.f32 1e-05, %v216_v63 }
 0x12d   :  { %v177_v4 = vpop.xlane.xlu1 %176  ;;  %v180_v5 = vpop.xlane.xlu0 %179 }
 0x12e   :  { %6304 = vrsqrt.f32 %v231_v2  ;;  %v217_v6 = vmul.f32 0.0625, %v177_v4  ;;  %v218_v7 = vmul.f32 0.0625, %v180_v5 }
 0x12f   :  { %6306 = vrsqrt.f32 %v232_v3 }
 0x130   :  { %v233_v8 = vadd.f32 1e-05, %v217_v6  ;;  %v234_v9 = vadd.f32 1e-05, %v218_v7 }
 0x131   :  { %v183_v12 = vpop.xlane.xlu1 %182  ;;  %v186_v13 = vpop.xlane.xlu0 %185 }
 0x132   :  { %6308 = vrsqrt.f32 %v233_v8  ;;  %v219_v14 = vmul.f32 0.0625, %v183_v12  ;;  %v220_v15 = vmul.f32 0.0625, %v186_v13 }
 0x133   :  { %6310 = vrsqrt.f32 %v234_v9 }
 0x134   :  { %v6303_v18 = vpop.eup %6302  ;;  %v235_v19 = vadd.f32 1e-05, %v219_v14  ;;  %v236_v22 = vadd.f32 1e-05, %v220_v15 }
 0x135   :  { %v189_v26 = vpop.xlane.xlu1 %188  ;;  %v192_v27 = vpop.xlane.xlu0 %191  ;;  %v262_v30 = vmul.f32 %v6303_v18, %v6754_v36 }
 0x136   :  { %6312 = vrsqrt.f32 %v235_v19  ;;  %v221_v31 = vmul.f32 0.0625, %v189_v26  ;;  %v222_v32 = vmul.f32 0.0625, %v192_v27 }
 0x137   :  { %6314 = vrsqrt.f32 %v236_v22  ;;  %v284_v34 = vmul.f32 %v6853_v16, %v262_v30 }
 0x138   :  { %v6305_v20 = vpop.eup %6304  ;;  %v237_v38 = vadd.f32 1e-05, %v221_v31  ;;  %v238_v39 = vadd.f32 1e-05, %v222_v32 }
 0x139   :  { %v6307_v40 = vpop.eup %6306  ;;  %v195_v41 = vpop.xlane.xlu1 %194  ;;  %v306_v43 = vadd.f32 %v6859_v33, %v284_v34  ;;  %v263_v36 = vmul.f32 %v6305_v20, %v6762_v44 }
 0x13a   :  { %v198_v42 = vpop.xlane.xlu0 %197  ;;  %6316 = vrsqrt.f32 %v237_v38  ;;  %v223_v46 = vmul.f32 0.0625, %v195_v41  ;;  %v264_v48 = vmul.f32 %v6307_v40, %v6756_v37 }
 0x13b   :  { %v224_v24 = vmul.f32 0.0625, %v198_v42  ;;  %6318 = vrsqrt.f32 %v238_v39  ;;  %5602 = vmatprep.mubr.msk.f32.mxu0 %vm68_vm0, %v306_v43  ;;  %v285_v49 = vmul.f32 %v6853_v16, %v263_v36 }
 0x13c   :  { %v6309_v50 = vpop.eup %6308  ;;  %v239_v51 = vadd.f32 1e-05, %v223_v46  ;;  %v286_v28 = vmul.f32 %v6853_v16, %v264_v48 }
 0x13d   :  { %v240_v52 = vadd.f32 1e-05, %v224_v24  ;;  %v6311_v29 = vpop.eup %6310  ;;  %v201_v53 = vpop.xlane.xlu1 %200  ;;  %v307_v44 = vadd.f32 %v6859_v33, %v285_v49  ;;  %v265_v57 = vmul.f32 %v6309_v50, %v6764_v45 }
 0x13e   :  { %v204_v56 = vpop.xlane.xlu0 %203  ;;  %6320 = vrsqrt.f32 %v239_v51  ;;  %v225_v58 = vmul.f32 0.0625, %v201_v53  ;;  %v308_v59 = vadd.f32 %v6859_v33, %v286_v28  ;;  %v266_v61 = vmul.f32 %v6311_v29, %v6772_v54 }
 0x13f   :  { %v226_v37 = vmul.f32 0.0625, %v204_v56  ;;  %6322 = vrsqrt.f32 %v240_v52  ;;  %5603 = vmatmul.mubr.msk.f32.vlgmr.msra.gmra.mrb[0].mxu0 %vm68_vm0, %v307_v44  ;;  %v287_v60 = vmul.f32 %v6853_v16, %v265_v57 }
 0x140   :  { %v6313_v62 = vpop.eup %6312  ;;  %v241_v63 = vadd.f32 1e-05, %v225_v58  ;;  %5605 = vmatprep.mubr.msk.f32.mxu0 %vm68_vm0, %v308_v59  ;;  %v288_v6 = vmul.f32 %v6853_v16, %v266_v61  ;;  %v5226_v59 = vld [vmem:[%s8578_s4] ss:$0 sm:$0xff]  ;;  %s6575_s4 = smov 96  }
 0x141   :  { %v242_v2 = vadd.f32 1e-05, %v226_v37  ;;  %v6315_v3 = vpop.eup %6314  ;;  %v207_v4 = vpop.xlane.xlu1 %206  ;;  %v309_v5 = vadd.f32 %v6859_v33, %v287_v60  ;;  %v267_v7 = vmul.f32 %v6313_v62, %v6774_v55 }
 0x142   :  { %v210_v45 = vpop.xlane.xlu0 %209  ;;  %6324 = vrsqrt.f32 %v241_v63  ;;  %v227_v8 = vmul.f32 0.0625, %v207_v4  ;;  %v268_v12 = vmul.f32 %v6315_v3, %v6783_v0  ;;  %v310_v54 = vadd.f32 %v6859_v33, %v288_v6 }
 0x143   :  { %v228_v9 = vmul.f32 0.0625, %v210_v45  ;;  %6326 = vrsqrt.f32 %v242_v2  ;;  %5606 = vmatmul.mubr.msk.f32.gmra.mrb[2].mxu0 %vm68_vm0, %v309_v5  ;;  %v289_v13 = vmul.f32 %v6853_v16, %v267_v7 }
 0x144   :  { %v6317_v14 = vpop.eup %6316  ;;  %v243_v15 = vadd.f32 1e-05, %v227_v8  ;;  %v290_v19 = vmul.f32 %v6853_v16, %v268_v12  ;;  %5608 = vmatprep.mubr.msk.f32.mxu0 %vm68_vm0, %v310_v54 }
 0x145   :  { %v244_v18 = vadd.f32 1e-05, %v228_v9  ;;  %v6319_v22 = vpop.eup %6318  ;;  %v213_v55 = vpop.xlane.xlu1 %212  ;;  %v311_v26 = vadd.f32 %v6859_v33, %v289_v13  ;;  %v269_v0 = vmul.f32 %v6317_v14, %v6786_v1 }
 0x146   :  { %6328 = vrsqrt.f32 %v243_v15  ;;  %v229_v27 = vmul.f32 0.0625, %v213_v55  ;;  %v312_v30 = vadd.f32 %v6859_v33, %v290_v19  ;;  %v270_v31 = vmul.f32 %v6319_v22, %v6795_v10 }
 0x147   :  { %6330 = vrsqrt.f32 %v244_v18  ;;  %5609 = vmatmul.mubr.msk.f32.gmra.mrb[4].mxu0 %vm68_vm0, %v311_v26  ;;  %v291_v32 = vmul.f32 %v6853_v16, %v269_v0 }
 0x148   :  { %v6321_v34 = vpop.eup %6320  ;;  %v245_v20 = vadd.f32 1e-05, %v229_v27  ;;  %5611 = vmatprep.mubr.msk.f32.mxu0 %vm68_vm0, %v312_v30  ;;  %v292_v38 = vmul.f32 %v6853_v16, %v270_v31 }
 0x149   :  { %v6323_v39 = vpop.eup %6322  ;;  %v313_v1 = vadd.f32 %v6859_v33, %v291_v32  ;;  %v271_v40 = vmul.f32 %v6321_v34, %v6798_v11 }
 0x14a   :  { %6332 = vrsqrt.f32 %v245_v20  ;;  %v314_v41 = vadd.f32 %v6859_v33, %v292_v38  ;;  %v272_v10 = vmul.f32 %v6323_v39, %v6807_v23 }
 0x14b   :  { %5612 = vmatmul.mubr.msk.f32.gmra.mrb[6].mxu0 %vm68_vm0, %v313_v1  ;;  %v293_v42 = vmul.f32 %v6853_v16, %v271_v40 }
 0x14c   :  { %v6325_v43 = vpop.eup %6324  ;;  %5614 = vmatprep.mubr.msk.f32.mxu0 %vm68_vm0, %v314_v41  ;;  %v294_v36 = vmul.f32 %v6853_v16, %v272_v10 }
 0x14d   :  { %v6327_v46 = vpop.eup %6326  ;;  %v315_v24 = vadd.f32 %v6859_v33, %v293_v42  ;;  %v273_v48 = vmul.f32 %v6325_v43, %v6810_v17 }
 0x14e   :  { %v316_v11 = vadd.f32 %v6859_v33, %v294_v36  ;;  %v274_v49 = vmul.f32 %v6327_v46, %v6819_v35 }
 0x14f   :  { %5615 = vmatmul.mubr.msk.f32.gmra.mrb[8].mxu0 %vm68_vm0, %v315_v24  ;;  %v295_v23 = vmul.f32 %v6853_v16, %v273_v48 }
 0x150   :  { %v6329_v50 = vpop.eup %6328  ;;  %5617 = vmatprep.mubr.msk.f32.mxu0 %vm68_vm0, %v316_v11  ;;  %v296_v51 = vmul.f32 %v6853_v16, %v274_v49 }
 0x151   :  { %v6331_v52 = vpop.eup %6330  ;;  %v317_v28 = vadd.f32 %v6859_v33, %v295_v23  ;;  %v275_v29 = vmul.f32 %v6329_v50, %v6822_v21 }
 0x152   :  { %v318_v17 = vadd.f32 %v6859_v33, %v296_v51  ;;  %v276_v53 = vmul.f32 %v6331_v52, %v6831_v47 }
 0x153   :  { %5618 = vmatmul.mubr.msk.f32.gmra.mrb[10].mxu0 %vm68_vm0, %v317_v28  ;;  %v297_v35 = vmul.f32 %v6853_v16, %v275_v29 }
 0x154   :  { %v6333_v56 = vpop.eup %6332  ;;  %5620 = vmatprep.mubr.msk.f32.mxu0 %vm68_vm0, %v318_v17  ;;  %v298_v44 = vmul.f32 %v6853_v16, %v276_v53 }
 0x155   :  { %v319_v57 = vadd.f32 %v6859_v33, %v297_v35  ;;  %v277_v58 = vmul.f32 %v6333_v56, %v6834_v25 }
 0x156   :  { %v320_v37 = vadd.f32 %v6859_v33, %v298_v44 }
 0x157   :  { %5621 = vmatmul.mubr.msk.f32.gmra.mrb[12].mxu0 %vm68_vm0, %v319_v57  ;;  %v299_v21 = vmul.f32 %v6853_v16, %v277_v58 }
 0x158   :  { %5623 = vmatprep.mubr.msk.f32.mxu0 %vm68_vm0, %v320_v37 }
 0x159   :  { %v321_v47 = vadd.f32 %v6859_v33, %v299_v21 }
 0x15b   :  { %5624 = vmatmul.mubr.msk.f32.gmra.mrb[14].mxu0 %vm68_vm0, %v321_v47 }
 0x212   :  { %v5604_v60 = vpop.f32.mrb[0].mxu0 }
 0x213   :  { %v6927_v61 = vadd.f32 %v5604_v60, %v5226_v59  ;;  %v445_v25 = vpop.f32.mrb[1].mxu0 }
 0x214   :  { %v446_v62 = vadd.f32 %v5226_v59, %v445_v25 }
 0x215   :  { %v7032_v53 = vmul.f32 0.35355338, %v6927_v61 }
 0x216   :  { %v5607_v63 = vpop.f32.mrb[2].mxu0  ;;  %v6930_v2 = vpack.i.bf16 %v6927_v61, %v446_v62  ;;  %v6932_v16 = vmul.f32 0.35355338, %v446_v62 }
 0x217   :  { %v6934_v3 = vadd.f32 %v5607_v63, %v5226_v59  ;;  %v455_v33 = vpop.f32.mrb[3].mxu0 }
 0x218   :  { %v6936_v4 = vadd.f32 %v5226_v59, %v455_v33  ;;  %6143 = vrot.lane.b32.xlu0 %v6930_v2, %s6574_s27  ;;  %5630 = vmatprep.mubr.msk.f32.mxu1 %vm566_vm1, %v6932_v16 }
 0x219   :  { %v7046_v60 = vmul.f32 0.35355338, %v6934_v3 }
 0x21a   :  { %v5610_v45 = vpop.f32.mrb[4].mxu0  ;;  %v6944_v5 = vpack.i.bf16 %v6934_v3, %v6936_v4  ;;  %v7035_v35 = vmul.f32 0.35355338, %v6936_v4 }
 0x21b   :  { %v6946_v6 = vadd.f32 %v5610_v45, %v5226_v59  ;;  %v465_v7 = vpop.f32.mrb[5].mxu0 }
 0x21c   :  { %v6948_v8 = vadd.f32 %v5226_v59, %v465_v7  ;;  %6148 = vrot.lane.b32.xlu1 %v6944_v5, %s6574_s27 }
 0x21e   :  { %v5613_v9 = vpop.f32.mrb[6].mxu0  ;;  %v6954_v12 = vpack.i.bf16 %v6946_v6, %v6948_v8  ;;  %v7049_v61 = vmul.f32 0.35355338, %v6948_v8  ;;  %v7064_v8 = vmul.f32 0.35355338, %v6946_v6 }
 0x21f   :  { %v6956_v54 = vadd.f32 %v5613_v9, %v5226_v59  ;;  %v475_v13 = vpop.f32.mrb[7].mxu0 }
 0x220   :  { %8608 = vst [vmem:[#allocation2_spill] sm:$0xff] %v6954_v12  ;;  %v6958_v14 = vadd.f32 %v5226_v59, %v475_v13  ;;  %6153 = vrot.lane.b32.xlu1 %v6954_v12, %s6574_s27 }
 0x222   :  { %v5616_v15 = vpop.f32.mrb[8].mxu0  ;;  %v6964_v18 = vpack.i.bf16 %v6956_v54, %v6958_v14 }
 0x223   :  { %v6966_v19 = vadd.f32 %v5616_v15, %v5226_v59  ;;  %v485_v22 = vpop.f32.mrb[9].mxu0  ;;  %v7074_v15 = vmul.f32 0.35355338, %v6958_v14 }
 0x224   :  { %8609 = vst [vmem:[#allocation3_spill] sm:$0xff] %v6964_v18  ;;  %v486_v55 = vadd.f32 %v5226_v59, %v485_v22  ;;  %6158 = vrot.lane.b32.xlu1 %v6964_v18, %s6574_s27 }
 0x225   :  { %v7067_v9 = vmul.f32 0.35355338, %v6966_v19 }
 0x226   :  { %v5619_v26 = vpop.f32.mrb[10].mxu0  ;;  %v6971_v0 = vpack.i.bf16 %v6966_v19, %v486_v55  ;;  %v6973_v27 = vmul.f32 0.35355338, %v486_v55 }
 0x227   :  { %v6975_v30 = vadd.f32 %v5619_v26, %v5226_v59  ;;  %v495_v31 = vpop.f32.mrb[11].mxu0 }
 0x228   :  { %v6977_v32 = vadd.f32 %v5226_v59, %v495_v31  ;;  %6163 = vrot.lane.b32.xlu0 %v6971_v0, %s6574_s27  ;;  %5658 = vmatprep.mubr.msk.f32.mxu0 %vm566_vm1, %v6973_v27 }
 0x22a   :  { %v5622_v34 = vpop.f32.mrb[12].mxu0  ;;  %v6985_v20 = vpack.i.bf16 %v6975_v30, %v6977_v32 }
 0x22b   :  { %v6987_v38 = vadd.f32 %v5622_v34, %v5226_v59  ;;  %v505_v39 = vpop.f32.mrb[13].mxu0 }
 0x22c   :  { %v6989_v1 = vadd.f32 %v5226_v59, %v505_v39  ;;  %6168 = vrot.lane.b32.xlu1 %v6985_v20, %s6574_s27 }
 0x22e   :  { %v5625_v40 = vpop.f32.mrb[14].mxu0  ;;  %v6995_v41 = vpack.i.bf16 %v6987_v38, %v6989_v1  ;;  %v7081_v6 = vmul.f32 0.35355338, %v6989_v1 }
 0x22f   :  { %v6997_v10 = vadd.f32 %v5625_v40, %v5226_v59  ;;  %v515_v42 = vpop.f32.mrb[15].mxu0  ;;  %v7092_v40 = vmul.f32 0.35355338, %v6956_v54 }
 0x230   :  { %v6999_v43 = vadd.f32 %v5226_v59, %v515_v42  ;;  %6173 = vrot.lane.b32.xlu0 %v6995_v41, %s6574_s27 }
 0x232   :  { %v7005_v36 = vpack.i.bf16 %v6997_v10, %v6999_v43 }
 0x234   :  { %6188 = vrot.lane.b32.xlu0 %v6944_v5, %s6575_s4  ;;  %6178 = vrot.lane.b32.xlu1 %v7005_v36, %s6574_s27 }
 0x238   :  { %6213 = vrot.lane.b32.xlu0 %v6995_v41, %s6575_s4  ;;  %6183 = vrot.lane.b32.xlu1 %v6930_v2, %s6575_s4 }
 0x23c   :  { %6218 = vrot.lane.b32.xlu0 %v6930_v2, %s6576_s28  ;;  %6193 = vrot.lane.b32.xlu1 %v6954_v12, %s6575_s4 }
 0x240   :  { %6198 = vrot.lane.b32.xlu1 %v6964_v18, %s6575_s4 }
 0x244   :  { %6203 = vrot.lane.b32.xlu1 %v6971_v0, %s6575_s4 }
 0x248   :  { %6208 = vrot.lane.b32.xlu1 %v6985_v20, %s6575_s4 }
 0x24c   :  { %6223 = vrot.lane.b32.xlu1 %v7005_v36, %s6575_s4 }
 0x28a   :  { %v6144_v46 = vpop.permute.xlu0 %6143 }
 0x28b   :  { %v6146_v24 = vunpack.i.h.bf16 %v6144_v46  ;;  %v6145_v48 = vunpack.i.l.bf16 %v6144_v46 }
 0x28d   :  { %v5950_v49 = vpack.c.bf16 %v6146_v24, %v6145_v48  ;;  %v7095_v24 = vmul.f32 0.35355338, %v6987_v38  ;;  %v7100_v48 = vmul.f32 0.35355338, %v6977_v32 }
 0x28e   :  { %v6149_v23 = vpop.permute.xlu1 %6148 }
 0x28f   :  { %v6151_v50 = vunpack.i.h.bf16 %v6149_v23  ;;  %v6150_v51 = vunpack.i.l.bf16 %v6149_v23  ;;  %5952 = vmatprep.subr.msk.bf16.mxu1 %vm7021_vm2, %v5950_v49 }
 0x290   :  { %5955 = vmatpush3.bf16.xpose.msk.msra.mxu1 %vm7021_vm2, %v5950_v49 }
 0x291   :  { %v5956_v52 = vpack.c.bf16 %v6151_v50, %v6150_v51  ;;  %v7116_v50 = vmul.f32 0.35355338, %v6975_v30  ;;  %v7119_v51 = vmul.f32 0.35355338, %v6999_v43  ;;  %v7128_v30 = vmul.f32 0.35355338, %v6997_v10 }
 0x292   :  { %v6154_v28 = vpop.permute.xlu1 %6153 }
 0x293   :  { %v6156_v29 = vunpack.i.h.bf16 %v6154_v28  ;;  %v6155_v17 = vunpack.i.l.bf16 %v6154_v28  ;;  %5958 = vmatprep.subr.msk.bf16.mxu1 %vm7021_vm2, %v5956_v52 }
 0x295   :  { %v5962_v56 = vpack.c.bf16 %v6156_v29, %v6155_v17 }
 0x296   :  { %v6159_v44 = vpop.permute.xlu1 %6158 }
 0x297   :  { %5631 = vmatmul.mubr.msk.f32.vlgmr.msra.gmra.mrb[0].mxu1 %vm566_vm1, %v7032_v53  ;;  %v6161_v58 = vunpack.i.h.bf16 %v6159_v44  ;;  %v6160_v37 = vunpack.i.l.bf16 %v6159_v44  ;;  %v7143_v44 = vld [vmem:[%s8579_s7] sm:$0xff] }
 0x298   :  { %5961 = vmatpush3.bf16.xpose.msk.msra.mxu1 %vm7021_vm2, %v5956_v52  ;;  %5637 = vmatprep.mubr.msk.f32.mxu1 %vm566_vm1, %v7035_v35 }
 0x299   :  { %5964 = vmatprep.subr.msk.bf16.mxu1 %vm7021_vm2, %v5962_v56  ;;  %v5968_v25 = vpack.c.bf16 %v6161_v58, %v6160_v37 }
 0x29a   :  { %v6164_v57 = vpop.permute.xlu0 %6163 }
 0x29b   :  { %v6166_v21 = vunpack.i.h.bf16 %v6164_v57  ;;  %v6165_v47 = vunpack.i.l.bf16 %v6164_v57  ;;  %v7148_v57 = vld [vmem:[%s8580_s8 + $0x8] sm:$0xff] }
 0x29d   :  { %v5974_v59 = vpack.c.bf16 %v6166_v21, %v6165_v47  ;;  %v7154_v21 = vld [vmem:[%s8580_s8] sm:$0xff] }
 0x29e   :  { %v6169_v62 = vpop.permute.xlu1 %6168 }
 0x29f   :  { %5638 = vmatmul.mubr.msk.f32.vlgmr.msra.gmra.mrb[2].mxu1 %vm566_vm1, %v7046_v60  ;;  %5976 = vmatprep.subr.msk.bf16.mxu0 %vm7021_vm2, %v5974_v59  ;;  %v6171_v4 = vunpack.i.h.bf16 %v6169_v62  ;;  %v6170_v45 = vunpack.i.l.bf16 %v6169_v62 }
 0x2a0   :  { %5967 = vmatpush3.bf16.xpose.msk.msra.mxu1 %vm7021_vm2, %v5962_v56  ;;  %5644 = vmatprep.mubr.msk.f32.mxu1 %vm566_vm1, %v7049_v61  ;;  %v7138_v56 = vld [vmem:[%s8579_s7 + $0x8] sm:$0xff] }
 0x2a1   :  { %5979 = vmatpush3.bf16.xpose.msk.msra.mxu0 %vm7021_vm2, %v5974_v59  ;;  %5970 = vmatprep.subr.msk.bf16.mxu1 %vm7021_vm2, %v5968_v25  ;;  %v5980_v22 = vpack.c.bf16 %v6171_v4, %v6170_v45 }
 0x2a2   :  { %v6174_v63 = vpop.permute.xlu0 %6173 }
 0x2a3   :  { %v6176_v3 = vunpack.i.h.bf16 %v6174_v63  ;;  %v6175_v33 = vunpack.i.l.bf16 %v6174_v63 }
 0x2a5   :  { %v5986_v7 = vpack.c.bf16 %v6176_v3, %v6175_v33  ;;  %v7170_v33 = vld [vmem:[%s8580_s8 + $0x18] sm:$0xff] }
 0x2a6   :  { %v6179_v13 = vpop.permute.xlu1 %6178  ;;  %v6189_v19 = vpop.permute.xlu0 %6188 }
 0x2a7   :  { %5645 = vmatmul.mubr.msk.f32.vlgmr.msra.gmra.mrb[4].mxu1 %vm566_vm1, %v7064_v8  ;;  %5988 = vmatprep.subr.msk.bf16.mxu0 %vm7021_vm2, %v5986_v7  ;;  %v6181_v31 = vunpack.i.h.bf16 %v6179_v13  ;;  %v6180_v34 = vunpack.i.l.bf16 %v6179_v13  ;;  %v6191_v39 = vunpack.i.h.bf16 %v6189_v19  ;;  %v6190_v1 = vunpack.i.l.bf16 %v6189_v19  ;;  %v7177_v13 = vld [vmem:[%s8580_s8 + $0x10] sm:$0xff] }
 0x2a8   :  { %5659 = vmatmul.mubr.msk.f32.vlgmr.msra.gmra.mrb[16].mxu0 %vm566_vm1, %v7067_v9  ;;  %5973 = vmatpush3.bf16.xpose.msk.msra.mxu1 %vm7021_vm2, %v5968_v25 }
 0x2a9   :  { %5651 = vmatprep.mubr.msk.f32.mxu1 %vm566_vm1, %v7074_v15  ;;  %5991 = vmatpush3.bf16.xpose.msk.msra.mxu0 %vm7021_vm2, %v5986_v7  ;;  %v5992_v49 = vpack.c.bf16 %v6181_v31, %v6180_v34  ;;  %v7106_v54 = vpack.c.bf16 %v6191_v39, %v6190_v1 }
 0x2aa   :  { %5672 = vmatprep.mubr.msk.f32.mxu0 %vm566_vm1, %v7081_v6  ;;  %5982 = vmatprep.subr.msk.bf16.mxu1 %vm7021_vm2, %v5980_v22  ;;  %v6184_v14 = vpop.permute.xlu1 %6183 }
 0x2ab   :  { %v6186_v55 = vunpack.i.h.bf16 %v6184_v14  ;;  %v6185_v26 = vunpack.i.l.bf16 %v6184_v14 }
 0x2ad   :  { %v5998_v42 = vpack.c.bf16 %v6186_v55, %v6185_v26  ;;  %v7190_v26 = vld [vmem:[%s8580_s8 + $0x28] sm:$0xff] }
 0x2ae   :  { %v6194_v46 = vpop.permute.xlu1 %6193 }
 0x2af   :  { %5652 = vmatmul.mubr.msk.f32.vlgmr.msra.gmra.mrb[6].mxu1 %vm566_vm1, %v7092_v40  ;;  %5999 = vmatprep.subr.bf16.mxu0 %v5998_v42  ;;  %v6196_v38 = vunpack.i.h.bf16 %v6194_v46  ;;  %v6195_v23 = vunpack.i.l.bf16 %v6194_v46 }
 0x2b0   :  { %5673 = vmatmul.mubr.msk.f32.vlgmr.msra.gmra.mrb[18].mxu0 %vm566_vm1, %v7095_v24  ;;  %5985 = vmatpush3.bf16.xpose.msk.msra.mxu1 %vm7021_vm2, %v5980_v22 }
 0x2b1   :  { %5665 = vmatprep.mubr.msk.f32.mxu1 %vm566_vm1, %v7100_v48  ;;  %6001 = vmatpush3.bf16.msra.mxu0 %v5998_v42  ;;  %v6006_v52 = vpack.c.bf16 %v6196_v38, %v6195_v23  ;;  %v7198_v42 = vld [vmem:[%s8580_s8 + $0x20] sm:$0xff]  ;;  %v7205_v23 = vld [vmem:[%s8580_s8 + $0x48] sm:$0xff] }
 0x2b2   :  { %5994 = vmatprep.subr.msk.bf16.mxu1 %vm7021_vm2, %v5992_v49  ;;  %6003 = vmatprep.subr.bf16.mxu0 %v7106_v54  ;;  %v7113_v32 = vpop.permute.xlu1 %6198 }
 0x2b6   :  { %v6204_v28 = vpop.permute.xlu1 %6203 }
 0x2b7   :  { %5666 = vmatmul.mubr.msk.f32.vlgmr.msra.gmra.mrb[8].mxu1 %vm566_vm1, %v7116_v50  ;;  %v6206_v29 = vunpack.i.h.bf16 %v6204_v28  ;;  %v6205_v17 = vunpack.i.l.bf16 %v6204_v28 }
 0x2b8   :  { %5997 = vmatpush3.bf16.xpose.msk.msra.mxu1 %vm7021_vm2, %v5992_v49  ;;  %5679 = vmatprep.mubr.msk.f32.mxu1 %vm566_vm1, %v7119_v51 }
 0x2b9   :  { %6007 = vmatprep.subr.bf16.mxu1 %v6006_v52  ;;  %v7132_v43 = vpack.c.bf16 %v6206_v29, %v6205_v17 }
 0x2bf   :  { %5680 = vmatmul.mubr.msk.f32.vlgmr.msra.gmra.mrb[10].mxu1 %vm566_vm1, %v7128_v30 }
 0x2c0   :  { %6009 = vmatpush3.bf16.msra.mxu1 %v6006_v52 }
 0x2c1   :  { %6015 = vmatprep.subr.bf16.mxu1 %v7132_v43 }
 0x36a   :  { %v5632_v10 = vpop.f32.mrb[0].mxu1 }
 0x36b   :  { %v649_v58 = vadd.f32 %v5632_v10, %v7138_v56  ;;  %v643_v37 = vpop.f32.mrb[1].mxu1 }
 0x36c   :  { %v644_v47 = vadd.f32 %v643_v37, %v7143_v44 }
 0x36d   :  { %v7158_v59 = vadd.f32 %v649_v58, %v7148_v57  ;;  %v7222_v58 = vld [vmem:[%s8580_s8 + $0x40] sm:$0xff] }
 0x36e   :  { %v7161_v25 = vadd.f32 %v644_v47, %v7154_v21  ;;  %8612 = vst [vmem:[#allocation4_spill] sm:$0xff] %v7222_v58 }
 0x36f   :  { %v1308_v62 = vsel %vm68_vm0, %v7158_v59, -inf }
 0x370   :  { %1309 = vmax.xlane.f32.xlu1 %v1308_v62  ;;  %v1305_v63 = vsel %vm68_vm0, %v7161_v25, -inf }
 0x371   :  { %1306 = vmax.xlane.f32.xlu0 %v1305_v63  ;;  %v7232_v63 = vld [vmem:[%s8580_s8 + $0x38] sm:$0xff] }
 0x372   :  { %v5639_v3 = vpop.f32.mrb[2].mxu1  ;;  %8613 = vst [vmem:[#allocation5_spill] sm:$0xff] %v7232_v63 }
 0x373   :  { %v740_v4 = vadd.f32 %v5639_v3, %v7138_v56  ;;  %v734_v45 = vpop.f32.mrb[3].mxu1 }
 0x374   :  { %v735_v7 = vadd.f32 %v734_v45, %v7143_v44 }
 0x375   :  { %v7180_v22 = vadd.f32 %v740_v4, %v7170_v33 }
 0x376   :  { %v7185_v14 = vadd.f32 %v735_v7, %v7177_v13 }
 0x377   :  { %v1314_v19 = vsel %vm68_vm0, %v7180_v22, -inf }
 0x378   :  { %1315 = vmax.xlane.f32.xlu0 %v1314_v19  ;;  %v1311_v1 = vsel %vm68_vm0, %v7185_v14, -inf }
 0x37a   :  { %v5646_v55 = vpop.f32.mrb[4].mxu1 }
 0x37b   :  { %v831_v31 = vadd.f32 %v5646_v55, %v7138_v56  ;;  %v5660_v34 = vpop.f32.mrb[16].mxu0  ;;  %v825_v39 = vpop.f32.mrb[5].mxu1 }
 0x37c   :  { %v1013_v46 = vadd.f32 %v5660_v34, %v7138_v56  ;;  %v826_v49 = vadd.f32 %v825_v39, %v7143_v44  ;;  %v1007_v38 = vpop.f32.mrb[17].mxu0  ;;  %1312 = vmax.xlane.f32.xlu0 %v1311_v1  ;;  %v7242_v34 = vld [vmem:[%s8580_s8 + $0x68] sm:$0xff]  ;;  %v7247_v39 = vld [vmem:[%s8580_s8 + $0x30] sm:$0xff] }
 0x37d   :  { %v7208_v52 = vadd.f32 %v831_v31, %v7190_v26  ;;  %v1008_v28 = vadd.f32 %v1007_v38, %v7143_v44  ;;  %8614 = vst [vmem:[#allocation6_spill] sm:$0xff] %v7242_v34  ;;  %8615 = vst [vmem:[#allocation7_spill] sm:$0xff] %v7247_v39 }
 0x37e   :  { %v7212_v29 = vadd.f32 %v826_v49, %v7198_v42  ;;  %v7217_v10 = vadd.f32 %v1013_v46, %v7205_v23 }
 0x37f   :  { %v1320_v17 = vsel %vm68_vm0, %v7208_v52, -inf  ;;  %v7227_v62 = vadd.f32 %v1008_v28, %v7222_v58 }
 0x380   :  { %1321 = vmax.xlane.f32.xlu1 %v1320_v17  ;;  %v1317_v37 = vsel %vm68_vm0, %v7212_v29, -inf  ;;  %v1332_v7 = vsel %vm68_vm0, %v7217_v10, -inf }
 0x381   :  { %1318 = vmax.xlane.f32.xlu0 %v1317_v37  ;;  %v1329_v46 = vsel %vm68_vm0, %v7227_v62, -inf  ;;  %v7266_v37 = vld [vmem:[%s8580_s8 + $0x60] sm:$0xff] }
 0x382   :  { %v5653_v47 = vpop.f32.mrb[6].mxu1  ;;  %8616 = vst [vmem:[#allocation8_spill] sm:$0xff] %v7266_v37 }
 0x383   :  { %v922_v3 = vadd.f32 %v5653_v47, %v7138_v56  ;;  %v5674_v4 = vpop.f32.mrb[18].mxu0  ;;  %v916_v45 = vpop.f32.mrb[7].mxu1 }
 0x384   :  { %v1195_v19 = vadd.f32 %v5674_v4, %v7138_v56  ;;  %v917_v55 = vadd.f32 %v916_v45, %v7143_v44  ;;  %v1189_v31 = vpop.f32.mrb[19].mxu0  ;;  %1333 = vmax.xlane.f32.xlu1 %v1332_v7 }
 0x385   :  { %v7250_v1 = vadd.f32 %v922_v3, %v7232_v63  ;;  %v1190_v49 = vadd.f32 %v1189_v31, %v7143_v44  ;;  %v7271_v3 = vld [vmem:[%s8580_s8 + $0x58] sm:$0xff] }
 0x386   :  { %v7258_v28 = vadd.f32 %v1195_v19, %v7242_v34  ;;  %v7261_v17 = vadd.f32 %v917_v55, %v7247_v39  ;;  %8617 = vst [vmem:[#allocation9_spill] sm:$0xff] %v7271_v3 }
 0x387   :  { %v1326_v38 = vsel %vm68_vm0, %v7250_v1, -inf  ;;  %v7279_v55 = vadd.f32 %v1190_v49, %v7266_v37 }
 0x388   :  { %1330 = vmax.xlane.f32.xlu1 %v1329_v46  ;;  %1327 = vmax.xlane.f32.xlu0 %v1326_v38  ;;  %v1344_v7 = vsel %vm68_vm0, %v7258_v28, -inf  ;;  %v1323_v19 = vsel %vm68_vm0, %v7261_v17, -inf  ;;  %v7285_v46 = vld [vmem:[%s8580_s8 + $0x50] sm:$0xff] }
 0x389   :  { %8618 = vst [vmem:[#allocation10_spill] sm:$0xff] %v7285_v46  ;;  %v1341_v39 = vsel %vm68_vm0, %v7279_v55, -inf }
 0x38a   :  { %v5667_v47 = vpop.f32.mrb[8].mxu1 }
 0x38b   :  { %v1104_v4 = vadd.f32 %v5667_v47, %v7138_v56  ;;  %v1098_v45 = vpop.f32.mrb[9].mxu1 }
 0x38c   :  { %v1099_v31 = vadd.f32 %v1098_v45, %v7143_v44  ;;  %1345 = vmax.xlane.f32.xlu1 %v1344_v7  ;;  %1324 = vmax.xlane.f32.xlu0 %v1323_v19 }
 0x38d   :  { %v7288_v38 = vadd.f32 %v1104_v4, %v7271_v3 }
 0x38e   :  { %v7295_v49 = vadd.f32 %v1099_v31, %v7285_v46  ;;  %v7316_v31 = vld [vmem:[%s8580_s8 + $0x70] sm:$0xff] }
 0x38f   :  { %v1338_v47 = vsel %vm68_vm0, %v7288_v38, -inf  ;;  %8620 = vst [vmem:[#allocation12_spill] sm:$0xff] %v7316_v31 }
 0x390   :  { %1339 = vmax.xlane.f32.xlu1 %v1338_v47  ;;  %1342 = vmax.xlane.f32.xlu0 %v1341_v39  ;;  %v1335_v37 = vsel %vm68_vm0, %v7295_v49, -inf  ;;  %v7308_v39 = vld [vmem:[%s8580_s8 + $0x78] sm:$0xff]  ;;  %s6578_s8 = smov 88  }
 0x391   :  { %8619 = vst [vmem:[#allocation11_spill] sm:$0xff] %v7308_v39 }
 0x392   :  { %v5681_v45 = vpop.f32.mrb[10].mxu1 }
 0x393   :  { %v1286_v7 = vadd.f32 %v5681_v45, %v7138_v56  ;;  %v1280_v19 = vpop.f32.mrb[11].mxu1  ;;  %v7333_v45 = vpop.permute.xlu1 %6208 }
 0x394   :  { %v1281_v4 = vadd.f32 %v1280_v19, %v7143_v44  ;;  %1336 = vmax.xlane.f32.xlu0 %v1335_v37 }
 0x395   :  { %v7311_v56 = vadd.f32 %v1286_v7, %v7308_v39  ;;  %v7335_v7 = vpop.permute.xlu0 %6213 }
 0x396   :  { %v7321_v37 = vadd.f32 %v1281_v4, %v7316_v31 }
 0x397   :  { %v1350_v44 = vsel %vm68_vm0, %v7311_v56, -inf  ;;  %v7337_v19 = vpop.permute.xlu1 %6223 }
 0x398   :  { %v1347_v47 = vsel %vm68_vm0, %v7321_v37, -inf }
 0x399   :  { %v7339_v4 = vpop.permute.xlu0 %6218 }
 0x3a1   :  { %6228 = vrot.lane.b32.xlu1 %v6944_v5, %s6576_s28 }
 0x3aa   :  { %6233 = vrot.lane.b32.xlu0 %v6954_v12, %s6576_s28 }
 0x3c5   :  { %1351 = vmax.xlane.f32.xlu1 %v1350_v44 }
 0x3c9   :  { %1348 = vmax.xlane.f32.xlu0 %v1347_v47 }
 0x3d6   :  { %2177 = vrot.lane.b32.xlu1 %v6932_v16, %s6577_s29 }
 0x3da   :  { %6238 = vrot.lane.b32.xlu1 %v6964_v18, %s6576_s28 }
 0x3df   :  { %2179 = vrot.lane.b32.xlu0 %v7032_v53, %s6577_s29 }
 0x3e3   :  { %2268 = vrot.lane.b32.xlu0 %v7035_v35, %s6577_s29 }
 0x3fd   :  { %v1310_v44 = vpop.xlane.xlu1 %1309 }
 0x3fe   :  { %v1354_v16 = vsub.f32 %v7158_v59, %v1310_v44  ;;  %v1307_v47 = vpop.xlane.xlu0 %1306 }
 0x3ff   :  { %v1353_v31 = vsub.f32 %v7161_v25, %v1307_v47 }
 0x400   :  { %v1371_v39 = vmul.f32 1.442695, %v1354_v16 }
 0x401   :  { %v1369_v12 = vmul.f32 1.442695, %v1353_v31 }
 0x402   :  { %6334 = vpow2.f32 %v1371_v39 }
 0x403   :  { %6336 = vpow2.f32 %v1369_v12 }
 0x405   :  { %v1316_v53 = vpop.xlane.xlu0 %1315 }
 0x406   :  { %v1356_v35 = vsub.f32 %v7180_v22, %v1316_v53 }
 0x408   :  { %v1375_v18 = vmul.f32 1.442695, %v1356_v35 }
 0x409   :  { %v1313_v46 = vpop.xlane.xlu0 %1312 }
 0x40a   :  { %6338 = vpow2.f32 %v1375_v18  ;;  %v1355_v3 = vsub.f32 %v7185_v14, %v1313_v46 }
 0x40c   :  { %v7345_v34 = vpop.eup %6334  ;;  %v1373_v63 = vmul.f32 1.442695, %v1355_v3 }
 0x40d   :  { %v7347_v58 = vpop.eup %6336  ;;  %v1322_v59 = vpop.xlane.xlu1 %1321  ;;  %v1404_v25 = vsel %vm68_vm0, %v7345_v34, 0.0 }
 0x40e   :  { %6340 = vpow2.f32 %v1373_v63  ;;  %v1358_v12 = vsub.f32 %v7208_v52, %v1322_v59  ;;  %1405 = vadd.xlane.f32.xlu1 %v1404_v25  ;;  %v1319_v39 = vpop.xlane.xlu0 %1318  ;;  %v1401_v22 = vsel %vm68_vm0, %v7347_v58, 0.0 }
 0x40f   :  { %1402 = vadd.xlane.f32.xlu0 %v1401_v22  ;;  %v1357_v14 = vsub.f32 %v7212_v29, %v1319_v39 }
 0x410   :  { %v1379_v18 = vmul.f32 1.442695, %v1358_v12 }
 0x411   :  { %v1334_v46 = vpop.xlane.xlu1 %1333  ;;  %v1377_v44 = vmul.f32 1.442695, %v1357_v14 }
 0x412   :  { %6342 = vpow2.f32 %v1379_v18  ;;  %v1362_v3 = vsub.f32 %v7217_v10, %v1334_v46 }
 0x414   :  { %v7356_v31 = vpop.eup %6338  ;;  %v1387_v16 = vmul.f32 1.442695, %v1362_v3 }
 0x415   :  { %v1331_v63 = vpop.xlane.xlu1 %1330  ;;  %v1328_v47 = vpop.xlane.xlu0 %1327  ;;  %v1410_v52 = vsel %vm68_vm0, %v7356_v31, 0.0 }
 0x416   :  { %6344 = vpow2.f32 %v1387_v16  ;;  %v1361_v53 = vsub.f32 %v7227_v62, %v1331_v63  ;;  %v1360_v35 = vsub.f32 %v7250_v1, %v1328_v47  ;;  %1411 = vadd.xlane.f32.xlu0 %v1410_v52 }
 0x417   :  { %6346 = vpow2.f32 %v1377_v44 }
 0x418   :  { %v7362_v29 = vpop.eup %6340  ;;  %v1385_v59 = vmul.f32 1.442695, %v1361_v53  ;;  %v1383_v10 = vmul.f32 1.442695, %v1360_v35 }
 0x419   :  { %v1346_v25 = vpop.xlane.xlu1 %1345  ;;  %v1325_v12 = vpop.xlane.xlu0 %1324  ;;  %v1407_v39 = vsel %vm68_vm0, %v7362_v29, 0.0 }
 0x41a   :  { %v1366_v22 = vsub.f32 %v7258_v28, %v1346_v25  ;;  %v1359_v18 = vsub.f32 %v7261_v17, %v1325_v12  ;;  %1408 = vadd.xlane.f32.xlu0 %v1407_v39  ;;  %6348 = vpow2.f32 %v1383_v10 }
 0x41b   :  { %6350 = vpow2.f32 %v1385_v59 }
 0x41c   :  { %v7368_v62 = vpop.eup %6342  ;;  %v1395_v1 = vmul.f32 1.442695, %v1366_v22  ;;  %v1381_v14 = vmul.f32 1.442695, %v1359_v18 }
 0x41d   :  { %v1340_v46 = vpop.xlane.xlu1 %1339  ;;  %v1343_v3 = vpop.xlane.xlu0 %1342  ;;  %v1416_v44 = vsel %vm68_vm0, %v7368_v62, 0.0 }
 0x41e   :  { %v1364_v16 = vsub.f32 %v7288_v38, %v1340_v46  ;;  %v1365_v63 = vsub.f32 %v7279_v55, %v1343_v3  ;;  %1417 = vadd.xlane.f32.xlu1 %v1416_v44  ;;  %6352 = vpow2.f32 %v1381_v14 }
 0x41f   :  { %6354 = vpow2.f32 %v1395_v1 }
 0x420   :  { %v7374_v28 = vpop.eup %6344  ;;  %v1391_v17 = vmul.f32 1.442695, %v1364_v16  ;;  %v1393_v47 = vmul.f32 1.442695, %v1365_v63 }
 0x421   :  { %v1337_v52 = vpop.xlane.xlu0 %1336  ;;  %v1428_v53 = vsel %vm68_vm0, %v7374_v28, 0.0  ;;  %v7378_v35 = vpop.eup %6346 }
 0x422   :  { %v1363_v59 = vsub.f32 %v7295_v49, %v1337_v52  ;;  %1429 = vadd.xlane.f32.xlu1 %v1428_v53  ;;  %6356 = vpow2.f32 %v1393_v47  ;;  %v1413_v10 = vsel %vm68_vm0, %v7378_v35, 0.0 }
 0x423   :  { %6358 = vpow2.f32 %v1391_v17  ;;  %v7417_v17 = vpop.permute.xlu1 %6228 }
 0x424   :  { %v1389_v38 = vmul.f32 1.442695, %v1363_v59  ;;  %v7381_v55 = vpop.eup %6348 }
 0x425   :  { %v7385_v25 = vpop.eup %6350  ;;  %v1422_v12 = vsel %vm68_vm0, %v7381_v55, 0.0  ;;  %v7421_v47 = vpop.permute.xlu0 %6233 }
 0x426   :  { %6360 = vpow2.f32 %v1389_v38  ;;  %1414 = vadd.xlane.f32.xlu1 %v1413_v10  ;;  %1423 = vadd.xlane.f32.xlu0 %v1422_v12  ;;  %v1425_v49 = vsel %vm68_vm0, %v7385_v25, 0.0  ;;  %v6201_v12 = vunpack.i.h.bf16 %v7113_v32 }
 0x428   :  { %v7389_v39 = vpop.eup %6352 }
 0x429   :  { %v7393_v22 = vpop.eup %6354  ;;  %v1419_v18 = vsel %vm68_vm0, %v7389_v39, 0.0 }
 0x42a   :  { %1426 = vadd.xlane.f32.xlu1 %v1425_v49  ;;  %1420 = vadd.xlane.f32.xlu0 %v1419_v18  ;;  %v1440_v14 = vsel %vm68_vm0, %v7393_v22, 0.0 }
 0x42c   :  { %v7397_v1 = vpop.eup %6356 }
 0x42d   :  { %v7401_v46 = vpop.eup %6358  ;;  %v1437_v3 = vsel %vm68_vm0, %v7397_v1, 0.0 }
 0x42e   :  { %1441 = vadd.xlane.f32.xlu1 %v1440_v14  ;;  %1438 = vadd.xlane.f32.xlu0 %v1437_v3  ;;  %v1434_v16 = vsel %vm68_vm0, %v7401_v46, 0.0 }
 0x430   :  { %v7405_v44 = vpop.eup %6360 }
 0x431   :  { %v1431_v63 = vsel %vm68_vm0, %v7405_v44, 0.0 }
 0x432   :  { %1435 = vadd.xlane.f32.xlu1 %v1434_v16  ;;  %1432 = vadd.xlane.f32.xlu0 %v1431_v63 }
 0x443   :  { %2270 = vrot.lane.b32.xlu1 %v7046_v60, %s6577_s29 }
 0x447   :  { %2359 = vrot.lane.b32.xlu1 %v7049_v61, %s6577_s29 }
 0x44b   :  { %6248 = vrot.lane.b32.xlu1 %v6985_v20, %s6576_s28 }
 0x44f   :  { %2452 = vrot.lane.b32.xlu1 %v7092_v40, %s6577_s29 }
 0x452   :  { %v1352_v52 = vpop.xlane.xlu1 %1351 }
 0x453   :  { %v1368_v53 = vsub.f32 %v7311_v56, %v1352_v52  ;;  %2541 = vrot.lane.b32.xlu1 %v6973_v27, %s6577_s29  ;;  %v6210_v52 = vunpack.i.l.bf16 %v7333_v45 }
 0x455   :  { %v1399_v60 = vmul.f32 1.442695, %v1368_v53 }
 0x456   :  { %v1349_v59 = vpop.xlane.xlu0 %1348 }
 0x457   :  { %6362 = vpow2.f32 %v1399_v60  ;;  %v1367_v61 = vsub.f32 %v7321_v37, %v1349_v59  ;;  %6258 = vrot.lane.b32.xlu1 %v7005_v36, %s6576_s28 }
 0x459   :  { %v1397_v38 = vmul.f32 1.442695, %v1367_v61 }
 0x45b   :  { %6364 = vpow2.f32 %v1397_v38  ;;  %2634 = vrot.lane.b32.xlu1 %v7116_v50, %s6577_s29 }
 0x45f   :  { %2725 = vrot.lane.b32.xlu1 %v7095_v24, %s6577_s29  ;;  %v7455_v24 = vpop.permute.xlu1 %2177 }
 0x461   :  { %v7433_v40 = vpop.eup %6362 }
 0x462   :  { %v1446_v27 = vsel %vm68_vm0, %v7433_v40, 0.0 }
 0x463   :  { %2816 = vrot.lane.b32.xlu1 %v7128_v30, %s6577_s29  ;;  %1447 = vadd.xlane.f32.xlu0 %v1446_v27 }
 0x465   :  { %v7439_v56 = vpop.eup %6364 }
 0x466   :  { %v1443_v37 = vsel %vm68_vm0, %v7439_v56, 0.0 }
 0x467   :  { %6268 = vrot.lane.b32.xlu1 %v6944_v5, %s6578_s8  ;;  %1444 = vadd.xlane.f32.xlu0 %v1443_v37  ;;  %v7459_v5 = vpop.permute.xlu0 %2179  ;;  %v6215_v37 = vunpack.i.l.bf16 %v7335_v7 }
 0x46b   :  { %v7465_v50 = vpop.permute.xlu0 %2268 }
 0x47d   :  { %6243 = vrot.lane.b32.xlu0 %v6971_v0, %s6576_s28 }
 0x481   :  { %2361 = vrot.lane.b32.xlu0 %v7064_v8, %s6577_s29  ;;  %v7463_v8 = vpop.permute.xlu1 %6238 }
 0x485   :  { %2450 = vrot.lane.b32.xlu0 %v7074_v15, %s6577_s29 }
 0x489   :  { %6253 = vrot.lane.b32.xlu0 %v6995_v41, %s6576_s28 }
 0x48d   :  { %2543 = vrot.lane.b32.xlu0 %v7067_v9, %s6577_s29 }
 0x491   :  { %2632 = vrot.lane.b32.xlu0 %v7100_v48, %s6577_s29 }
 0x495   :  { %2723 = vrot.lane.b32.xlu0 %v7081_v6, %s6577_s29  ;;  %v6200_v6 = vunpack.i.l.bf16 %v7113_v32  ;;  %v6211_v32 = vunpack.i.h.bf16 %v7333_v45 }
 0x499   :  { %2814 = vrot.lane.b32.xlu0 %v7119_v51, %s6577_s29 }
 0x49b   :  { %v1406_v15 = vpop.xlane.xlu1 %1405 }
 0x49c   :  { %6366 = vrcp.f32 %v1406_v15  ;;  %v1403_v9 = vpop.xlane.xlu0 %1402 }
 0x49d   :  { %6368 = vrcp.f32 %v1403_v9  ;;  %6263 = vrot.lane.b32.xlu0 %v6930_v2, %s6578_s8  ;;  %v6010_v2 = vpack.c.bf16 %v6201_v12, %v6200_v6 }
 0x4a3   :  { %v1412_v48 = vpop.xlane.xlu0 %1411 }
 0x4a4   :  { %6370 = vrcp.f32 %v1412_v48 }
 0x4a6   :  { %v6367_v30 = vpop.eup %6366 }
 0x4a7   :  { %v6369_v10 = vpop.eup %6368  ;;  %v1409_v49 = vpop.xlane.xlu0 %1408  ;;  %v1452_v51 = vmul.f32 %v6367_v30, %v7345_v34 }
 0x4a8   :  { %6372 = vrcp.f32 %v1409_v49  ;;  %v1450_v18 = vmul.f32 %v6369_v10, %v7347_v58  ;;  %v6221_v49 = vunpack.i.h.bf16 %v7339_v4 }
 0x4aa   :  { %5686 = vmatprep.mubr.msk.f32.mxu0 %vm68_vm0, %v1450_v18  ;;  %v6220_v18 = vunpack.i.l.bf16 %v7339_v4 }
 0x4ab   :  { %v1418_v14 = vpop.xlane.xlu1 %1417  ;;  %5687 = vmatmul.mubr.msk.f32.vlgmr.msra.gmra.mrb[20].mxu0 %vm68_vm0, %v1452_v51 }
 0x4ac   :  { %6005 = vmatpush3.bf16.msra.mxu0 %v7106_v54  ;;  %6374 = vrcp.f32 %v1418_v14  ;;  %v6018_v54 = vpack.c.bf16 %v6211_v32, %v6210_v52  ;;  %v6225_v14 = vunpack.i.l.bf16 %v7337_v19  ;;  %v6230_v52 = vunpack.i.l.bf16 %v7417_v17 }
 0x4ad   :  { %6011 = vmatprep.subr.bf16.mxu0 %v6010_v2 }
 0x4ae   :  { %v6371_v16 = vpop.eup %6370 }
 0x4af   :  { %v1430_v3 = vpop.xlane.xlu1 %1429  ;;  %v1456_v60 = vmul.f32 %v6371_v16, %v7356_v31  ;;  %v6216_v31 = vunpack.i.h.bf16 %v7335_v7 }
 0x4b1   :  { %v6022_v7 = vpack.c.bf16 %v6216_v31, %v6215_v37 }
 0x4b2   :  { %v6373_v63 = vpop.eup %6372 }
 0x4b3   :  { %v1415_v58 = vpop.xlane.xlu1 %1414  ;;  %v1454_v34 = vmul.f32 %v6373_v63, %v7362_v29  ;;  %v1424_v53 = vpop.xlane.xlu0 %1423  ;;  %v6030_v63 = vpack.c.bf16 %v6221_v49, %v6220_v18 }
 0x4b4   :  { %6376 = vrcp.f32 %v1415_v58  ;;  %v6236_v58 = vunpack.i.h.bf16 %v7421_v47 }
 0x4b5   :  { %5693 = vmatprep.mubr.msk.f32.mxu0 %vm68_vm0, %v1454_v34  ;;  %6378 = vrcp.f32 %v1430_v3  ;;  %v6235_v34 = vunpack.i.l.bf16 %v7421_v47 }
 0x4b6   :  { %5694 = vmatmul.mubr.msk.f32.vlgmr.msra.gmra.mrb[22].mxu0 %vm68_vm0, %v1456_v60  ;;  %6380 = vrcp.f32 %v1424_v53  ;;  %v6375_v38 = vpop.eup %6374 }
 0x4b7   :  { %6013 = vmatpush3.bf16.msra.mxu0 %v6010_v2  ;;  %v1427_v59 = vpop.xlane.xlu1 %1426  ;;  %v1421_v45 = vpop.xlane.xlu0 %1420  ;;  %v1460_v10 = vmul.f32 %v6375_v38, %v7368_v62  ;;  %v6042_v60 = vpack.c.bf16 %v6236_v58, %v6235_v34 }
 0x4b8   :  { %6382 = vrcp.f32 %v1427_v59  ;;  %6019 = vmatprep.subr.bf16.mxu0 %v6018_v54 }
 0x4b9   :  { %6384 = vrcp.f32 %v1421_v45 }
 0x4bb   :  { %v1442_v61 = vpop.xlane.xlu1 %1441  ;;  %v1439_v29 = vpop.xlane.xlu0 %1438 }
 0x4bc   :  { %6386 = vrcp.f32 %v1442_v61 }
 0x4bd   :  { %6388 = vrcp.f32 %v1439_v29 }
 0x4be   :  { %v6377_v27 = vpop.eup %6376 }
 0x4bf   :  { %v1436_v15 = vpop.xlane.xlu1 %1435  ;;  %v1458_v9 = vmul.f32 %v6377_v27, %v7378_v35  ;;  %v6379_v48 = vpop.eup %6378  ;;  %v6226_v35 = vunpack.i.h.bf16 %v7337_v19 }
 0x4c0   :  { %6390 = vrcp.f32 %v1436_v15  ;;  %v1433_v30 = vpop.xlane.xlu0 %1432  ;;  %v6381_v12 = vpop.eup %6380  ;;  %v1468_v3 = vmul.f32 %v6379_v48, %v7374_v28  ;;  %v6241_v15 = vunpack.i.h.bf16 %v7463_v8 }
 0x4c1   :  { %6392 = vrcp.f32 %v1433_v30  ;;  %5700 = vmatprep.mubr.msk.f32.mxu1 %vm68_vm0, %v1458_v9  ;;  %v1464_v4 = vmul.f32 %v6381_v12, %v7381_v55  ;;  %v6240_v9 = vunpack.i.l.bf16 %v7463_v8 }
 0x4c2   :  { %v6383_v6 = vpop.eup %6382  ;;  %5701 = vmatmul.mubr.msk.f32.vlgmr.msra.gmra.mrb[12].mxu1 %vm68_vm0, %v1460_v10 }
 0x4c3   :  { %v6385_v51 = vpop.eup %6384  ;;  %6017 = vmatpush3.bf16.msra.mxu1 %v7132_v43  ;;  %v1466_v62 = vmul.f32 %v6383_v6, %v7385_v25  ;;  %v6026_v43 = vpack.c.bf16 %v6226_v35, %v6225_v14  ;;  %v6048_v6 = vpack.c.bf16 %v6241_v15, %v6240_v9 }
 0x4c4   :  { %6023 = vmatprep.subr.bf16.mxu1 %v6022_v7  ;;  %v1462_v2 = vmul.f32 %v6385_v51, %v7389_v39  ;;  %v6231_v39 = vunpack.i.h.bf16 %v7417_v17  ;;  %v2271_v17 = vpop.permute.xlu1 %2270 }
 0x4c5   :  { %5714 = vmatprep.mubr.msk.f32.mxu1 %vm68_vm0, %v1466_v62 }
 0x4c6   :  { %v6387_v16 = vpop.eup %6386  ;;  %5707 = vmatprep.mubr.msk.f32.mxu0 %vm68_vm0, %v1462_v2  ;;  %5715 = vmatmul.mubr.msk.f32.vlgmr.msra.gmra.mrb[14].mxu1 %vm68_vm0, %v1468_v3  ;;  %v6036_v53 = vpack.c.bf16 %v6231_v39, %v6230_v52 }
 0x4c7   :  { %v6389_v19 = vpop.eup %6388  ;;  %5708 = vmatmul.mubr.msk.f32.vlgmr.msra.gmra.mrb[24].mxu0 %vm68_vm0, %v1464_v4  ;;  %6025 = vmatpush3.bf16.msra.mxu1 %v6022_v7  ;;  %v1476_v25 = vmul.f32 %v6387_v16, %v7393_v22 }
 0x4c8   :  { %6021 = vmatpush3.bf16.msra.mxu0 %v6018_v54  ;;  %6032 = vmatprep.subr.msk.bf16.mxu1 %vm7021_vm2, %v6030_v63  ;;  %v1474_v28 = vmul.f32 %v6389_v19, %v7397_v1 }
 0x4c9   :  { %6027 = vmatprep.subr.bf16.mxu0 %v6026_v43 }
 0x4ca   :  { %v6391_v55 = vpop.eup %6390  ;;  %5728 = vmatprep.mubr.msk.f32.mxu1 %vm68_vm0, %v1474_v28 }
 0x4cb   :  { %v6393_v32 = vpop.eup %6392  ;;  %5729 = vmatmul.mubr.msk.f32.vlgmr.msra.gmra.mrb[16].mxu1 %vm68_vm0, %v1476_v25  ;;  %v1472_v22 = vmul.f32 %v6391_v55, %v7401_v46  ;;  %v2360_v46 = vpop.permute.xlu1 %2359 }
 0x4cc   :  { %5742 = vmatprep.mubr.msk.f32.mxu1 %vm566_vm1, %v7455_v24  ;;  %v1470_v1 = vmul.f32 %v6393_v32, %v7405_v44 }
 0x4ce   :  { %5721 = vmatprep.mubr.msk.f32.mxu0 %vm68_vm0, %v1470_v1 }
 0x4cf   :  { %5722 = vmatmul.mubr.msk.f32.vlgmr.msra.gmra.mrb[26].mxu0 %vm68_vm0, %v1472_v22  ;;  %v6249_v44 = vpop.permute.xlu1 %6248 }
 0x4d0   :  { %6029 = vmatpush3.bf16.msra.mxu0 %v6026_v43  ;;  %6035 = vmatpush3.bf16.xpose.msk.msra.mxu1 %vm7021_vm2, %v6030_v63  ;;  %v6251_v18 = vunpack.i.h.bf16 %v6249_v44 }
 0x4d1   :  { %6038 = vmatprep.subr.msk.bf16.mxu0 %vm7021_vm2, %v6036_v53  ;;  %6044 = vmatprep.subr.msk.bf16.mxu1 %vm7021_vm2, %v6042_v60 }
 0x4d3   :  { %v2453_v47 = vpop.permute.xlu1 %2452 }
 0x4d7   :  { %5743 = vmatmul.mubr.msk.f32.vlgmr.msra.gmra.mrb[18].mxu1 %vm566_vm1, %v7459_v5  ;;  %v2542_v59 = vpop.permute.xlu1 %2541 }
 0x4d8   :  { %6047 = vmatpush3.bf16.xpose.msk.msra.mxu1 %vm7021_vm2, %v6042_v60  ;;  %5756 = vmatprep.mubr.msk.f32.mxu1 %vm566_vm1, %v2360_v46 }
 0x4db   :  { %v6259_v27 = vpop.permute.xlu1 %6258 }
 0x4dc   :  { %v6261_v2 = vunpack.i.h.bf16 %v6259_v27  ;;  %v6260_v3 = vunpack.i.l.bf16 %v6259_v27 }
 0x4de   :  { %v6072_v16 = vpack.c.bf16 %v6261_v2, %v6260_v3 }
 0x4df   :  { %v2635_v12 = vpop.permute.xlu1 %2634 }
 0x4e3   :  { %v2726_v51 = vpop.permute.xlu1 %2725 }
 0x4e7   :  { %v2817_v62 = vpop.permute.xlu1 %2816 }
 0x4eb   :  { %v6269_v63 = vpop.permute.xlu1 %6268 }
 0x4ec   :  { %v6271_v43 = vunpack.i.h.bf16 %v6269_v63  ;;  %v6270_v25 = vunpack.i.l.bf16 %v6269_v63 }
 0x4ee   :  { %v6082_v32 = vpack.c.bf16 %v6271_v43, %v6270_v25 }
 0x4f0   :  { %v1448_v24 = vpop.xlane.xlu0 %1447 }
 0x4f1   :  { %6394 = vrcp.f32 %v1448_v24 }
 0x4f4   :  { %v1445_v54 = vpop.xlane.xlu0 %1444 }
 0x4f5   :  { %6396 = vrcp.f32 %v1445_v54 }
 0x4f8   :  { %v6244_v45 = vpop.permute.xlu0 %6243 }
 0x4f9   :  { %v6246_v61 = vunpack.i.h.bf16 %v6244_v45  ;;  %v6245_v29 = vunpack.i.l.bf16 %v6244_v45  ;;  %v7603_v45 = vld [vmem:[%s8579_s7 + $0x18] sm:$0xff] }
 0x4fb   :  { %v6054_v38 = vpack.c.bf16 %v6246_v61, %v6245_v29  ;;  %v6395_v5 = vpop.eup %6394  ;;  %v7608_v61 = vld [vmem:[%s8579_s7 + $0x10] sm:$0xff] }
 0x4fc   :  { %v2362_v31 = vpop.permute.xlu0 %2361  ;;  %v1480_v10 = vmul.f32 %v6395_v5, %v7433_v40  ;;  %v6250_v40 = vunpack.i.l.bf16 %v6249_v44 }
 0x4fd   :  { %5757 = vmatmul.mubr.msk.f32.vlgmr.msra.gmra.mrb[20].mxu1 %vm566_vm1, %v2362_v31  ;;  %6056 = vmatprep.subr.msk.bf16.mxu1 %vm7021_vm2, %v6054_v38 }
 0x4fe   :  { %6059 = vmatpush3.bf16.xpose.msk.msra.mxu1 %vm7021_vm2, %v6054_v38  ;;  %5770 = vmatprep.mubr.msk.f32.mxu1 %vm566_vm1, %v2542_v59 }
 0x4ff   :  { %v6397_v37 = vpop.eup %6396 }
 0x500   :  { %v2451_v48 = vpop.permute.xlu0 %2450  ;;  %v1478_v30 = vmul.f32 %v6397_v37, %v7439_v56 }
 0x502   :  { %5735 = vmatprep.mubr.msk.f32.mxu0 %vm68_vm0, %v1478_v30 }
 0x503   :  { %5736 = vmatmul.mubr.msk.f32.vlgmr.msra.gmra.mrb[28].mxu0 %vm68_vm0, %v1480_v10 }
 0x504   :  { %6041 = vmatpush3.bf16.xpose.msk.msra.mxu0 %vm7021_vm2, %v6036_v53  ;;  %5749 = vmatprep.mubr.msk.f32.mxu0 %vm566_vm1, %v7465_v50  ;;  %v6254_v49 = vpop.permute.xlu0 %6253  ;;  %v6060_v50 = vpack.c.bf16 %v6251_v18, %v6250_v40 }
 0x505   :  { %6050 = vmatprep.subr.msk.bf16.mxu0 %vm7021_vm2, %v6048_v6  ;;  %v6256_v8 = vunpack.i.h.bf16 %v6254_v49  ;;  %v6255_v56 = vunpack.i.l.bf16 %v6254_v49 }
 0x507   :  { %v6066_v7 = vpack.c.bf16 %v6256_v8, %v6255_v56 }
 0x508   :  { %v2544_v35 = vpop.permute.xlu0 %2543 }
 0x509   :  { %5771 = vmatmul.mubr.msk.f32.vlgmr.msra.gmra.mrb[22].mxu1 %vm566_vm1, %v2544_v35  ;;  %6068 = vmatprep.subr.msk.bf16.mxu1 %vm7021_vm2, %v6066_v7 }
 0x50a   :  { %6071 = vmatpush3.bf16.xpose.msk.msra.mxu1 %vm7021_vm2, %v6066_v7 }
 0x50b   :  { %5750 = vmatmul.mubr.msk.f32.vlgmr.msra.gmra.mrb[30].mxu0 %vm566_vm1, %v2271_v17 }
 0x50c   :  { %6053 = vmatpush3.bf16.xpose.msk.msra.mxu0 %vm7021_vm2, %v6048_v6  ;;  %5763 = vmatprep.mubr.msk.f32.mxu0 %vm566_vm1, %v2451_v48  ;;  %v2633_v14 = vpop.permute.xlu0 %2632 }
 0x50d   :  { %6062 = vmatprep.subr.msk.bf16.mxu0 %vm7021_vm2, %v6060_v50 }
 0x510   :  { %v2724_v4 = vpop.permute.xlu0 %2723 }
 0x511   :  { %5784 = vmatprep.mubr.msk.f32.mxu1 %vm566_vm1, %v2724_v4 }
 0x512   :  { %5785 = vmatmul.mubr.msk.f32.vlgmr.msra.gmra.mrb[24].mxu1 %vm566_vm1, %v2726_v51 }
 0x513   :  { %5764 = vmatmul.mubr.msk.f32.vlgmr.msra.gmra.mrb[32].mxu0 %vm566_vm1, %v2453_v47 }
 0x514   :  { %6065 = vmatpush3.bf16.xpose.msk.msra.mxu0 %vm7021_vm2, %v6060_v50  ;;  %5777 = vmatprep.mubr.msk.f32.mxu0 %vm566_vm1, %v2633_v14  ;;  %v2815_v19 = vpop.permute.xlu0 %2814 }
 0x515   :  { %6074 = vmatprep.subr.msk.bf16.mxu0 %vm7021_vm2, %v6072_v16 }
 0x518   :  { %v6264_v28 = vpop.permute.xlu0 %6263 }
 0x519   :  { %v6266_v55 = vunpack.i.h.bf16 %v6264_v28  ;;  %v6265_v39 = vunpack.i.l.bf16 %v6264_v28 }
 0x51b   :  { %v6078_v52 = vpack.c.bf16 %v6266_v55, %v6265_v39  ;;  %5778 = vmatmul.mubr.msk.f32.vlgmr.msra.gmra.mrb[34].mxu0 %vm566_vm1, %v2635_v12  ;;  %v8622_v39 = vld [vmem:[#allocation5_spill] sm:$0xff] }
 0x51c   :  { %6077 = vmatpush3.bf16.xpose.msk.msra.mxu0 %vm7021_vm2, %v6072_v16  ;;  %5791 = vmatprep.mubr.msk.f32.mxu0 %vm566_vm1, %v2815_v19  ;;  %v8621_v16 = vld [vmem:[#allocation4_spill] sm:$0xff] }
 0x51d   :  { %6083 = vmatprep.subr.bf16.mxu0 %v6082_v32  ;;  %6079 = vmatprep.subr.bf16.mxu1 %v6078_v52 }
 0x51e   :  { %6081 = vmatpush3.bf16.msra.mxu1 %v6078_v52 }
 0x523   :  { %5792 = vmatmul.mubr.msk.f32.vlgmr.msra.gmra.mrb[36].mxu0 %vm566_vm1, %v2817_v62 }
 0x524   :  { %6085 = vmatpush3.bf16.msra.mxu0 %v6082_v32 }
 0x57e   :  { %v7572_v58 = vpop.f32.mrb[20].mxu0 }
 0x57f   :  { %v7574_v34 = vpop.f32.mrb[21].mxu0 }
 0x589   :  { %v7576_v22 = vpop.f32.mrb[22].mxu0 }
 0x58a   :  { %v7578_v1 = vpop.f32.mrb[23].mxu0 }
 0x595   :  { %v7580_v53 = vpop.f32.mrb[12].mxu1 }
 0x596   :  { %v7582_v11 = vpop.f32.mrb[13].mxu1 }
 0x599   :  { %v7584_v60 = vpop.f32.mrb[14].mxu1 }
 0x59a   :  { %v7586_v17 = vpop.f32.mrb[24].mxu0  ;;  %v7588_v46 = vpop.f32.mrb[15].mxu1 }
 0x59b   :  { %v7590_v44 = vpop.f32.mrb[25].mxu0 }
 0x59e   :  { %v7592_v47 = vpop.f32.mrb[16].mxu1 }
 0x59f   :  { %v7594_v24 = vpop.f32.mrb[17].mxu1 }
 0x5a2   :  { %v7596_v54 = vpop.f32.mrb[26].mxu0 }
 0x5a3   :  { %v7598_v59 = vpop.f32.mrb[27].mxu0 }
 0x5aa   :  { %v5744_v29 = vpop.f32.mrb[18].mxu1 }
 0x5ab   :  { %v2265_v38 = vadd.f32 %v5744_v29, %v7603_v45  ;;  %v2259_v27 = vpop.f32.mrb[19].mxu1  ;;  %v8623_v29 = vld [vmem:[#allocation6_spill] sm:$0xff] }
 0x5ac   :  { %v2260_v31 = vadd.f32 %v2259_v27, %v7608_v61  ;;  %v8624_v27 = vld [vmem:[#allocation7_spill] sm:$0xff] }
 0x5ad   :  { %v7613_v5 = vadd.f32 %v2265_v38, %v7148_v57 }
 0x5ae   :  { %v7616_v37 = vadd.f32 %v2260_v31, %v7154_v21 }
 0x5af   :  { %v2924_v15 = vsel %vm68_vm0, %v7613_v5, -inf }
 0x5b0   :  { %2925 = vmax.xlane.f32.xlu1 %v2924_v15  ;;  %v2921_v9 = vsel %vm68_vm0, %v7616_v37, -inf }
 0x5b1   :  { %2922 = vmax.xlane.f32.xlu0 %v2921_v9 }
 0x5d0   :  { %v5758_v48 = vpop.f32.mrb[20].mxu1 }
 0x5d1   :  { %v2447_v30 = vadd.f32 %v5758_v48, %v7603_v45  ;;  %v2441_v10 = vpop.f32.mrb[21].mxu1 }
 0x5d2   :  { %v2442_v12 = vadd.f32 %v2441_v10, %v7608_v61 }
 0x5d3   :  { %v7625_v57 = vadd.f32 %v2447_v30, %v7190_v26  ;;  %v8625_v30 = vld [vmem:[#allocation8_spill] sm:$0xff] }
 0x5d4   :  { %v7628_v21 = vadd.f32 %v2442_v12, %v7198_v42 }
 0x5d5   :  { %v2936_v6 = vsel %vm68_vm0, %v7625_v57, -inf }
 0x5d6   :  { %v7632_v49 = vpop.f32.mrb[28].mxu0  ;;  %2937 = vmax.xlane.f32.xlu1 %v2936_v6  ;;  %v2933_v8 = vsel %vm68_vm0, %v7628_v21, -inf }
 0x5d7   :  { %v7636_v56 = vpop.f32.mrb[29].mxu0  ;;  %2934 = vmax.xlane.f32.xlu0 %v2933_v8 }
 0x5dc   :  { %v5772_v18 = vpop.f32.mrb[22].mxu1 }
 0x5dd   :  { %v2629_v40 = vadd.f32 %v5772_v18, %v7603_v45  ;;  %v2623_v26 = vpop.f32.mrb[23].mxu1 }
 0x5de   :  { %v5751_v7 = vpop.f32.mrb[30].mxu0  ;;  %v2624_v2 = vadd.f32 %v2623_v26, %v7608_v61  ;;  %v8626_v26 = vld [vmem:[#allocation9_spill] sm:$0xff] }
 0x5df   :  { %v7640_v42 = vadd.f32 %v2629_v40, %v7205_v23  ;;  %v2356_v51 = vadd.f32 %v5751_v7, %v7603_v45  ;;  %v2350_v35 = vpop.f32.mrb[31].mxu0 }
 0x5e0   :  { %v2351_v50 = vadd.f32 %v2350_v35, %v7608_v61  ;;  %v7656_v63 = vadd.f32 %v2624_v2, %v8621_v16  ;;  %v8628_v16 = vld [vmem:[#allocation3_spill] sm:$0xff] }
 0x5e1   :  { %v7645_v14 = vadd.f32 %v2356_v51, %v7170_v33  ;;  %v2948_v62 = vsel %vm68_vm0, %v7640_v42, -inf  ;;  %v8627_v51 = vld [vmem:[#allocation10_spill] sm:$0xff] }
 0x5e2   :  { %2949 = vmax.xlane.f32.xlu1 %v2948_v62  ;;  %v7651_v3 = vadd.f32 %v2351_v50, %v7177_v13  ;;  %v2945_v52 = vsel %vm68_vm0, %v7656_v63, -inf }
 0x5e3   :  { %v2930_v23 = vsel %vm68_vm0, %v7645_v14, -inf }
 0x5e4   :  { %2931 = vmax.xlane.f32.xlu0 %v2930_v23  ;;  %v2927_v55 = vsel %vm68_vm0, %v7651_v3, -inf }
 0x5e5   :  { %v5786_v4 = vpop.f32.mrb[24].mxu1 }
 0x5e6   :  { %v5765_v19 = vpop.f32.mrb[32].mxu0  ;;  %v2805_v33 = vpop.f32.mrb[25].mxu1  ;;  %v2811_v25 = vadd.f32 %v5786_v4, %v7603_v45 }
 0x5e7   :  { %v2538_v43 = vadd.f32 %v5765_v19, %v7603_v45  ;;  %v2532_v28 = vpop.f32.mrb[33].mxu0  ;;  %v2806_v15 = vadd.f32 %v2805_v33, %v7608_v61  ;;  %v8629_v19 = vld [vmem:[#allocation2_spill] sm:$0xff] }
 0x5e8   :  { %v2533_v13 = vadd.f32 %v2532_v28, %v7608_v61  ;;  %2928 = vmax.xlane.f32.xlu0 %v2927_v55  ;;  %v7669_v38 = vadd.f32 %v2811_v25, %v8623_v29  ;;  %v8631_v55 = vld [vmem:[#allocation12_spill] sm:$0xff] }
 0x5e9   :  { %v7664_v32 = vadd.f32 %v2538_v43, %v8622_v39  ;;  %v7678_v10 = vadd.f32 %v2806_v15, %v8625_v30  ;;  %v8630_v43 = vld [vmem:[#allocation11_spill] sm:$0xff] }
 0x5ea   :  { %v7672_v31 = vadd.f32 %v2533_v13, %v8624_v27  ;;  %v2960_v8 = vsel %vm68_vm0, %v7669_v38, -inf }
 0x5eb   :  { %v2942_v9 = vsel %vm68_vm0, %v7664_v32, -inf  ;;  %v2957_v62 = vsel %vm68_vm0, %v7678_v10, -inf }
 0x5ec   :  { %2943 = vmax.xlane.f32.xlu1 %v2942_v9  ;;  %2946 = vmax.xlane.f32.xlu0 %v2945_v52  ;;  %v2939_v18 = vsel %vm68_vm0, %v7672_v31, -inf }
 0x5ee   :  { %v5779_v48 = vpop.f32.mrb[34].mxu0 }
 0x5ef   :  { %v2720_v12 = vadd.f32 %v5779_v48, %v7603_v45  ;;  %v2714_v6 = vpop.f32.mrb[35].mxu0 }
 0x5f0   :  { %v2715_v40 = vadd.f32 %v2714_v6, %v7608_v61  ;;  %2961 = vmax.xlane.f32.xlu1 %v2960_v8  ;;  %2940 = vmax.xlane.f32.xlu0 %v2939_v18 }
 0x5f1   :  { %v7687_v7 = vadd.f32 %v2720_v12, %v8626_v26 }
 0x5f2   :  { %v7690_v35 = vadd.f32 %v2715_v40, %v8627_v51 }
 0x5f3   :  { %v2954_v50 = vsel %vm68_vm0, %v7687_v7, -inf }
 0x5f4   :  { %2955 = vmax.xlane.f32.xlu1 %v2954_v50  ;;  %2958 = vmax.xlane.f32.xlu0 %v2957_v62  ;;  %v2951_v4 = vsel %vm68_vm0, %v7690_v35, -inf }
 0x5f6   :  { %v5793_v2 = vpop.f32.mrb[36].mxu0 }
 0x5f7   :  { %v2896_v23 = vpop.f32.mrb[37].mxu0  ;;  %v2902_v33 = vadd.f32 %v5793_v2, %v7603_v45 }
 0x5f8   :  { %2952 = vmax.xlane.f32.xlu0 %v2951_v4  ;;  %v2897_v28 = vadd.f32 %v2896_v23, %v7608_v61 }
 0x5f9   :  { %v7704_v25 = vadd.f32 %v2902_v33, %v8630_v43 }
 0x5fa   :  { %v7708_v13 = vadd.f32 %v2897_v28, %v8631_v55 }
 0x5fb   :  { %v2966_v39 = vsel %vm68_vm0, %v7704_v25, -inf }
 0x5fc   :  { %v2963_v52 = vsel %vm68_vm0, %v7708_v13, -inf }
 0x605   :  { %6278 = vrot.lane.b32.xlu1 %v8628_v16, %s6578_s8 }
 0x60e   :  { %6273 = vrot.lane.b32.xlu0 %v8629_v19, %s6578_s8 }
 0x629   :  { %2967 = vmax.xlane.f32.xlu1 %v2966_v39 }
 0x62d   :  { %2964 = vmax.xlane.f32.xlu0 %v2963_v52 }
 0x63a   :  { %6288 = vrot.lane.b32.xlu1 %v6985_v20, %s6578_s8 }
 0x63d   :  { %v2926_v45 = vpop.xlane.xlu1 %2925 }
 0x63e   :  { %v2970_v61 = vsub.f32 %v7613_v5, %v2926_v45  ;;  %v2923_v29 = vpop.xlane.xlu0 %2922 }
 0x63f   :  { %v2969_v15 = vsub.f32 %v7616_v37, %v2923_v29 }
 0x640   :  { %v2987_v27 = vmul.f32 1.442695, %v2970_v61 }
 0x641   :  { %v2985_v9 = vmul.f32 1.442695, %v2969_v15 }
 0x642   :  { %6398 = vpow2.f32 %v2987_v27 }
 0x643   :  { %6283 = vrot.lane.b32.xlu0 %v6971_v0, %s6578_s8  ;;  %6400 = vpow2.f32 %v2985_v9 }
 0x64c   :  { %v7720_v48 = vpop.eup %6398 }
 0x64d   :  { %v3020_v30 = vsel %vm68_vm0, %v7720_v48, 0.0  ;;  %v7724_v12 = vpop.eup %6400 }
 0x64e   :  { %v3017_v0 = vsel %vm68_vm0, %v7724_v12, 0.0 }
 0x65e   :  { %3021 = vadd.xlane.f32.xlu1 %v3020_v30 }
 0x662   :  { %3018 = vadd.xlane.f32.xlu0 %v3017_v0 }
 0x663   :  { %v2938_v20 = vpop.xlane.xlu1 %2937 }
 0x664   :  { %v2974_v5 = vsub.f32 %v7625_v57, %v2938_v20  ;;  %v2935_v6 = vpop.xlane.xlu0 %2934 }
 0x665   :  { %v2973_v37 = vsub.f32 %v7628_v21, %v2935_v6 }
 0x666   :  { %v2995_v8 = vmul.f32 1.442695, %v2974_v5 }
 0x667   :  { %v2993_v18 = vmul.f32 1.442695, %v2973_v37 }
 0x668   :  { %6402 = vpow2.f32 %v2995_v8 }
 0x669   :  { %6404 = vpow2.f32 %v2993_v18 }
 0x66f   :  { %v2950_v40 = vpop.xlane.xlu1 %2949 }
 0x670   :  { %v2978_v26 = vsub.f32 %v7640_v42, %v2950_v40 }
 0x671   :  { %v2932_v51 = vpop.xlane.xlu0 %2931 }
 0x672   :  { %v7731_v50 = vpop.eup %6402  ;;  %v2972_v62 = vsub.f32 %v7645_v14, %v2932_v51  ;;  %v3003_v23 = vmul.f32 1.442695, %v2978_v26 }
 0x673   :  { %v7734_v2 = vpop.eup %6404  ;;  %v3032_v57 = vsel %vm68_vm0, %v7731_v50, 0.0 }
 0x674   :  { %v2991_v4 = vmul.f32 1.442695, %v2972_v62  ;;  %3033 = vadd.xlane.f32.xlu1 %v3032_v57  ;;  %v3029_v21 = vsel %vm68_vm0, %v7734_v2, 0.0 }
 0x675   :  { %v2929_v16 = vpop.xlane.xlu0 %2928  ;;  %3030 = vadd.xlane.f32.xlu0 %v3029_v21 }
 0x676   :  { %6406 = vpow2.f32 %v2991_v4  ;;  %v2971_v42 = vsub.f32 %v7651_v3, %v2929_v16 }
 0x677   :  { %6408 = vpow2.f32 %v3003_v23 }
 0x678   :  { %v2989_v19 = vmul.f32 1.442695, %v2971_v42 }
 0x679   :  { %v2944_v33 = vpop.xlane.xlu1 %2943  ;;  %v2947_v14 = vpop.xlane.xlu0 %2946 }
 0x67a   :  { %6410 = vpow2.f32 %v2989_v19  ;;  %v2976_v43 = vsub.f32 %v7664_v32, %v2944_v33  ;;  %v2977_v28 = vsub.f32 %v7656_v63, %v2947_v14 }
 0x67c   :  { %v2999_v55 = vmul.f32 1.442695, %v2976_v43  ;;  %v3001_v39 = vmul.f32 1.442695, %v2977_v28 }
 0x67d   :  { %v2962_v52 = vpop.xlane.xlu1 %2961  ;;  %v2941_v45 = vpop.xlane.xlu0 %2940 }
 0x67e   :  { %6412 = vpow2.f32 %v2999_v55  ;;  %v2982_v61 = vsub.f32 %v7669_v38, %v2962_v52  ;;  %v2975_v29 = vsub.f32 %v7672_v31, %v2941_v45 }
 0x67f   :  { %6414 = vpow2.f32 %v3001_v39 }
 0x680   :  { %v7745_v3 = vpop.eup %6406  ;;  %v3011_v27 = vmul.f32 1.442695, %v2982_v61  ;;  %v2997_v15 = vmul.f32 1.442695, %v2975_v29 }
 0x681   :  { %v2956_v9 = vpop.xlane.xlu1 %2955  ;;  %v2959_v30 = vpop.xlane.xlu0 %2958  ;;  %v3026_v32 = vsel %vm68_vm0, %v7745_v3, 0.0 }
 0x682   :  { %v7749_v63 = vpop.eup %6408  ;;  %6416 = vpow2.f32 %v3011_v27  ;;  %v2980_v0 = vsub.f32 %v7687_v7, %v2956_v9  ;;  %v2981_v20 = vsub.f32 %v7678_v10, %v2959_v30  ;;  %3027 = vadd.xlane.f32.xlu1 %v3026_v32 }
 0x683   :  { %6418 = vpow2.f32 %v2997_v15  ;;  %v3044_v8 = vsel %vm68_vm0, %v7749_v63, 0.0 }
 0x684   :  { %v7753_v38 = vpop.eup %6410  ;;  %v3009_v31 = vmul.f32 1.442695, %v2981_v20  ;;  %v3007_v5 = vmul.f32 1.442695, %v2980_v0 }
 0x685   :  { %v6279_v6 = vpop.permute.xlu1 %6278  ;;  %v2953_v37 = vpop.xlane.xlu0 %2952  ;;  %v3023_v18 = vsel %vm68_vm0, %v7753_v38, 0.0 }
 0x686   :  { %v6281_v40 = vunpack.i.h.bf16 %v6279_v6  ;;  %v6280_v26 = vunpack.i.l.bf16 %v6279_v6  ;;  %v2979_v7 = vsub.f32 %v7690_v35, %v2953_v37  ;;  %3045 = vadd.xlane.f32.xlu1 %v3044_v8  ;;  %3024 = vadd.xlane.f32.xlu0 %v3023_v18  ;;  %6420 = vpow2.f32 %v3009_v31 }
 0x687   :  { %6422 = vpow2.f32 %v3007_v5 }
 0x688   :  { %v7760_v10 = vpop.eup %6412  ;;  %v7762_v51 = vpack.c.bf16 %v6281_v40, %v6280_v26  ;;  %v3005_v62 = vmul.f32 1.442695, %v2979_v7 }
 0x689   :  { %v7764_v57 = vpop.eup %6414  ;;  %v6274_v23 = vpop.permute.xlu0 %6273  ;;  %v3038_v4 = vsel %vm68_vm0, %v7760_v10, 0.0 }
 0x68a   :  { %6424 = vpow2.f32 %v3005_v62  ;;  %v6276_v21 = vunpack.i.h.bf16 %v6274_v23  ;;  %v6275_v16 = vunpack.i.l.bf16 %v6274_v23  ;;  %6091 = vmatprep.subr.bf16.mxu0 %v7762_v51  ;;  %3039 = vadd.xlane.f32.xlu1 %v3038_v4  ;;  %v3041_v35 = vsel %vm68_vm0, %v7764_v57, 0.0 }
 0x68b   :  { %3042 = vadd.xlane.f32.xlu0 %v3041_v35 }
 0x68c   :  { %v7771_v42 = vpop.eup %6416  ;;  %v6086_v19 = vpack.c.bf16 %v6276_v21, %v6275_v16 }
 0x68d   :  { %v7773_v33 = vpop.eup %6418  ;;  %v3056_v14 = vsel %vm68_vm0, %v7771_v42, 0.0 }
 0x68e   :  { %3057 = vadd.xlane.f32.xlu1 %v3056_v14  ;;  %v3035_v43 = vsel %vm68_vm0, %v7773_v33, 0.0  ;;  %6087 = vmatprep.subr.bf16.mxu1 %v6086_v19 }
 0x68f   :  { %3036 = vadd.xlane.f32.xlu0 %v3035_v43 }
 0x690   :  { %v7779_v28 = vpop.eup %6420 }
 0x691   :  { %v3053_v55 = vsel %vm68_vm0, %v7779_v28, 0.0  ;;  %v7783_v39 = vpop.eup %6422 }
 0x692   :  { %3054 = vadd.xlane.f32.xlu1 %v3053_v55  ;;  %v3050_v61 = vsel %vm68_vm0, %v7783_v39, 0.0 }
 0x694   :  { %v7785_v52 = vpop.eup %6424 }
 0x695   :  { %v3047_v45 = vsel %vm68_vm0, %v7785_v52, 0.0 }
 0x696   :  { %3048 = vadd.xlane.f32.xlu0 %v3047_v45  ;;  %3051 = vadd.xlane.f32.xlu1 %v3050_v61 }
 0x6b6   :  { %v2968_v29 = vpop.xlane.xlu1 %2967 }
 0x6b7   :  { %v2984_v27 = vsub.f32 %v7704_v25, %v2968_v29 }
 0x6b9   :  { %v3015_v15 = vmul.f32 1.442695, %v2984_v27 }
 0x6ba   :  { %v2965_v9 = vpop.xlane.xlu0 %2964  ;;  %v6289_v25 = vpop.permute.xlu1 %6288 }
 0x6bb   :  { %6426 = vpow2.f32 %v3015_v15  ;;  %v2983_v30 = vsub.f32 %v7708_v13, %v2965_v9  ;;  %v6291_v61 = vunpack.i.h.bf16 %v6289_v25  ;;  %v6290_v29 = vunpack.i.l.bf16 %v6289_v25 }
 0x6bd   :  { %v3013_v32 = vmul.f32 1.442695, %v2983_v30 }
 0x6be   :  { %v6284_v13 = vpop.permute.xlu0 %6283 }
 0x6bf   :  { %6428 = vpow2.f32 %v3013_v32  ;;  %v6286_v40 = vunpack.i.h.bf16 %v6284_v13  ;;  %v6285_v26 = vunpack.i.l.bf16 %v6284_v13 }
 0x6c5   :  { %v7793_v0 = vpop.eup %6426 }
 0x6c6   :  { %v3062_v20 = vsel %vm68_vm0, %v7793_v0, 0.0 }
 0x6c7   :  { %3063 = vadd.xlane.f32.xlu1 %v3062_v20  ;;  %v6098_v20 = vpack.c.bf16 %v6291_v61, %v6290_v29 }
 0x6c9   :  { %v7797_v31 = vpop.eup %6428 }
 0x6ca   :  { %v3059_v5 = vsel %vm68_vm0, %v7797_v31, 0.0 }
 0x6cb   :  { %3060 = vadd.xlane.f32.xlu0 %v3059_v5 }
 0x6d8   :  { %6298 = vrot.lane.b32.xlu1 %v7005_v36, %s6578_s8  ;;  %v6094_v36 = vpack.c.bf16 %v6286_v40, %v6285_v26 }
 0x6e1   :  { %6293 = vrot.lane.b32.xlu0 %v6995_v41, %s6578_s8 }
 0x6eb   :  { %v3022_v6 = vpop.xlane.xlu1 %3021 }
 0x6ec   :  { %6430 = vrcp.f32 %v3022_v6 }
 0x6ef   :  { %v3019_v37 = vpop.xlane.xlu0 %3018 }
 0x6f0   :  { %6432 = vrcp.f32 %v3019_v37 }
 0x6f6   :  { %v6431_v8 = vpop.eup %6430 }
 0x6f7   :  { %v3068_v62 = vmul.f32 %v6431_v8, %v7720_v48 }
 0x6fa   :  { %v6433_v18 = vpop.eup %6432 }
 0x6fb   :  { %v3066_v7 = vmul.f32 %v6433_v18, %v7724_v12 }
 0x6fd   :  { %5798 = vmatprep.mubr.msk.f32.mxu1 %vm68_vm0, %v3066_v7 }
 0x6fe   :  { %5799 = vmatmul.mubr.msk.f32.vlgmr.msra.gmra.mrb[26].mxu1 %vm68_vm0, %v3068_v62 }
 0x6ff   :  { %6089 = vmatpush3.bf16.msra.mxu1 %v6086_v19 }
 0x700   :  { %6095 = vmatprep.subr.bf16.mxu1 %v6094_v36 }
 0x701   :  { %v3034_v41 = vpop.xlane.xlu1 %3033 }
 0x702   :  { %6434 = vrcp.f32 %v3034_v41  ;;  %v3031_v23 = vpop.xlane.xlu0 %3030 }
 0x703   :  { %6436 = vrcp.f32 %v3031_v23 }
 0x70c   :  { %v6435_v4 = vpop.eup %6434 }
 0x70d   :  { %v6437_v21 = vpop.eup %6436  ;;  %v3076_v35 = vmul.f32 %v6435_v4, %v7731_v50 }
 0x70e   :  { %v3074_v16 = vmul.f32 %v6437_v21, %v7734_v2 }
 0x70f   :  { %v3028_v12 = vpop.xlane.xlu1 %3027 }
 0x710   :  { %5812 = vmatprep.mubr.msk.f32.mxu1 %vm68_vm0, %v3074_v16  ;;  %6438 = vrcp.f32 %v3028_v12 }
 0x711   :  { %5813 = vmatmul.mubr.msk.f32.vlgmr.msra.gmra.mrb[28].mxu1 %vm68_vm0, %v3076_v35 }
 0x712   :  { %6097 = vmatpush3.bf16.msra.mxu1 %v6094_v36 }
 0x713   :  { %v3046_v48 = vpop.xlane.xlu1 %3045  ;;  %v3025_v14 = vpop.xlane.xlu0 %3024 }
 0x714   :  { %6440 = vrcp.f32 %v3025_v14  ;;  %v3873_v14 = vld [vmem:[%s8581_s5] sm:$0xff] }
 0x715   :  { %6442 = vrcp.f32 %v3046_v48 }
 0x717   :  { %v3040_v19 = vpop.xlane.xlu1 %3039 }
 0x718   :  { %v3043_v43 = vpop.xlane.xlu0 %3042 }
 0x719   :  { %6444 = vrcp.f32 %v3043_v43 }
 0x71a   :  { %6446 = vrcp.f32 %v3040_v19  ;;  %v6439_v2 = vpop.eup %6438  ;;  %v3874_v19 = vld [vmem:[%s8581_s5 + $0x8] sm:$0xff] }
 0x71b   :  { %v3058_v55 = vpop.xlane.xlu1 %3057  ;;  %v3072_v9 = vmul.f32 %v6439_v2, %v7745_v3  ;;  %v6110_v43 = vpack.c.bf16 %v3874_v19, %v3873_v14 }
 0x71c   :  { %v3037_v45 = vpop.xlane.xlu0 %3036 }
 0x71d   :  { %6448 = vrcp.f32 %v3037_v45 }
 0x71e   :  { %v6441_v50 = vpop.eup %6440 }
 0x71f   :  { %v3055_v27 = vpop.xlane.xlu1 %3054  ;;  %v3070_v15 = vmul.f32 %v6441_v50, %v7753_v38  ;;  %v6443_v30 = vpop.eup %6442 }
 0x720   :  { %6450 = vrcp.f32 %v3055_v27  ;;  %v3084_v6 = vmul.f32 %v6443_v30, %v7749_v63 }
 0x721   :  { %5805 = vmatprep.mubr.msk.f32.mxu0 %vm68_vm0, %v3070_v15 }
 0x722   :  { %5806 = vmatmul.mubr.msk.f32.vlgmr.msra.gmra.mrb[38].mxu0 %vm68_vm0, %v3072_v9 }
 0x723   :  { %v6445_v32 = vpop.eup %6444  ;;  %v3049_v5 = vpop.xlane.xlu0 %3048  ;;  %6093 = vmatpush3.bf16.msra.mxu0 %v7762_v51 }
 0x724   :  { %v3052_v13 = vpop.xlane.xlu1 %3051  ;;  %6452 = vrcp.f32 %v3049_v5  ;;  %v3082_v25 = vmul.f32 %v6445_v32, %v7764_v57  ;;  %6099 = vmatprep.subr.bf16.mxu0 %v6098_v20  ;;  %v6447_v3 = vpop.eup %6446 }
 0x725   :  { %6454 = vrcp.f32 %v3052_v13  ;;  %v3080_v8 = vmul.f32 %v6447_v3, %v7760_v10 }
 0x726   :  { %5826 = vmatprep.mubr.msk.f32.mxu1 %vm68_vm0, %v3082_v25  ;;  %6456 = vrcp.f32 %v3058_v55 }
 0x727   :  { %v6449_v38 = vpop.eup %6448  ;;  %5827 = vmatmul.mubr.msk.f32.vlgmr.msra.gmra.mrb[30].mxu1 %vm68_vm0, %v3084_v6 }
 0x728   :  { %v3078_v37 = vmul.f32 %v6449_v38, %v7773_v33 }
 0x72a   :  { %5819 = vmatprep.mubr.msk.f32.mxu0 %vm68_vm0, %v3078_v37  ;;  %v6451_v51 = vpop.eup %6450 }
 0x72b   :  { %5820 = vmatmul.mubr.msk.f32.vlgmr.msra.gmra.mrb[40].mxu0 %vm68_vm0, %v3080_v8  ;;  %v3090_v63 = vmul.f32 %v6451_v51, %v7779_v28 }
 0x72c   :  { %6101 = vmatpush3.bf16.msra.mxu0 %v6098_v20 }
 0x72d   :  { %5840 = vmatprep.mubr.msk.f32.mxu1 %vm68_vm0, %v3090_v63 }
 0x72e   :  { %v6453_v57 = vpop.eup %6452 }
 0x72f   :  { %v6455_v18 = vpop.eup %6454  ;;  %v3086_v40 = vmul.f32 %v6453_v57, %v7785_v52 }
 0x730   :  { %v3088_v26 = vmul.f32 %v6455_v18, %v7783_v39  ;;  %v6457_v39 = vpop.eup %6456 }
 0x731   :  { %5833 = vmatprep.mubr.msk.f32.mxu0 %vm68_vm0, %v3086_v40  ;;  %v3092_v35 = vmul.f32 %v6457_v39, %v7771_v42  ;;  %v6559_v39 = vld [vmem:[%s8574_s0] sm:$0xff] }
 0x732   :  { %5834 = vmatmul.mubr.msk.f32.vlgmr.msra.gmra.mrb[42].mxu0 %vm68_vm0, %v3088_v26 }
 0x754   :  { %v3064_v10 = vpop.xlane.xlu1 %3063 }
 0x755   :  { %6458 = vrcp.f32 %v3064_v10 }
 0x758   :  { %v6299_v33 = vpop.permute.xlu1 %6298  ;;  %v3061_v7 = vpop.xlane.xlu0 %3060 }
 0x759   :  { %v6301_v62 = vunpack.i.h.bf16 %v6299_v33  ;;  %v6300_v36 = vunpack.i.l.bf16 %v6299_v33  ;;  %6460 = vrcp.f32 %v3061_v7 }
 0x75b   :  { %v6106_v28 = vpack.c.bf16 %v6301_v62, %v6300_v36 }
 0x75c   :  { %v6294_v41 = vpop.permute.xlu0 %6293 }
 0x75d   :  { %v6296_v23 = vunpack.i.h.bf16 %v6294_v41  ;;  %v6295_v4 = vunpack.i.l.bf16 %v6294_v41  ;;  %6107 = vmatprep.subr.bf16.mxu0 %v6106_v28 }
 0x75e   :  { %6109 = vmatpush3.bf16.msra.mxu0 %v6106_v28 }
 0x75f   :  { %v6102_v52 = vpack.c.bf16 %v6296_v23, %v6295_v4  ;;  %v6459_v21 = vpop.eup %6458  ;;  %6111 = vmatprep.subr.bf16.mxu0 %v6110_v43 }
 0x760   :  { %v3096_v48 = vmul.f32 %v6459_v21, %v7793_v0 }
 0x761   :  { %6103 = vmatprep.subr.bf16.mxu1 %v6102_v52 }
 0x762   :  { %6105 = vmatpush3.bf16.msra.mxu1 %v6102_v52 }
 0x763   :  { %v6461_v16 = vpop.eup %6460  ;;  %6134 = vmatprep.subr.bf16.mxu1 %v6110_v43 }
 0x764   :  { %v3094_v12 = vmul.f32 %v6461_v16, %v7797_v31 }
 0x765   :  { %5841 = vmatmul.mubr.msk.f32.vlgmr.msra.gmra.mrb[32].mxu1 %vm68_vm0, %v3092_v35 }
 0x766   :  { %5847 = vmatprep.mubr.msk.f32.mxu0 %vm68_vm0, %v3094_v12  ;;  %6135 = vmatpush3.bf16.msra.mxu1 %v6110_v43 }
 0x767   :  { %5848 = vmatmul.mubr.msk.f32.vlgmr.msra.gmra.mrb[44].mxu0 %vm68_vm0, %v3096_v48 }
 0x768   :  { %6113 = vmatpush3.bf16.msra.mxu0 %v6110_v43  ;;  %v6560_v43 = vld [vmem:[%s8574_s0 + $0x18] sm:$0xff] }
 0x7d1   :  { %v5800_v42 = vpop.f32.mrb[26].mxu1 }
 0x7d2   :  { %3811 = vrot.lane.b32.xlu1 %v5800_v42, %s6579_s21  ;;  %v3175_v0 = vpop.f32.mrb[27].mxu1 }
 0x7d3   :  { %3809 = vrot.lane.b32.xlu0 %v3175_v0, %s6579_s21 }
 0x7e4   :  { %v5814_v31 = vpop.f32.mrb[28].mxu1 }
 0x7e5   :  { %v3349_v55 = vpop.f32.mrb[29].mxu1 }
 0x7f5   :  { %v5807_v45 = vpop.f32.mrb[38].mxu0 }
 0x7f6   :  { %3815 = vrot.lane.b32.xlu1 %v5807_v45, %s6579_s21  ;;  %v3262_v2 = vpop.f32.mrb[39].mxu0 }
 0x7f7   :  { %3813 = vrot.lane.b32.xlu0 %v3262_v2, %s6579_s21 }
 0x7fa   :  { %v5828_v50 = vpop.f32.mrb[30].mxu1  ;;  %3819 = vrot.lane.b32.xlu1 %v5814_v31, %s6579_s21  ;;  %v6561_v31 = vld [vmem:[%s8574_s0 + $0x10] sm:$0xff] }
 0x7fb   :  { %v3523_v61 = vpop.f32.mrb[31].mxu1  ;;  %3817 = vrot.lane.b32.xlu0 %v3349_v55, %s6579_s21 }
 0x7fe   :  { %v5821_v29 = vpop.f32.mrb[40].mxu0 }
 0x7ff   :  { %v3436_v27 = vpop.f32.mrb[41].mxu0  ;;  %3823 = vrot.lane.b32.xlu1 %v5821_v29, %s6579_s21  ;;  %v6562_v29 = vld [vmem:[%s8574_s0 + $0x28] sm:$0xff] }
 0x800   :  { %3821 = vrot.lane.b32.xlu0 %v3436_v27, %s6579_s21 }
 0x803   :  { %3827 = vrot.lane.b32.xlu1 %v5828_v50, %s6579_s21 }
 0x804   :  { %3825 = vrot.lane.b32.xlu0 %v3523_v61, %s6579_s21 }
 0x805   :  { %v5835_v15 = vpop.f32.mrb[42].mxu0 }
 0x806   :  { %v3610_v9 = vpop.f32.mrb[43].mxu0 }
 0x807   :  { %3831 = vrot.lane.b32.xlu1 %v5835_v15, %s6579_s21 }
 0x808   :  { %3829 = vrot.lane.b32.xlu0 %v3610_v9, %s6579_s21  ;;  %v6563_v9 = vld [vmem:[%s8574_s0 + $0x20] sm:$0xff] }
 0x838   :  { %v5842_v30 = vpop.f32.mrb[32].mxu1 }
 0x839   :  { %3835 = vrot.lane.b32.xlu1 %v5842_v30, %s6579_s21  ;;  %v3697_v32 = vpop.f32.mrb[33].mxu1 }
 0x83a   :  { %v5849_v20 = vpop.f32.mrb[44].mxu0  ;;  %3833 = vrot.lane.b32.xlu0 %v3697_v32, %s6579_s21 }
 0x83b   :  { %v3784_v5 = vpop.f32.mrb[45].mxu0 }
 0x83d   :  { %3839 = vrot.lane.b32.xlu1 %v5849_v20, %s6579_s21 }
 0x83e   :  { %3837 = vrot.lane.b32.xlu0 %v3784_v5, %s6579_s21 }
 0x844   :  { %v3812_v13 = vpop.permute.xlu1 %3811 }
 0x845   :  { %v3810_v25 = vpop.permute.xlu0 %3809  ;;  %v3858_v3 = vsel %vm566_vm1, %v7572_v58, %v3812_v13 }
 0x846   :  { %v3857_v6 = vsel %vm566_vm1, %v7574_v34, %v3810_v25 }
 0x847   :  { %5854 = vmatprep.mubr.msk.f32.mxu0 %vm68_vm0, %v3857_v6  ;;  %v6564_v6 = vld [vmem:[%s8574_s0 + $0x38] sm:$0xff] }
 0x848   :  { %5855 = vmatmul.mubr.msk.f32.vlgmr.msra.gmra.mrb[46].mxu0 %vm68_vm0, %v3858_v3 }
 0x868   :  { %v3816_v38 = vpop.permute.xlu1 %3815 }
 0x869   :  { %v3814_v37 = vpop.permute.xlu0 %3813  ;;  %v3860_v51 = vsel %vm566_vm1, %v7576_v22, %v3816_v38 }
 0x86a   :  { %v3859_v8 = vsel %vm566_vm1, %v7578_v1, %v3814_v37  ;;  %v6565_v37 = vld [vmem:[%s8574_s0 + $0x30] sm:$0xff] }
 0x86b   :  { %5857 = vmatprep.mubr.msk.f32.mxu0 %vm68_vm0, %v3859_v8 }
 0x86c   :  { %5858 = vmatmul.mubr.msk.f32.gmra.mrb[48].mxu0 %vm68_vm0, %v3860_v51  ;;  %v3820_v34 = vpop.permute.xlu1 %3819 }
 0x86d   :  { %v3818_v63 = vpop.permute.xlu0 %3817  ;;  %v3862_v57 = vsel %vm566_vm1, %v7580_v53, %v3820_v34 }
 0x86e   :  { %v3861_v58 = vsel %vm566_vm1, %v7582_v11, %v3818_v63 }
 0x86f   :  { %5860 = vmatprep.mubr.msk.f32.mxu0 %vm68_vm0, %v3861_v58 }
 0x870   :  { %5861 = vmatmul.mubr.msk.f32.gmra.mrb[50].mxu0 %vm68_vm0, %v3862_v57 }
 0x871   :  { %v3824_v18 = vpop.permute.xlu1 %3823 }
 0x872   :  { %v3822_v1 = vpop.permute.xlu0 %3821  ;;  %v3864_v40 = vsel %vm566_vm1, %v7586_v17, %v3824_v18  ;;  %v6566_v18 = vld [vmem:[%s8574_s0 + $0x48] sm:$0xff] }
 0x873   :  { %v3863_v22 = vsel %vm566_vm1, %v7590_v44, %v3822_v1 }
 0x874   :  { %5863 = vmatprep.mubr.msk.f32.mxu0 %vm68_vm0, %v3863_v22 }
 0x875   :  { %5864 = vmatmul.mubr.msk.f32.gmra.mrb[52].mxu0 %vm68_vm0, %v3864_v40  ;;  %v3828_v11 = vpop.permute.xlu1 %3827  ;;  %v6567_v40 = vld [vmem:[%s8574_s0 + $0x40] sm:$0xff] }
 0x876   :  { %v3826_v26 = vpop.permute.xlu0 %3825  ;;  %v3866_v10 = vsel %vm566_vm1, %v7584_v60, %v3828_v11 }
 0x877   :  { %v3865_v53 = vsel %vm566_vm1, %v7588_v46, %v3826_v26 }
 0x878   :  { %5866 = vmatprep.mubr.msk.f32.mxu1 %vm68_vm0, %v3865_v53 }
 0x879   :  { %v3832_v33 = vpop.permute.xlu1 %3831  ;;  %5867 = vmatmul.mubr.msk.f32.vlgmr.msra.gmra.mrb[34].mxu1 %vm68_vm0, %v3866_v10 }
 0x87a   :  { %v3830_v44 = vpop.permute.xlu0 %3829  ;;  %v3868_v7 = vsel %vm566_vm1, %v7596_v54, %v3832_v33 }
 0x87b   :  { %v3867_v17 = vsel %vm566_vm1, %v7598_v59, %v3830_v44 }
 0x87c   :  { %5869 = vmatprep.mubr.msk.f32.mxu1 %vm68_vm0, %v3867_v17  ;;  %v6568_v17 = vld [vmem:[%s8574_s0 + $0x58] sm:$0xff] }
 0x87d   :  { %5870 = vmatmul.mubr.msk.f32.gmra.mrb[36].mxu1 %vm68_vm0, %v3868_v7 }
 0x8ab   :  { %v3836_v46 = vpop.permute.xlu1 %3835 }
 0x8ac   :  { %v3834_v62 = vpop.permute.xlu0 %3833  ;;  %v3870_v36 = vsel %vm566_vm1, %v7592_v47, %v3836_v46  ;;  %v7911_v47 = vld [vmem:[%s8582_s6] ss:$0 sm:$0xff]  ;;  %v6569_v46 = vld [vmem:[%s8574_s0 + $0x50] sm:$0xff] }
 0x8ad   :  { %v3869_v60 = vsel %vm566_vm1, %v7594_v24, %v3834_v62 }
 0x8ae   :  { %5872 = vmatprep.mubr.msk.f32.mxu1 %vm68_vm0, %v3869_v60 }
 0x8af   :  { %v3840_v28 = vpop.permute.xlu1 %3839  ;;  %5873 = vmatmul.mubr.msk.f32.gmra.mrb[38].mxu1 %vm68_vm0, %v3870_v36 }
 0x8b0   :  { %v3838_v59 = vpop.permute.xlu0 %3837  ;;  %v3872_v41 = vsel %vm566_vm1, %v7632_v49, %v3840_v28 }
 0x8b1   :  { %v3871_v54 = vsel %vm566_vm1, %v7636_v56, %v3838_v59  ;;  %v6558_v56 = vld [vmem:[%s8574_s0 + $0x8] sm:$0xff] }
 0x8b2   :  { %5875 = vmatprep.mubr.msk.f32.mxu1 %vm68_vm0, %v3871_v54 }
 0x8b3   :  { %5876 = vmatmul.mubr.msk.f32.gmra.mrb[40].mxu1 %vm68_vm0, %v3872_v41 }
 0x91b   :  { %v5856_v24 = vpop.f32.mrb[46].mxu0 }
 0x91c   :  { %v4002_v23 = vadd.f32 %v5856_v24, %v7911_v47  ;;  %v3996_v4 = vpop.f32.mrb[47].mxu0 }
 0x91d   :  { %v3997_v52 = vadd.f32 %v7911_v47, %v3996_v4 }
 0x91e   :  { %v7918_v49 = vadd.f32 %v6558_v56, %v4002_v23  ;;  %v6570_v23 = vld [vmem:[%s8574_s0 + $0x68] sm:$0xff] }
 0x91f   :  { %v7923_v21 = vadd.f32 %v6559_v39, %v3997_v52  ;;  %v6571_v52 = vld [vmem:[%s8574_s0 + $0x60] sm:$0xff] }
 0x920   :  { %v4096_v16 = vsel %vm68_vm0, %v7918_v49, 0.0 }
 0x921   :  { %4097 = vadd.xlane.f32.xlu1 %v4096_v16  ;;  %v4093_v35 = vsel %vm68_vm0, %v7923_v21, 0.0 }
 0x922   :  { %4094 = vadd.xlane.f32.xlu0 %v4093_v35 }
 0x93f   :  { %v5859_v12 = vpop.f32.mrb[48].mxu0 }
 0x940   :  { %v4012_v48 = vadd.f32 %v5859_v12, %v7911_v47  ;;  %v4006_v14 = vpop.f32.mrb[49].mxu0 }
 0x941   :  { %v4007_v19 = vadd.f32 %v7911_v47, %v4006_v14 }
 0x942   :  { %v7934_v42 = vadd.f32 %v6560_v43, %v4012_v48 }
 0x943   :  { %v5862_v0 = vpop.f32.mrb[50].mxu0  ;;  %v7939_v55 = vadd.f32 %v6561_v31, %v4007_v19  ;;  %v6572_v19 = vld [vmem:[%s8574_s0 + $0x78] sm:$0xff] }
 0x944   :  { %v4022_v45 = vadd.f32 %v5862_v0, %v7911_v47  ;;  %v4016_v2 = vpop.f32.mrb[51].mxu0  ;;  %v4102_v50 = vsel %vm68_vm0, %v7934_v42, 0.0  ;;  %v6573_v0 = vld [vmem:[%s8574_s0 + $0x70] sm:$0xff] }
 0x945   :  { %v4017_v61 = vadd.f32 %v7911_v47, %v4016_v2  ;;  %4103 = vadd.xlane.f32.xlu0 %v4102_v50  ;;  %v4099_v13 = vsel %vm68_vm0, %v7939_v55, 0.0 }
 0x946   :  { %v7948_v27 = vadd.f32 %v6562_v29, %v4022_v45 }
 0x947   :  { %v7953_v30 = vadd.f32 %v6563_v9, %v4017_v61 }
 0x948   :  { %v5865_v15 = vpop.f32.mrb[52].mxu0  ;;  %v4108_v5 = vsel %vm68_vm0, %v7948_v27, 0.0 }
 0x949   :  { %v4032_v32 = vadd.f32 %v5865_v15, %v7911_v47  ;;  %v4026_v20 = vpop.f32.mrb[53].mxu0  ;;  %4109 = vadd.xlane.f32.xlu1 %v4108_v5  ;;  %4100 = vadd.xlane.f32.xlu0 %v4099_v13  ;;  %v4105_v58 = vsel %vm68_vm0, %v7953_v30, 0.0 }
 0x94a   :  { %v4027_v25 = vadd.f32 %v7911_v47, %v4026_v20 }
 0x94b   :  { %v7964_v3 = vadd.f32 %v6564_v6, %v4032_v32 }
 0x94c   :  { %v5868_v38 = vpop.f32.mrb[34].mxu1  ;;  %v7969_v8 = vadd.f32 %v6565_v37, %v4027_v25  ;;  %v4345_v37 = vld [vmem:[%s8583_s11] sm:$0xff] }
 0x94d   :  { %v4042_v51 = vadd.f32 %v5868_v38, %v7911_v47  ;;  %v4036_v34 = vpop.f32.mrb[35].mxu1  ;;  %v4114_v63 = vsel %vm68_vm0, %v7964_v3, 0.0  ;;  %4106 = vadd.xlane.f32.xlu0 %v4105_v58 }
 0x94e   :  { %v4037_v57 = vadd.f32 %v7911_v47, %v4036_v34  ;;  %4115 = vadd.xlane.f32.xlu1 %v4114_v63  ;;  %v4111_v10 = vsel %vm68_vm0, %v7969_v8, 0.0 }
 0x94f   :  { %v7980_v1 = vadd.f32 %v6566_v18, %v4042_v51  ;;  %v4346_v51 = vld [vmem:[%s8583_s11 + $0x8] sm:$0xff] }
 0x950   :  { %v5871_v22 = vpop.f32.mrb[36].mxu1  ;;  %v7985_v11 = vadd.f32 %v6567_v40, %v4037_v57  ;;  %v6114_v58 = vpack.c.bf16 %v4346_v51, %v4345_v37 }
 0x951   :  { %v4052_v26 = vadd.f32 %v5871_v22, %v7911_v47  ;;  %v4046_v53 = vpop.f32.mrb[37].mxu1  ;;  %v4120_v33 = vsel %vm68_vm0, %v7980_v1, 0.0  ;;  %4112 = vadd.xlane.f32.xlu0 %v4111_v10 }
 0x952   :  { %8632 = vst [vmem:[#allocation4_spill] sm:$0xff] %v7985_v11  ;;  %v4047_v44 = vadd.f32 %v7911_v47, %v4046_v53  ;;  %4121 = vadd.xlane.f32.xlu1 %v4120_v33  ;;  %v4117_v36 = vsel %vm68_vm0, %v7985_v11, 0.0  ;;  %6115 = vmatprep.subr.bf16.mxu0 %v6114_v58 }
 0x953   :  { %v7996_v7 = vadd.f32 %v6568_v17, %v4052_v26  ;;  %6117 = vmatpush3.bf16.msra.mxu0 %v6114_v58 }
 0x954   :  { %v8001_v62 = vadd.f32 %v6569_v46, %v4047_v44 }
 0x955   :  { %8633 = vst [vmem:[#allocation5_spill] sm:$0xff] %v7996_v7  ;;  %v4126_v60 = vsel %vm68_vm0, %v7996_v7, 0.0  ;;  %4118 = vadd.xlane.f32.xlu0 %v4117_v36 }
 0x956   :  { %8634 = vst [vmem:[#allocation6_spill] sm:$0xff] %v8001_v62  ;;  %4127 = vadd.xlane.f32.xlu1 %v4126_v60  ;;  %v4123_v28 = vsel %vm68_vm0, %v8001_v62, 0.0 }
 0x959   :  { %4124 = vadd.xlane.f32.xlu0 %v4123_v28 }
 0x982   :  { %v5874_v59 = vpop.f32.mrb[38].mxu1 }
 0x983   :  { %v4062_v54 = vadd.f32 %v5874_v59, %v7911_v47  ;;  %v4056_v41 = vpop.f32.mrb[39].mxu1 }
 0x984   :  { %v4057_v24 = vadd.f32 %v7911_v47, %v4056_v41 }
 0x985   :  { %v8014_v4 = vadd.f32 %v6570_v23, %v4062_v54 }
 0x986   :  { %v8019_v56 = vadd.f32 %v6571_v52, %v4057_v24  ;;  %v5877_v39 = vpop.f32.mrb[40].mxu1 }
 0x987   :  { %8635 = vst [vmem:[#allocation7_spill] sm:$0xff] %v8014_v4  ;;  %v4072_v16 = vadd.f32 %v5877_v39, %v7911_v47  ;;  %v4066_v35 = vpop.f32.mrb[41].mxu1  ;;  %v4132_v12 = vsel %vm68_vm0, %v8014_v4, 0.0 }
 0x988   :  { %8636 = vst [vmem:[#allocation8_spill] sm:$0xff] %v8019_v56  ;;  %v4067_v48 = vadd.f32 %v7911_v47, %v4066_v35  ;;  %4133 = vadd.xlane.f32.xlu1 %v4132_v12  ;;  %v4129_v14 = vsel %vm68_vm0, %v8019_v56, 0.0 }
 0x989   :  { %v8030_v43 = vadd.f32 %v6572_v19, %v4072_v16  ;;  %4130 = vadd.xlane.f32.xlu0 %v4129_v14 }
 0x98a   :  { %v8035_v31 = vadd.f32 %v6573_v0, %v4067_v48 }
 0x98b   :  { %8637 = vst [vmem:[#allocation9_spill] sm:$0xff] %v8030_v43  ;;  %v4138_v47 = vsel %vm68_vm0, %v8030_v43, 0.0 }
 0x98c   :  { %8638 = vst [vmem:[#allocation10_spill] sm:$0xff] %v8035_v31  ;;  %4139 = vadd.xlane.f32.xlu1 %v4138_v47  ;;  %v4135_v45 = vsel %vm68_vm0, %v8035_v31, 0.0 }
 0x98d   :  { %4136 = vadd.xlane.f32.xlu0 %v4135_v45 }
 0x9ae   :  { %v4098_v2 = vpop.xlane.xlu1 %4097 }
 0x9af   :  { %v4142_v50 = vmul.f32 0.0625, %v4098_v2  ;;  %v4095_v61 = vpop.xlane.xlu0 %4094 }
 0x9b0   :  { %v4141_v29 = vmul.f32 0.0625, %v4095_v61 }
 0x9b1   :  { %v8042_v15 = vsub.f32 %v7918_v49, %v4142_v50 }
 0x9b2   :  { %v8045_v9 = vsub.f32 %v7923_v21, %v4141_v29 }
 0x9b3   :  { %v4174_v32 = vmul.f32 %v8042_v15, %v8042_v15 }
 0x9b4   :  { %v4173_v20 = vmul.f32 %v8045_v9, %v8045_v9 }
 0x9b5   :  { %v4192_v5 = vsel %vm68_vm0, %v4174_v32, 0.0 }
 0x9b6   :  { %4193 = vadd.xlane.f32.xlu1 %v4192_v5  ;;  %v4189_v13 = vsel %vm68_vm0, %v4173_v20, 0.0 }
 0x9b7   :  { %4190 = vadd.xlane.f32.xlu0 %v4189_v13 }
 0x9d2   :  { %v4104_v25 = vpop.xlane.xlu0 %4103 }
 0x9d3   :  { %v4144_v6 = vmul.f32 0.0625, %v4104_v25 }
 0x9d5   :  { %v8054_v38 = vsub.f32 %v7934_v42, %v4144_v6 }
 0x9d6   :  { %v4110_v34 = vpop.xlane.xlu1 %4109  ;;  %v4101_v63 = vpop.xlane.xlu0 %4100 }
 0x9d7   :  { %v4146_v57 = vmul.f32 0.0625, %v4110_v34  ;;  %v4143_v18 = vmul.f32 0.0625, %v4101_v63  ;;  %v4176_v22 = vmul.f32 %v8054_v38, %v8054_v38 }
 0x9d9   :  { %v8065_v40 = vsub.f32 %v7948_v27, %v4146_v57  ;;  %v8068_v26 = vsub.f32 %v7939_v55, %v4143_v18  ;;  %v4198_v53 = vsel %vm68_vm0, %v4176_v22, 0.0 }
 0x9da   :  { %v4107_v33 = vpop.xlane.xlu0 %4106  ;;  %4199 = vadd.xlane.f32.xlu1 %v4198_v53 }
 0x9db   :  { %v4116_v10 = vpop.xlane.xlu1 %4115  ;;  %v4145_v17 = vmul.f32 0.0625, %v4107_v33  ;;  %v4178_v46 = vmul.f32 %v8065_v40, %v8065_v40  ;;  %v4175_v60 = vmul.f32 %v8068_v26, %v8068_v26 }
 0x9dc   :  { %v4148_v44 = vmul.f32 0.0625, %v4116_v10 }
 0x9dd   :  { %v8079_v28 = vsub.f32 %v7953_v30, %v4145_v17  ;;  %v4204_v59 = vsel %vm68_vm0, %v4178_v46, 0.0  ;;  %v4195_v54 = vsel %vm68_vm0, %v4175_v60, 0.0 }
 0x9de   :  { %v8076_v36 = vsub.f32 %v7964_v3, %v4148_v44  ;;  %v4113_v41 = vpop.xlane.xlu0 %4112  ;;  %4205 = vadd.xlane.f32.xlu1 %v4204_v59  ;;  %4196 = vadd.xlane.f32.xlu0 %v4195_v54 }
 0x9df   :  { %v4122_v24 = vpop.xlane.xlu1 %4121  ;;  %v4147_v23 = vmul.f32 0.0625, %v4113_v41  ;;  %v4177_v16 = vmul.f32 %v8079_v28, %v8079_v28 }
 0x9e0   :  { %v4150_v52 = vmul.f32 0.0625, %v4122_v24  ;;  %v4180_v39 = vmul.f32 %v8076_v36, %v8076_v36 }
 0x9e1   :  { %v8088_v35 = vsub.f32 %v7969_v8, %v4147_v23  ;;  %v4201_v14 = vsel %vm68_vm0, %v4177_v16, 0.0 }
 0x9e2   :  { %v8091_v12 = vsub.f32 %v7980_v1, %v4150_v52  ;;  %v4210_v48 = vsel %vm68_vm0, %v4180_v39, 0.0  ;;  %4202 = vadd.xlane.f32.xlu0 %v4201_v14  ;;  %v4119_v0 = vpop.xlane.xlu0 %4118 }
 0x9e3   :  { %v4128_v19 = vpop.xlane.xlu1 %4127  ;;  %4211 = vadd.xlane.f32.xlu1 %v4210_v48  ;;  %v4149_v45 = vmul.f32 0.0625, %v4119_v0  ;;  %v4179_v50 = vmul.f32 %v8088_v35, %v8088_v35 }
 0x9e4   :  { %v4152_v47 = vmul.f32 0.0625, %v4128_v19  ;;  %v4182_v2 = vmul.f32 %v8091_v12, %v8091_v12 }
 0x9e5   :  { %v8103_v29 = vsub.f32 %v7985_v11, %v4149_v45  ;;  %v4207_v20 = vsel %vm68_vm0, %v4179_v50, 0.0 }
 0x9e6   :  { %v8100_v61 = vsub.f32 %v7996_v7, %v4152_v47  ;;  %v4216_v32 = vsel %vm68_vm0, %v4182_v2, 0.0  ;;  %4208 = vadd.xlane.f32.xlu0 %v4207_v20  ;;  %v4125_v5 = vpop.xlane.xlu0 %4124  ;;  %v8146_v20 = vld [vmem:[%s8584_s9] ss:$0 sm:$0xff] }
 0x9e7   :  { %4217 = vadd.xlane.f32.xlu1 %v4216_v32  ;;  %v4151_v13 = vmul.f32 0.0625, %v4125_v5  ;;  %v4181_v6 = vmul.f32 %v8103_v29, %v8103_v29 }
 0x9e8   :  { %v4184_v25 = vmul.f32 %v8100_v61, %v8100_v61 }
 0x9e9   :  { %v8112_v37 = vsub.f32 %v8001_v62, %v4151_v13  ;;  %v4213_v34 = vsel %vm68_vm0, %v4181_v6, 0.0  ;;  %v8153_v6 = vld [vmem:[%s8585_s10] ss:$0 sm:$0xff] }
 0x9ea   :  { %v4222_v51 = vsel %vm68_vm0, %v4184_v25, 0.0  ;;  %4214 = vadd.xlane.f32.xlu0 %v4213_v34 }
 0x9eb   :  { %4223 = vadd.xlane.f32.xlu1 %v4222_v51  ;;  %v4183_v63 = vmul.f32 %v8112_v37, %v8112_v37 }
 0x9ed   :  { %v4219_v58 = vsel %vm68_vm0, %v4183_v63, 0.0 }
 0x9ee   :  { %4220 = vadd.xlane.f32.xlu0 %v4219_v58 }
 0xa15   :  { %v4134_v57 = vpop.xlane.xlu1 %4133 }
 0xa16   :  { %v4154_v18 = vmul.f32 0.0625, %v4134_v57  ;;  %v4131_v22 = vpop.xlane.xlu0 %4130 }
 0xa17   :  { %v4153_v53 = vmul.f32 0.0625, %v4131_v22 }
 0xa18   :  { %v8120_v10 = vsub.f32 %v8014_v4, %v4154_v18 }
 0xa19   :  { %v8123_v33 = vsub.f32 %v8019_v56, %v4153_v53  ;;  %v4140_v44 = vpop.xlane.xlu1 %4139 }
 0xa1a   :  { %v4156_v17 = vmul.f32 0.0625, %v4140_v44  ;;  %v4137_v46 = vpop.xlane.xlu0 %4136  ;;  %v4186_v60 = vmul.f32 %v8120_v10, %v8120_v10 }
 0xa1b   :  { %v4155_v59 = vmul.f32 0.0625, %v4137_v46  ;;  %v4185_v54 = vmul.f32 %v8123_v33, %v8123_v33 }
 0xa1c   :  { %v8130_v41 = vsub.f32 %v8030_v43, %v4156_v17  ;;  %v4228_v24 = vsel %vm68_vm0, %v4186_v60, 0.0 }
 0xa1d   :  { %v8134_v23 = vsub.f32 %v8035_v31, %v4155_v59  ;;  %4229 = vadd.xlane.f32.xlu1 %v4228_v24  ;;  %v4225_v52 = vsel %vm68_vm0, %v4185_v54, 0.0 }
 0xa1e   :  { %4226 = vadd.xlane.f32.xlu0 %v4225_v52  ;;  %v4188_v39 = vmul.f32 %v8130_v41, %v8130_v41 }
 0xa1f   :  { %v4187_v16 = vmul.f32 %v8134_v23, %v8134_v23 }
 0xa20   :  { %v4234_v48 = vsel %vm68_vm0, %v4188_v39, 0.0 }
 0xa21   :  { %4235 = vadd.xlane.f32.xlu1 %v4234_v48  ;;  %v4231_v14 = vsel %vm68_vm0, %v4187_v16, 0.0 }
 0xa22   :  { %4232 = vadd.xlane.f32.xlu0 %v4231_v14 }
 0xa43   :  { %v4194_v19 = vpop.xlane.xlu1 %4193 }
 0xa44   :  { %v4238_v0 = vmul.f32 0.0625, %v4194_v19  ;;  %v4191_v47 = vpop.xlane.xlu0 %4190 }
 0xa45   :  { %v4237_v45 = vmul.f32 0.0625, %v4191_v47 }
 0xa46   :  { %v4254_v2 = vadd.f32 1e-05, %v4238_v0 }
 0xa47   :  { %v4253_v50 = vadd.f32 1e-05, %v4237_v45 }
 0xa48   :  { %6462 = vrsqrt.f32 %v4254_v2 }
 0xa49   :  { %6464 = vrsqrt.f32 %v4253_v50 }
 0xa52   :  { %v6463_v32 = vpop.eup %6462 }
 0xa53   :  { %v6465_v5 = vpop.eup %6464  ;;  %v4286_v13 = vmul.f32 %v6463_v32, %v8042_v15 }
 0xa54   :  { %v4285_v25 = vmul.f32 %v6465_v5, %v8045_v9 }
 0xa55   :  { %v4308_v51 = vmul.f32 %v8146_v20, %v4286_v13 }
 0xa56   :  { %v4307_v34 = vmul.f32 %v8146_v20, %v4285_v25 }
 0xa57   :  { %v4330_v58 = vadd.f32 %v8153_v6, %v4308_v51 }
 0xa58   :  { %v4329_v63 = vadd.f32 %v8153_v6, %v4307_v34 }
 0xa5a   :  { %5882 = vmatprep.mubr.msk.f32.mxu0 %vm68_vm0, %v4329_v63 }
 0xa5b   :  { %5883 = vmatmul.mubr.msk.f32.vlgmr.msra.gmra.mrb[54].mxu0 %vm68_vm0, %v4330_v58 }
 0xa67   :  { %v4200_v15 = vpop.xlane.xlu1 %4199 }
 0xa68   :  { %v4240_v57 = vmul.f32 0.0625, %v4200_v15 }
 0xa6a   :  { %v4256_v9 = vadd.f32 1e-05, %v4240_v57 }
 0xa6b   :  { %v4206_v18 = vpop.xlane.xlu1 %4205  ;;  %v4197_v22 = vpop.xlane.xlu0 %4196 }
 0xa6c   :  { %6466 = vrsqrt.f32 %v4256_v9  ;;  %v4242_v53 = vmul.f32 0.0625, %v4206_v18  ;;  %v4239_v44 = vmul.f32 0.0625, %v4197_v22 }
 0xa6e   :  { %v4258_v17 = vadd.f32 1e-05, %v4242_v53  ;;  %v4255_v46 = vadd.f32 1e-05, %v4239_v44 }
 0xa6f   :  { %v4203_v59 = vpop.xlane.xlu0 %4202 }
 0xa70   :  { %v4212_v60 = vpop.xlane.xlu1 %4211  ;;  %6468 = vrsqrt.f32 %v4258_v17  ;;  %v4241_v24 = vmul.f32 0.0625, %v4203_v59 }
 0xa71   :  { %v4244_v54 = vmul.f32 0.0625, %v4212_v60  ;;  %6470 = vrsqrt.f32 %v4255_v46 }
 0xa72   :  { %v4257_v39 = vadd.f32 1e-05, %v4241_v24 }
 0xa73   :  { %v4260_v52 = vadd.f32 1e-05, %v4244_v54  ;;  %v4209_v48 = vpop.xlane.xlu0 %4208 }
 0xa74   :  { %v4218_v16 = vpop.xlane.xlu1 %4217  ;;  %v4243_v19 = vmul.f32 0.0625, %v4209_v48 }
 0xa75   :  { %6472 = vrsqrt.f32 %v4260_v52  ;;  %v4246_v14 = vmul.f32 0.0625, %v4218_v16 }
 0xa76   :  { %6474 = vrsqrt.f32 %v4257_v39  ;;  %v6467_v0 = vpop.eup %6466  ;;  %v4259_v45 = vadd.f32 1e-05, %v4243_v19 }
 0xa77   :  { %v4262_v47 = vadd.f32 1e-05, %v4246_v14  ;;  %v4215_v50 = vpop.xlane.xlu0 %4214  ;;  %v4288_v13 = vmul.f32 %v6467_v0, %v8054_v38 }
 0xa78   :  { %v4224_v2 = vpop.xlane.xlu1 %4223  ;;  %v4245_v5 = vmul.f32 0.0625, %v4215_v50 }
 0xa79   :  { %6476 = vrsqrt.f32 %v4262_v47  ;;  %v4248_v32 = vmul.f32 0.0625, %v4224_v2  ;;  %v4310_v9 = vmul.f32 %v8146_v20, %v4288_v13 }
 0xa7a   :  { %6478 = vrsqrt.f32 %v4259_v45  ;;  %v6469_v25 = vpop.eup %6468  ;;  %v4261_v34 = vadd.f32 1e-05, %v4245_v5 }
 0xa7b   :  { %v4264_v51 = vadd.f32 1e-05, %v4248_v32  ;;  %v6471_v63 = vpop.eup %6470  ;;  %v4221_v58 = vpop.xlane.xlu0 %4220  ;;  %v4290_v18 = vmul.f32 %v6469_v25, %v8065_v40  ;;  %v4332_v60 = vadd.f32 %v8153_v6, %v4310_v9 }
 0xa7c   :  { %v4247_v15 = vmul.f32 0.0625, %v4221_v58  ;;  %v4287_v57 = vmul.f32 %v6471_v63, %v8068_v26 }
 0xa7d   :  { %6480 = vrsqrt.f32 %v4264_v51  ;;  %v4312_v59 = vmul.f32 %v8146_v20, %v4290_v18 }
 0xa7e   :  { %6482 = vrsqrt.f32 %v4261_v34  ;;  %v4263_v53 = vadd.f32 1e-05, %v4247_v15  ;;  %v4309_v44 = vmul.f32 %v8146_v20, %v4287_v57 }
 0xa7f   :  { %v6473_v22 = vpop.eup %6472 }
 0xa80   :  { %v6475_v17 = vpop.eup %6474  ;;  %6484 = vrsqrt.f32 %v4263_v53  ;;  %v4331_v38 = vadd.f32 %v8153_v6, %v4309_v44  ;;  %v4292_v26 = vmul.f32 %v6473_v22, %v8076_v36 }
 0xa81   :  { %v4289_v46 = vmul.f32 %v6475_v17, %v8079_v28  ;;  %v4334_v28 = vadd.f32 %v8153_v6, %v4312_v59 }
 0xa82   :  { %5885 = vmatprep.mubr.msk.f32.mxu0 %vm68_vm0, %v4331_v38  ;;  %v4314_v16 = vmul.f32 %v8146_v20, %v4292_v26 }
 0xa83   :  { %v6477_v54 = vpop.eup %6476  ;;  %v4311_v40 = vmul.f32 %v8146_v20, %v4289_v46  ;;  %5886 = vmatmul.mubr.msk.f32.gmra.mrb[56].mxu0 %vm68_vm0, %v4332_v60 }
 0xa84   :  { %v6479_v24 = vpop.eup %6478  ;;  %v4294_v48 = vmul.f32 %v6477_v54, %v8091_v12 }
 0xa85   :  { %v4333_v52 = vadd.f32 %v8153_v6, %v4311_v40  ;;  %v4291_v39 = vmul.f32 %v6479_v24, %v8088_v35  ;;  %v4336_v35 = vadd.f32 %v8153_v6, %v4314_v16 }
 0xa86   :  { %v4316_v45 = vmul.f32 %v8146_v20, %v4294_v48 }
 0xa87   :  { %v6481_v14 = vpop.eup %6480  ;;  %5888 = vmatprep.mubr.msk.f32.mxu0 %vm68_vm0, %v4333_v52  ;;  %v4313_v36 = vmul.f32 %v8146_v20, %v4291_v39 }
 0xa88   :  { %v6483_v19 = vpop.eup %6482  ;;  %5889 = vmatmul.mubr.msk.f32.gmra.mrb[58].mxu0 %vm68_vm0, %v4334_v28  ;;  %v4296_v2 = vmul.f32 %v6481_v14, %v8100_v61  ;;  %v4338_v13 = vadd.f32 %v8153_v6, %v4316_v45  ;;  %v4985_v45 = vld [vmem:[%s8586_s13 + $0x30] sm:$0xff] }
 0xa89   :  { %v4335_v0 = vadd.f32 %v8153_v6, %v4313_v36  ;;  %v4293_v47 = vmul.f32 %v6483_v19, %v8103_v29 }
 0xa8a   :  { %v6485_v50 = vpop.eup %6484  ;;  %v4318_v25 = vmul.f32 %v8146_v20, %v4296_v2  ;;  %v4986_v2 = vld [vmem:[%s8586_s13 + $0x38] sm:$0xff] }
 0xa8b   :  { %5891 = vmatprep.mubr.msk.f32.mxu0 %vm68_vm0, %v4335_v0  ;;  %v4315_v12 = vmul.f32 %v8146_v20, %v4293_v47  ;;  %v4295_v32 = vmul.f32 %v6485_v50, %v8112_v37  ;;  %v4983_v0 = vld [vmem:[%s8586_s13 + $0x20] sm:$0xff]  ;;  %v4984_v47 = vld [vmem:[%s8586_s13 + $0x28] sm:$0xff]  ;;  %v6130_v50 = vpack.c.bf16 %v4986_v2, %v4985_v45 }
 0xa8c   :  { %5892 = vmatmul.mubr.msk.f32.gmra.mrb[60].mxu0 %vm68_vm0, %v4336_v35  ;;  %v4340_v51 = vadd.f32 %v8153_v6, %v4318_v25  ;;  %v6126_v35 = vpack.c.bf16 %v4984_v47, %v4983_v0 }
 0xa8d   :  { %v4337_v5 = vadd.f32 %v8153_v6, %v4315_v12  ;;  %v4317_v29 = vmul.f32 %v8146_v20, %v4295_v32  ;;  %v8244_v12 = vld [vmem:[%s8587_s12] ss:$0 sm:$0xff] }
 0xa8f   :  { %5894 = vmatprep.mubr.msk.f32.mxu0 %vm68_vm0, %v4337_v5  ;;  %v4339_v61 = vadd.f32 %v8153_v6, %v4317_v29 }
 0xa90   :  { %5895 = vmatmul.mubr.msk.f32.gmra.mrb[62].mxu0 %vm68_vm0, %v4338_v13 }
 0xa91   :  { %5897 = vmatprep.mubr.msk.f32.mxu0 %vm68_vm0, %v4339_v61 }
 0xa94   :  { %5898 = vmatmul.mubr.msk.f32.gmra.mrb[64].mxu0 %vm68_vm0, %v4340_v51 }
 0xaaa   :  { %v4230_v37 = vpop.xlane.xlu1 %4229 }
 0xaab   :  { %v4250_v34 = vmul.f32 0.0625, %v4230_v37  ;;  %v4227_v63 = vpop.xlane.xlu0 %4226 }
 0xaac   :  { %v4249_v58 = vmul.f32 0.0625, %v4227_v63 }
 0xaad   :  { %v4266_v15 = vadd.f32 1e-05, %v4250_v34 }
 0xaae   :  { %v4265_v57 = vadd.f32 1e-05, %v4249_v58  ;;  %v4236_v9 = vpop.xlane.xlu1 %4235 }
 0xaaf   :  { %6486 = vrsqrt.f32 %v4266_v15  ;;  %v4252_v18 = vmul.f32 0.0625, %v4236_v9  ;;  %v4233_v22 = vpop.xlane.xlu0 %4232 }
 0xab0   :  { %6488 = vrsqrt.f32 %v4265_v57  ;;  %v4251_v53 = vmul.f32 0.0625, %v4233_v22 }
 0xab1   :  { %v4268_v44 = vadd.f32 1e-05, %v4252_v18 }
 0xab2   :  { %v4267_v17 = vadd.f32 1e-05, %v4251_v53 }
 0xab3   :  { %6490 = vrsqrt.f32 %v4268_v44 }
 0xab4   :  { %6492 = vrsqrt.f32 %v4267_v17 }
 0xab9   :  { %v6487_v38 = vpop.eup %6486 }
 0xaba   :  { %v6489_v46 = vpop.eup %6488  ;;  %v4298_v60 = vmul.f32 %v6487_v38, %v8120_v10 }
 0xabb   :  { %v4297_v59 = vmul.f32 %v6489_v46, %v8123_v33 }
 0xabc   :  { %v4320_v26 = vmul.f32 %v8146_v20, %v4298_v60 }
 0xabd   :  { %v6491_v54 = vpop.eup %6490  ;;  %v4319_v40 = vmul.f32 %v8146_v20, %v4297_v59 }
 0xabe   :  { %v6493_v24 = vpop.eup %6492  ;;  %v4300_v52 = vmul.f32 %v6491_v54, %v8130_v41  ;;  %v4342_v16 = vadd.f32 %v8153_v6, %v4320_v26  ;;  %v4979_v41 = vld [vmem:[%s8586_s13] sm:$0xff] }
 0xabf   :  { %v4341_v39 = vadd.f32 %v8153_v6, %v4319_v40  ;;  %v4299_v28 = vmul.f32 %v6493_v24, %v8134_v23  ;;  %v4980_v23 = vld [vmem:[%s8586_s13 + $0x8] sm:$0xff] }
 0xac0   :  { %v4322_v48 = vmul.f32 %v8146_v20, %v4300_v52  ;;  %v6118_v36 = vpack.c.bf16 %v4980_v23, %v4979_v41 }
 0xac1   :  { %5900 = vmatprep.mubr.msk.f32.mxu0 %vm68_vm0, %v4341_v39  ;;  %v4321_v10 = vmul.f32 %v8146_v20, %v4299_v28  ;;  %v4981_v20 = vld [vmem:[%s8586_s13 + $0x10] sm:$0xff] }
 0xac2   :  { %5901 = vmatmul.mubr.msk.f32.gmra.mrb[66].mxu0 %vm68_vm0, %v4342_v16  ;;  %v4344_v14 = vadd.f32 %v8153_v6, %v4322_v48  ;;  %6119 = vmatprep.subr.bf16.mxu1 %v6118_v36 }
 0xac3   :  { %v4343_v33 = vadd.f32 %v8153_v6, %v4321_v10  ;;  %6121 = vmatpush3.bf16.msra.mxu1 %v6118_v36  ;;  %v4982_v6 = vld [vmem:[%s8586_s13 + $0x18] sm:$0xff] }
 0xac4   :  { %v6122_v19 = vpack.c.bf16 %v4982_v6, %v4981_v20 }
 0xac5   :  { %5903 = vmatprep.mubr.msk.f32.mxu0 %vm68_vm0, %v4343_v33 }
 0xac6   :  { %5904 = vmatmul.mubr.msk.f32.gmra.mrb[68].mxu0 %vm68_vm0, %v4344_v14  ;;  %6123 = vmatprep.subr.bf16.mxu1 %v6122_v19 }
 0xac7   :  { %6125 = vmatpush3.bf16.msra.mxu1 %v6122_v19 }
 0xac8   :  { %6127 = vmatprep.subr.bf16.mxu1 %v6126_v35 }
 0xacb   :  { %6129 = vmatpush3.bf16.msra.mxu1 %v6126_v35 }
 0xacc   :  { %6131 = vmatprep.subr.bf16.mxu1 %v6130_v50 }
 0xacf   :  { %6133 = vmatpush3.bf16.msra.mxu1 %v6130_v50 }
 0xb2e   :  { %v5884_v32 = vpop.f32.mrb[54].mxu0 }
 0xb2f   :  { %v8247_v5 = vadd.f32 %v5884_v32, %v8244_v12  ;;  %v4468_v13 = vpop.f32.mrb[55].mxu0 }
 0xb30   :  { %v8250_v29 = vadd.f32 %v8244_v12, %v4468_v13 }
 0xb31   :  { %v4548_v25 = vmul.f32 0.70710677, %v8247_v5 }
 0xb32   :  { %v4547_v61 = vmul.f32 0.70710677, %v8250_v29 }
 0xb33   :  { %v4564_v51 = vand.u32 2147483647, %v4548_v25  ;;  %vm4884_vm3 = vcmp.lt.f32.partialorder %v4548_v25, 0.0 }
 0xb34   :  { %v4563_v37 = vand.u32 2147483647, %v4547_v61  ;;  %vm4883_vm4 = vcmp.lt.f32.partialorder %v4547_v61, 0.0 }
 0xb35   :  { %v4580_v34 = vmul.f32 0.3275911, %v4564_v51  ;;  %v4788_v57 = vsub.f32 0.0, %v4564_v51 }
 0xb36   :  { %v4579_v63 = vmul.f32 0.3275911, %v4563_v37  ;;  %v4787_v9 = vsub.f32 0.0, %v4563_v37 }
 0xb37   :  { %v4596_v58 = vadd.f32 1.0, %v4580_v34  ;;  %v4804_v22 = vmul.f32 %v4788_v57, %v4564_v51 }
 0xb38   :  { %v4595_v15 = vadd.f32 1.0, %v4579_v63  ;;  %v4803_v17 = vmul.f32 %v4787_v9, %v4563_v37 }
 0xb39   :  { %6494 = vrcp.f32 %v4596_v58  ;;  %v4821_v60 = vmul.f32 1.442695, %v4804_v22 }
 0xb3a   :  { %6496 = vrcp.f32 %v4595_v15  ;;  %v4819_v54 = vmul.f32 1.442695, %v4803_v17 }
 0xb3b   :  { %6498 = vpow2.f32 %v4821_v60 }
 0xb3c   :  { %6500 = vpow2.f32 %v4819_v54 }
 0xb43   :  { %v6495_v18 = vpop.eup %6494 }
 0xb44   :  { %v6497_v53 = vpop.eup %6496  ;;  %v4644_v44 = vmul.f32 1.0614054, %v6495_v18 }
 0xb45   :  { %v4643_v38 = vmul.f32 1.0614054, %v6497_v53  ;;  %v6499_v36 = vpop.eup %6498 }
 0xb46   :  { %v4660_v46 = vadd.f32 -1.4531521, %v4644_v44  ;;  %v6501_v6 = vpop.eup %6500  ;;  %v4931_v44 = vmul.f32 0.5, %v8250_v29 }
 0xb47   :  { %v4659_v59 = vadd.f32 -1.4531521, %v4643_v38 }
 0xb48   :  { %v4676_v26 = vmul.f32 %v6495_v18, %v4660_v46  ;;  %v4932_v46 = vmul.f32 0.5, %v8247_v5 }
 0xb49   :  { %v4675_v40 = vmul.f32 %v6497_v53, %v4659_v59 }
 0xb4a   :  { %v4692_v24 = vadd.f32 1.4214138, %v4676_v26 }
 0xb4b   :  { %v4691_v52 = vadd.f32 1.4214138, %v4675_v40 }
 0xb4c   :  { %v4708_v39 = vmul.f32 %v6495_v18, %v4692_v24 }
 0xb4d   :  { %v4707_v28 = vmul.f32 %v6497_v53, %v4691_v52 }
 0xb4e   :  { %v4724_v16 = vadd.f32 -0.28449672, %v4708_v39 }
 0xb4f   :  { %v4723_v48 = vadd.f32 -0.28449672, %v4707_v28 }
 0xb50   :  { %v4740_v10 = vmul.f32 %v6495_v18, %v4724_v16 }
 0xb51   :  { %v4739_v33 = vmul.f32 %v6497_v53, %v4723_v48 }
 0xb52   :  { %v4756_v14 = vadd.f32 0.2548296, %v4740_v10 }
 0xb53   :  { %v4755_v41 = vadd.f32 0.2548296, %v4739_v33 }
 0xb54   :  { %v4772_v23 = vmul.f32 %v6495_v18, %v4756_v14 }
 0xb55   :  { %v4771_v20 = vmul.f32 %v6497_v53, %v4755_v41 }
 0xb56   :  { %v4852_v19 = vmul.f32 %v6499_v36, %v4772_v23  ;;  %v5887_v47 = vpop.f32.mrb[56].mxu0 }
 0xb57   :  { %v4851_v0 = vmul.f32 %v6501_v6, %v4771_v20  ;;  %v4484_v45 = vadd.f32 %v5887_v47, %v8244_v12  ;;  %v4478_v2 = vpop.f32.mrb[57].mxu0 }
 0xb58   :  { %v4868_v35 = vsub.f32 1.0, %v4852_v19  ;;  %v4479_v32 = vadd.f32 %v8244_v12, %v4478_v2 }
 0xb59   :  { %v4867_v50 = vsub.f32 1.0, %v4851_v0  ;;  %v8256_v51 = vmul.f32 0.70710677, %v4484_v45 }
 0xb5a   :  { %v4900_v13 = vsub.f32 0.0, %v4868_v35  ;;  %v8258_v34 = vmul.f32 0.70710677, %v4479_v32 }
 0xb5b   :  { %v4899_v37 = vsub.f32 0.0, %v4867_v50  ;;  %v5890_v63 = vpop.f32.mrb[58].mxu0  ;;  %v4566_v15 = vand.u32 2147483647, %v8256_v51  ;;  %vm4886_vm6 = vcmp.lt.f32.partialorder %v8256_v51, 0.0 }
 0xb5c   :  { %v4916_v58 = vsel %vm4884_vm3, %v4900_v13, %v4868_v35  ;;  %v4494_v57 = vadd.f32 %v5890_v63, %v8244_v12  ;;  %v4488_v9 = vpop.f32.mrb[59].mxu0  ;;  %v4565_v53 = vand.u32 2147483647, %v8258_v34  ;;  %vm4885_vm7 = vcmp.lt.f32.partialorder %v8258_v34, 0.0 }
 0xb5d   :  { %v4948_v18 = vadd.f32 1.0, %v4916_v58  ;;  %v4915_v22 = vsel %vm4883_vm4, %v4899_v37, %v4867_v50  ;;  %v4582_v38 = vmul.f32 0.3275911, %v4566_v15  ;;  %v4790_v54 = vsub.f32 0.0, %v4566_v15 }
 0xb5e   :  { %v4947_v17 = vadd.f32 1.0, %v4915_v22  ;;  %v8264_v25 = vmul.f32 0.70710677, %v4494_v57  ;;  %v4581_v60 = vmul.f32 0.3275911, %v4565_v53  ;;  %v8269_v28 = vadd.f32 %v8244_v12, %v4488_v9 }
 0xb5f   :  { %v5893_v59 = vpop.f32.mrb[60].mxu0  ;;  %v4598_v26 = vadd.f32 1.0, %v4582_v38  ;;  %v4964_v52 = vmul.f32 %v4948_v18, %v4932_v46  ;;  %v4806_v48 = vmul.f32 %v4790_v54, %v4566_v15  ;;  %v4789_v10 = vsub.f32 0.0, %v4565_v53 }
 0xb60   :  { %v4963_v61 = vmul.f32 %v4947_v17, %v4931_v44  ;;  %v4568_v40 = vand.u32 2147483647, %v8264_v25  ;;  %v4498_v24 = vpop.f32.mrb[61].mxu0  ;;  %v4597_v39 = vadd.f32 1.0, %v4581_v60  ;;  %v8273_v5 = vmul.f32 0.70710677, %v8269_v28 }
 0xb61   :  { %6502 = vrcp.f32 %v4598_v26  ;;  %v8277_v14 = vadd.f32 %v5893_v59, %v8244_v12  ;;  %v8281_v36 = vadd.f32 %v8244_v12, %v4498_v24  ;;  %v4825_v47 = vmul.f32 1.442695, %v4806_v48 }
 0xb62   :  { %v4584_v29 = vmul.f32 0.3275911, %v4568_v40  ;;  %5922 = vmatprep.mubr.msk.f32.mxu1 %vm4994_vm5, %v4963_v61  ;;  %6504 = vrcp.f32 %v4597_v39  ;;  %v4567_v23 = vand.u32 2147483647, %v8273_v5  ;;  %v4792_v6 = vsub.f32 0.0, %v4568_v40 }
 0xb63   :  { %v5896_v16 = vpop.f32.mrb[62].mxu0  ;;  %5923 = vmatmul.mubr.msk.f32.vlgmr.msra.gmra.mrb[42].mxu1 %vm4994_vm5, %v4964_v52  ;;  %v8284_v20 = vmul.f32 0.70710677, %v8277_v14  ;;  %v8287_v0 = vmul.f32 0.70710677, %v8281_v36  ;;  %v4805_v35 = vmul.f32 %v4789_v10, %v4565_v53  ;;  %v8293_v37 = vmul.f32 0.5, %v4484_v45 }
 0xb64   :  { %v4600_v33 = vadd.f32 1.0, %v4584_v29  ;;  %v4508_v41 = vpop.f32.mrb[63].mxu0  ;;  %v4583_v19 = vmul.f32 0.3275911, %v4567_v23  ;;  %v8291_v50 = vadd.f32 %v5896_v16, %v8244_v12  ;;  %v4791_v58 = vsub.f32 0.0, %v4567_v23 }
 0xb65   :  { %v4570_v2 = vand.u32 2147483647, %v8284_v20  ;;  %v4569_v15 = vand.u32 2147483647, %v8287_v0  ;;  %v8298_v18 = vmul.f32 0.5, %v4479_v32  ;;  %v4808_v17 = vmul.f32 %v4792_v6, %v4568_v40 }
 0xb66   :  { %6506 = vrcp.f32 %v4600_v33  ;;  %v4599_v63 = vadd.f32 1.0, %v4583_v19  ;;  %v8301_v53 = vmul.f32 0.70710677, %v8291_v50  ;;  %v8303_v38 = vmul.f32 0.5, %v4494_v57 }
 0xb67   :  { %v5899_v13 = vpop.f32.mrb[64].mxu0  ;;  %v4586_v22 = vmul.f32 0.3275911, %v4570_v2  ;;  %v4794_v44 = vsub.f32 0.0, %v4570_v2  ;;  %v4585_v46 = vmul.f32 0.3275911, %v4569_v15  ;;  %v4807_v24 = vmul.f32 %v4791_v58, %v4567_v23 }
 0xb68   :  { %v8296_v9 = vpop.f32.mrb[65].mxu0  ;;  %6508 = vrcp.f32 %v4599_v63  ;;  %v4823_v60 = vmul.f32 1.442695, %v4805_v35  ;;  %v4793_v61 = vsub.f32 0.0, %v4569_v15  ;;  %v4572_v26 = vand.u32 2147483647, %v8301_v53 }
 0xb69   :  { %v4602_v59 = vadd.f32 1.0, %v4586_v22  ;;  %6510 = vpow2.f32 %v4825_v47  ;;  %v4601_v52 = vadd.f32 1.0, %v4585_v46  ;;  %v4810_v57 = vmul.f32 %v4794_v44, %v4570_v2 }
 0xb6a   :  { %v4588_v39 = vmul.f32 0.3275911, %v4572_v26  ;;  %v4829_v16 = vmul.f32 1.442695, %v4808_v17  ;;  %v4796_v48 = vsub.f32 0.0, %v4572_v26  ;;  %v4809_v6 = vmul.f32 %v4793_v61, %v4569_v15 }
 0xb6b   :  { %v8305_v45 = vpop.eup %6502  ;;  %6512 = vrcp.f32 %v4602_v59  ;;  %v8315_v35 = vadd.f32 %v8244_v12, %v4508_v41  ;;  %v4827_v63 = vmul.f32 1.442695, %v4807_v24  ;;  %v4833_v58 = vmul.f32 1.442695, %v4810_v57 }
 0xb6c   :  { %v8308_v54 = vpop.eup %6504  ;;  %v4646_v32 = vmul.f32 1.0614054, %v8305_v45  ;;  %6514 = vrcp.f32 %v4601_v52  ;;  %v4604_v19 = vadd.f32 1.0, %v4588_v39  ;;  %v4812_v15 = vmul.f32 %v4796_v48, %v4572_v26 }
 0xb6d   :  { %v4645_v40 = vmul.f32 1.0614054, %v8308_v54  ;;  %6516 = vpow2.f32 %v4823_v60  ;;  %v8321_v22 = vmul.f32 0.70710677, %v8315_v35  ;;  %v8324_v46 = vadd.f32 %v5899_v13, %v8244_v12 }
 0xb6e   :  { %v4662_v29 = vadd.f32 -1.4531521, %v4646_v32  ;;  %6518 = vrcp.f32 %v4604_v19  ;;  %v4831_v59 = vmul.f32 1.442695, %v4809_v6  ;;  %v8332_v52 = vmul.f32 0.5, %v8269_v28 }
 0xb6f   :  { %v4661_v33 = vadd.f32 -1.4531521, %v4645_v40  ;;  %6520 = vpow2.f32 %v4829_v16  ;;  %v4571_v60 = vand.u32 2147483647, %v8321_v22  ;;  %v8337_v57 = vmul.f32 0.70710677, %v8324_v46 }
 0xb70   :  { %v8312_v10 = vpop.eup %6506  ;;  %v4678_v23 = vmul.f32 %v8305_v45, %v4662_v29  ;;  %6522 = vpow2.f32 %v4827_v63  ;;  %v4837_v48 = vmul.f32 1.442695, %v4812_v15  ;;  %vm4888_vm8 = vcmp.lt.f32.partialorder %v8264_v25, 0.0 }
 0xb71   :  { %v4648_v47 = vmul.f32 1.0614054, %v8312_v10  ;;  %v4677_v2 = vmul.f32 %v8308_v54, %v4661_v33  ;;  %v4587_v40 = vmul.f32 0.3275911, %v4571_v60  ;;  %6524 = vpow2.f32 %v4833_v58 }
 0xb72   :  { %v4694_v44 = vadd.f32 1.4214138, %v4678_v23  ;;  %v8327_v61 = vpop.eup %6508  ;;  %6526 = vpow2.f32 %v4831_v59  ;;  %vm4887_vm9 = vcmp.lt.f32.partialorder %v8273_v5, 0.0  ;;  %vm4890_vm10 = vcmp.lt.f32.partialorder %v8284_v20, 0.0 }
 0xb73   :  { %v4664_v17 = vadd.f32 -1.4531521, %v4648_v47  ;;  %v4693_v41 = vadd.f32 1.4214138, %v4677_v2  ;;  %v4647_v13 = vmul.f32 1.0614054, %v8327_v61  ;;  %v6511_v39 = vpop.eup %6510 }
 0xb74   :  { %v4710_v32 = vmul.f32 %v8305_v45, %v4694_v44  ;;  %v4603_v28 = vadd.f32 1.0, %v4587_v40  ;;  %v4795_v44 = vsub.f32 0.0, %v4571_v60  ;;  %vm4889_vm11 = vcmp.lt.f32.partialorder %v8287_v0, 0.0 }
 0xb75   :  { %v4680_v24 = vmul.f32 %v8312_v10, %v4664_v17  ;;  %v4709_v26 = vmul.f32 %v8308_v54, %v4693_v41  ;;  %v8339_v33 = vpop.eup %6512  ;;  %v4663_v19 = vadd.f32 -1.4531521, %v4647_v13  ;;  %v8350_v41 = vand.u32 2147483647, %v8337_v57 }
 0xb76   :  { %v4726_v29 = vadd.f32 -0.28449672, %v4710_v32  ;;  %v8341_v23 = vpop.eup %6514  ;;  %v4650_v2 = vmul.f32 1.0614054, %v8339_v33  ;;  %6528 = vrcp.f32 %v4603_v28  ;;  %v4938_v20 = vmul.f32 0.5, %v8277_v14 }
 0xb77   :  { %v4696_v16 = vadd.f32 1.4214138, %v4680_v24  ;;  %v4725_v6 = vadd.f32 -0.28449672, %v4709_v26  ;;  %v4679_v58 = vmul.f32 %v8327_v61, %v4663_v19  ;;  %v4649_v15 = vmul.f32 1.0614054, %v8341_v23  ;;  %v6517_v59 = vpop.eup %6516 }
 0xb78   :  { %v4742_v47 = vmul.f32 %v8305_v45, %v4726_v29  ;;  %v4666_v26 = vadd.f32 -1.4531521, %v4650_v2  ;;  %v8352_v13 = vpop.eup %6518  ;;  %6530 = vpow2.f32 %v4837_v48  ;;  %vm4892_vm12 = vcmp.lt.f32.partialorder %v8301_v53, 0.0 }
 0xb79   :  { %v4712_v63 = vmul.f32 %v8312_v10, %v4696_v16  ;;  %v4741_v17 = vmul.f32 %v8308_v54, %v4725_v6  ;;  %v4695_v29 = vadd.f32 1.4214138, %v4679_v58  ;;  %v4665_v16 = vadd.f32 -1.4531521, %v4649_v15 }
 0xb7a   :  { %v4758_v32 = vadd.f32 0.2548296, %v4742_v47  ;;  %v4682_v31 = vmul.f32 %v8339_v33, %v4666_v26  ;;  %v4652_v47 = vmul.f32 1.0614054, %v8352_v13  ;;  %v4590_v58 = vmul.f32 0.3275911, %v8350_v41 }
 0xb7b   :  { %v4728_v24 = vadd.f32 -0.28449672, %v4712_v63  ;;  %v4757_v40 = vadd.f32 0.2548296, %v4741_v17  ;;  %v6521_v63 = vpop.eup %6520  ;;  %v4711_v2 = vmul.f32 %v8327_v61, %v4695_v29  ;;  %v4681_v17 = vmul.f32 %v8341_v23, %v4665_v16 }
 0xb7c   :  { %v4774_v6 = vmul.f32 %v8305_v45, %v4758_v32  ;;  %v6523_v48 = vpop.eup %6522  ;;  %v4698_v32 = vadd.f32 1.4214138, %v4682_v31  ;;  %v4668_v43 = vadd.f32 -1.4531521, %v4652_v47  ;;  %v4811_v26 = vmul.f32 %v4795_v44, %v4571_v60 }
 0xb7d   :  { %v4744_v19 = vmul.f32 %v8312_v10, %v4728_v24  ;;  %v4773_v28 = vmul.f32 %v8308_v54, %v4757_v40  ;;  %v4727_v24 = vadd.f32 -0.28449672, %v4711_v2  ;;  %v4697_v4 = vadd.f32 1.4214138, %v4681_v17  ;;  %v6525_v62 = vpop.eup %6524 }
 0xb7e   :  { %v4854_v15 = vmul.f32 %v6511_v39, %v4774_v6  ;;  %v4714_v54 = vmul.f32 %v8339_v33, %v4698_v32  ;;  %v4684_v40 = vmul.f32 %v8352_v13, %v4668_v43  ;;  %v6527_v29 = vpop.eup %6526  ;;  %vm4891_vm13 = vcmp.lt.f32.partialorder %v8321_v22, 0.0 }
 0xb7f   :  { %v4760_v45 = vadd.f32 0.2548296, %v4744_v19  ;;  %v4853_v56 = vmul.f32 %v6517_v59, %v4773_v28  ;;  %v4743_v39 = vmul.f32 %v8327_v61, %v4727_v24  ;;  %v4713_v31 = vmul.f32 %v8341_v23, %v4697_v4 }
 0xb80   :  { %v4870_v7 = vsub.f32 1.0, %v4854_v15  ;;  %v4606_v59 = vadd.f32 1.0, %v4590_v58  ;;  %v4730_v60 = vadd.f32 -0.28449672, %v4714_v54  ;;  %v4700_v44 = vadd.f32 1.4214138, %v4684_v40  ;;  %v8370_v2 = vpop.eup %6528 }
 0xb81   :  { %v4776_v11 = vmul.f32 %v8312_v10, %v4760_v45  ;;  %v4869_v16 = vsub.f32 1.0, %v4853_v56  ;;  %v4759_v28 = vadd.f32 0.2548296, %v4743_v39  ;;  %v4729_v10 = vadd.f32 -0.28449672, %v4713_v31 }
 0xb82   :  { %v4902_v6 = vsub.f32 0.0, %v4870_v7  ;;  %6532 = vrcp.f32 %v4606_v59  ;;  %v4746_v56 = vmul.f32 %v8339_v33, %v4730_v60  ;;  %v4716_v15 = vmul.f32 %v8352_v13, %v4700_v44  ;;  %v6531_v4 = vpop.eup %6530 }
 0xb83   :  { %v4856_v19 = vmul.f32 %v6521_v63, %v4776_v11  ;;  %v4901_v47 = vsub.f32 0.0, %v4869_v16  ;;  %v4775_v63 = vmul.f32 %v8327_v61, %v4759_v28  ;;  %v4745_v45 = vmul.f32 %v8341_v23, %v4729_v10 }
 0xb84   :  { %v4918_v43 = vsel %vm4886_vm6, %v4902_v6, %v4870_v7  ;;  %v4762_v54 = vadd.f32 0.2548296, %v4746_v56  ;;  %v4732_v40 = vadd.f32 -0.28449672, %v4716_v15  ;;  %v4651_v39 = vmul.f32 1.0614054, %v8370_v2 }
 0xb85   :  { %v4872_v17 = vsub.f32 1.0, %v4856_v19  ;;  %v4950_v58 = vadd.f32 1.0, %v4918_v43  ;;  %v4917_v11 = vsel %vm4885_vm7, %v4901_v47, %v4869_v16  ;;  %v4855_v51 = vmul.f32 %v6523_v48, %v4775_v63 }
 0xb86   :  { %v4949_v32 = vadd.f32 1.0, %v4917_v11  ;;  %v4761_v7 = vadd.f32 0.2548296, %v4745_v45  ;;  %v8383_v31 = vadd.f32 %v8244_v12, %v8296_v9  ;;  %v4778_v61 = vmul.f32 %v8339_v33, %v4762_v54 }
 0xb87   :  { %v4904_v24 = vsub.f32 0.0, %v4872_v17  ;;  %v4966_v59 = vmul.f32 %v4950_v58, %v8293_v37  ;;  %v4748_v16 = vmul.f32 %v8352_v13, %v4732_v40  ;;  %v4871_v19 = vsub.f32 1.0, %v4855_v51 }
 0xb88   :  { %v4965_v34 = vmul.f32 %v4949_v32, %v8298_v18  ;;  %v4777_v48 = vmul.f32 %v8341_v23, %v4761_v7  ;;  %v4667_v60 = vadd.f32 -1.4531521, %v4651_v39  ;;  %v4858_v44 = vmul.f32 %v6525_v62, %v4778_v61 }
 0xb89   :  { %v4920_v6 = vsel %vm4888_vm8, %v4904_v24, %v4872_v17  ;;  %v4764_v9 = vadd.f32 0.2548296, %v4748_v16  ;;  %v4835_v47 = vmul.f32 1.442695, %v4811_v26  ;;  %v4903_v37 = vsub.f32 0.0, %v4871_v19 }
 0xb8a   :  { %5925 = vmatprep.mubr.msk.f32.mxu1 %vm4994_vm5, %v4965_v34  ;;  %v4857_v18 = vmul.f32 %v6527_v29, %v4777_v48  ;;  %v4683_v33 = vmul.f32 %v8370_v2, %v4667_v60  ;;  %v4952_v25 = vadd.f32 1.0, %v4920_v6  ;;  %v4874_v28 = vsub.f32 1.0, %v4858_v44 }
 0xb8b   :  { %5926 = vmatmul.mubr.msk.f32.gmra.mrb[44].mxu1 %vm4994_vm5, %v4966_v59  ;;  %v4780_v23 = vmul.f32 %v8352_v13, %v4764_v9  ;;  %v4919_v62 = vsel %vm4887_vm9, %v4903_v37, %v4871_v19  ;;  %v8402_v43 = vmul.f32 0.70710677, %v8383_v31  ;;  %6534 = vpow2.f32 %v4835_v47 }
 0xb8c   :  { %v8399_v5 = vpop.eup %6532  ;;  %v4873_v26 = vsub.f32 1.0, %v4857_v18  ;;  %v4699_v10 = vadd.f32 1.4214138, %v4683_v33  ;;  %v4951_v17 = vadd.f32 1.0, %v4919_v62  ;;  %v4906_v29 = vsub.f32 0.0, %v4874_v28 }
 0xb8d   :  { %v4654_v56 = vmul.f32 1.0614054, %v8399_v5  ;;  %v4798_v11 = vsub.f32 0.0, %v8350_v41  ;;  %v8408_v13 = vand.u32 2147483647, %v8402_v43  ;;  %v4860_v32 = vmul.f32 %v6531_v4, %v4780_v23 }
 0xb8e   :  { %v4905_v15 = vsub.f32 0.0, %v4873_v26  ;;  %v4715_v58 = vmul.f32 %v8370_v2, %v4699_v10  ;;  %v4967_v63 = vmul.f32 %v4951_v17, %v8332_v52  ;;  %v4922_v45 = vsel %vm4890_vm10, %v4906_v29, %v4874_v28 }
 0xb8f   :  { %v4670_v24 = vadd.f32 -1.4531521, %v4654_v56  ;;  %v4968_v54 = vmul.f32 %v4952_v25, %v8303_v38  ;;  %v4954_v40 = vadd.f32 1.0, %v4922_v45  ;;  %v4937_v39 = vmul.f32 0.5, %v8281_v36 }
 0xb90   :  { %v4921_v51 = vsel %vm4889_vm11, %v4905_v15, %v4873_v26  ;;  %v4731_v7 = vadd.f32 -0.28449672, %v4715_v58  ;;  %v4589_v61 = vmul.f32 0.3275911, %v8408_v13  ;;  %5928 = vmatprep.mubr.msk.f32.mxu1 %vm4994_vm5, %v4967_v63  ;;  %v4876_v4 = vsub.f32 1.0, %v4860_v32 }
 0xb91   :  { %v4953_v59 = vadd.f32 1.0, %v4921_v51  ;;  %v4686_v34 = vmul.f32 %v8399_v5, %v4670_v24  ;;  %5929 = vmatmul.mubr.msk.f32.gmra.mrb[46].mxu1 %vm4994_vm5, %v4968_v54  ;;  %v4970_v19 = vmul.f32 %v4954_v40, %v4938_v20  ;;  %v4814_v48 = vmul.f32 %v4798_v11, %v8350_v41 }
 0xb92   :  { %v4747_v52 = vmul.f32 %v8370_v2, %v4731_v7  ;;  %v4605_v16 = vadd.f32 1.0, %v4589_v61  ;;  %v4908_v18 = vsub.f32 0.0, %v4876_v4  ;;  %v4797_v15 = vsub.f32 0.0, %v8408_v13 }
 0xb93   :  { %v4969_v38 = vmul.f32 %v4953_v59, %v4937_v39  ;;  %v4702_v0 = vadd.f32 1.4214138, %v4686_v34  ;;  %v4841_v25 = vmul.f32 1.442695, %v4814_v48  ;;  %v4939_v45 = vmul.f32 0.5, %v8315_v35 }
 0xb94   :  { %v4763_v36 = vadd.f32 0.2548296, %v4747_v52  ;;  %6536 = vrcp.f32 %v4605_v16  ;;  %v4924_v56 = vsel %vm4892_vm12, %v4908_v18, %v4876_v4  ;;  %v4813_v34 = vmul.f32 %v4797_v15, %v8408_v13 }
 0xb95   :  { %v5902_v6 = vpop.f32.mrb[66].mxu0  ;;  %v4718_v44 = vmul.f32 %v8399_v5, %v4702_v0  ;;  %5931 = vmatprep.mubr.msk.f32.mxu1 %vm4994_vm5, %v4969_v38  ;;  %v6535_v37 = vpop.eup %6534  ;;  %6538 = vpow2.f32 %v4841_v25  ;;  %v4956_v40 = vadd.f32 1.0, %v4924_v56  ;;  %v4940_v61 = vmul.f32 0.5, %v8291_v50 }
 0xb96   :  { %v4528_v60 = vpop.f32.mrb[67].mxu0  ;;  %v8427_v14 = vadd.f32 %v5902_v6, %v8244_v12  ;;  %v4779_v47 = vmul.f32 %v8370_v2, %v4763_v36  ;;  %5932 = vmatmul.mubr.msk.f32.gmra.mrb[48].mxu1 %vm4994_vm5, %v4970_v19  ;;  %v4839_v6 = vmul.f32 1.442695, %v4813_v34  ;;  %vm4894_vm14 = vcmp.lt.f32.partialorder %v8337_v57, 0.0 }
 0xb97   :  { %v8430_v9 = vadd.f32 %v8244_v12, %v4528_v60  ;;  %v4734_v62 = vadd.f32 -0.28449672, %v4718_v44  ;;  %v4972_v4 = vmul.f32 %v4956_v40, %v4940_v61  ;;  %vm4893_vm15 = vcmp.lt.f32.partialorder %v8402_v43, 0.0 }
 0xb98   :  { %v8435_v41 = vmul.f32 0.70710677, %v8427_v14  ;;  %v4859_v33 = vmul.f32 %v6535_v37, %v4779_v47 }
 0xb99   :  { %v8438_v28 = vmul.f32 0.70710677, %v8430_v9  ;;  %v5905_v23 = vpop.f32.mrb[68].mxu0  ;;  %v4750_v53 = vmul.f32 %v8399_v5, %v4734_v62 }
 0xb9a   :  { %v4576_v26 = vand.u32 2147483647, %v8435_v41  ;;  %v8442_v10 = vadd.f32 %v5905_v23, %v8244_v12  ;;  %v4538_v2 = vpop.f32.mrb[69].mxu0  ;;  %v4875_v17 = vsub.f32 1.0, %v4859_v33  ;;  %vm4896_vm1 = vcmp.lt.f32.partialorder %v8435_v41, 0.0 }
 0xb9b   :  { %v4575_v29 = vand.u32 2147483647, %v8438_v28  ;;  %v8448_v11 = vadd.f32 %v8244_v12, %v4538_v2  ;;  %v4766_v38 = vadd.f32 0.2548296, %v4750_v53  ;;  %vm4895_vm2 = vcmp.lt.f32.partialorder %v8438_v28, 0.0 }
 0xb9c   :  { %v4592_v58 = vmul.f32 0.3275911, %v4576_v26  ;;  %v4907_v63 = vsub.f32 0.0, %v4875_v17  ;;  %v8452_v24 = vmul.f32 0.70710677, %v8442_v10  ;;  %v4800_v50 = vsub.f32 0.0, %v4576_v26 }
 0xb9d   :  { %v4591_v32 = vmul.f32 0.3275911, %v4575_v29  ;;  %v8459_v35 = vmul.f32 0.70710677, %v8448_v11  ;;  %v4782_v36 = vmul.f32 %v8399_v5, %v4766_v38  ;;  %v4799_v44 = vsub.f32 0.0, %v4575_v29 }
 0xb9e   :  { %v4608_v54 = vadd.f32 1.0, %v4592_v58  ;;  %v4923_v51 = vsel %vm4891_vm13, %v4907_v63, %v4875_v17  ;;  %v4578_v39 = vand.u32 2147483647, %v8452_v24  ;;  %v6537_v12 = vpop.eup %6536  ;;  %v4816_v23 = vmul.f32 %v4800_v50, %v4576_v26 }
 0xb9f   :  { %v4607_v7 = vadd.f32 1.0, %v4591_v32  ;;  %v4955_v59 = vadd.f32 1.0, %v4923_v51  ;;  %v4653_v22 = vmul.f32 1.0614054, %v6537_v12  ;;  %v4577_v19 = vand.u32 2147483647, %v8459_v35  ;;  %v6539_v47 = vpop.eup %6538 }
 0xba0   :  { %6540 = vrcp.f32 %v4608_v54  ;;  %v4594_v20 = vmul.f32 0.3275911, %v4578_v39  ;;  %v4862_v25 = vmul.f32 %v6539_v47, %v4782_v36  ;;  %v4815_v56 = vmul.f32 %v4799_v44, %v4575_v29 }
 0xba1   :  { %6542 = vrcp.f32 %v4607_v7  ;;  %v4971_v52 = vmul.f32 %v4955_v59, %v4939_v45  ;;  %v4669_v0 = vadd.f32 -1.4531521, %v4653_v22  ;;  %v4593_v48 = vmul.f32 0.3275911, %v4577_v19 }
 0xba2   :  { %v4610_v16 = vadd.f32 1.0, %v4594_v20  ;;  %v4802_v15 = vsub.f32 0.0, %v4578_v39  ;;  %v4878_v45 = vsub.f32 1.0, %v4862_v25  ;;  %v4845_v32 = vmul.f32 1.442695, %v4816_v23 }
 0xba3   :  { %5934 = vmatprep.mubr.msk.f32.mxu1 %vm4994_vm5, %v4971_v52  ;;  %v4685_v13 = vmul.f32 %v6537_v12, %v4669_v0  ;;  %v4609_v37 = vadd.f32 1.0, %v4593_v48  ;;  %v4843_v7 = vmul.f32 1.442695, %v4815_v56  ;;  %v4801_v61 = vsub.f32 0.0, %v4577_v19 }
 0xba4   :  { %5935 = vmatmul.mubr.msk.f32.gmra.mrb[50].mxu1 %vm4994_vm5, %v4972_v4  ;;  %6544 = vrcp.f32 %v4610_v16  ;;  %v4818_v59 = vmul.f32 %v4802_v15, %v4578_v39  ;;  %v4910_v52 = vsub.f32 0.0, %v4878_v45  ;;  %vm4898_vm3 = vcmp.lt.f32.partialorder %v8452_v24, 0.0  ;;  %v5375_v24 = vld [vmem:[%s8588_s14] ss:$0 sm:$0xff] }
 0xba5   :  { %v4701_v60 = vadd.f32 1.4214138, %v4685_v13  ;;  %6546 = vpow2.f32 %v4839_v6  ;;  %v4817_v39 = vmul.f32 %v4801_v61, %v4577_v19  ;;  %vm4897_vm4 = vcmp.lt.f32.partialorder %v8459_v35, 0.0 }
 0xba6   :  { %6548 = vrcp.f32 %v4609_v37  ;;  %v4849_v6 = vmul.f32 1.442695, %v4818_v59  ;;  %v4926_v44 = vsel %vm4894_vm14, %v4910_v52, %v4878_v45 }
 0xba7   :  { %v4717_v18 = vmul.f32 %v6537_v12, %v4701_v60  ;;  %6550 = vpow2.f32 %v4845_v32  ;;  %v4847_v56 = vmul.f32 1.442695, %v4817_v39  ;;  %v4958_v15 = vadd.f32 1.0, %v4926_v44 }
 0xba8   :  { %6552 = vpow2.f32 %v4843_v7 }
 0xba9   :  { %v4733_v2 = vadd.f32 -0.28449672, %v4717_v18  ;;  %6554 = vpow2.f32 %v4849_v6 }
 0xbaa   :  { %v6541_v33 = vpop.eup %6540  ;;  %6556 = vpow2.f32 %v4847_v56  ;;  %v4945_v56 = vmul.f32 0.5, %v8448_v11 }
 0xbab   :  { %v6543_v62 = vpop.eup %6542  ;;  %v4656_v17 = vmul.f32 1.0614054, %v6541_v33  ;;  %v4749_v63 = vmul.f32 %v6537_v12, %v4733_v2 }
 0xbac   :  { %v4655_v58 = vmul.f32 1.0614054, %v6543_v62 }
 0xbad   :  { %v4672_v5 = vadd.f32 -1.4531521, %v4656_v17  ;;  %v4765_v40 = vadd.f32 0.2548296, %v4749_v63  ;;  %v4941_v63 = vmul.f32 0.5, %v8383_v31 }
 0xbae   :  { %v4671_v53 = vadd.f32 -1.4531521, %v4655_v58  ;;  %v8466_v54 = vpop.eup %6544 }
 0xbaf   :  { %v4688_v51 = vmul.f32 %v6541_v33, %v4672_v5  ;;  %v4658_v26 = vmul.f32 1.0614054, %v8466_v54  ;;  %v4781_v22 = vmul.f32 %v6537_v12, %v4765_v40  ;;  %v6547_v29 = vpop.eup %6546 }
 0xbb0   :  { %v4687_v34 = vmul.f32 %v6543_v62, %v4671_v53  ;;  %v6549_v13 = vpop.eup %6548  ;;  %v4942_v53 = vmul.f32 0.5, %v8324_v46 }
 0xbb1   :  { %v4704_v20 = vadd.f32 1.4214138, %v4688_v51  ;;  %v4674_v4 = vadd.f32 -1.4531521, %v4658_v26  ;;  %v4861_v0 = vmul.f32 %v6547_v29, %v4781_v22  ;;  %v4657_v12 = vmul.f32 1.0614054, %v6549_v13  ;;  %v6551_v7 = vpop.eup %6550 }
 0xbb2   :  { %v4703_v38 = vadd.f32 1.4214138, %v4687_v34  ;;  %v6553_v26 = vpop.eup %6552  ;;  %v4974_v61 = vmul.f32 %v4958_v15, %v4942_v53  ;;  %v4946_v15 = vmul.f32 0.5, %v8442_v10 }
 0xbb3   :  { %v4720_v16 = vmul.f32 %v6541_v33, %v4704_v20  ;;  %v4690_v50 = vmul.f32 %v8466_v54, %v4674_v4  ;;  %v4877_v48 = vsub.f32 1.0, %v4861_v0  ;;  %v4673_v23 = vadd.f32 -1.4531521, %v4657_v12  ;;  %v6555_v4 = vpop.eup %6554 }
 0xbb4   :  { %v4719_v36 = vmul.f32 %v6543_v62, %v4703_v38  ;;  %v4943_v12 = vmul.f32 0.5, %v8430_v9 }
 0xbb5   :  { %v4736_v60 = vadd.f32 -0.28449672, %v4720_v16  ;;  %v4706_v37 = vadd.f32 1.4214138, %v4690_v50  ;;  %v4909_v18 = vsub.f32 0.0, %v4877_v48  ;;  %v4689_v57 = vmul.f32 %v6549_v13, %v4673_v23 }
 0xbb6   :  { %v4735_v47 = vadd.f32 -0.28449672, %v4719_v36 }
 0xbb7   :  { %v4752_v25 = vmul.f32 %v6541_v33, %v4736_v60  ;;  %v4722_v17 = vmul.f32 %v8466_v54, %v4706_v37  ;;  %v4925_v19 = vsel %vm4893_vm15, %v4909_v18, %v4877_v48  ;;  %v4705_v51 = vadd.f32 1.4214138, %v4689_v57  ;;  %v6557_v37 = vpop.eup %6556 }
 0xbb8   :  { %v4751_v2 = vmul.f32 %v6543_v62, %v4735_v47  ;;  %v4957_v5 = vadd.f32 1.0, %v4925_v19 }
 0xbb9   :  { %v4768_v58 = vadd.f32 0.2548296, %v4752_v25  ;;  %v4738_v32 = vadd.f32 -0.28449672, %v4722_v17  ;;  %v4721_v20 = vmul.f32 %v6549_v13, %v4705_v51 }
 0xbba   :  { %v4767_v45 = vadd.f32 0.2548296, %v4751_v2  ;;  %v4973_v59 = vmul.f32 %v4957_v5, %v4941_v63 }
 0xbbb   :  { %v4784_v40 = vmul.f32 %v6541_v33, %v4768_v58  ;;  %v4754_v34 = vmul.f32 %v8466_v54, %v4738_v32  ;;  %v4737_v38 = vadd.f32 -0.28449672, %v4721_v20 }
 0xbbc   :  { %v4783_v43 = vmul.f32 %v6543_v62, %v4767_v45  ;;  %5937 = vmatprep.mubr.msk.f32.mxu1 %vm4994_vm5, %v4973_v59 }
 0xbbd   :  { %v4864_v22 = vmul.f32 %v6551_v7, %v4784_v40  ;;  %v4770_v52 = vadd.f32 0.2548296, %v4754_v34  ;;  %5938 = vmatmul.mubr.msk.f32.gmra.mrb[52].mxu1 %vm4994_vm5, %v4974_v61  ;;  %v4753_v0 = vmul.f32 %v6549_v13, %v4737_v38 }
 0xbbe   :  { %v4863_v29 = vmul.f32 %v6553_v26, %v4783_v43 }
 0xbbf   :  { %v4880_v31 = vsub.f32 1.0, %v4864_v22  ;;  %v4786_v33 = vmul.f32 %v8466_v54, %v4770_v52  ;;  %v4769_v50 = vadd.f32 0.2548296, %v4753_v0  ;;  %v4944_v54 = vmul.f32 0.5, %v8427_v14  ;;  %v8640_v0 = vld [vmem:[#allocation5_spill] sm:$0xff] }
 0xbc0   :  { %v4879_v46 = vsub.f32 1.0, %v4863_v29 }
 0xbc1   :  { %v4912_v62 = vsub.f32 0.0, %v4880_v31  ;;  %v4866_v6 = vmul.f32 %v6555_v4, %v4786_v33  ;;  %v4785_v47 = vmul.f32 %v6549_v13, %v4769_v50 }
 0xbc2   :  { %v4911_v16 = vsub.f32 0.0, %v4879_v46 }
 0xbc3   :  { %v4928_v36 = vsel %vm4896_vm1, %v4912_v62, %v4880_v31  ;;  %v4882_v60 = vsub.f32 1.0, %v4866_v6  ;;  %v4865_v23 = vmul.f32 %v6557_v37, %v4785_v47  ;;  %v8641_v6 = vld [vmem:[#allocation6_spill] sm:$0xff] }
 0xbc4   :  { %v4960_v39 = vadd.f32 1.0, %v4928_v36  ;;  %v4927_v48 = vsel %vm4895_vm2, %v4911_v16, %v4879_v46  ;;  %v8639_v46 = vld [vmem:[#allocation4_spill] sm:$0xff] }
 0xbc5   :  { %v4959_v44 = vadd.f32 1.0, %v4927_v48  ;;  %v4914_v18 = vsub.f32 0.0, %v4882_v60  ;;  %v4881_v2 = vsub.f32 1.0, %v4865_v23  ;;  %v8644_v23 = vld [vmem:[#allocation9_spill] sm:$0xff] }
 0xbc6   :  { %v4976_v41 = vmul.f32 %v4960_v39, %v4944_v54 }
 0xbc7   :  { %v4975_v25 = vmul.f32 %v4959_v44, %v4943_v12  ;;  %v4930_v28 = vsel %vm4898_vm3, %v4914_v18, %v4882_v60  ;;  %v4913_v17 = vsub.f32 0.0, %v4881_v2  ;;  %v8642_v60 = vld [vmem:[#allocation7_spill] sm:$0xff]  ;;  %v8643_v44 = vld [vmem:[#allocation8_spill] sm:$0xff] }
 0xbc8   :  { %v4962_v9 = vadd.f32 1.0, %v4930_v28 }
 0xbc9   :  { %5940 = vmatprep.mubr.msk.f32.mxu1 %vm4994_vm5, %v4975_v25  ;;  %v4929_v13 = vsel %vm4897_vm4, %v4913_v17, %v4881_v2  ;;  %v8645_v2 = vld [vmem:[#allocation10_spill] sm:$0xff] }
 0xbca   :  { %5941 = vmatmul.mubr.msk.f32.gmra.mrb[54].mxu1 %vm4994_vm5, %v4976_v41  ;;  %v4961_v14 = vadd.f32 1.0, %v4929_v13  ;;  %v4978_v58 = vmul.f32 %v4962_v9, %v4946_v15 }
 0xbcc   :  { %v4977_v19 = vmul.f32 %v4961_v14, %v4945_v56 }
 0xbce   :  { %5943 = vmatprep.mubr.msk.f32.mxu1 %vm4994_vm5, %v4977_v19 }
 0xbcf   :  { %5944 = vmatmul.mubr.msk.f32.gmra.mrb[56].mxu1 %vm4994_vm5, %v4978_v58 }
 0xc36   :  { %v5924_v57 = vpop.f32.mrb[42].mxu1 }
 0xc37   :  { %v5115_v63 = vadd.f32 %v5924_v57, %v5375_v24  ;;  %v5109_v35 = vpop.f32.mrb[43].mxu1 }
 0xc38   :  { %v5110_v5 = vadd.f32 %v5375_v24, %v5109_v35 }
 0xc39   :  { %v5189_v45 = vadd.f32 %v5115_v63, %v7918_v49 }
 0xc3a   :  { %v5188_v11 = vadd.f32 %v5110_v5, %v7923_v21 }
 0xc3b   :  { %5205 = vst.msk [vmem:[%s8589_s15 + $0x8] sm:$0xff] %vm68_vm0, %v5189_v45 }
 0xc3c   :  { %5204 = vst.msk [vmem:[%s8589_s15] sm:$0xff] %vm68_vm0, %v5188_v11 }
 0xc5e   :  { %v5927_v10 = vpop.f32.mrb[44].mxu1 }
 0xc5f   :  { %v5125_v32 = vadd.f32 %v5927_v10, %v5375_v24  ;;  %v5119_v53 = vpop.f32.mrb[45].mxu1 }
 0xc60   :  { %v5120_v40 = vadd.f32 %v5375_v24, %v5119_v53 }
 0xc61   :  { %v5191_v51 = vadd.f32 %v5125_v32, %v7934_v42 }
 0xc62   :  { %v5190_v49 = vadd.f32 %v5120_v40, %v7939_v55 }
 0xc63   :  { %5207 = vst.msk [vmem:[%s8589_s15 + $0x18] sm:$0xff] %vm68_vm0, %v5191_v51 }
 0xc64   :  { %5206 = vst.msk [vmem:[%s8589_s15 + $0x10] sm:$0xff] %vm68_vm0, %v5190_v49  ;;  %v5930_v21 = vpop.f32.mrb[46].mxu1 }
 0xc65   :  { %v5135_v7 = vadd.f32 %v5930_v21, %v5375_v24  ;;  %v5129_v59 = vpop.f32.mrb[47].mxu1 }
 0xc66   :  { %v5130_v43 = vadd.f32 %v5375_v24, %v5129_v59 }
 0xc67   :  { %v5193_v34 = vadd.f32 %v5135_v7, %v7948_v27 }
 0xc68   :  { %v5192_v42 = vadd.f32 %v5130_v43, %v7953_v30 }
 0xc69   :  { %v5933_v26 = vpop.f32.mrb[48].mxu1  ;;  %5209 = vst.msk [vmem:[%s8589_s15 + $0x28] sm:$0xff] %vm68_vm0, %v5193_v34 }
 0xc6a   :  { %v5145_v55 = vadd.f32 %v5933_v26, %v5375_v24  ;;  %v5139_v61 = vpop.f32.mrb[49].mxu1  ;;  %5208 = vst.msk [vmem:[%s8589_s15 + $0x20] sm:$0xff] %vm68_vm0, %v5192_v42 }
 0xc6b   :  { %v5140_v22 = vadd.f32 %v5375_v24, %v5139_v61 }
 0xc6c   :  { %v5195_v20 = vadd.f32 %v5145_v55, %v7964_v3 }
 0xc6d   :  { %v5194_v27 = vadd.f32 %v5140_v22, %v7969_v8 }
 0xc6e   :  { %5211 = vst.msk [vmem:[%s8589_s15 + $0x38] sm:$0xff] %vm68_vm0, %v5195_v20 }
 0xc6f   :  { %5210 = vst.msk [vmem:[%s8589_s15 + $0x30] sm:$0xff] %vm68_vm0, %v5194_v27 }
 0xc77   :  { %v5936_v30 = vpop.f32.mrb[50].mxu1 }
 0xc78   :  { %v5155_v29 = vadd.f32 %v5936_v30, %v5375_v24  ;;  %v5149_v52 = vpop.f32.mrb[51].mxu1 }
 0xc79   :  { %v5150_v31 = vadd.f32 %v5375_v24, %v5149_v52 }
 0xc7a   :  { %v5197_v38 = vadd.f32 %v5155_v29, %v7980_v1 }
 0xc7b   :  { %v5196_v3 = vadd.f32 %v5150_v31, %v8639_v46 }
 0xc7c   :  { %5213 = vst.msk [vmem:[%s8589_s15 + $0x48] sm:$0xff] %vm68_vm0, %v5197_v38 }
 0xc7d   :  { %5212 = vst.msk [vmem:[%s8589_s15 + $0x40] sm:$0xff] %vm68_vm0, %v5196_v3 }
 0xc90   :  { %v5939_v8 = vpop.f32.mrb[52].mxu1 }
 0xc91   :  { %v5165_v33 = vadd.f32 %v5939_v8, %v5375_v24  ;;  %v5159_v4 = vpop.f32.mrb[53].mxu1 }
 0xc92   :  { %v5160_v62 = vadd.f32 %v5375_v24, %v5159_v4 }
 0xc93   :  { %v5199_v16 = vadd.f32 %v5165_v33, %v8640_v0 }
 0xc94   :  { %v5198_v1 = vadd.f32 %v5160_v62, %v8641_v6 }
 0xc95   :  { %5215 = vst.msk [vmem:[%s8589_s15 + $0x58] sm:$0xff] %vm68_vm0, %v5199_v16 }
 0xc96   :  { %5214 = vst.msk [vmem:[%s8589_s15 + $0x50] sm:$0xff] %vm68_vm0, %v5198_v1 }
 0xc9d   :  { %v5942_v36 = vpop.f32.mrb[54].mxu1 }
 0xc9e   :  { %v5175_v50 = vadd.f32 %v5942_v36, %v5375_v24  ;;  %v5169_v39 = vpop.f32.mrb[55].mxu1 }
 0xc9f   :  { %v5170_v48 = vadd.f32 %v5375_v24, %v5169_v39 }
 0xca0   :  { %v5201_v12 = vadd.f32 %v5175_v50, %v8642_v60 }
 0xca1   :  { %v5200_v47 = vadd.f32 %v5170_v48, %v8643_v44 }
 0xca2   :  { %5217 = vst.msk [vmem:[%s8589_s15 + $0x68] sm:$0xff] %vm68_vm0, %v5201_v12  ;;  %v5945_v37 = vpop.f32.mrb[56].mxu1 }
 0xca3   :  { %5216 = vst.msk [vmem:[%s8589_s15 + $0x60] sm:$0xff] %vm68_vm0, %v5200_v47  ;;  %v5185_v54 = vadd.f32 %v5945_v37, %v5375_v24  ;;  %v5179_v18 = vpop.f32.mrb[57].mxu1 }
 0xca4   :  { %v5180_v25 = vadd.f32 %v5375_v24, %v5179_v18 }
 0xca5   :  { %v5203_v41 = vadd.f32 %v5185_v54, %v8644_v23 }
 0xca6   :  { %v5202_v28 = vadd.f32 %v5180_v25, %v8645_v2 }
 0xca7   :  { %5219 = vst.msk [vmem:[%s8589_s15 + $0x78] sm:$0xff] %vm68_vm0, %v5203_v41 }
 0xca8   :  { %5218 = vst.msk [vmem:[%s8589_s15 + $0x70] sm:$0xff] %vm68_vm0, %v5202_v28 }

// kernel: _lambda_.15
= control target key start
LH: loop header
LB: loop body
LE: loop exit
PB: predicated region body
PF: predicated region fallthrough
CT: control target
= control target key end

     0   :  { %vm42_vm0 = vcmask 261120   ;;  %s871_s0 = inlined_call_operand.vmem [shape: f32[32,32], index: 0, kind: input, shape index: {}]   ;;  %s872_s1 = inlined_call_operand.vmem [shape: f32[1,32], index: 1, kind: input, shape index: {}]   ;;  %s873_s2 = inlined_call_operand.vmem [shape: f32[1,32], index: 2, kind: input, shape index: {}]   ;;  %s874_s3 = inlined_call_operand.vmem [shape: f32[2,32], index: 3, kind: input, shape index: {}]   ;;  %s875_s4 = inlined_call_operand.vmem [shape: f32[32,256], index: 4, kind: input, shape index: {}]   ;;  %s876_s5 = inlined_call_operand.vmem [shape: f32[1,256], index: 5, kind: input, shape index: {}, may-alias: {5,7}]   ;;  %s877_s6 = inlined_call_operand.vmem [shape: f32[1,256], index: 6, kind: input, shape index: {}]   ;;  %s878_s7 = inlined_call_operand.vmem [shape: f32[1,256], index: 7, kind: input, shape index: {}, may-alias: {5,7}]   ;;  %s879_s8 = inlined_call_operand.vmem [shape: f32[256,5], index: 8, kind: input, shape index: {}]   ;;  %s880_s9 = inlined_call_operand.vmem [shape: f32[1,5], index: 9, kind: input, shape index: {}]   ;;  %s881_s10 = inlined_call_operand.hbm [shape: f32[2,5], index: 10, kind: output, shape index: {}]  }
   0x1   :  { %v36_v0 = vld [vmem:[%s871_s0] sm:$0xff]  ;;  %v38_v1 = vld [vmem:[%s871_s0 + $0x10] sm:$0xff]  ;;  %v37_v2 = vld [vmem:[%s871_s0 + $0x8] sm:$0xff] }
   0x2   :  { %v43_v3 = vsel %vm42_vm0, %v36_v0, 0.0  ;;  %v49_v4 = vsel %vm42_vm0, %v38_v1, 0.0  ;;  %v39_v5 = vld [vmem:[%s871_s0 + $0x18] sm:$0xff] }
   0x3   :  { %15 = vsyncpa [#allocation3], 0  ;;  %44 = vadd.xlane.f32.xlu0 %v43_v3  ;;  %50 = vadd.xlane.f32.xlu1 %v49_v4  ;;  %v46_v6 = vsel %vm42_vm0, %v37_v2, 0.0  ;;  %v52_v7 = vsel %vm42_vm0, %v39_v5, 0.0  ;;  %v637_v28 = vmov 0.0|0.0   ;;  %vm638_vm1 = vmmov 0  }
   0x4   :  { %547 = vmatprep.subr.bf16.mxu1 %v637_v28  ;;  %v639_v29 = vmov 0.0   ;;  %v491_v44 = vld [vmem:[%s872_s1] ss:$0 sm:$0xff]  ;;  %v191_v59 = vld [vmem:[%s875_s4 + $0x8] sm:$0xff]  ;;  %v193_v60 = vld [vmem:[%s875_s4 + $0x18] sm:$0xff]  ;;  %vm475_vm4 = vcmask 33792  }
   0x5   :  { %544 = vmatprep.mubr.msk.f32.mxu1 %vm638_vm1, %v639_v29  ;;  %v492_v49 = vld [vmem:[%s873_s2] ss:$0 sm:$0xff]  ;;  %v553_v63 = vpack.c.bf16 %v193_v60, %v191_v59  ;;  %v195_v3 = vld [vmem:[%s875_s4 + $0x28] sm:$0xff]  ;;  %v197_v4 = vld [vmem:[%s875_s4 + $0x38] sm:$0xff] }
   0x6   :  { %v381_v59 = vld [vmem:[%s879_s8 + $0x78] sm:$0xff] }
   0x7   :  { %47 = vadd.xlane.f32.xlu0 %v46_v6  ;;  %53 = vadd.xlane.f32.xlu1 %v52_v7  ;;  %v557_v7 = vpack.c.bf16 %v197_v4, %v195_v3  ;;  %v298_v4 = vld [vmem:[%s878_s7] sm:$0x3]  ;;  %s640_s7 = smov [#allocation2]  }
  0x90   :  { %v45_v8 = vpop.xlane.xlu0 %44  ;;  %v51_v9 = vpop.xlane.xlu1 %50 }
  0x91   :  { %v56_v10 = vmul.f32 0.03125, %v45_v8  ;;  %v58_v11 = vmul.f32 0.03125, %v51_v9  ;;  %v194_v8 = vld [vmem:[%s875_s4 + $0x20] sm:$0xff]  ;;  %v196_v9 = vld [vmem:[%s875_s4 + $0x30] sm:$0xff] }
  0x93   :  { %v60_v12 = vsub.f32 %v36_v0, %v56_v10  ;;  %v62_v13 = vsub.f32 %v38_v1, %v58_v11  ;;  %v190_v0 = vld [vmem:[%s875_s4] sm:$0xff]  ;;  %v192_v1 = vld [vmem:[%s875_s4 + $0x10] sm:$0xff]  ;;  %v559_v10 = vpack.c.bf16 %v196_v9, %v194_v8 }
  0x94   :  { %v48_v14 = vpop.xlane.xlu0 %47  ;;  %v54_v15 = vpop.xlane.xlu1 %53  ;;  %v555_v6 = vpack.c.bf16 %v192_v1, %v190_v0  ;;  %v198_v0 = vld [vmem:[%s876_s5] sm:$0x3] }
  0x95   :  { %v57_v16 = vmul.f32 0.03125, %v48_v14  ;;  %v59_v17 = vmul.f32 0.03125, %v54_v15  ;;  %v64_v18 = vmul.f32 %v60_v12, %v60_v12  ;;  %v66_v19 = vmul.f32 %v62_v13, %v62_v13  ;;  %v383_v14 = vld [vmem:[%s879_s8 + $0x88] sm:$0xff]  ;;  %v366_v15 = vld [vmem:[%s879_s8] sm:$0xff] }
  0x97   :  { %v61_v20 = vsub.f32 %v37_v2, %v57_v16  ;;  %v63_v21 = vsub.f32 %v39_v5, %v59_v17  ;;  %v68_v22 = vsel %vm42_vm0, %v64_v18, 0.0  ;;  %v74_v23 = vsel %vm42_vm0, %v66_v19, 0.0  ;;  %v116_v5 = vld [vmem:[%s874_s3] sm:$0x3]  ;;  %v367_v17 = vld [vmem:[%s879_s8 + $0x8] sm:$0xff]  ;;  %v384_v18 = vld [vmem:[%s879_s8 + $0x90] sm:$0xff] }
  0x98   :  { %69 = vadd.xlane.f32.xlu0 %v68_v22  ;;  %v385_v19 = vld [vmem:[%s879_s8 + $0x98] sm:$0xff]  ;;  %v368_v22 = vld [vmem:[%s879_s8 + $0x10] sm:$0xff] }
  0x99   :  { %v65_v24 = vmul.f32 %v61_v20, %v61_v20  ;;  %v67_v25 = vmul.f32 %v63_v21, %v63_v21 }
  0x9b   :  { %v71_v26 = vsel %vm42_vm0, %v65_v24, 0.0  ;;  %v77_v27 = vsel %vm42_vm0, %v67_v25, 0.0  ;;  %v386_v24 = vld [vmem:[%s879_s8 + $0xa0] sm:$0xff]  ;;  %v387_v25 = vld [vmem:[%s879_s8 + $0xa8] sm:$0xff] }
  0x9c   :  { %75 = vadd.xlane.f32.xlu0 %v74_v23  ;;  %72 = vadd.xlane.f32.xlu1 %v71_v26  ;;  %v369_v23 = vld [vmem:[%s879_s8 + $0x18] sm:$0xff] }
  0x9d   :  { %v567_v26 = vpack.c.bf16 %v369_v23, %v368_v22 }
  0xa0   :  { %78 = vadd.xlane.f32.xlu1 %v77_v27  ;;  %v569_v27 = vpack.c.bf16 %v387_v25, %v386_v24 }
 0x125   :  { %v70_v30 = vpop.xlane.xlu0 %69 }
 0x126   :  { %v80_v31 = vmul.f32 0.03125, %v70_v30  ;;  %v388_v30 = vld [vmem:[%s879_s8 + $0xb0] sm:$0xff] }
 0x128   :  { %v84_v32 = vadd.f32 1e-05, %v80_v31  ;;  %v389_v31 = vld [vmem:[%s879_s8 + $0xb8] sm:$0xff] }
 0x129   :  { %v73_v33 = vpop.xlane.xlu1 %72  ;;  %v76_v34 = vpop.xlane.xlu0 %75 }
 0x12a   :  { %597 = vrsqrt.f32 %v84_v32  ;;  %v81_v35 = vmul.f32 0.03125, %v73_v33  ;;  %v82_v36 = vmul.f32 0.03125, %v76_v34  ;;  %v573_v33 = vpack.c.bf16 %v389_v31, %v388_v30  ;;  %v372_v34 = vld [vmem:[%s879_s8 + $0x30] sm:$0xff] }
 0x12c   :  { %v85_v37 = vadd.f32 1e-05, %v81_v35  ;;  %v86_v38 = vadd.f32 1e-05, %v82_v36  ;;  %v373_v35 = vld [vmem:[%s879_s8 + $0x38] sm:$0xff]  ;;  %v390_v36 = vld [vmem:[%s879_s8 + $0xc0] sm:$0xff] }
 0x12d   :  { %v79_v39 = vpop.xlane.xlu1 %78 }
 0x12e   :  { %599 = vrsqrt.f32 %v85_v37  ;;  %v83_v40 = vmul.f32 0.03125, %v79_v39  ;;  %v391_v37 = vld [vmem:[%s879_s8 + $0xc8] sm:$0xff] }
 0x12f   :  { %601 = vrsqrt.f32 %v86_v38  ;;  %v575_v38 = vpack.c.bf16 %v373_v35, %v372_v34  ;;  %v577_v39 = vpack.c.bf16 %v391_v37, %v390_v36 }
 0x130   :  { %v87_v41 = vadd.f32 1e-05, %v83_v40  ;;  %v374_v40 = vld [vmem:[%s879_s8 + $0x40] sm:$0xff] }
 0x132   :  { %603 = vrsqrt.f32 %v87_v41  ;;  %v375_v41 = vld [vmem:[%s879_s8 + $0x48] sm:$0xff] }
 0x134   :  { %v598_v42 = vpop.eup %597 }
 0x135   :  { %v92_v43 = vmul.f32 %v598_v42, %v60_v12  ;;  %v392_v42 = vld [vmem:[%s879_s8 + $0xd0] sm:$0xff] }
 0x137   :  { %v102_v48 = vmul.f32 %v491_v44, %v92_v43  ;;  %v393_v43 = vld [vmem:[%s879_s8 + $0xd8] sm:$0xff] }
 0x138   :  { %v600_v45 = vpop.eup %599 }
 0x139   :  { %v602_v46 = vpop.eup %601  ;;  %v93_v47 = vmul.f32 %v600_v45, %v61_v20  ;;  %v112_v53 = vadd.f32 %v492_v49, %v102_v48  ;;  %v563_v20 = vpack.c.bf16 %v367_v17, %v366_v15  ;;  %v581_v45 = vpack.c.bf16 %v393_v43, %v392_v42  ;;  %v394_v48 = vld [vmem:[%s879_s8 + $0xe0] sm:$0xff] }
 0x13a   :  { %v94_v50 = vmul.f32 %v602_v46, %v62_v13  ;;  %v382_v13 = vld [vmem:[%s879_s8 + $0x80] sm:$0xff]  ;;  %v376_v46 = vld [vmem:[%s879_s8 + $0x50] sm:$0xff] }
 0x13b   :  { %v103_v51 = vmul.f32 %v491_v44, %v93_v47  ;;  %v561_v16 = vpack.c.bf16 %v383_v14, %v382_v13  ;;  %v377_v47 = vld [vmem:[%s879_s8 + $0x58] sm:$0xff] }
 0x13c   :  { %v604_v52 = vpop.eup %603  ;;  %v104_v56 = vmul.f32 %v491_v44, %v94_v50  ;;  %v583_v50 = vpack.c.bf16 %v377_v47, %v376_v46 }
 0x13d   :  { %v113_v54 = vadd.f32 %v492_v49, %v103_v51  ;;  %v95_v55 = vmul.f32 %v604_v52, %v63_v21  ;;  %v565_v21 = vpack.c.bf16 %v385_v19, %v384_v18  ;;  %562 = vmatprep.subr.bf16.mxu0 %v561_v16  ;;  %v378_v52 = vld [vmem:[%s879_s8 + $0x60] sm:$0xff] }
 0x13e   :  { %v114_v61 = vadd.f32 %v492_v49, %v104_v56  ;;  %564 = vmatpush3.bf16.msra.mxu0 %v563_v20 }
 0x13f   :  { %v548_v57 = vpack.c.bf16 %v113_v54, %v112_v53  ;;  %v105_v58 = vmul.f32 %v491_v44, %v95_v55  ;;  %566 = vmatprep.subr.bf16.mxu0 %v565_v21  ;;  %v579_v44 = vpack.c.bf16 %v375_v41, %v374_v40  ;;  %v379_v53 = vld [vmem:[%s879_s8 + $0x68] sm:$0xff]  ;;  %v396_v54 = vld [vmem:[%s879_s8 + $0xf0] sm:$0xff]  ;;  %v397_v55 = vld [vmem:[%s879_s8 + $0xf8] sm:$0xff] }
 0x140   :  { %v587_v56 = vpack.c.bf16 %v379_v53, %v378_v52 }
 0x141   :  { %549 = vmatpush3.bf16.msra.mxu1 %v548_v57  ;;  %v115_v62 = vadd.f32 %v492_v49, %v105_v58  ;;  %v395_v49 = vld [vmem:[%s879_s8 + $0xe8] sm:$0xff]  ;;  %v589_v57 = vpack.c.bf16 %v397_v55, %v396_v54  ;;  %v380_v58 = vld [vmem:[%s879_s8 + $0x70] sm:$0xff] }
 0x142   :  { %550 = vmatprep.subr.bf16.mxu1 %v637_v28  ;;  %v370_v28 = vld [vmem:[%s879_s8 + $0x20] sm:$0xff]  ;;  %568 = vmatpush3.bf16.msra.mxu0 %v567_v26  ;;  %v585_v51 = vpack.c.bf16 %v395_v49, %v394_v48  ;;  %v591_v60 = vpack.c.bf16 %v381_v59, %v380_v58 }
 0x143   :  { %v551_v2 = vpack.c.bf16 %v115_v62, %v114_v61  ;;  %570 = vmatprep.subr.bf16.mxu0 %v569_v27  ;;  %v200_v61 = vlaneseq }
 0x145   :  { %552 = vmatpush3.bf16.msra.mxu1 %v551_v2  ;;  %v201_v62 = vshrl.u32 %v200_v61, 7  ;;  %v284_v2 = vld [vmem:[%s877_s6] sm:$0x3] }
 0x146   :  { %554 = vmatprep.subr.bf16.mxu1 %v553_v63 }
 0x147   :  { %v202_v63 = vsub.s32 0, %v201_v62  ;;  %v206_v1 = vsub.s32 1, %v201_v62 }
 0x148   :  { %545 = vmatmul.mubr.msk.f32.vlgmr.msra.gmra.mrb[0].mxu1 %vm42_vm0, %v116_v5 }
 0x149   :  { %556 = vmatpush1.bf16.msra.mxu1 %v555_v6  ;;  %277 = vmatprep.mubr.f32.mxu1 %v639_v29  ;;  %v371_v29 = vld [vmem:[%s879_s8 + $0x28] sm:$0xff]  ;;  %v203_v3 = vrot.slane %v198_v0, %v202_v63  ;;  %v207_v5 = vrot.slane %v198_v0, %v206_v1  ;;  %v289_v6 = vrot.slane %v284_v2, %v202_v63  ;;  %s483_s8 = sshll.u32 %s640_s7, 4  ;;  %s484_s8 = int_to_ptr.vmem [resolvable:$true] %s483_s8 }
 0x14a   :  { %558 = vmatprep.subr.bf16.mxu1 %v557_v7  ;;  %v571_v32 = vpack.c.bf16 %v371_v29, %v370_v28  ;;  %v293_v8 = vrot.slane %v284_v2, %v206_v1  ;;  %v307_v13 = vrot.slane %v298_v4, %v206_v1  ;;  %s613_s15 = scalar_lea.vmem %s484_s8, 32  ;;  %p618_p1 = scmp.lt.s32.totalorder %s484_s8, %s484_s8 }
 0x14b   :  { %p614_p0 = scmp.ne.s32.totalorder %s484_s8, %s613_s15  ;;  %p619_p2 = scmp.lt.s32.totalorder %s613_s15, %s613_s15 }
 0x14c   :  { %572 = vmatpush3.bf16.msra.mxu0 %v571_v32 }
 0x14d   :  { %560 = vmatpush1.bf16.msra.mxu1 %v559_v10  ;;  %574 = vmatprep.subr.bf16.mxu0 %v573_v33  ;;  %v303_v10 = vrot.slane %v298_v4, %v202_v63  ;;  %p620_p3 = por %p619_p2, %p618_p1 }
 0x14f   :  { %p621_p4 = pnand %p620_p3, %p614_p0 }
 0x150   :  { %576 = vmatpush3.bf16.msra.mxu0 %v575_v38 }
 0x151   :  { %578 = vmatprep.subr.bf16.mxu0 %v577_v39 }
 0x154   :  { %580 = vmatpush3.bf16.msra.mxu0 %v579_v44 }
 0x155   :  { %582 = vmatprep.subr.bf16.mxu0 %v581_v45 }
 0x158   :  { %584 = vmatpush3.bf16.msra.mxu0 %v583_v50 }
 0x159   :  { %586 = vmatprep.subr.bf16.mxu0 %v585_v51 }
 0x15c   :  { %588 = vmatpush3.bf16.msra.mxu0 %v587_v56 }
 0x15d   :  { %590 = vmatprep.subr.bf16.mxu0 %v589_v57 }
 0x160   :  { %592 = vmatpush3.bf16.msra.mxu0 %v591_v60 }
 0x21b   :  { %v186_v11 = vpop.f32.mrb[0].mxu1 }
 0x21c   :  { %v546_v12 = vpop.f32.mrb[1].mxu1  ;;  %494 = vmatmul.mubr.msk.f32.vlgmr.msra.gmra.mrb[2].mxu1 %vm42_vm0, %v186_v11 }
 0x2ef   :  { %v279_v7 = vpop.f32.mrb[2].mxu1 }
 0x2f0   :  { %v280_v9 = vadd.f32 %v279_v7, %v203_v3  ;;  %v281_v11 = vpop.f32.mrb[3].mxu1 }
 0x2f1   :  { %v282_v12 = vadd.f32 %v281_v11, %v207_v5  ;;  %v495_v5 = vld [vmem:[%s880_s9] ss:$0 sm:$0xff] }
 0x2f2   :  { %v296_v14 = vmul.f32 %v289_v6, %v280_v9 }
 0x2f3   :  { %v297_v15 = vmul.f32 %v293_v8, %v282_v12 }
 0x2f4   :  { %v310_v16 = vadd.f32 %v303_v10, %v296_v14 }
 0x2f5   :  { %v311_v17 = vadd.f32 %v307_v13, %v297_v15 }
 0x2f6   :  { %v312_v18 = vmul.f32 0.70710677, %v310_v16  ;;  %v360_v1 = vmul.f32 0.5, %v310_v16 }
 0x2f7   :  { %v313_v19 = vmul.f32 0.70710677, %v311_v17  ;;  %v361_v63 = vmul.f32 0.5, %v311_v17 }
 0x2f8   :  { %v314_v20 = vand.u32 2147483647, %v312_v18  ;;  %vm354_vm2 = vcmp.lt.f32.partialorder %v312_v18, 0.0 }
 0x2f9   :  { %v315_v21 = vand.u32 2147483647, %v313_v19  ;;  %vm355_vm3 = vcmp.lt.f32.partialorder %v313_v19, 0.0 }
 0x2fa   :  { %v316_v22 = vmul.f32 0.3275911, %v314_v20  ;;  %v342_v26 = vsub.f32 0.0, %v314_v20 }
 0x2fb   :  { %v317_v23 = vmul.f32 0.3275911, %v315_v21  ;;  %v343_v27 = vsub.f32 0.0, %v315_v21 }
 0x2fc   :  { %v318_v24 = vadd.f32 1.0, %v316_v22  ;;  %v344_v29 = vmul.f32 %v342_v26, %v314_v20 }
 0x2fd   :  { %v319_v25 = vadd.f32 1.0, %v317_v23  ;;  %v345_v31 = vmul.f32 %v343_v27, %v315_v21 }
 0x2fe   :  { %605 = vrcp.f32 %v318_v24  ;;  %v346_v35 = vmul.f32 1.442695, %v344_v29 }
 0x2ff   :  { %607 = vrcp.f32 %v319_v25  ;;  %v348_v37 = vmul.f32 1.442695, %v345_v31 }
 0x300   :  { %609 = vpow2.f32 %v346_v35 }
 0x301   :  { %611 = vpow2.f32 %v348_v37 }
 0x308   :  { %v606_v28 = vpop.eup %605 }
 0x309   :  { %v608_v30 = vpop.eup %607  ;;  %v324_v32 = vmul.f32 1.0614054, %v606_v28 }
 0x30a   :  { %v325_v33 = vmul.f32 1.0614054, %v608_v30  ;;  %v610_v51 = vpop.eup %609 }
 0x30b   :  { %v326_v34 = vadd.f32 -1.4531521, %v324_v32  ;;  %v612_v53 = vpop.eup %611 }
 0x30c   :  { %v327_v36 = vadd.f32 -1.4531521, %v325_v33 }
 0x30d   :  { %v328_v38 = vmul.f32 %v606_v28, %v326_v34 }
 0x30e   :  { %v329_v39 = vmul.f32 %v608_v30, %v327_v36 }
 0x30f   :  { %v330_v40 = vadd.f32 1.4214138, %v328_v38 }
 0x310   :  { %v331_v41 = vadd.f32 1.4214138, %v329_v39 }
 0x311   :  { %v332_v42 = vmul.f32 %v606_v28, %v330_v40 }
 0x312   :  { %v333_v43 = vmul.f32 %v608_v30, %v331_v41 }
 0x313   :  { %v334_v44 = vadd.f32 -0.28449672, %v332_v42 }
 0x314   :  { %v335_v45 = vadd.f32 -0.28449672, %v333_v43 }
 0x315   :  { %v336_v46 = vmul.f32 %v606_v28, %v334_v44 }
 0x316   :  { %v337_v47 = vmul.f32 %v608_v30, %v335_v45 }
 0x317   :  { %v338_v48 = vadd.f32 0.2548296, %v336_v46 }
 0x318   :  { %v339_v49 = vadd.f32 0.2548296, %v337_v47 }
 0x319   :  { %v340_v50 = vmul.f32 %v606_v28, %v338_v48 }
 0x31a   :  { %v341_v52 = vmul.f32 %v608_v30, %v339_v49 }
 0x31b   :  { %v350_v54 = vmul.f32 %v610_v51, %v340_v50 }
 0x31c   :  { %v351_v55 = vmul.f32 %v612_v53, %v341_v52 }
 0x31d   :  { %v352_v56 = vsub.f32 1.0, %v350_v54 }
 0x31e   :  { %v353_v57 = vsub.f32 1.0, %v351_v55 }
 0x31f   :  { %v356_v58 = vsub.f32 0.0, %v352_v56 }
 0x320   :  { %v357_v59 = vsub.f32 0.0, %v353_v57 }
 0x321   :  { %v358_v60 = vsel %vm354_vm2, %v356_v58, %v352_v56 }
 0x322   :  { %v359_v61 = vsel %vm355_vm3, %v357_v59, %v353_v57  ;;  %v362_v62 = vadd.f32 1.0, %v358_v60 }
 0x323   :  { %v363_v0 = vadd.f32 1.0, %v359_v61 }
 0x324   :  { %v364_v3 = vmul.f32 %v362_v62, %v360_v1 }
 0x325   :  { %v365_v2 = vmul.f32 %v363_v0, %v361_v63 }
 0x327   :  { %469 = vmatprep.mubr.f32.mxu0 %v365_v2 }
 0x328   :  { %470 = vmatmul.mubr.f32.vlgmr.msra.gmra.mrb[0].mxu0 %v364_v3 }
 0x3fb   :  { %v533_v4 = vpop.f32.mrb[0].mxu0 }
 0x3fc   :  { %v534_v6 = vpop.f32.mrb[1].mxu0 }
 0x3fd   :  { %v535_v7 = vadd.f32 %v534_v6, %v533_v4 }
 0x3ff   :  { %v472_v8 = vadd.f32 %v535_v7, %v495_v5 }
 0x401   :  { %476 = vst.msk [vmem:[#allocation2] sm:$0x3] %vm475_vm4, %v472_v8 }
 0x402   :  { %624 = shalt.err (!%p621_p4)
}
 0x403   :  { %s625_s18 = scalar_lea.hbm %s881_s10, 32 }
 0x404   :  { %p626_p5 = scmp.ne.s32.totalorder %s881_s10, %s625_s18  ;;  %p629_p6 = scmp.lt.u32.totalorder %s625_s18, %s881_s10 }
 0x406   :  { %p631_p7 = pnand %p629_p6, %p626_p5 }
 0x408   :  { %634 = shalt.err (!%p631_p7)
}
 0x409   :  { %486 = dma.vmem_to_hbm [thread:$0]  %s484_s8, 32, %s881_s10, [#allocation3]  }
 0x40a   :  { %635 = dma.done.wait [#allocation3], 32  }
 0x40b   :  { %636 = vsyncadd [#allocation3], 4294967264 }
 0x40c   :  { %490 = vsyncpa [#allocation3], 1 }

// kernel: _lambda_.13
= control target key start
LH: loop header
LB: loop body
LE: loop exit
PB: predicated region body
PF: predicated region fallthrough
CT: control target
= control target key end

     0   :  { %vm53_vm0 = vcmask 261120   ;;  %vm253_vm1 = vcmask 64512   ;;  %s3130_s16 = smov 96   ;;  %vm430_vm3 = vcmask 130048   ;;  %s3131_s20 = smov 64   ;;  %vm1905_vm4 = vcmask 195584   ;;  %s3667_s0 = inlined_call_operand.vmem [shape: f32[32,32], index: 0, kind: input, shape index: {}]   ;;  %s3668_s3 = inlined_call_operand.vmem [shape: f32[32,96], index: 3, kind: input, shape index: {}]   ;;  %s3669_s1 = inlined_call_operand.vmem [shape: f32[1,32], index: 1, kind: input, shape index: {}, may-alias: {1,8}]   ;;  %s3670_s2 = inlined_call_operand.vmem [shape: f32[1,32], index: 2, kind: input, shape index: {}, may-alias: {2,6,9,13}]   ;;  %s3671_s4 = inlined_call_operand.vmem [shape: f32[1,96], index: 4, kind: input, shape index: {}]   ;;  %s3672_s7 = inlined_call_operand.vmem [shape: f32[4,16,16], index: 7, kind: input, shape index: {}]   ;;  %s3673_s5 = inlined_call_operand.vmem [shape: f32[32,32], index: 5, kind: input, shape index: {}]   ;;  %s3674_s6 = inlined_call_operand.vmem [shape: f32[1,32], index: 6, kind: input, shape index: {}, may-alias: {2,6,9,13}]   ;;  %s3675_s10 = inlined_call_operand.vmem [shape: f32[32,128], index: 10, kind: input, shape index: {}]   ;;  %s3676_s8 = inlined_call_operand.vmem [shape: f32[1,32], index: 8, kind: input, shape index: {}, may-alias: {1,8}]   ;;  %s3677_s9 = inlined_call_operand.vmem [shape: f32[1,32], index: 9, kind: input, shape index: {}, may-alias: {2,6,9,13}]   ;;  %s3678_s12 = inlined_call_operand.vmem [shape: f32[128,32], index: 12, kind: input, shape index: {}]   ;;  %s3679_s11 = inlined_call_operand.vmem [shape: f32[1,128], index: 11, kind: input, shape index: {}]   ;;  %s3680_s13 = inlined_call_operand.vmem [shape: f32[1,32], index: 13, kind: input, shape index: {}, may-alias: {2,6,9,13}]   ;;  %s3681_s14 = inlined_call_operand.vmem [shape: f32[32,32], index: 14, kind: output, shape index: {}]  }
   0x1   :  { %v47_v0 = vld [vmem:[%s3667_s0] sm:$0xff]  ;;  %v49_v1 = vld [vmem:[%s3667_s0 + $0x10] sm:$0xff]  ;;  %v48_v2 = vld [vmem:[%s3667_s0 + $0x8] sm:$0xff]  ;;  %s3132_s21 = smov 88   ;;  %s3133_s22 = smov 120  }
   0x2   :  { %v54_v3 = vsel %vm53_vm0, %v47_v0, 0.0  ;;  %v60_v4 = vsel %vm53_vm0, %v49_v1, 0.0  ;;  %v50_v5 = vld [vmem:[%s3667_s0 + $0x18] sm:$0xff]  ;;  %v57_v6 = vsel %vm53_vm0, %v48_v2, 0.0  ;;  %v127_v28 = vld [vmem:[%s3668_s3] sm:$0xff]  ;;  %v128_v29 = vld [vmem:[%s3668_s3 + $0x8] sm:$0xff] }
   0x3   :  { %55 = vadd.xlane.f32.xlu0 %v54_v3  ;;  %61 = vadd.xlane.f32.xlu1 %v60_v4  ;;  %v63_v7 = vsel %vm53_vm0, %v50_v5, 0.0  ;;  %v129_v30 = vld [vmem:[%s3668_s3 + $0x10] sm:$0xff]  ;;  %v2800_v31 = vpack.c.bf16 %v128_v29, %v127_v28  ;;  %v130_v32 = vld [vmem:[%s3668_s3 + $0x18] sm:$0xff]  ;;  %v2432_v47 = vld [vmem:[%s3669_s1] ss:$0 sm:$0xff]  ;;  %s3134_s27 = smov 56  }
   0x4   :  { %v2804_v33 = vpack.c.bf16 %v130_v32, %v129_v30  ;;  %v2433_v49 = vld [vmem:[%s3670_s2] ss:$0 sm:$0xff]  ;;  %vm3276_vm2 = vmpackc.low %vm253_vm1, %vm253_vm1  ;;  %s3135_s28 = smov 80   ;;  %s3136_s3 = smov 112  }
   0x5   :  { %2801 = vmatprep.subr.bf16.mxu1 %v2800_v31  ;;  %s3137_s2 = smov 48   ;;  %s3143_s30 = smov 24  }
   0x6   :  { %2803 = vmatpush3.bf16.msra.mxu1 %v2800_v31 }
   0x7   :  { %58 = vadd.xlane.f32.xlu0 %v57_v6  ;;  %64 = vadd.xlane.f32.xlu1 %v63_v7 }
   0x8   :  { %2805 = vmatprep.subr.bf16.mxu1 %v2804_v33 }
   0xa   :  { %2807 = vmatpush3.bf16.msra.mxu1 %v2804_v33 }
  0x90   :  { %v56_v8 = vpop.xlane.xlu0 %55  ;;  %v62_v9 = vpop.xlane.xlu1 %61 }
  0x91   :  { %v67_v10 = vmul.f32 0.03125, %v56_v8  ;;  %v69_v11 = vmul.f32 0.03125, %v62_v9 }
  0x93   :  { %v71_v12 = vsub.f32 %v47_v0, %v67_v10  ;;  %v73_v13 = vsub.f32 %v49_v1, %v69_v11  ;;  %v2434_v0 = vld [vmem:[%s3671_s4] ss:$0 sm:$0xff]  ;;  %s3139_s4 = smov 104  }
  0x94   :  { %v59_v14 = vpop.xlane.xlu0 %58  ;;  %v65_v15 = vpop.xlane.xlu1 %64 }
  0x95   :  { %v68_v16 = vmul.f32 0.03125, %v59_v14  ;;  %v70_v17 = vmul.f32 0.03125, %v65_v15  ;;  %v75_v18 = vmul.f32 %v71_v12, %v71_v12  ;;  %v77_v19 = vmul.f32 %v73_v13, %v73_v13 }
  0x97   :  { %v72_v20 = vsub.f32 %v48_v2, %v68_v16  ;;  %v74_v21 = vsub.f32 %v50_v5, %v70_v17  ;;  %v79_v22 = vsel %vm53_vm0, %v75_v18, 0.0  ;;  %v85_v23 = vsel %vm53_vm0, %v77_v19, 0.0 }
  0x98   :  { %80 = vadd.xlane.f32.xlu0 %v79_v22 }
  0x99   :  { %v76_v24 = vmul.f32 %v72_v20, %v72_v20  ;;  %v78_v25 = vmul.f32 %v74_v21, %v74_v21 }
  0x9b   :  { %v82_v26 = vsel %vm53_vm0, %v76_v24, 0.0  ;;  %v88_v27 = vsel %vm53_vm0, %v78_v25, 0.0  ;;  %v236_v24 = vld [vmem:[%s3672_s7 + $0x8] sm:$0xff]  ;;  %v235_v25 = vld [vmem:[%s3672_s7] sm:$0xff] }
  0x9c   :  { %86 = vadd.xlane.f32.xlu0 %v85_v23  ;;  %83 = vadd.xlane.f32.xlu1 %v82_v26 }
  0xa0   :  { %89 = vadd.xlane.f32.xlu1 %v88_v27 }
 0x125   :  { %v81_v34 = vpop.xlane.xlu0 %80 }
 0x126   :  { %v91_v35 = vmul.f32 0.03125, %v81_v34 }
 0x128   :  { %v95_v36 = vadd.f32 1e-05, %v91_v35 }
 0x129   :  { %v84_v37 = vpop.xlane.xlu1 %83  ;;  %v87_v38 = vpop.xlane.xlu0 %86 }
 0x12a   :  { %3030 = vrsqrt.f32 %v95_v36  ;;  %v92_v39 = vmul.f32 0.03125, %v84_v37  ;;  %v93_v40 = vmul.f32 0.03125, %v87_v38 }
 0x12c   :  { %v96_v41 = vadd.f32 1e-05, %v92_v39  ;;  %v97_v42 = vadd.f32 1e-05, %v93_v40 }
 0x12d   :  { %v90_v43 = vpop.xlane.xlu1 %89 }
 0x12e   :  { %3032 = vrsqrt.f32 %v96_v41  ;;  %v94_v44 = vmul.f32 0.03125, %v90_v43 }
 0x12f   :  { %3034 = vrsqrt.f32 %v97_v42 }
 0x130   :  { %v98_v45 = vadd.f32 1e-05, %v94_v44 }
 0x132   :  { %3036 = vrsqrt.f32 %v98_v45 }
 0x134   :  { %v3031_v46 = vpop.eup %3030 }
 0x135   :  { %v103_v48 = vmul.f32 %v3031_v46, %v71_v12 }
 0x137   :  { %v113_v50 = vmul.f32 %v2432_v47, %v103_v48 }
 0x138   :  { %v3033_v51 = vpop.eup %3032 }
 0x139   :  { %v3035_v52 = vpop.eup %3034  ;;  %v123_v53 = vadd.f32 %v2433_v49, %v113_v50  ;;  %v104_v54 = vmul.f32 %v3033_v51, %v72_v20 }
 0x13a   :  { %v105_v55 = vmul.f32 %v3035_v52, %v73_v13 }
 0x13b   :  { %2616 = vmatprep.mubr.msk.f32.mxu1 %vm53_vm0, %v123_v53  ;;  %v114_v56 = vmul.f32 %v2432_v47, %v104_v54 }
 0x13c   :  { %v3037_v57 = vpop.eup %3036  ;;  %v115_v58 = vmul.f32 %v2432_v47, %v105_v55 }
 0x13d   :  { %v124_v59 = vadd.f32 %v2433_v49, %v114_v56  ;;  %v106_v60 = vmul.f32 %v3037_v57, %v74_v21 }
 0x13e   :  { %v125_v61 = vadd.f32 %v2433_v49, %v115_v58 }
 0x13f   :  { %2617 = vmatmul.mubr.msk.f32.vlgmr.msra.gmra.mrb[0].mxu1 %vm53_vm0, %v124_v59  ;;  %v116_v62 = vmul.f32 %v2432_v47, %v106_v60 }
 0x140   :  { %2619 = vmatprep.mubr.msk.f32.mxu1 %vm53_vm0, %v125_v61 }
 0x141   :  { %v126_v63 = vadd.f32 %v2433_v49, %v116_v62 }
 0x143   :  { %2620 = vmatmul.mubr.msk.f32.gmra.mrb[2].mxu1 %vm53_vm0, %v126_v63 }
 0x212   :  { %v2618_v1 = vpop.f32.mrb[0].mxu1 }
 0x213   :  { %v222_v2 = vadd.f32 %v2618_v1, %v2434_v0  ;;  %v216_v3 = vpop.f32.mrb[1].mxu1 }
 0x214   :  { %v217_v4 = vadd.f32 %v2434_v0, %v216_v3 }
 0x215   :  { %v3286_v21 = vmul.f32 0.35355338, %v222_v2 }
 0x216   :  { %v2621_v5 = vpop.f32.mrb[2].mxu1  ;;  %v3264_v6 = vpack.i.bf16 %v222_v2, %v217_v4  ;;  %v3266_v7 = vmul.f32 0.35355338, %v217_v4 }
 0x217   :  { %v232_v8 = vadd.f32 %v2621_v5, %v2434_v0  ;;  %v226_v9 = vpop.f32.mrb[3].mxu1 }
 0x218   :  { %v227_v10 = vadd.f32 %v2434_v0, %v226_v9  ;;  %2951 = vrot.lane.b32.xlu0 %v3264_v6, %s3130_s16  ;;  %2626 = vmatprep.mubr.msk.f32.mxu1 %vm253_vm1, %v3266_v7 }
 0x219   :  { %v3296_v23 = vmul.f32 0.35355338, %v232_v8 }
 0x21a   :  { %v3271_v11 = vpack.i.bf16 %v232_v8, %v227_v10  ;;  %v3288_v22 = vmul.f32 0.35355338, %v227_v10 }
 0x21c   :  { %2956 = vrot.lane.b32.xlu1 %v3271_v11, %s3130_s16  ;;  %s3138_s16 = smov 72  }
 0x28a   :  { %v2952_v12 = vpop.permute.xlu0 %2951 }
 0x28b   :  { %v2954_v13 = vunpack.i.h.bf16 %v2952_v12  ;;  %v2953_v14 = vunpack.i.l.bf16 %v2952_v12 }
 0x28d   :  { %v2808_v16 = vpack.c.bf16 %v2954_v13, %v2953_v14 }
 0x28e   :  { %v2957_v17 = vpop.permute.xlu1 %2956 }
 0x28f   :  { %v2959_v18 = vunpack.i.h.bf16 %v2957_v17  ;;  %v2958_v19 = vunpack.i.l.bf16 %v2957_v17  ;;  %2810 = vmatprep.subr.msk.bf16.mxu1 %vm3276_vm2, %v2808_v16 }
 0x290   :  { %2813 = vmatpush3.bf16.xpose.msk.msra.mxu1 %vm3276_vm2, %v2808_v16 }
 0x291   :  { %v2814_v20 = vpack.c.bf16 %v2959_v18, %v2958_v19 }
 0x293   :  { %2816 = vmatprep.subr.msk.bf16.mxu1 %vm3276_vm2, %v2814_v20 }
 0x297   :  { %2627 = vmatmul.mubr.msk.f32.vlgmr.msra.gmra.mrb[4].mxu1 %vm253_vm1, %v3286_v21 }
 0x298   :  { %2819 = vmatpush3.bf16.xpose.msk.msra.mxu1 %vm3276_vm2, %v2814_v20  ;;  %2633 = vmatprep.mubr.msk.f32.mxu1 %vm253_vm1, %v3288_v22 }
 0x29f   :  { %2634 = vmatmul.mubr.msk.f32.vlgmr.msra.gmra.mrb[6].mxu1 %vm253_vm1, %v3296_v23 }
 0x36a   :  { %v2628_v26 = vpop.f32.mrb[4].mxu1 }
 0x36b   :  { %v336_v27 = vadd.f32 %v2628_v26, %v236_v24  ;;  %v330_v28 = vpop.f32.mrb[5].mxu1 }
 0x36c   :  { %v331_v29 = vadd.f32 %v330_v28, %v235_v25 }
 0x36d   :  { %v434_v30 = vsel %vm430_vm3, %v336_v27, -inf }
 0x36e   :  { %435 = vmax.xlane.f32.xlu0 %v434_v30  ;;  %v431_v31 = vsel %vm430_vm3, %v331_v29, -inf }
 0x36f   :  { %432 = vmax.xlane.f32.xlu1 %v431_v31 }
 0x372   :  { %v2635_v32 = vpop.f32.mrb[6].mxu1 }
 0x373   :  { %v427_v33 = vadd.f32 %v2635_v32, %v236_v24  ;;  %v421_v34 = vpop.f32.mrb[7].mxu1 }
 0x374   :  { %v422_v35 = vadd.f32 %v421_v34, %v235_v25 }
 0x375   :  { %v440_v36 = vsel %vm430_vm3, %v427_v33, -inf }
 0x376   :  { %441 = vmax.xlane.f32.xlu1 %v440_v36  ;;  %v437_v37 = vsel %vm430_vm3, %v422_v35, -inf  ;;  %v237_v36 = vld [vmem:[%s3672_s7 + $0x10] sm:$0xff] }
 0x377   :  { %438 = vmax.xlane.f32.xlu0 %v437_v37 }
 0x3fb   :  { %v436_v38 = vpop.xlane.xlu0 %435 }
 0x3fc   :  { %v444_v39 = vsub.f32 %v336_v27, %v436_v38  ;;  %v433_v40 = vpop.xlane.xlu1 %432 }
 0x3fd   :  { %v443_v41 = vsub.f32 %v331_v29, %v433_v40 }
 0x3fe   :  { %v449_v42 = vmul.f32 1.442695, %v444_v39 }
 0x3ff   :  { %v447_v43 = vmul.f32 1.442695, %v443_v41 }
 0x400   :  { %3038 = vpow2.f32 %v449_v42 }
 0x401   :  { %3040 = vpow2.f32 %v447_v43 }
 0x403   :  { %v442_v50 = vpop.xlane.xlu1 %441 }
 0x404   :  { %v439_v48 = vpop.xlane.xlu0 %438  ;;  %v446_v52 = vsub.f32 %v427_v33, %v442_v50 }
 0x405   :  { %v445_v49 = vsub.f32 %v422_v35, %v439_v48  ;;  %v238_v35 = vld [vmem:[%s3672_s7 + $0x18] sm:$0xff] }
 0x406   :  { %v453_v53 = vmul.f32 1.442695, %v446_v52 }
 0x407   :  { %v451_v51 = vmul.f32 1.442695, %v445_v49 }
 0x409   :  { %3042 = vpow2.f32 %v451_v51 }
 0x40a   :  { %v3039_v44 = vpop.eup %3038  ;;  %3044 = vpow2.f32 %v453_v53 }
 0x40b   :  { %v3041_v45 = vpop.eup %3040  ;;  %v458_v46 = vsel %vm430_vm3, %v3039_v44, 0.0 }
 0x40c   :  { %459 = vadd.xlane.f32.xlu1 %v458_v46  ;;  %v455_v47 = vsel %vm430_vm3, %v3041_v45, 0.0 }
 0x40d   :  { %456 = vadd.xlane.f32.xlu0 %v455_v47 }
 0x413   :  { %v3043_v54 = vpop.eup %3042 }
 0x414   :  { %v461_v55 = vsel %vm430_vm3, %v3043_v54, 0.0  ;;  %v3045_v56 = vpop.eup %3044 }
 0x415   :  { %v464_v57 = vsel %vm430_vm3, %v3045_v56, 0.0 }
 0x41d   :  { %2966 = vrot.lane.b32.xlu1 %v3271_v11, %s3131_s20 }
 0x421   :  { %2971 = vrot.lane.b32.xlu1 %v3264_v6, %s3132_s21 }
 0x423   :  { %2961 = vrot.lane.b32.xlu0 %v3264_v6, %s3131_s20 }
 0x425   :  { %2976 = vrot.lane.b32.xlu1 %v3271_v11, %s3132_s21  ;;  %s3141_s21 = smov 8  }
 0x442   :  { %462 = vadd.xlane.f32.xlu0 %v461_v55 }
 0x449   :  { %465 = vadd.xlane.f32.xlu1 %v464_v57 }
 0x458   :  { %649 = vrot.lane.b32.xlu0 %v3266_v7, %s3133_s22 }
 0x45a   :  { %651 = vrot.lane.b32.xlu1 %v3286_v21, %s3133_s22 }
 0x45c   :  { %740 = vrot.lane.b32.xlu0 %v3288_v22, %s3133_s22 }
 0x45e   :  { %742 = vrot.lane.b32.xlu1 %v3296_v23, %s3133_s22  ;;  %s3142_s22 = smov 16  }
 0x499   :  { %v460_v58 = vpop.xlane.xlu1 %459 }
 0x49a   :  { %3046 = vrcp.f32 %v460_v58  ;;  %v457_v59 = vpop.xlane.xlu0 %456 }
 0x49b   :  { %3048 = vrcp.f32 %v457_v59 }
 0x49d   :  { %v2967_v60 = vpop.permute.xlu1 %2966 }
 0x49e   :  { %v2962_v61 = vpop.permute.xlu0 %2961  ;;  %v2969_v62 = vunpack.i.h.bf16 %v2967_v60  ;;  %v2968_v63 = vunpack.i.l.bf16 %v2967_v60 }
 0x49f   :  { %v2964_v0 = vunpack.i.h.bf16 %v2962_v61  ;;  %v2963_v1 = vunpack.i.l.bf16 %v2962_v61 }
 0x4a0   :  { %v2824_v8 = vpack.c.bf16 %v2969_v62, %v2968_v63 }
 0x4a1   :  { %v2820_v2 = vpack.c.bf16 %v2964_v0, %v2963_v1  ;;  %v2972_v3 = vpop.permute.xlu1 %2971 }
 0x4a2   :  { %v2974_v4 = vunpack.i.h.bf16 %v2972_v3  ;;  %v2973_v5 = vunpack.i.l.bf16 %v2972_v3 }
 0x4a3   :  { %2821 = vmatprep.subr.bf16.mxu1 %v2820_v2 }
 0x4a4   :  { %v3047_v9 = vpop.eup %3046  ;;  %2823 = vmatpush3.bf16.msra.mxu1 %v2820_v2  ;;  %v2828_v10 = vpack.c.bf16 %v2974_v4, %v2973_v5 }
 0x4a5   :  { %v3049_v12 = vpop.eup %3048  ;;  %v2977_v13 = vpop.permute.xlu1 %2976  ;;  %2825 = vmatprep.subr.bf16.mxu1 %v2824_v8  ;;  %v470_v18 = vmul.f32 %v3047_v9, %v3039_v44 }
 0x4a6   :  { %v2979_v14 = vunpack.i.h.bf16 %v2977_v13  ;;  %v2978_v16 = vunpack.i.l.bf16 %v2977_v13  ;;  %2830 = vmatprep.subr.msk.bf16.mxu0 %vm3276_vm2, %v2828_v10  ;;  %v468_v17 = vmul.f32 %v3049_v12, %v3041_v45 }
 0x4a7   :  { %2833 = vmatpush3.bf16.xpose.msk.msra.mxu0 %vm3276_vm2, %v2828_v10 }
 0x4a8   :  { %v2834_v19 = vpack.c.bf16 %v2979_v14, %v2978_v16  ;;  %2640 = vmatprep.mubr.msk.f32.mxu1 %vm430_vm3, %v468_v17 }
 0x4a9   :  { %2641 = vmatmul.mubr.msk.f32.vlgmr.msra.gmra.mrb[8].mxu1 %vm430_vm3, %v470_v18 }
 0x4aa   :  { %2827 = vmatpush3.bf16.msra.mxu1 %v2824_v8 }
 0x4ab   :  { %2836 = vmatprep.subr.msk.bf16.mxu1 %vm3276_vm2, %v2834_v19 }
 0x4cf   :  { %v463_v20 = vpop.xlane.xlu0 %462 }
 0x4d0   :  { %3050 = vrcp.f32 %v463_v20 }
 0x4d3   :  { %v650_v24 = vpop.permute.xlu0 %649 }
 0x4d4   :  { %2654 = vmatprep.mubr.msk.f32.mxu0 %vm253_vm1, %v650_v24 }
 0x4d6   :  { %v466_v25 = vpop.xlane.xlu1 %465 }
 0x4d7   :  { %3052 = vrcp.f32 %v466_v25  ;;  %v741_v31 = vpop.permute.xlu0 %740 }
 0x4da   :  { %v3051_v26 = vpop.eup %3050  ;;  %v652_v27 = vpop.permute.xlu1 %651 }
 0x4db   :  { %2655 = vmatmul.mubr.msk.f32.vlgmr.msra.gmra.mrb[0].mxu0 %vm253_vm1, %v652_v27  ;;  %v472_v28 = vmul.f32 %v3051_v26, %v3043_v54 }
 0x4dd   :  { %2647 = vmatprep.mubr.msk.f32.mxu1 %vm430_vm3, %v472_v28 }
 0x4de   :  { %v743_v32 = vpop.permute.xlu1 %742 }
 0x4e1   :  { %v3053_v29 = vpop.eup %3052 }
 0x4e2   :  { %v474_v30 = vmul.f32 %v3053_v29, %v3045_v56 }
 0x4e4   :  { %2648 = vmatmul.mubr.msk.f32.vlgmr.msra.gmra.mrb[10].mxu1 %vm430_vm3, %v474_v30 }
 0x4e5   :  { %2839 = vmatpush3.bf16.xpose.msk.msra.mxu1 %vm3276_vm2, %v2834_v19  ;;  %2661 = vmatprep.mubr.msk.f32.mxu1 %vm253_vm1, %v741_v31 }
 0x4ec   :  { %2662 = vmatmul.mubr.msk.f32.vlgmr.msra.gmra.mrb[12].mxu1 %vm253_vm1, %v743_v32 }
 0x57c   :  { %v3338_v33 = vpop.f32.mrb[8].mxu1 }
 0x57d   :  { %v3340_v34 = vpop.f32.mrb[9].mxu1 }
 0x5ae   :  { %v2656_v37 = vpop.f32.mrb[0].mxu0 }
 0x5af   :  { %v737_v38 = vadd.f32 %v2656_v37, %v238_v35  ;;  %v731_v39 = vpop.f32.mrb[1].mxu0 }
 0x5b0   :  { %v732_v40 = vadd.f32 %v731_v39, %v237_v36 }
 0x5b1   :  { %v834_v41 = vsel %vm430_vm3, %v737_v38, -inf }
 0x5b2   :  { %835 = vmax.xlane.f32.xlu1 %v834_v41  ;;  %v831_v42 = vsel %vm430_vm3, %v732_v40, -inf }
 0x5b3   :  { %832 = vmax.xlane.f32.xlu0 %v831_v42 }
 0x5b7   :  { %v3350_v43 = vpop.f32.mrb[10].mxu1 }
 0x5b8   :  { %v3352_v44 = vpop.f32.mrb[11].mxu1 }
 0x5bf   :  { %v2663_v45 = vpop.f32.mrb[12].mxu1 }
 0x5c0   :  { %v822_v46 = vpop.f32.mrb[13].mxu1  ;;  %v828_v48 = vadd.f32 %v2663_v45, %v238_v35 }
 0x5c1   :  { %v823_v47 = vadd.f32 %v822_v46, %v237_v36 }
 0x5c2   :  { %v840_v50 = vsel %vm430_vm3, %v828_v48, -inf }
 0x5c3   :  { %v837_v49 = vsel %vm430_vm3, %v823_v47, -inf }
 0x5c4   :  { %838 = vmax.xlane.f32.xlu0 %v837_v49 }
 0x5c8   :  { %841 = vmax.xlane.f32.xlu0 %v840_v50 }
 0x63f   :  { %v836_v51 = vpop.xlane.xlu1 %835 }
 0x640   :  { %v844_v52 = vsub.f32 %v737_v38, %v836_v51  ;;  %v833_v53 = vpop.xlane.xlu0 %832 }
 0x641   :  { %v843_v54 = vsub.f32 %v732_v40, %v833_v53  ;;  %v239_v53 = vld [vmem:[%s3672_s7 + $0x20] sm:$0xff] }
 0x642   :  { %v849_v55 = vmul.f32 1.442695, %v844_v52  ;;  %v240_v52 = vld [vmem:[%s3672_s7 + $0x28] sm:$0xff] }
 0x643   :  { %v847_v56 = vmul.f32 1.442695, %v843_v54 }
 0x644   :  { %3054 = vpow2.f32 %v849_v55 }
 0x645   :  { %3056 = vpow2.f32 %v847_v56 }
 0x64e   :  { %v3055_v57 = vpop.eup %3054 }
 0x64f   :  { %v3057_v58 = vpop.eup %3056  ;;  %v858_v59 = vsel %vm430_vm3, %v3055_v57, 0.0 }
 0x650   :  { %859 = vadd.xlane.f32.xlu1 %v858_v59  ;;  %v855_v60 = vsel %vm430_vm3, %v3057_v58, 0.0 }
 0x651   :  { %856 = vadd.xlane.f32.xlu0 %v855_v60  ;;  %v839_v61 = vpop.xlane.xlu0 %838 }
 0x652   :  { %v845_v62 = vsub.f32 %v823_v47, %v839_v61 }
 0x654   :  { %v851_v63 = vmul.f32 1.442695, %v845_v62 }
 0x655   :  { %v842_v0 = vpop.xlane.xlu0 %841 }
 0x656   :  { %v846_v1 = vsub.f32 %v828_v48, %v842_v0  ;;  %3058 = vpow2.f32 %v851_v63 }
 0x658   :  { %v853_v2 = vmul.f32 1.442695, %v846_v1 }
 0x65a   :  { %3060 = vpow2.f32 %v853_v2 }
 0x660   :  { %v3059_v3 = vpop.eup %3058 }
 0x661   :  { %2986 = vrot.lane.b32.xlu1 %v3271_v11, %s3134_s27  ;;  %v861_v4 = vsel %vm430_vm3, %v3059_v3, 0.0 }
 0x664   :  { %v3061_v5 = vpop.eup %3060 }
 0x665   :  { %2991 = vrot.lane.b32.xlu1 %v3264_v6, %s3135_s28  ;;  %v864_v8 = vsel %vm430_vm3, %v3061_v5, 0.0 }
 0x667   :  { %2981 = vrot.lane.b32.xlu0 %v3264_v6, %s3134_s27 }
 0x669   :  { %2996 = vrot.lane.b32.xlu1 %v3271_v11, %s3135_s28 }
 0x686   :  { %862 = vadd.xlane.f32.xlu0 %v861_v4 }
 0x68d   :  { %865 = vadd.xlane.f32.xlu1 %v864_v8 }
 0x69c   :  { %1049 = vrot.lane.b32.xlu0 %v3266_v7, %s3136_s3 }
 0x69e   :  { %1051 = vrot.lane.b32.xlu1 %v3286_v21, %s3136_s3 }
 0x6a0   :  { %1140 = vrot.lane.b32.xlu0 %v3288_v22, %s3136_s3 }
 0x6a2   :  { %1142 = vrot.lane.b32.xlu1 %v3296_v23, %s3136_s3 }
 0x6dd   :  { %v860_v9 = vpop.xlane.xlu1 %859 }
 0x6de   :  { %3062 = vrcp.f32 %v860_v9  ;;  %v857_v10 = vpop.xlane.xlu0 %856 }
 0x6df   :  { %3064 = vrcp.f32 %v857_v10 }
 0x6e1   :  { %v2987_v12 = vpop.permute.xlu1 %2986 }
 0x6e2   :  { %v2989_v13 = vunpack.i.h.bf16 %v2987_v12  ;;  %v2988_v14 = vunpack.i.l.bf16 %v2987_v12  ;;  %v2982_v16 = vpop.permute.xlu0 %2981 }
 0x6e3   :  { %v2984_v17 = vunpack.i.h.bf16 %v2982_v16  ;;  %v2983_v18 = vunpack.i.l.bf16 %v2982_v16 }
 0x6e4   :  { %v2844_v19 = vpack.c.bf16 %v2989_v13, %v2988_v14 }
 0x6e5   :  { %v2840_v20 = vpack.c.bf16 %v2984_v17, %v2983_v18  ;;  %v2992_v24 = vpop.permute.xlu1 %2991 }
 0x6e6   :  { %v2994_v25 = vunpack.i.h.bf16 %v2992_v24  ;;  %v2993_v26 = vunpack.i.l.bf16 %v2992_v24  ;;  %2845 = vmatprep.subr.bf16.mxu1 %v2844_v19 }
 0x6e7   :  { %2841 = vmatprep.subr.bf16.mxu0 %v2840_v20  ;;  %2847 = vmatpush3.bf16.msra.mxu1 %v2844_v19 }
 0x6e8   :  { %v3063_v27 = vpop.eup %3062  ;;  %v2848_v28 = vpack.c.bf16 %v2994_v25, %v2993_v26  ;;  %2843 = vmatpush3.bf16.msra.mxu0 %v2840_v20 }
 0x6e9   :  { %v3065_v29 = vpop.eup %3064  ;;  %v2997_v30 = vpop.permute.xlu1 %2996  ;;  %v870_v36 = vmul.f32 %v3063_v27, %v3055_v57 }
 0x6ea   :  { %v2999_v31 = vunpack.i.h.bf16 %v2997_v30  ;;  %v2998_v32 = vunpack.i.l.bf16 %v2997_v30  ;;  %2850 = vmatprep.subr.msk.bf16.mxu0 %vm3276_vm2, %v2848_v28  ;;  %v868_v35 = vmul.f32 %v3065_v29, %v3057_v58 }
 0x6ec   :  { %v2854_v37 = vpack.c.bf16 %v2999_v31, %v2998_v32  ;;  %2668 = vmatprep.mubr.msk.f32.mxu0 %vm430_vm3, %v868_v35 }
 0x6ed   :  { %2669 = vmatmul.mubr.msk.f32.vlgmr.msra.gmra.mrb[2].mxu0 %vm430_vm3, %v870_v36 }
 0x6ee   :  { %2856 = vmatprep.subr.msk.bf16.mxu1 %vm3276_vm2, %v2854_v37 }
 0x6f1   :  { %2853 = vmatpush3.bf16.xpose.msk.msra.mxu0 %vm3276_vm2, %v2848_v28 }
 0x713   :  { %v863_v38 = vpop.xlane.xlu0 %862 }
 0x714   :  { %3066 = vrcp.f32 %v863_v38 }
 0x717   :  { %v1050_v39 = vpop.permute.xlu0 %1049 }
 0x718   :  { %2682 = vmatprep.mubr.msk.f32.mxu0 %vm253_vm1, %v1050_v39 }
 0x71a   :  { %v866_v40 = vpop.xlane.xlu1 %865 }
 0x71b   :  { %3068 = vrcp.f32 %v866_v40  ;;  %v1141_v48 = vpop.permute.xlu0 %1140 }
 0x71e   :  { %v3067_v41 = vpop.eup %3066  ;;  %v1052_v42 = vpop.permute.xlu1 %1051 }
 0x71f   :  { %2683 = vmatmul.mubr.msk.f32.vlgmr.msra.gmra.mrb[4].mxu0 %vm253_vm1, %v1052_v42  ;;  %v872_v45 = vmul.f32 %v3067_v41, %v3059_v3 }
 0x721   :  { %2675 = vmatprep.mubr.msk.f32.mxu1 %vm430_vm3, %v872_v45 }
 0x722   :  { %v1143_v49 = vpop.permute.xlu1 %1142 }
 0x725   :  { %v3069_v46 = vpop.eup %3068 }
 0x726   :  { %v874_v47 = vmul.f32 %v3069_v46, %v3061_v5 }
 0x728   :  { %2676 = vmatmul.mubr.msk.f32.vlgmr.msra.gmra.mrb[14].mxu1 %vm430_vm3, %v874_v47 }
 0x729   :  { %2859 = vmatpush3.bf16.xpose.msk.msra.mxu1 %vm3276_vm2, %v2854_v37  ;;  %2689 = vmatprep.mubr.msk.f32.mxu1 %vm253_vm1, %v1141_v48 }
 0x730   :  { %2690 = vmatmul.mubr.msk.f32.vlgmr.msra.gmra.mrb[16].mxu1 %vm253_vm1, %v1143_v49 }
 0x7c0   :  { %v3384_v50 = vpop.f32.mrb[2].mxu0 }
 0x7c1   :  { %v3386_v51 = vpop.f32.mrb[3].mxu0 }
 0x7f2   :  { %v2684_v54 = vpop.f32.mrb[4].mxu0 }
 0x7f3   :  { %v1137_v55 = vadd.f32 %v2684_v54, %v240_v52  ;;  %v1131_v56 = vpop.f32.mrb[5].mxu0 }
 0x7f4   :  { %v1132_v57 = vadd.f32 %v1131_v56, %v239_v53 }
 0x7f5   :  { %v1234_v58 = vsel %vm430_vm3, %v1137_v55, -inf }
 0x7f6   :  { %1235 = vmax.xlane.f32.xlu1 %v1234_v58  ;;  %v1231_v59 = vsel %vm430_vm3, %v1132_v57, -inf }
 0x7f7   :  { %1232 = vmax.xlane.f32.xlu0 %v1231_v59 }
 0x7fb   :  { %v3396_v60 = vpop.f32.mrb[14].mxu1 }
 0x7fc   :  { %v3398_v61 = vpop.f32.mrb[15].mxu1 }
 0x803   :  { %v2691_v62 = vpop.f32.mrb[16].mxu1 }
 0x804   :  { %v1222_v63 = vpop.f32.mrb[17].mxu1  ;;  %v1228_v1 = vadd.f32 %v2691_v62, %v240_v52 }
 0x805   :  { %v1223_v0 = vadd.f32 %v1222_v63, %v239_v53 }
 0x806   :  { %v1240_v3 = vsel %vm430_vm3, %v1228_v1, -inf }
 0x807   :  { %v1237_v2 = vsel %vm430_vm3, %v1223_v0, -inf }
 0x808   :  { %1238 = vmax.xlane.f32.xlu0 %v1237_v2 }
 0x80c   :  { %1241 = vmax.xlane.f32.xlu0 %v1240_v3 }
 0x883   :  { %v1236_v4 = vpop.xlane.xlu1 %1235 }
 0x884   :  { %v1244_v5 = vsub.f32 %v1137_v55, %v1236_v4  ;;  %v1233_v8 = vpop.xlane.xlu0 %1232 }
 0x885   :  { %v1243_v9 = vsub.f32 %v1132_v57, %v1233_v8  ;;  %v241_v8 = vld [vmem:[%s3672_s7 + $0x30] sm:$0xff] }
 0x886   :  { %v1249_v10 = vmul.f32 1.442695, %v1244_v5  ;;  %v242_v5 = vld [vmem:[%s3672_s7 + $0x38] sm:$0xff]  ;;  %s3140_s7 = smov 40  }
 0x887   :  { %v1247_v12 = vmul.f32 1.442695, %v1243_v9 }
 0x888   :  { %3070 = vpow2.f32 %v1249_v10 }
 0x889   :  { %3072 = vpow2.f32 %v1247_v12 }
 0x892   :  { %v3071_v13 = vpop.eup %3070 }
 0x893   :  { %v3073_v14 = vpop.eup %3072  ;;  %v1258_v16 = vsel %vm430_vm3, %v3071_v13, 0.0 }
 0x894   :  { %1259 = vadd.xlane.f32.xlu1 %v1258_v16  ;;  %v1255_v17 = vsel %vm430_vm3, %v3073_v14, 0.0 }
 0x895   :  { %1256 = vadd.xlane.f32.xlu0 %v1255_v17  ;;  %v1239_v18 = vpop.xlane.xlu0 %1238 }
 0x896   :  { %v1245_v19 = vsub.f32 %v1223_v0, %v1239_v18 }
 0x898   :  { %v1251_v20 = vmul.f32 1.442695, %v1245_v19 }
 0x899   :  { %v1242_v24 = vpop.xlane.xlu0 %1241 }
 0x89a   :  { %v1246_v25 = vsub.f32 %v1228_v1, %v1242_v24  ;;  %3074 = vpow2.f32 %v1251_v20 }
 0x89c   :  { %v1253_v26 = vmul.f32 1.442695, %v1246_v25 }
 0x89e   :  { %3076 = vpow2.f32 %v1253_v26 }
 0x8a4   :  { %v3075_v27 = vpop.eup %3074 }
 0x8a5   :  { %3006 = vrot.lane.b32.xlu1 %v3271_v11, %s3137_s2  ;;  %v1261_v28 = vsel %vm430_vm3, %v3075_v27, 0.0 }
 0x8a8   :  { %v3077_v29 = vpop.eup %3076 }
 0x8a9   :  { %3011 = vrot.lane.b32.xlu1 %v3264_v6, %s3138_s16  ;;  %v1264_v30 = vsel %vm430_vm3, %v3077_v29, 0.0 }
 0x8ab   :  { %3001 = vrot.lane.b32.xlu0 %v3264_v6, %s3137_s2 }
 0x8ad   :  { %3016 = vrot.lane.b32.xlu1 %v3271_v11, %s3138_s16 }
 0x8ca   :  { %1262 = vadd.xlane.f32.xlu0 %v1261_v28 }
 0x8d1   :  { %1265 = vadd.xlane.f32.xlu1 %v1264_v30 }
 0x8e0   :  { %1449 = vrot.lane.b32.xlu0 %v3266_v7, %s3139_s4 }
 0x8e2   :  { %1451 = vrot.lane.b32.xlu1 %v3286_v21, %s3139_s4 }
 0x8e4   :  { %1540 = vrot.lane.b32.xlu0 %v3288_v22, %s3139_s4 }
 0x8e6   :  { %1542 = vrot.lane.b32.xlu1 %v3296_v23, %s3139_s4 }
 0x921   :  { %v1260_v31 = vpop.xlane.xlu1 %1259 }
 0x922   :  { %3078 = vrcp.f32 %v1260_v31  ;;  %v1257_v32 = vpop.xlane.xlu0 %1256 }
 0x923   :  { %3080 = vrcp.f32 %v1257_v32 }
 0x925   :  { %v3007_v35 = vpop.permute.xlu1 %3006 }
 0x926   :  { %v3009_v36 = vunpack.i.h.bf16 %v3007_v35  ;;  %v3008_v37 = vunpack.i.l.bf16 %v3007_v35  ;;  %v3002_v38 = vpop.permute.xlu0 %3001 }
 0x927   :  { %v3004_v39 = vunpack.i.h.bf16 %v3002_v38  ;;  %v3003_v40 = vunpack.i.l.bf16 %v3002_v38 }
 0x928   :  { %v2864_v41 = vpack.c.bf16 %v3009_v36, %v3008_v37 }
 0x929   :  { %v2860_v42 = vpack.c.bf16 %v3004_v39, %v3003_v40  ;;  %v3012_v45 = vpop.permute.xlu1 %3011 }
 0x92a   :  { %v3014_v7 = vunpack.i.h.bf16 %v3012_v45  ;;  %v3013_v46 = vunpack.i.l.bf16 %v3012_v45  ;;  %2865 = vmatprep.subr.bf16.mxu1 %v2864_v41 }
 0x92b   :  { %2861 = vmatprep.subr.bf16.mxu0 %v2860_v42  ;;  %2867 = vmatpush3.bf16.msra.mxu1 %v2864_v41 }
 0x92c   :  { %v3079_v21 = vpop.eup %3078  ;;  %v2868_v22 = vpack.c.bf16 %v3014_v7, %v3013_v46  ;;  %2863 = vmatpush3.bf16.msra.mxu0 %v2860_v42 }
 0x92d   :  { %v3081_v23 = vpop.eup %3080  ;;  %v3017_v47 = vpop.permute.xlu1 %3016  ;;  %v1270_v53 = vmul.f32 %v3079_v21, %v3071_v13 }
 0x92e   :  { %v3019_v48 = vunpack.i.h.bf16 %v3017_v47  ;;  %v3018_v49 = vunpack.i.l.bf16 %v3017_v47  ;;  %2870 = vmatprep.subr.msk.bf16.mxu0 %vm3276_vm2, %v2868_v22  ;;  %v1268_v52 = vmul.f32 %v3081_v23, %v3073_v14 }
 0x930   :  { %v2874_v54 = vpack.c.bf16 %v3019_v48, %v3018_v49  ;;  %2696 = vmatprep.mubr.msk.f32.mxu0 %vm430_vm3, %v1268_v52 }
 0x931   :  { %2697 = vmatmul.mubr.msk.f32.vlgmr.msra.gmra.mrb[6].mxu0 %vm430_vm3, %v1270_v53 }
 0x932   :  { %2876 = vmatprep.subr.msk.bf16.mxu1 %vm3276_vm2, %v2874_v54 }
 0x935   :  { %2873 = vmatpush3.bf16.xpose.msk.msra.mxu0 %vm3276_vm2, %v2868_v22 }
 0x957   :  { %v1263_v55 = vpop.xlane.xlu0 %1262 }
 0x958   :  { %3082 = vrcp.f32 %v1263_v55 }
 0x95b   :  { %v1450_v56 = vpop.permute.xlu0 %1449 }
 0x95c   :  { %2710 = vmatprep.mubr.msk.f32.mxu0 %vm253_vm1, %v1450_v56 }
 0x95e   :  { %v1266_v57 = vpop.xlane.xlu1 %1265 }
 0x95f   :  { %3084 = vrcp.f32 %v1266_v57  ;;  %v1541_v1 = vpop.permute.xlu0 %1540 }
 0x962   :  { %v3083_v58 = vpop.eup %3082  ;;  %v1452_v59 = vpop.permute.xlu1 %1451 }
 0x963   :  { %2711 = vmatmul.mubr.msk.f32.vlgmr.msra.gmra.mrb[8].mxu0 %vm253_vm1, %v1452_v59  ;;  %v1272_v62 = vmul.f32 %v3083_v58, %v3075_v27 }
 0x965   :  { %2703 = vmatprep.mubr.msk.f32.mxu1 %vm430_vm3, %v1272_v62 }
 0x966   :  { %v1543_v2 = vpop.permute.xlu1 %1542 }
 0x969   :  { %v3085_v63 = vpop.eup %3084 }
 0x96a   :  { %v1274_v0 = vmul.f32 %v3085_v63, %v3077_v29 }
 0x96c   :  { %2704 = vmatmul.mubr.msk.f32.vlgmr.msra.gmra.mrb[18].mxu1 %vm430_vm3, %v1274_v0 }
 0x96d   :  { %2879 = vmatpush3.bf16.xpose.msk.msra.mxu1 %vm3276_vm2, %v2874_v54  ;;  %2717 = vmatprep.mubr.msk.f32.mxu1 %vm253_vm1, %v1541_v1 }
 0x974   :  { %2718 = vmatmul.mubr.msk.f32.vlgmr.msra.gmra.mrb[20].mxu1 %vm253_vm1, %v1543_v2 }
 0xa04   :  { %v2698_v3 = vpop.f32.mrb[6].mxu0 }
 0xa05   :  { %v1353_v4 = vpop.f32.mrb[7].mxu0 }
 0xa36   :  { %v2712_v9 = vpop.f32.mrb[8].mxu0 }
 0xa37   :  { %v1537_v10 = vadd.f32 %v2712_v9, %v242_v5  ;;  %v1531_v12 = vpop.f32.mrb[9].mxu0  ;;  %v1913_v9 = vld [vmem:[%s3673_s5 + $0x18] sm:$0xff] }
 0xa38   :  { %v1532_v15 = vadd.f32 %v1531_v12, %v241_v8 }
 0xa39   :  { %v1634_v13 = vsel %vm430_vm3, %v1537_v10, -inf }
 0xa3a   :  { %1635 = vmax.xlane.f32.xlu1 %v1634_v13  ;;  %v1631_v14 = vsel %vm430_vm3, %v1532_v15, -inf }
 0xa3b   :  { %1632 = vmax.xlane.f32.xlu0 %v1631_v14 }
 0xa3f   :  { %v3438_v16 = vpop.f32.mrb[18].mxu1 }
 0xa40   :  { %v3440_v17 = vpop.f32.mrb[19].mxu1 }
 0xa47   :  { %v2719_v18 = vpop.f32.mrb[20].mxu1 }
 0xa48   :  { %v1622_v19 = vpop.f32.mrb[21].mxu1  ;;  %v1628_v24 = vadd.f32 %v2719_v18, %v242_v5  ;;  %v1912_v5 = vld [vmem:[%s3673_s5 + $0x10] sm:$0xff] }
 0xa49   :  { %v1623_v20 = vadd.f32 %v1622_v19, %v241_v8 }
 0xa4a   :  { %v1640_v26 = vsel %vm430_vm3, %v1628_v24, -inf }
 0xa4b   :  { %v1637_v25 = vsel %vm430_vm3, %v1623_v20, -inf }
 0xa4c   :  { %1638 = vmax.xlane.f32.xlu0 %v1637_v25 }
 0xa50   :  { %1641 = vmax.xlane.f32.xlu0 %v1640_v26 }
 0xac7   :  { %v1636_v27 = vpop.xlane.xlu1 %1635 }
 0xac8   :  { %v1644_v28 = vsub.f32 %v1537_v10, %v1636_v27  ;;  %v1633_v29 = vpop.xlane.xlu0 %1632  ;;  %v2892_v10 = vpack.c.bf16 %v1913_v9, %v1912_v5 }
 0xac9   :  { %v1643_v30 = vsub.f32 %v1532_v15, %v1633_v29 }
 0xaca   :  { %v1649_v31 = vmul.f32 1.442695, %v1644_v28 }
 0xacb   :  { %v1647_v32 = vmul.f32 1.442695, %v1643_v30 }
 0xacc   :  { %3086 = vpow2.f32 %v1649_v31 }
 0xacd   :  { %3088 = vpow2.f32 %v1647_v32 }
 0xad6   :  { %v3087_v35 = vpop.eup %3086 }
 0xad7   :  { %v3089_v36 = vpop.eup %3088  ;;  %v1658_v37 = vsel %vm430_vm3, %v3087_v35, 0.0 }
 0xad8   :  { %1659 = vadd.xlane.f32.xlu1 %v1658_v37  ;;  %v1655_v38 = vsel %vm430_vm3, %v3089_v36, 0.0 }
 0xad9   :  { %v1639_v39 = vpop.xlane.xlu0 %1638  ;;  %1656 = vadd.xlane.f32.xlu0 %v1655_v38 }
 0xada   :  { %v1645_v40 = vsub.f32 %v1623_v20, %v1639_v39 }
 0xadc   :  { %v1651_v41 = vmul.f32 1.442695, %v1645_v40 }
 0xadd   :  { %v1642_v42 = vpop.xlane.xlu0 %1641 }
 0xade   :  { %3090 = vpow2.f32 %v1651_v41  ;;  %v1646_v45 = vsub.f32 %v1628_v24, %v1642_v42 }
 0xae0   :  { %v1653_v7 = vmul.f32 1.442695, %v1646_v45 }
 0xae2   :  { %3092 = vpow2.f32 %v1653_v7  ;;  %v3126_v7 = vld [vmem:[%s3667_s0 + $0x8] sm:$0xff] }
 0xae8   :  { %v3091_v46 = vpop.eup %3090 }
 0xae9   :  { %v1661_v21 = vsel %vm430_vm3, %v3091_v46, 0.0 }
 0xaea   :  { %1662 = vadd.xlane.f32.xlu0 %v1661_v21  ;;  %v3127_v21 = vld [vmem:[%s3667_s0] sm:$0xff] }
 0xaec   :  { %v3093_v22 = vpop.eup %3092 }
 0xaed   :  { %v1664_v23 = vsel %vm430_vm3, %v3093_v22, 0.0 }
 0xaee   :  { %1665 = vadd.xlane.f32.xlu1 %v1664_v23 }
 0xaff   :  { %3026 = vrot.lane.b32.xlu1 %v3271_v11, %s3140_s7 }
 0xb00   :  { %3021 = vrot.lane.b32.xlu0 %v3264_v6, %s3140_s7 }
 0xb03   :  { %1853 = vrot.lane.b32.xlu1 %v3386_v51, %s3141_s21 }
 0xb04   :  { %1869 = vrot.lane.b32.xlu0 %v1353_v4, %s3142_s22  ;;  %v1911_v4 = vld [vmem:[%s3673_s5 + $0x8] sm:$0xff] }
 0xb07   :  { %1855 = vrot.lane.b32.xlu1 %v3384_v50, %s3141_s21 }
 0xb0b   :  { %1871 = vrot.lane.b32.xlu1 %v2698_v3, %s3142_s22  ;;  %v1910_v3 = vld [vmem:[%s3673_s5] sm:$0xff] }
 0xb0c   :  { %v2888_v8 = vpack.c.bf16 %v1911_v4, %v1910_v3 }
 0xb65   :  { %v1660_v49 = vpop.xlane.xlu1 %1659 }
 0xb66   :  { %v1657_v47 = vpop.xlane.xlu0 %1656 }
 0xb67   :  { %3094 = vrcp.f32 %v1657_v47 }
 0xb68   :  { %3096 = vrcp.f32 %v1660_v49 }
 0xb71   :  { %v3095_v48 = vpop.eup %3094 }
 0xb72   :  { %v1668_v52 = vmul.f32 %v3095_v48, %v3089_v36  ;;  %v3097_v56 = vpop.eup %3096 }
 0xb73   :  { %v1670_v62 = vmul.f32 %v3097_v56, %v3087_v35 }
 0xb74   :  { %2724 = vmatprep.mubr.msk.f32.mxu0 %vm430_vm3, %v1668_v52 }
 0xb77   :  { %v1663_v6 = vpop.xlane.xlu0 %1662 }
 0xb78   :  { %3098 = vrcp.f32 %v1663_v6 }
 0xb7b   :  { %v1666_v11 = vpop.xlane.xlu1 %1665  ;;  %v3022_v51 = vpop.permute.xlu0 %3021 }
 0xb7c   :  { %3100 = vrcp.f32 %v1666_v11  ;;  %v3024_v53 = vunpack.i.h.bf16 %v3022_v51  ;;  %v3023_v54 = vunpack.i.l.bf16 %v3022_v51  ;;  %v3128_v11 = vld [vmem:[%s3667_s0 + $0x10] sm:$0xff] }
 0xb7e   :  { %v2880_v55 = vpack.c.bf16 %v3024_v53, %v3023_v54  ;;  %v3129_v53 = vld [vmem:[%s3667_s0 + $0x18] sm:$0xff] }
 0xb7f   :  { %v3027_v50 = vpop.permute.xlu1 %3026  ;;  %v1870_v24 = vpop.permute.xlu0 %1869 }
 0xb80   :  { %v3029_v57 = vunpack.i.h.bf16 %v3027_v50  ;;  %v3028_v58 = vunpack.i.l.bf16 %v3027_v50  ;;  %2881 = vmatprep.subr.bf16.mxu0 %v2880_v55 }
 0xb81   :  { %2883 = vmatpush3.bf16.msra.mxu0 %v2880_v55 }
 0xb82   :  { %v3099_v59 = vpop.eup %3098  ;;  %v2884_v63 = vpack.c.bf16 %v3029_v57, %v3028_v58  ;;  %2889 = vmatprep.subr.bf16.mxu0 %v2888_v8 }
 0xb83   :  { %v1672_v0 = vmul.f32 %v3099_v59, %v3091_v46  ;;  %v1854_v18 = vpop.permute.xlu1 %1853 }
 0xb84   :  { %2725 = vmatmul.mubr.msk.f32.vlgmr.msra.gmra.mrb[10].mxu0 %vm430_vm3, %v1670_v62  ;;  %2885 = vmatprep.subr.bf16.mxu1 %v2884_v63  ;;  %v1897_v25 = vsel %vm253_vm1, %v3340_v34, %v1854_v18 }
 0xb85   :  { %2887 = vmatpush3.bf16.msra.mxu1 %v2884_v63  ;;  %2731 = vmatprep.mubr.msk.f32.mxu1 %vm430_vm3, %v1672_v0  ;;  %v1901_v26 = vsel %vm430_vm3, %v1897_v25, %v1870_v24  ;;  %v2098_v25 = vld [vmem:[%s3675_s10 + $0x10] sm:$0xff] }
 0xb86   :  { %v3101_v1 = vpop.eup %3100  ;;  %2891 = vmatpush3.bf16.msra.mxu0 %v2888_v8 }
 0xb87   :  { %v1674_v2 = vmul.f32 %v3101_v1, %v3093_v22  ;;  %2893 = vmatprep.subr.bf16.mxu0 %v2892_v10  ;;  %v1856_v19 = vpop.permute.xlu1 %1855 }
 0xb89   :  { %2732 = vmatmul.mubr.msk.f32.vlgmr.msra.gmra.mrb[22].mxu1 %vm430_vm3, %v1674_v2 }
 0xb8a   :  { %2895 = vmatpush3.bf16.msra.mxu0 %v2892_v10 }
 0xb8b   :  { %v1872_v20 = vpop.permute.xlu1 %1871 }
 0xc57   :  { %v2726_v12 = vpop.f32.mrb[10].mxu0 }
 0xc58   :  { %1887 = vrot.lane.b32.xlu1 %v2726_v12, %s3143_s30  ;;  %v1753_v15 = vpop.f32.mrb[11].mxu0 }
 0xc59   :  { %1885 = vrot.lane.b32.xlu0 %v1753_v15, %s3143_s30 }
 0xc5c   :  { %v2733_v13 = vpop.f32.mrb[22].mxu1  ;;  %1859 = vrot.lane.b32.xlu1 %v3396_v60, %s3141_s21 }
 0xc5d   :  { %v1840_v14 = vpop.f32.mrb[23].mxu1  ;;  %1857 = vrot.lane.b32.xlu0 %v3398_v61, %s3141_s21  ;;  %v1898_v61 = vsel %vm253_vm1, %v3338_v33, %v1856_v19  ;;  %v2096_v19 = vld [vmem:[%s3675_s10] sm:$0xff] }
 0xc5e   :  { %v1902_v27 = vsel %vm430_vm3, %v1898_v61, %v1872_v20  ;;  %v2097_v20 = vld [vmem:[%s3675_s10 + $0x8] sm:$0xff] }
 0xc5f   :  { %v2896_v24 = vpack.c.bf16 %v2097_v20, %v2096_v19  ;;  %v2494_v19 = vld [vmem:[%s3679_s11] ss:$0 sm:$0xff] }
 0xc60   :  { %1875 = vrot.lane.b32.xlu1 %v3438_v16, %s3142_s22 }
 0xc61   :  { %1873 = vrot.lane.b32.xlu0 %v3440_v17, %s3142_s22  ;;  %2897 = vmatprep.subr.bf16.mxu1 %v2896_v24 }
 0xc62   :  { %2899 = vmatpush3.bf16.msra.mxu1 %v2896_v24 }
 0xc64   :  { %1891 = vrot.lane.b32.xlu1 %v2733_v13, %s3143_s30 }
 0xc65   :  { %1889 = vrot.lane.b32.xlu0 %v1840_v14, %s3143_s30 }
 0xcca   :  { %v1888_v60 = vpop.permute.xlu1 %1887 }
 0xccb   :  { %v1886_v16 = vpop.permute.xlu0 %1885  ;;  %v1907_v28 = vsel %vm1905_vm4, %v1902_v27, %v1888_v60  ;;  %v2099_v60 = vld [vmem:[%s3675_s10 + $0x18] sm:$0xff] }
 0xccc   :  { %v1906_v17 = vsel %vm1905_vm4, %v1901_v26, %v1886_v16  ;;  %v2900_v61 = vpack.c.bf16 %v2099_v60, %v2098_v25 }
 0xccd   :  { %2742 = vmatprep.mubr.msk.f32.mxu0 %vm53_vm0, %v1906_v17 }
 0xcce   :  { %v1860_v29 = vpop.permute.xlu1 %1859  ;;  %2743 = vmatmul.mubr.msk.f32.vlgmr.msra.gmra.mrb[12].mxu0 %vm53_vm0, %v1907_v28  ;;  %2901 = vmatprep.subr.bf16.mxu1 %v2900_v61 }
 0xccf   :  { %v1858_v34 = vpop.permute.xlu0 %1857  ;;  %v1900_v35 = vsel %vm253_vm1, %v3350_v43, %v1860_v29  ;;  %2903 = vmatpush3.bf16.msra.mxu1 %v2900_v61 }
 0xcd0   :  { %v1899_v33 = vsel %vm253_vm1, %v3352_v44, %v1858_v34  ;;  %v2487_v44 = vld [vmem:[%s3674_s6] ss:$0 sm:$0xff] }
 0xcd2   :  { %v1876_v30 = vpop.permute.xlu1 %1875 }
 0xcd3   :  { %v1874_v31 = vpop.permute.xlu0 %1873  ;;  %v1904_v38 = vsel %vm430_vm3, %v1900_v35, %v1876_v30 }
 0xcd4   :  { %v1903_v36 = vsel %vm430_vm3, %v1899_v33, %v1874_v31  ;;  %v2492_v33 = vld [vmem:[%s3676_s8] ss:$0 sm:$0xff] }
 0xcd6   :  { %v1892_v32 = vpop.permute.xlu1 %1891 }
 0xcd7   :  { %v1890_v37 = vpop.permute.xlu0 %1889  ;;  %v1909_v40 = vsel %vm1905_vm4, %v1904_v38, %v1892_v32 }
 0xcd8   :  { %v1908_v39 = vsel %vm1905_vm4, %v1903_v36, %v1890_v37 }
 0xcd9   :  { %2745 = vmatprep.mubr.msk.f32.mxu0 %vm53_vm0, %v1908_v39 }
 0xcda   :  { %2746 = vmatmul.mubr.msk.f32.gmra.mrb[14].mxu0 %vm53_vm0, %v1909_v40  ;;  %v2493_v40 = vld [vmem:[%s3677_s9] ss:$0 sm:$0xff] }
 0xda1   :  { %v2744_v41 = vpop.f32.mrb[12].mxu0 }
 0xda2   :  { %v2005_v42 = vadd.f32 %v2744_v41, %v2487_v44  ;;  %v1999_v43 = vpop.f32.mrb[13].mxu0 }
 0xda3   :  { %v2000_v45 = vadd.f32 %v2487_v44, %v1999_v43 }
 0xda4   :  { %v3506_v46 = vadd.f32 %v3126_v7, %v2005_v42 }
 0xda5   :  { %v3511_v22 = vadd.f32 %v3127_v21, %v2000_v45 }
 0xda6   :  { %v2027_v23 = vsel %vm53_vm0, %v3506_v46, 0.0 }
 0xda7   :  { %2028 = vadd.xlane.f32.xlu1 %v2027_v23  ;;  %v2024_v47 = vsel %vm53_vm0, %v3511_v22, 0.0 }
 0xda8   :  { %2025 = vadd.xlane.f32.xlu0 %v2024_v47 }
 0xdad   :  { %v2747_v48 = vpop.f32.mrb[14].mxu0 }
 0xdae   :  { %v2009_v49 = vpop.f32.mrb[15].mxu0  ;;  %v2015_v52 = vadd.f32 %v2747_v48, %v2487_v44 }
 0xdaf   :  { %v2010_v6 = vadd.f32 %v2487_v44, %v2009_v49 }
 0xdb0   :  { %v3525_v54 = vadd.f32 %v3129_v53, %v2015_v52  ;;  %v2313_v53 = vld [vmem:[%s3678_s12 + $0x8] sm:$0xff] }
 0xdb1   :  { %v3520_v51 = vadd.f32 %v3128_v11, %v2010_v6  ;;  %v2312_v11 = vld [vmem:[%s3678_s12] sm:$0xff] }
 0xdb2   :  { %v2033_v56 = vsel %vm53_vm0, %v3525_v54, 0.0 }
 0xdb3   :  { %v2030_v55 = vsel %vm53_vm0, %v3520_v51, 0.0 }
 0xdb4   :  { %2031 = vadd.xlane.f32.xlu0 %v2030_v55  ;;  %v2904_v55 = vpack.c.bf16 %v2313_v53, %v2312_v11 }
 0xdb6   :  { %2905 = vmatprep.subr.bf16.mxu0 %v2904_v55 }
 0xdb7   :  { %2907 = vmatpush3.bf16.msra.mxu0 %v2904_v55 }
 0xdb8   :  { %2034 = vadd.xlane.f32.xlu0 %v2033_v56  ;;  %v2314_v56 = vld [vmem:[%s3678_s12 + $0x10] sm:$0xff] }
 0xe34   :  { %v2029_v50 = vpop.xlane.xlu1 %2028 }
 0xe35   :  { %v2037_v57 = vmul.f32 0.03125, %v2029_v50  ;;  %v2026_v58 = vpop.xlane.xlu0 %2025  ;;  %v2315_v50 = vld [vmem:[%s3678_s12 + $0x18] sm:$0xff] }
 0xe36   :  { %v2036_v59 = vmul.f32 0.03125, %v2026_v58  ;;  %v2316_v58 = vld [vmem:[%s3678_s12 + $0x20] sm:$0xff] }
 0xe37   :  { %v2041_v62 = vsub.f32 %v3506_v46, %v2037_v57  ;;  %v2908_v57 = vpack.c.bf16 %v2315_v50, %v2314_v56 }
 0xe38   :  { %v2040_v63 = vsub.f32 %v3511_v22, %v2036_v59  ;;  %v2317_v59 = vld [vmem:[%s3678_s12 + $0x28] sm:$0xff] }
 0xe39   :  { %v2045_v0 = vmul.f32 %v2041_v62, %v2041_v62  ;;  %2909 = vmatprep.subr.bf16.mxu0 %v2908_v57 }
 0xe3a   :  { %v2044_v1 = vmul.f32 %v2040_v63, %v2040_v63  ;;  %2911 = vmatpush3.bf16.msra.mxu0 %v2908_v57 }
 0xe3b   :  { %v2051_v2 = vsel %vm53_vm0, %v2045_v0, 0.0  ;;  %v2319_v0 = vld [vmem:[%s3678_s12 + $0x38] sm:$0xff] }
 0xe3c   :  { %2052 = vadd.xlane.f32.xlu1 %v2051_v2  ;;  %v2048_v3 = vsel %vm53_vm0, %v2044_v1, 0.0  ;;  %v2320_v2 = vld [vmem:[%s3678_s12 + $0x40] sm:$0xff] }
 0xe3d   :  { %2049 = vadd.xlane.f32.xlu0 %v2048_v3  ;;  %v2321_v3 = vld [vmem:[%s3678_s12 + $0x48] sm:$0xff] }
 0xe41   :  { %v2032_v4 = vpop.xlane.xlu0 %2031 }
 0xe42   :  { %v2038_v5 = vmul.f32 0.03125, %v2032_v4  ;;  %v2920_v4 = vpack.c.bf16 %v2321_v3, %v2320_v2 }
 0xe44   :  { %v2042_v8 = vsub.f32 %v3520_v51, %v2038_v5  ;;  %v2322_v5 = vld [vmem:[%s3678_s12 + $0x50] sm:$0xff] }
 0xe45   :  { %v2035_v9 = vpop.xlane.xlu0 %2034 }
 0xe46   :  { %v2039_v10 = vmul.f32 0.03125, %v2035_v9  ;;  %v2046_v12 = vmul.f32 %v2042_v8, %v2042_v8 }
 0xe48   :  { %v2043_v15 = vsub.f32 %v3525_v54, %v2039_v10  ;;  %v2054_v13 = vsel %vm53_vm0, %v2046_v12, 0.0  ;;  %v2324_v10 = vld [vmem:[%s3678_s12 + $0x60] sm:$0xff]  ;;  %v2325_v12 = vld [vmem:[%s3678_s12 + $0x68] sm:$0xff] }
 0xe49   :  { %2055 = vadd.xlane.f32.xlu0 %v2054_v13  ;;  %v2326_v13 = vld [vmem:[%s3678_s12 + $0x70] sm:$0xff] }
 0xe4a   :  { %v2047_v14 = vmul.f32 %v2043_v15, %v2043_v15 }
 0xe4c   :  { %v2057_v18 = vsel %vm53_vm0, %v2047_v14, 0.0  ;;  %v2327_v14 = vld [vmem:[%s3678_s12 + $0x78] sm:$0xff] }
 0xe4d   :  { %2058 = vadd.xlane.f32.xlu1 %v2057_v18  ;;  %v2932_v18 = vpack.c.bf16 %v2327_v14, %v2326_v13 }
 0xec9   :  { %v2053_v26 = vpop.xlane.xlu1 %2052 }
 0xeca   :  { %v2061_v16 = vmul.f32 0.03125, %v2053_v26  ;;  %v2050_v27 = vpop.xlane.xlu0 %2049 }
 0xecb   :  { %v2060_v17 = vmul.f32 0.03125, %v2050_v27 }
 0xecc   :  { %v2065_v28 = vadd.f32 1e-05, %v2061_v16 }
 0xecd   :  { %v2064_v29 = vadd.f32 1e-05, %v2060_v17 }
 0xece   :  { %3102 = vrsqrt.f32 %v2065_v28 }
 0xecf   :  { %3104 = vrsqrt.f32 %v2064_v29 }
 0xed6   :  { %v2056_v34 = vpop.xlane.xlu0 %2055 }
 0xed7   :  { %v2062_v30 = vmul.f32 0.03125, %v2056_v34 }
 0xed8   :  { %v3103_v31 = vpop.eup %3102 }
 0xed9   :  { %v3105_v32 = vpop.eup %3104  ;;  %v2073_v35 = vmul.f32 %v3103_v31, %v2041_v62  ;;  %v2066_v36 = vadd.f32 1e-05, %v2062_v30  ;;  %v2912_v62 = vpack.c.bf16 %v2317_v59, %v2316_v58 }
 0xeda   :  { %v2059_v37 = vpop.xlane.xlu1 %2058  ;;  %v2072_v38 = vmul.f32 %v3105_v32, %v2040_v63  ;;  %v2318_v63 = vld [vmem:[%s3678_s12 + $0x30] sm:$0xff] }
 0xedb   :  { %3106 = vrsqrt.f32 %v2066_v36  ;;  %v2063_v39 = vmul.f32 0.03125, %v2059_v37  ;;  %v2083_v44 = vmul.f32 %v2492_v33, %v2073_v35  ;;  %2913 = vmatprep.subr.bf16.mxu0 %v2912_v62  ;;  %v2916_v1 = vpack.c.bf16 %v2319_v0, %v2318_v63 }
 0xedc   :  { %v2082_v41 = vmul.f32 %v2492_v33, %v2072_v38  ;;  %2915 = vmatpush3.bf16.msra.mxu0 %v2912_v62 }
 0xedd   :  { %v2067_v42 = vadd.f32 1e-05, %v2063_v39  ;;  %v2093_v45 = vadd.f32 %v2493_v40, %v2083_v44  ;;  %2917 = vmatprep.subr.bf16.mxu0 %v2916_v1 }
 0xede   :  { %v2092_v43 = vadd.f32 %v2493_v40, %v2082_v41 }
 0xedf   :  { %3108 = vrsqrt.f32 %v2067_v42 }
 0xee0   :  { %2756 = vmatprep.mubr.msk.f32.mxu1 %vm53_vm0, %v2092_v43  ;;  %2919 = vmatpush3.bf16.msra.mxu0 %v2916_v1 }
 0xee1   :  { %2757 = vmatmul.mubr.msk.f32.vlgmr.msra.gmra.mrb[24].mxu1 %vm53_vm0, %v2093_v45  ;;  %2921 = vmatprep.subr.bf16.mxu0 %v2920_v4 }
 0xee4   :  { %2923 = vmatpush3.bf16.msra.mxu0 %v2920_v4 }
 0xee5   :  { %v3107_v7 = vpop.eup %3106 }
 0xee6   :  { %v2074_v21 = vmul.f32 %v3107_v7, %v2042_v8  ;;  %v2323_v8 = vld [vmem:[%s3678_s12 + $0x58] sm:$0xff] }
 0xee7   :  { %v2924_v9 = vpack.c.bf16 %v2323_v8, %v2322_v5 }
 0xee8   :  { %v2084_v23 = vmul.f32 %v2492_v33, %v2074_v21 }
 0xee9   :  { %v3109_v47 = vpop.eup %3108  ;;  %2925 = vmatprep.subr.bf16.mxu0 %v2924_v9 }
 0xeea   :  { %v2094_v48 = vadd.f32 %v2493_v40, %v2084_v23  ;;  %v2075_v49 = vmul.f32 %v3109_v47, %v2043_v15  ;;  %2927 = vmatpush3.bf16.msra.mxu0 %v2924_v9  ;;  %v2928_v15 = vpack.c.bf16 %v2325_v12, %v2324_v10 }
 0xeec   :  { %2759 = vmatprep.mubr.msk.f32.mxu1 %vm53_vm0, %v2094_v48  ;;  %v2085_v52 = vmul.f32 %v2492_v33, %v2075_v49  ;;  %2929 = vmatprep.subr.bf16.mxu0 %v2928_v15 }
 0xeee   :  { %v2095_v6 = vadd.f32 %v2493_v40, %v2085_v52  ;;  %2931 = vmatpush3.bf16.msra.mxu0 %v2928_v15 }
 0xeef   :  { %2933 = vmatprep.subr.bf16.mxu0 %v2932_v18 }
 0xef0   :  { %2760 = vmatmul.mubr.msk.f32.gmra.mrb[26].mxu1 %vm53_vm0, %v2095_v6 }
 0xef2   :  { %2935 = vmatpush3.bf16.msra.mxu0 %v2932_v18 }
 0xfb4   :  { %v2758_v20 = vpop.f32.mrb[24].mxu1 }
 0xfb5   :  { %v3612_v24 = vadd.f32 %v2758_v20, %v2494_v19  ;;  %v2185_v25 = vpop.f32.mrb[25].mxu1 }
 0xfb6   :  { %v3614_v60 = vadd.f32 %v2494_v19, %v2185_v25 }
 0xfb7   :  { %v3617_v61 = vmul.f32 0.70710677, %v3612_v24 }
 0xfb8   :  { %v3620_v26 = vmul.f32 0.70710677, %v3614_v60 }
 0xfb9   :  { %v2209_v16 = vand.u32 2147483647, %v3617_v61  ;;  %vm2289_vm5 = vcmp.lt.f32.partialorder %v3617_v61, 0.0 }
 0xfba   :  { %v2208_v27 = vand.u32 2147483647, %v3620_v26  ;;  %vm2288_vm6 = vcmp.lt.f32.partialorder %v3620_v26, 0.0 }
 0xfbb   :  { %v2213_v17 = vmul.f32 0.3275911, %v2209_v16  ;;  %v2265_v32 = vsub.f32 0.0, %v2209_v16 }
 0xfbc   :  { %v2212_v28 = vmul.f32 0.3275911, %v2208_v27  ;;  %v2264_v36 = vsub.f32 0.0, %v2208_v27 }
 0xfbd   :  { %v2217_v29 = vadd.f32 1.0, %v2213_v17  ;;  %v2269_v44 = vmul.f32 %v2265_v32, %v2209_v16 }
 0xfbe   :  { %v2216_v34 = vadd.f32 1.0, %v2212_v28  ;;  %v2268_v45 = vmul.f32 %v2264_v36, %v2208_v27 }
 0xfbf   :  { %3110 = vrcp.f32 %v2217_v29  ;;  %v2274_v49 = vmul.f32 1.442695, %v2269_v44 }
 0xfc0   :  { %3112 = vrcp.f32 %v2216_v34  ;;  %v2272_v53 = vmul.f32 1.442695, %v2268_v45 }
 0xfc3   :  { %v2761_v30 = vpop.f32.mrb[26].mxu1 }
 0xfc4   :  { %v3624_v31 = vadd.f32 %v2761_v30, %v2494_v19  ;;  %v2195_v33 = vpop.f32.mrb[27].mxu1 }
 0xfc5   :  { %v3626_v35 = vadd.f32 %v2494_v19, %v2195_v33 }
 0xfc6   :  { %v3629_v37 = vmul.f32 0.70710677, %v3624_v31 }
 0xfc7   :  { %v3632_v38 = vmul.f32 0.70710677, %v3626_v35 }
 0xfc8   :  { %v2211_v39 = vand.u32 2147483647, %v3629_v37  ;;  %vm2291_vm7 = vcmp.lt.f32.partialorder %v3629_v37, 0.0 }
 0xfc9   :  { %v3111_v40 = vpop.eup %3110  ;;  %v2210_v41 = vand.u32 2147483647, %v3632_v38  ;;  %vm2290_vm8 = vcmp.lt.f32.partialorder %v3632_v38, 0.0 }
 0xfca   :  { %v3113_v42 = vpop.eup %3112  ;;  %v2229_v43 = vmul.f32 1.0614054, %v3111_v40  ;;  %v2215_v7 = vmul.f32 0.3275911, %v2211_v39  ;;  %v2267_v62 = vsub.f32 0.0, %v2211_v39 }
 0xfcb   :  { %v2214_v21 = vmul.f32 0.3275911, %v2210_v41  ;;  %v2228_v23 = vmul.f32 1.0614054, %v3113_v42  ;;  %v2266_v63 = vsub.f32 0.0, %v2210_v41 }
 0xfcc   :  { %v2233_v47 = vadd.f32 -1.4531521, %v2229_v43  ;;  %v2219_v48 = vadd.f32 1.0, %v2215_v7  ;;  %v2271_v5 = vmul.f32 %v2267_v62, %v2211_v39 }
 0xfcd   :  { %v2218_v52 = vadd.f32 1.0, %v2214_v21  ;;  %v2232_v6 = vadd.f32 -1.4531521, %v2228_v23  ;;  %v2270_v9 = vmul.f32 %v2266_v63, %v2210_v41  ;;  %v2300_v21 = vmul.f32 0.5, %v3614_v60 }
 0xfce   :  { %v2237_v11 = vmul.f32 %v3111_v40, %v2233_v47  ;;  %3114 = vrcp.f32 %v2219_v48  ;;  %v2278_v16 = vmul.f32 1.442695, %v2271_v5  ;;  %v2301_v48 = vmul.f32 0.5, %v3612_v24 }
 0xfcf   :  { %3116 = vrcp.f32 %v2218_v52  ;;  %v2236_v55 = vmul.f32 %v3113_v42, %v2232_v6  ;;  %v2276_v17 = vmul.f32 1.442695, %v2270_v9  ;;  %v2499_v9 = vld [vmem:[%s3680_s13] ss:$0 sm:$0xff] }
 0xfd0   :  { %v2241_v56 = vadd.f32 1.4214138, %v2237_v11  ;;  %3118 = vpow2.f32 %v2274_v49 }
 0xfd1   :  { %v2240_v50 = vadd.f32 1.4214138, %v2236_v55  ;;  %3120 = vpow2.f32 %v2272_v53 }
 0xfd2   :  { %v2245_v57 = vmul.f32 %v3111_v40, %v2241_v56  ;;  %3122 = vpow2.f32 %v2278_v16 }
 0xfd3   :  { %v2244_v58 = vmul.f32 %v3113_v42, %v2240_v50  ;;  %3124 = vpow2.f32 %v2276_v17 }
 0xfd4   :  { %v2249_v59 = vadd.f32 -0.28449672, %v2245_v57 }
 0xfd5   :  { %v2248_v0 = vadd.f32 -0.28449672, %v2244_v58 }
 0xfd6   :  { %v2253_v1 = vmul.f32 %v3111_v40, %v2249_v59 }
 0xfd7   :  { %v2252_v2 = vmul.f32 %v3113_v42, %v2248_v0 }
 0xfd8   :  { %v3115_v3 = vpop.eup %3114  ;;  %v2257_v4 = vadd.f32 0.2548296, %v2253_v1 }
 0xfd9   :  { %v3117_v8 = vpop.eup %3116  ;;  %v2256_v10 = vadd.f32 0.2548296, %v2252_v2  ;;  %v2231_v12 = vmul.f32 1.0614054, %v3115_v3  ;;  %v2302_v2 = vmul.f32 0.5, %v3626_v35 }
 0xfda   :  { %v2261_v15 = vmul.f32 %v3111_v40, %v2257_v4  ;;  %v2230_v13 = vmul.f32 1.0614054, %v3117_v8  ;;  %v3119_v14 = vpop.eup %3118 }
 0xfdb   :  { %v2260_v18 = vmul.f32 %v3113_v42, %v2256_v10  ;;  %v2235_v19 = vadd.f32 -1.4531521, %v2231_v12  ;;  %v3121_v20 = vpop.eup %3120 }
 0xfdc   :  { %v2281_v25 = vmul.f32 %v3119_v14, %v2261_v15  ;;  %v2234_v27 = vadd.f32 -1.4531521, %v2230_v13  ;;  %v3123_v26 = vpop.eup %3122 }
 0xfdd   :  { %v2280_v28 = vmul.f32 %v3121_v20, %v2260_v18  ;;  %v2239_v29 = vmul.f32 %v3115_v3, %v2235_v19  ;;  %v3125_v50 = vpop.eup %3124 }
 0xfde   :  { %v2285_v34 = vsub.f32 1.0, %v2281_v25  ;;  %v2238_v30 = vmul.f32 %v3117_v8, %v2234_v27 }
 0xfdf   :  { %v2284_v33 = vsub.f32 1.0, %v2280_v28  ;;  %v2243_v32 = vadd.f32 1.4214138, %v2239_v29 }
 0xfe0   :  { %v2293_v36 = vsub.f32 0.0, %v2285_v34  ;;  %v2242_v39 = vadd.f32 1.4214138, %v2238_v30 }
 0xfe1   :  { %v2292_v40 = vsub.f32 0.0, %v2284_v33  ;;  %v2247_v44 = vmul.f32 %v3115_v3, %v2243_v32 }
 0xfe2   :  { %v2297_v41 = vsel %vm2289_vm5, %v2293_v36, %v2285_v34  ;;  %v2246_v42 = vmul.f32 %v3117_v8, %v2242_v39 }
 0xfe3   :  { %v2305_v43 = vadd.f32 1.0, %v2297_v41  ;;  %v2296_v45 = vsel %vm2288_vm6, %v2292_v40, %v2284_v33  ;;  %v2251_v7 = vadd.f32 -0.28449672, %v2247_v44 }
 0xfe4   :  { %v2304_v23 = vadd.f32 1.0, %v2296_v45  ;;  %v2250_v47 = vadd.f32 -0.28449672, %v2246_v42 }
 0xfe5   :  { %v2255_v49 = vmul.f32 %v3115_v3, %v2251_v7  ;;  %v2309_v61 = vmul.f32 %v2305_v43, %v2301_v48 }
 0xfe6   :  { %v2308_v52 = vmul.f32 %v2304_v23, %v2300_v21  ;;  %v2254_v6 = vmul.f32 %v3117_v8, %v2250_v47 }
 0xfe7   :  { %v2259_v11 = vadd.f32 0.2548296, %v2255_v49 }
 0xfe8   :  { %2794 = vmatprep.mubr.f32.mxu0 %v2308_v52  ;;  %v2258_v53 = vadd.f32 0.2548296, %v2254_v6 }
 0xfe9   :  { %2795 = vmatmul.mubr.f32.vlgmr.msra.gmra.mrb[16].mxu0 %v2309_v61  ;;  %v2263_v55 = vmul.f32 %v3115_v3, %v2259_v11  ;;  %v2303_v3 = vmul.f32 0.5, %v3624_v31 }
 0xfea   :  { %v2262_v56 = vmul.f32 %v3117_v8, %v2258_v53 }
 0xfeb   :  { %v2283_v57 = vmul.f32 %v3123_v26, %v2263_v55 }
 0xfec   :  { %v2282_v58 = vmul.f32 %v3125_v50, %v2262_v56 }
 0xfed   :  { %v2287_v59 = vsub.f32 1.0, %v2283_v57 }
 0xfee   :  { %v2286_v60 = vsub.f32 1.0, %v2282_v58 }
 0xfef   :  { %v2295_v62 = vsub.f32 0.0, %v2287_v59 }
 0xff0   :  { %v2294_v24 = vsub.f32 0.0, %v2286_v60 }
 0xff1   :  { %v2299_v63 = vsel %vm2291_vm7, %v2295_v62, %v2287_v59 }
 0xff2   :  { %v2298_v0 = vsel %vm2290_vm8, %v2294_v24, %v2286_v60  ;;  %v2307_v1 = vadd.f32 1.0, %v2299_v63 }
 0xff3   :  { %v2306_v4 = vadd.f32 1.0, %v2298_v0 }
 0xff4   :  { %v2311_v8 = vmul.f32 %v2307_v1, %v2303_v3 }
 0xff5   :  { %v2310_v5 = vmul.f32 %v2306_v4, %v2302_v2 }
 0xff7   :  { %2797 = vmatprep.mubr.f32.mxu0 %v2310_v5 }
 0xff8   :  { %2798 = vmatmul.mubr.f32.gmra.mrb[18].mxu0 %v2311_v8 }
0x10bc   :  { %v2796_v37 = vpop.f32.mrb[16].mxu0 }
0x10bd   :  { %v2407_v10 = vadd.f32 %v2796_v37, %v2499_v9  ;;  %v2401_v12 = vpop.f32.mrb[17].mxu0 }
0x10be   :  { %v2402_v38 = vadd.f32 %v2499_v9, %v2401_v12 }
0x10bf   :  { %v2421_v15 = vadd.f32 %v2407_v10, %v3506_v46 }
0x10c0   :  { %v2420_v13 = vadd.f32 %v2402_v38, %v3511_v22 }
0x10c1   :  { %2425 = vst.msk [vmem:[%s3681_s14 + $0x8] sm:$0xff] %vm53_vm0, %v2421_v15 }
0x10c2   :  { %2424 = vst.msk [vmem:[%s3681_s14] sm:$0xff] %vm53_vm0, %v2420_v13 }
0x10cb   :  { %v2799_v31 = vpop.f32.mrb[18].mxu0 }
0x10cc   :  { %v2417_v35 = vadd.f32 %v2799_v31, %v2499_v9  ;;  %v2411_v14 = vpop.f32.mrb[19].mxu0 }
0x10cd   :  { %v2412_v18 = vadd.f32 %v2499_v9, %v2411_v14 }
0x10ce   :  { %v2423_v19 = vadd.f32 %v2417_v35, %v3525_v54 }
0x10cf   :  { %v2422_v46 = vadd.f32 %v2412_v18, %v3520_v51 }
0x10d0   :  { %2427 = vst.msk [vmem:[%s3681_s14 + $0x18] sm:$0xff] %vm53_vm0, %v2423_v19 }
0x10d1   :  { %2426 = vst.msk [vmem:[%s3681_s14 + $0x10] sm:$0xff] %vm53_vm0, %v2422_v46 }

</bundles_post_ra>
